<compile_context>
chip_gen: v7x
topology: tpu7x:2x2x1
jax: 0.10.0
libtpu: 0.0.40
codegen_flags: <defaults>
</compile_context>

<pallas_src>
import functools
import math

import numpy as np
import jax
import jax.numpy as jnp
from jax.experimental import pallas as pl
from jax.experimental.pallas import tpu as pltpu

# ----------------------------- configuration --------------------------------
D_MODEL = 32
D_EMB = 32                      # d_embedding == d_model (residual connections)
CATE_DIMS = [12, 31, 24]        # e.g. month, day, hour
NUM_CV = 3                      # continuous variables
SEQ_LEN = 8
TAU = 4
NUM_TARGETS = 2
QUANTILES = [0.1, 0.5, 0.9]
NUM_HEADS = 4
LN_EPS = 1e-5

assert D_EMB == D_MODEL, "identity GRN skips require d_embedding == d_model"

VMEM_SPEC = pl.BlockSpec(memory_space=pltpu.MemorySpace.VMEM)


def _cate_offsets():
    offs = [0]
    for c in CATE_DIMS[:-1]:
        offs.append(offs[-1] + c)
    return offs


# --------------------------- in-kernel math helpers ---------------------------
def _mm(a, b):
    return jnp.dot(a, b, preferred_element_type=jnp.float32)


def _elu(x):
    return jnp.where(x > 0, x, jnp.exp(x) - 1.0)


def _ln(y, gamma, beta):
    # one-pass LayerNorm: mean and mean-of-squares reductions are independent
    mu = jnp.mean(y, axis=-1, keepdims=True)
    ms = jnp.mean(y * y, axis=-1, keepdims=True)
    return (y - mu) * jax.lax.rsqrt(ms - mu * mu + LN_EPS) * gamma + beta


def _vsn(combo, e_ref, m_ref, f_ref, s_ref, b_ref, *, num_var):
    """Fused embedding + variable-selection network on all rows at once.

    combo : (N, Cin)  continuous values + categorical one-hot, column-offset
    e_ref : (Cin, V*E)   embedding slab (conti weights + block-diag tables)
    m_ref : (V*E, 4*V*E + 2*D + 2*V)  [W2bd|W1bd|W4bd|W5bd|fw2|SumM|fws|BlockMean]
    f_ref : (D, V)       flat-GRN hidden->logits weight
    s_ref : (V, 2*V+V*E) [flat w4 | flat w5 | ExpandM]
    b_ref : (14, V*E)    bias/gamma/beta rows
    returns (N, D) softmax-weighted mix of the per-variable GRN outputs.
    """
    V = num_var
    D = D_MODEL
    VE = V * D_EMB
    c_fw2 = 4 * VE
    c_sum = 4 * VE + D
    c_fws = 4 * VE + 2 * D
    c_bm = 4 * VE + 2 * D + V

    # embedding lookup for all variables == one matmul against the packed slab
    x = _mm(combo, e_ref[...]) + b_ref[0:1, :]                     # (N, V*E)

    # flat GRN with linear skip -> per-variable selection weights (N, V)
    eta2 = _elu(_mm(x, m_ref[:, c_fw2:c_fw2 + D]) + b_ref[1:2, :D])
    eta1 = _mm(eta2, f_ref[...]) + b_ref[2:3, :V]
    gate = jax.nn.sigmoid(_mm(eta1, s_ref[:, 0:V]) + b_ref[3:4, :V])
    val = _mm(eta1, s_ref[:, V:2 * V]) + b_ref[4:5, :V]
    resid = _mm(x, m_ref[:, c_fws:c_fws + V]) + b_ref[5:6, :V]
    logits = _ln(resid + gate * val, b_ref[6:7, :V], b_ref[7:8, :V])
    w = jax.nn.softmax(logits, axis=-1)                            # (N, V)

    # all per-variable GRNs at once via block-diagonal packed weights
    e2v = _elu(_mm(x, m_ref[:, 0:VE]) + b_ref[8:9, :])
    e1v = _mm(e2v, m_ref[:, VE:2 * VE]) + b_ref[9:10, :]
    gv = jax.nn.sigmoid(_mm(e1v, m_ref[:, 2 * VE:3 * VE]) + b_ref[10:11, :])
    vv = _mm(e1v, m_ref[:, 3 * VE:4 * VE]) + b_ref[11:12, :]
    y = x + gv * vv                                                # identity skip (E == D)

    # block-wise LayerNorm stats via tiny matmuls (no lane reshapes / XLU reduce)
    expm = s_ref[:, 2 * V:2 * V + VE]                              # (V, V*E) block broadcast
    bm = m_ref[:, c_bm:c_bm + V]                                   # (V*E, V) block mean
    mu = _mm(_mm(y, bm), expm)
    ms = _mm(_mm(y * y, bm), expm)
    normed = ((y - mu) * jax.lax.rsqrt(ms - mu * mu + LN_EPS)
              * b_ref[12:13, :] + b_ref[13:14, :])

    # softmax-weighted mix: broadcast weights per block, then block segment-sum
    wb = _mm(w, expm)                                              # (N, V*E)
    return _mm(normed * wb, m_ref[:, c_sum:c_sum + D])             # (N, D)


# ----------------------------- the fused kernel -------------------------------
def _tft_kernel(conti_ref, cidx_ref, fidx_ref,
                e1_ref, m1_ref, f1_ref, s1_ref, b1_ref,
                e2_ref, m2_ref, f2_ref, s2_ref, b2_ref,
                wd_ref, bd_ref, mask_ref, o_ref, y_scr, *, batch):
    D = D_MODEL
    B = batch
    ncv, nca = NUM_CV, len(CATE_DIMS)
    tot = sum(CATE_DIMS)
    offs = _cate_offsets()
    n1 = conti_ref.shape[0]              # SEQ_LEN * B  (time-major rows: s*B + b)
    n2 = fidx_ref.shape[0]               # TAU * B
    TB = n1 + n2
    T = TB // B
    tau = n2 // B
    H = NUM_HEADS
    dk = D // H
    nw = o_ref.shape[2]                  # NUM_TARGETS * NUM_QUANTILES

    # ------------- embeddings + variable selection (all rows at once) --------
    col1 = jax.lax.broadcasted_iota(jnp.int32, (n1, ncv + tot), 1)
    conti = conti_ref[...]
    cidx = cidx_ref[...]
    combo1 = jnp.zeros((n1, ncv + tot), jnp.float32)
    for i in range(ncv):                 # continuous values at columns 0..ncv-1
        combo1 = combo1 + jnp.where(col1 == i, conti[:, i:i + 1], 0.0)
    for j in range(nca):                 # categorical one-hot at ncv + offset
        combo1 = combo1 + jnp.where(col1 == ncv + offs[j] + cidx[:, j:j + 1], 1.0, 0.0)
    x1 = _vsn(combo1, e1_ref, m1_ref, f1_ref, s1_ref, b1_ref, num_var=ncv + nca)

    col2 = jax.lax.broadcasted_iota(jnp.int32, (n2, tot), 1)
    fidx = fidx_ref[...]
    combo2 = jnp.zeros((n2, tot), jnp.float32)
    for j in range(nca):
        combo2 = combo2 + jnp.where(col2 == offs[j] + fidx[:, j:j + 1], 1.0, 0.0)
    x2 = _vsn(combo2, e2_ref, m2_ref, f2_ref, s2_ref, b2_ref, num_var=nca)

    x = jnp.concatenate([x1, x2], axis=0)          # (TB, D), row = t*B + b

    # ------------- temporal fusion decoder (batch folded into rows) ----------
    def w(i):
        return wd_ref[:, i * D:(i + 1) * D]

    def bias(i):
        return bd_ref[i:i + 1, :D]

    def gan(a, resid, wi, bi):                     # GLU gate + add & norm
        g = jax.nn.sigmoid(_mm(a, w(wi)) + bias(bi))
        v = _mm(a, w(wi + 1)) + bias(bi + 1)
        return _ln(resid + g * v, bias(bi + 2), bias(bi + 3))

    def grn(xa, wi, bi):                           # gated residual net, identity skip
        e2 = _elu(_mm(xa, w(wi)) + bias(bi))
        e1 = _mm(e2, w(wi + 1)) + bias(bi + 1)
        g = jax.nn.sigmoid(_mm(e1, w(wi + 2)) + bias(bi + 2))
        v = _mm(e1, w(wi + 3)) + bias(bi + 3)
        return _ln(xa + g * v, bias(bi + 4), bias(bi + 5))

    # LSTM: input contribution hoisted out of the recurrence; gate columns are
    # packed [i, f, o, g] so one sigmoid covers three gates per step.
    xg = _mm(x, wd_ref[:, 0:4 * D]) + bd_ref[0:1, :]               # (TB, 4D)
    whh = wd_ref[:, 4 * D:8 * D]                                   # (D, 4D)
    h = jnp.zeros((B, D), jnp.float32)
    c = jnp.zeros((B, D), jnp.float32)
    for t in range(T):                                             # trace-unrolled
        gts = xg[t * B:(t + 1) * B, :] + _mm(h, whh)               # (B, 4D)
        sg = jax.nn.sigmoid(gts[:, 0:3 * D])                       # i | f | o
        gg = jnp.tanh(gts[:, 3 * D:4 * D])                         # g
        c = sg[:, D:2 * D] * c + sg[:, 0:D] * gg
        h = sg[:, 2 * D:3 * D] * jnp.tanh(c)
        y_scr[t * B:(t + 1) * B, :] = h            # collection only, off the h/c chain
    lstm_out = y_scr[...]                                          # (TB, D)

    glu_phi = gan(lstm_out, x, 8, 1)               # gate + add&norm (residual = x)
    theta = grn(glu_phi, 10, 5)                    # static enrichment

    # interpretable multi-head attention: heads share V (folded with wo), batch
    # handled by a same-batch + causal additive mask over the (TB, TB) scores.
    q = _mm(theta, w(14))                          # (TB, H*dk), head-grouped columns
    k = _mm(theta, w(15))
    vproj = _mm(theta, w(16))                      # theta @ (wv @ wo)  -> (TB, D)
    maskb = mask_ref[...]
    scale = 1.0 / math.sqrt(dk)
    asum = jnp.zeros((TB, TB), jnp.float32)
    for hh in range(H):                            # static unroll, independent heads
        qh = q[:, hh * dk:(hh + 1) * dk]
        kh = k[:, hh * dk:(hh + 1) * dk]
        s = jax.lax.dot_general(qh, kh, (((1,), (1,)), ((), ())),
                                preferred_element_type=jnp.float32) * scale + maskb
        asum = asum + jax.nn.softmax(s, axis=-1)
    attn_out = _mm(asum * (1.0 / H), vproj)        # mean_h(A_h) @ V @ wo

    delta = gan(attn_out, theta, 17, 11)           # gate + add&norm (residual = theta)
    vtil = grn(delta, 19, 15)                      # point-wise feed forward GRN
    varphi = gan(vtil, glu_phi, 23, 21)            # gate + add&norm (residual = glu_phi)

    # fused target-feature + quantile affine heads, tail (last tau steps) only
    tail = varphi[(T - tau) * B:, :]                               # (tau*B, D)
    yq = _mm(tail, w(25)) + bias(25)                               # first nw cols real
    for b in range(B):
        for t in range(tau):
            r = t * B + b
            o_ref[b, t:t + 1, :] = yq[r:r + 1, 0:nw]


# ----------------------------- model forward ---------------------------------
def tft_forward(packed, conti_input, cate_input, future_input):
    B, S, _ = conti_input.shape
    nca = len(CATE_DIMS)
    T = S + TAU
    TB = T * B
    nw = NUM_TARGETS * len(QUANTILES)

    # time-major row ordering (row = t*B + b) so the LSTM step slab is contiguous
    conti_tm = jnp.transpose(conti_input, (1, 0, 2)).reshape(S * B, NUM_CV)
    cate_tm = jnp.transpose(cate_input, (1, 0, 2)).reshape(S * B, nca)
    fut_tm = jnp.transpose(future_input, (1, 0, 2)).reshape(TAU * B, nca)

    # causal + same-batch additive mask; depends only on static shapes, so XLA
    # constant-folds it at compile time.
    r = jnp.arange(TB, dtype=jnp.int32)
    same = (r[:, None] % B) == (r[None, :] % B)
    causal = (r[None, :] // B) <= (r[:, None] // B)
    maskb = jnp.where(same & causal, 0.0, -1e9).astype(jnp.float32)

    args = (conti_tm, cate_tm, fut_tm,
            packed["e1"], packed["m1"], packed["f1"], packed["s1"], packed["b1"],
            packed["e2"], packed["m2"], packed["f2"], packed["s2"], packed["b2"],
            packed["wd"], packed["bd"], maskb)

    out = pl.pallas_call(
        functools.partial(_tft_kernel, batch=B),
        out_shape=jax.ShapeDtypeStruct((B, TAU, nw), jnp.float32),
        in_specs=[VMEM_SPEC] * len(args),
        out_specs=VMEM_SPEC,
        scratch_shapes=[pltpu.VMEM((TB, D_MODEL), jnp.float32)],
    )(*args)
    return out.reshape(B, TAU, NUM_TARGETS, len(QUANTILES))


# ----------------------------- parameters ------------------------------------
def _dense(key, din, dout):
    w = jax.random.normal(key, (din, dout), jnp.float32) * (1.0 / math.sqrt(din))
    b = jnp.zeros((1, dout), jnp.float32)
    return w, b


def _grn_params(key, din, dout, dh=None):
    dh = dout if dh is None else dh
    ks = jax.random.split(key, 5)
    p = {}
    p["w2"], p["b2"] = _dense(ks[0], din, dh)
    p["w1"], p["b1"] = _dense(ks[1], dh, dout)
    p["w4"], p["b4"] = _dense(ks[2], dout, dout)
    p["w5"], p["b5"] = _dense(ks[3], dout, dout)
    if din != dout:
        p["ws"], p["bs"] = _dense(ks[4], din, dout)
    p["gamma"] = jnp.ones((1, dout), jnp.float32)
    p["beta"] = jnp.zeros((1, dout), jnp.float32)
    return p


def _gan_params(key, d):
    ks = jax.random.split(key, 2)
    p = {}
    p["w4"], p["b4"] = _dense(ks[0], d, d)
    p["w5"], p["b5"] = _dense(ks[1], d, d)
    p["gamma"] = jnp.ones((1, d), jnp.float32)
    p["beta"] = jnp.zeros((1, d), jnp.float32)
    return p


def init_params(key):
    keys = jax.random.split(key, 16)
    num_var = NUM_CV + len(CATE_DIMS)
    num_cate = len(CATE_DIMS)
    dk = D_MODEL // NUM_HEADS
    params = {}
    # ContiFeatureEmbedding: per continuous var Linear(1, d_emb)
    params["conti_w"] = jax.random.normal(keys[0], (NUM_CV, D_EMB), jnp.float32) * 0.1
    params["conti_b"] = jnp.zeros((NUM_CV, D_EMB), jnp.float32)
    # CateFeatureEmbedding: embedding tables (shared by cate_input / future_input)
    params["cate_emb"] = [
        jax.random.normal(jax.random.fold_in(keys[1], i), (c, D_EMB), jnp.float32) * 0.1
        for i, c in enumerate(CATE_DIMS)]
    # Variable selection networks
    params["vsn1"] = {
        "flat": _grn_params(keys[2], num_var * D_EMB, num_var, dh=D_MODEL),
        "vars": [_grn_params(jax.random.fold_in(keys[3], i), D_EMB, D_MODEL)
                 for i in range(num_var)],
    }
    params["vsn2"] = {
        "flat": _grn_params(keys[4], num_cate * D_EMB, num_cate, dh=D_MODEL),
        "vars": [_grn_params(jax.random.fold_in(keys[5], i), D_EMB, D_MODEL)
                 for i in range(num_cate)],
    }
    # Temporal fusion decoder
    ks = jax.random.split(keys[6], 3)
    params["lstm"] = {
        "wih": jax.random.normal(ks[0], (D_MODEL, 4 * D_MODEL), jnp.float32) / math.sqrt(D_MODEL),
        "whh": jax.random.normal(ks[1], (D_MODEL, 4 * D_MODEL), jnp.float32) / math.sqrt(D_MODEL),
        "b": jnp.zeros((1, 4 * D_MODEL), jnp.float32),
    }
    params["gan1"] = _gan_params(keys[7], D_MODEL)
    params["enrich"] = _grn_params(keys[8], D_MODEL, D_MODEL)
    ka = jax.random.split(keys[9], 4)
    params["attn"] = {
        "wq": jax.random.normal(ka[0], (NUM_HEADS, D_MODEL, dk), jnp.float32) / math.sqrt(D_MODEL),
        "wk": jax.random.normal(ka[1], (NUM_HEADS, D_MODEL, dk), jnp.float32) / math.sqrt(D_MODEL),
        "wv": jax.random.normal(ka[2], (D_MODEL, dk), jnp.float32) / math.sqrt(D_MODEL),
        "wo": jax.random.normal(ka[3], (dk, D_MODEL), jnp.float32) / math.sqrt(dk),
    }
    params["gan2"] = _gan_params(keys[10], D_MODEL)
    # Point-wise feed forward
    params["pwff_grn"] = _grn_params(keys[11], D_MODEL, D_MODEL)
    params["pwff_gan"] = _gan_params(keys[12], D_MODEL)
    # Target feature layer + quantile output heads
    params["tfl"] = [_dense(jax.random.fold_in(keys[13], i), D_MODEL, D_MODEL)
                     for i in range(NUM_TARGETS)]
    params["qo"] = [_dense(jax.random.fold_in(keys[14], i), D_MODEL, 1)
                    for i in range(len(QUANTILES))]
    return params


# ----------------------------- one-time weight packing ------------------------
def pack_params(p):
    """Pack all weights ONCE into lane-dense slabs (no per-call stacking)."""
    f32 = np.float32
    D, E = D_MODEL, D_EMB
    ncv, nca = NUM_CV, len(CATE_DIMS)
    tot = sum(CATE_DIMS)
    offs = _cate_offsets()
    H, dk = NUM_HEADS, D_MODEL // NUM_HEADS
    nq = len(QUANTILES)

    def npa(x):
        return np.asarray(x, f32)

    # ---- embedding slabs: ContiFeatureEmbedding + CateFeatureEmbedding tables
    VE1 = (ncv + nca) * E
    e1 = np.zeros((ncv + tot, VE1), f32)
    eb1 = np.zeros((VE1,), f32)
    for i in range(ncv):
        e1[i, i * E:(i + 1) * E] = npa(p["conti_w"][i])
        eb1[i * E:(i + 1) * E] = npa(p["conti_b"][i])
    for j in range(nca):
        e1[ncv + offs[j]:ncv + offs[j] + CATE_DIMS[j],
           (ncv + j) * E:(ncv + j + 1) * E] = npa(p["cate_emb"][j])
    VE2 = nca * E
    e2 = np.zeros((tot, VE2), f32)
    for j in range(nca):
        e2[offs[j]:offs[j] + CATE_DIMS[j], j * E:(j + 1) * E] = npa(p["cate_emb"][j])

    def pack_vsn(vp, V, VE, emb_bias):
        flat, pvs = vp["flat"], vp["vars"]
        m = np.zeros((VE, 4 * VE + 2 * D + 2 * V), f32)
        for v in range(V):
            r = slice(v * D, (v + 1) * D)
            m[r, 0 * VE + v * D:0 * VE + (v + 1) * D] = npa(pvs[v]["w2"])
            m[r, 1 * VE + v * D:1 * VE + (v + 1) * D] = npa(pvs[v]["w1"])
            m[r, 2 * VE + v * D:2 * VE + (v + 1) * D] = npa(pvs[v]["w4"])
            m[r, 3 * VE + v * D:3 * VE + (v + 1) * D] = npa(pvs[v]["w5"])
            m[r, 4 * VE + D:4 * VE + 2 * D] = np.eye(D, dtype=f32)       # SumM
            m[r, 4 * VE + 2 * D + V + v] = 1.0 / D                       # BlockMean
        m[:, 4 * VE:4 * VE + D] = npa(flat["w2"])                        # fw2
        m[:, 4 * VE + 2 * D:4 * VE + 2 * D + V] = npa(flat["ws"])        # fws
        s = np.zeros((V, 2 * V + VE), f32)
        s[:, 0:V] = npa(flat["w4"])
        s[:, V:2 * V] = npa(flat["w5"])
        for v in range(V):
            s[v, 2 * V + v * D:2 * V + (v + 1) * D] = 1.0                # ExpandM
        b = np.zeros((14, VE), f32)
        b[0, :] = emb_bias
        b[1, :D] = npa(flat["b2"])[0]
        for r, k in zip((2, 3, 4, 5, 6, 7), ("b1", "b4", "b5", "bs", "gamma", "beta")):
            b[r, :V] = npa(flat[k])[0]
        for v in range(V):
            c = slice(v * D, (v + 1) * D)
            for r, k in zip((8, 9, 10, 11, 12, 13),
                            ("b2", "b1", "b4", "b5", "gamma", "beta")):
                b[r, c] = npa(pvs[v][k])[0]
        return m, npa(flat["w1"]), s, b

    m1, f1, s1, b1 = pack_vsn(p["vsn1"], ncv + nca, VE1, eb1)
    m2, f2, s2, b2 = pack_vsn(p["vsn2"], nca, VE2, np.zeros((VE2,), f32))

    # ---- decoder matrix slab (32, 26*32): gate columns reordered [i,f,o,g]
    def reorder_gates(arr):
        return np.concatenate([arr[..., 0:D], arr[..., D:2 * D],
                               arr[..., 3 * D:4 * D], arr[..., 2 * D:3 * D]], axis=-1)

    wblocks = []
    wih = reorder_gates(npa(p["lstm"]["wih"]))
    whh = reorder_gates(npa(p["lstm"]["whh"]))
    for g in range(4):
        wblocks.append(wih[:, g * D:(g + 1) * D])
    for g in range(4):
        wblocks.append(whh[:, g * D:(g + 1) * D])
    wblocks += [npa(p["gan1"]["w4"]), npa(p["gan1"]["w5"])]
    wblocks += [npa(p["enrich"][k]) for k in ("w2", "w1", "w4", "w5")]
    att = p["attn"]
    wblocks.append(np.moveaxis(npa(att["wq"]), 0, 1).reshape(D, H * dk))
    wblocks.append(np.moveaxis(npa(att["wk"]), 0, 1).reshape(D, H * dk))
    wblocks.append(npa(att["wv"]) @ npa(att["wo"]))                       # wvo = wv @ wo
    wblocks += [npa(p["gan2"]["w4"]), npa(p["gan2"]["w5"])]
    wblocks += [npa(p["pwff_grn"][k]) for k in ("w2", "w1", "w4", "w5")]
    wblocks += [npa(p["pwff_gan"]["w4"]), npa(p["pwff_gan"]["w5"])]
    # fused TargetFeatureLayer + QuantileOutput (affine o affine), padded to D cols
    qw = np.concatenate([npa(w) for (w, _) in p["qo"]], axis=1)           # (D, NQ)
    qb = np.concatenate([npa(b) for (_, b) in p["qo"]], axis=1)           # (1, NQ)
    wout = np.zeros((D, D), f32)
    bout = np.zeros((D,), f32)
    for nt, (tw, tb) in enumerate(p["tfl"]):
        wout[:, nt * nq:(nt + 1) * nq] = npa(tw) @ qw
        bout[nt * nq:(nt + 1) * nq] = (npa(tb) @ qw + qb)[0]
    wblocks.append(wout)
    wd = np.concatenate(wblocks, axis=1)                                  # (32, 832)

    # ---- decoder bias slab (26, 128)
    bd = np.zeros((26, 4 * D), f32)
    bd[0, :] = reorder_gates(npa(p["lstm"]["b"]))[0]
    row = 1
    for name, keys in (("gan1", ("b4", "b5", "gamma", "beta")),
                       ("enrich", ("b2", "b1", "b4", "b5", "gamma", "beta")),
                       ("gan2", ("b4", "b5", "gamma", "beta")),
                       ("pwff_grn", ("b2", "b1", "b4", "b5", "gamma", "beta")),
                       ("pwff_gan", ("b4", "b5", "gamma", "beta"))):
        for k in keys:
            bd[row, :D] = npa(p[name][k])[0]
            row += 1
    bd[row, :D] = bout

    packed = dict(e1=e1, m1=m1, f1=f1, s1=s1, b1=b1,
                  e2=e2, m2=m2, f2=f2, s2=s2, b2=b2, wd=wd, bd=bd)
    return {k: jnp.asarray(v) for k, v in packed.items()}


# ----------------------------- driver -----------------------------------------
if __name__ == "__main__":
    key = jax.random.PRNGKey(0)
    pkey, k1, k2, k3 = jax.random.split(key, 4)
    params = init_params(pkey)
    packed = pack_params(params)          # one-time weight packing (outside jit)

    B = 2
    conti = jax.random.normal(k1, (B, SEQ_LEN, NUM_CV), jnp.float32)
    cate = jnp.stack(
        [jax.random.randint(jax.random.fold_in(k2, i), (B, SEQ_LEN), 0, c)
         for i, c in enumerate(CATE_DIMS)], axis=-1).astype(jnp.int32)
    future = jnp.stack(
        [jax.random.randint(jax.random.fold_in(k3, i), (B, TAU), 0, c)
         for i, c in enumerate(CATE_DIMS)], axis=-1).astype(jnp.int32)

    out = jax.jit(tft_forward)(packed, conti, cate, future)
    out = jax.block_until_ready(out)
    assert out.shape == (B, TAU, NUM_TARGETS, len(QUANTILES)), out.shape
    assert bool(jnp.all(jnp.isfinite(out)))
    print("KERNEL_OK")
</pallas_src>

<mosaic_0001>
module attributes {stable_mosaic.version = 11 : i64} {
  func.func @_tft_kernel(%arg0: memref<16x3xf32, #tpu.memory_space<vmem>>, %arg1: memref<16x3xi32, #tpu.memory_space<vmem>>, %arg2: memref<8x3xi32, #tpu.memory_space<vmem>>, %arg3: memref<70x192xf32, #tpu.memory_space<vmem>>, %arg4: memref<192x844xf32, #tpu.memory_space<vmem>>, %arg5: memref<32x6xf32, #tpu.memory_space<vmem>>, %arg6: memref<6x204xf32, #tpu.memory_space<vmem>>, %arg7: memref<14x192xf32, #tpu.memory_space<vmem>>, %arg8: memref<67x96xf32, #tpu.memory_space<vmem>>, %arg9: memref<96x454xf32, #tpu.memory_space<vmem>>, %arg10: memref<32x3xf32, #tpu.memory_space<vmem>>, %arg11: memref<3x102xf32, #tpu.memory_space<vmem>>, %arg12: memref<14x96xf32, #tpu.memory_space<vmem>>, %arg13: memref<32x832xf32, #tpu.memory_space<vmem>>, %arg14: memref<26x128xf32, #tpu.memory_space<vmem>>, %arg15: memref<24x24xf32, #tpu.memory_space<vmem>>, %arg16: memref<2x4x6xf32, #tpu.memory_space<vmem>>, %arg17: memref<24x32xf32, #tpu.memory_space<vmem>>) attributes {dimension_semantics = [], scalar_prefetch = 0 : i64, scratch_operands = 1 : i64, tpu.core_type = #tpu.core_type<tc>} {
    %0 = tpu.iota {dimensions = array<i32: 1>} : vector<16x70xi32>
    %c0 = arith.constant 0 : index
    %c0_0 = arith.constant 0 : index
    %1 = vector.load %arg0[%c0, %c0_0] : memref<16x3xf32, #tpu.memory_space<vmem>>, vector<16x3xf32>
    %c0_1 = arith.constant 0 : index
    %c0_2 = arith.constant 0 : index
    %2 = vector.load %arg1[%c0_1, %c0_2] : memref<16x3xi32, #tpu.memory_space<vmem>>, vector<16x3xi32>
    %cst = arith.constant 0.000000e+00 : f32
    %3 = vector.broadcast %cst : f32 to vector<16x70xf32>
    %c0_i32 = arith.constant 0 : i32
    %4 = vector.broadcast %c0_i32 : i32 to vector<16x70xi32>
    %5 = arith.cmpi eq, %0, %4 : vector<16x70xi32>
    %6 = vector.extract_strided_slice %1 {offsets = [0, 0], sizes = [16, 1], strides = [1, 1]} : vector<16x3xf32> to vector<16x1xf32>
    %cst_3 = arith.constant 0.000000e+00 : f32
    %7 = vector.shape_cast %6 : vector<16x1xf32> to vector<16x1xf32>
    %8 = vector.broadcast %7 : vector<16x1xf32> to vector<16x70xf32>
    %9 = vector.broadcast %cst_3 : f32 to vector<16x70xf32>
    %10 = arith.select %5, %8, %9 : vector<16x70xi1>, vector<16x70xf32>
    %11 = arith.addf %3, %10 : vector<16x70xf32>
    %c1_i32 = arith.constant 1 : i32
    %12 = vector.broadcast %c1_i32 : i32 to vector<16x70xi32>
    %13 = arith.cmpi eq, %0, %12 : vector<16x70xi32>
    %14 = vector.extract_strided_slice %1 {offsets = [0, 1], sizes = [16, 1], strides = [1, 1]} : vector<16x3xf32> to vector<16x1xf32>
    %cst_4 = arith.constant 0.000000e+00 : f32
    %15 = vector.shape_cast %14 : vector<16x1xf32> to vector<16x1xf32>
    %16 = vector.broadcast %15 : vector<16x1xf32> to vector<16x70xf32>
    %17 = vector.broadcast %cst_4 : f32 to vector<16x70xf32>
    %18 = arith.select %13, %16, %17 : vector<16x70xi1>, vector<16x70xf32>
    %19 = arith.addf %11, %18 : vector<16x70xf32>
    %c2_i32 = arith.constant 2 : i32
    %20 = vector.broadcast %c2_i32 : i32 to vector<16x70xi32>
    %21 = arith.cmpi eq, %0, %20 : vector<16x70xi32>
    %22 = vector.extract_strided_slice %1 {offsets = [0, 2], sizes = [16, 1], strides = [1, 1]} : vector<16x3xf32> to vector<16x1xf32>
    %cst_5 = arith.constant 0.000000e+00 : f32
    %23 = vector.shape_cast %22 : vector<16x1xf32> to vector<16x1xf32>
    %24 = vector.broadcast %23 : vector<16x1xf32> to vector<16x70xf32>
    %25 = vector.broadcast %cst_5 : f32 to vector<16x70xf32>
    %26 = arith.select %21, %24, %25 : vector<16x70xi1>, vector<16x70xf32>
    %27 = arith.addf %19, %26 : vector<16x70xf32>
    %28 = vector.extract_strided_slice %2 {offsets = [0, 0], sizes = [16, 1], strides = [1, 1]} : vector<16x3xi32> to vector<16x1xi32>
    %c3_i32 = arith.constant 3 : i32
    %29 = vector.broadcast %c3_i32 : i32 to vector<16x1xi32>
    %30 = arith.addi %29, %28 : vector<16x1xi32>
    %31 = vector.broadcast %30 : vector<16x1xi32> to vector<16x70xi32>
    %32 = arith.cmpi eq, %0, %31 : vector<16x70xi32>
    %cst_6 = arith.constant 1.000000e+00 : f32
    %cst_7 = arith.constant 0.000000e+00 : f32
    %33 = vector.broadcast %cst_6 : f32 to vector<16x70xf32>
    %34 = vector.broadcast %cst_7 : f32 to vector<16x70xf32>
    %35 = arith.select %32, %33, %34 : vector<16x70xi1>, vector<16x70xf32>
    %36 = arith.addf %27, %35 : vector<16x70xf32>
    %37 = vector.extract_strided_slice %2 {offsets = [0, 1], sizes = [16, 1], strides = [1, 1]} : vector<16x3xi32> to vector<16x1xi32>
    %c15_i32 = arith.constant 15 : i32
    %38 = vector.broadcast %c15_i32 : i32 to vector<16x1xi32>
    %39 = arith.addi %38, %37 : vector<16x1xi32>
    %40 = vector.broadcast %39 : vector<16x1xi32> to vector<16x70xi32>
    %41 = arith.cmpi eq, %0, %40 : vector<16x70xi32>
    %cst_8 = arith.constant 1.000000e+00 : f32
    %cst_9 = arith.constant 0.000000e+00 : f32
    %42 = vector.broadcast %cst_8 : f32 to vector<16x70xf32>
    %43 = vector.broadcast %cst_9 : f32 to vector<16x70xf32>
    %44 = arith.select %41, %42, %43 : vector<16x70xi1>, vector<16x70xf32>
    %45 = arith.addf %36, %44 : vector<16x70xf32>
    %46 = vector.extract_strided_slice %2 {offsets = [0, 2], sizes = [16, 1], strides = [1, 1]} : vector<16x3xi32> to vector<16x1xi32>
    %c46_i32 = arith.constant 46 : i32
    %47 = vector.broadcast %c46_i32 : i32 to vector<16x1xi32>
    %48 = arith.addi %47, %46 : vector<16x1xi32>
    %49 = vector.broadcast %48 : vector<16x1xi32> to vector<16x70xi32>
    %50 = arith.cmpi eq, %0, %49 : vector<16x70xi32>
    %cst_10 = arith.constant 1.000000e+00 : f32
    %cst_11 = arith.constant 0.000000e+00 : f32
    %51 = vector.broadcast %cst_10 : f32 to vector<16x70xf32>
    %52 = vector.broadcast %cst_11 : f32 to vector<16x70xf32>
    %53 = arith.select %50, %51, %52 : vector<16x70xi1>, vector<16x70xf32>
    %54 = arith.addf %45, %53 : vector<16x70xf32>
    %c0_12 = arith.constant 0 : index
    %c0_13 = arith.constant 0 : index
    %55 = vector.load %arg3[%c0_12, %c0_13] : memref<70x192xf32, #tpu.memory_space<vmem>>, vector<70x192xf32>
    %cst_14 = arith.constant dense<0.000000e+00> : vector<16x192xf32>
    %56 = tpu.matmul %54, %55, %cst_14 {dimension_numbers = #tpu.dot_dimension_numbers<[1], [0], [0], [1], [0, 0, 1, 1], [], []>} : vector<16x70xf32>, vector<70x192xf32>, vector<16x192xf32> -> vector<16x192xf32>
    %c0_15 = arith.constant 0 : index
    %c0_16 = arith.constant 0 : index
    %57 = vector.load %arg7[%c0_15, %c0_16] : memref<14x192xf32, #tpu.memory_space<vmem>>, vector<1x192xf32>
    %58 = vector.broadcast %57 : vector<1x192xf32> to vector<16x192xf32>
    %59 = arith.addf %56, %58 : vector<16x192xf32>
    %c0_17 = arith.constant 0 : index
    %c768 = arith.constant 768 : index
    %60 = vector.load %arg4[%c0_17, %c768] : memref<192x844xf32, #tpu.memory_space<vmem>>, vector<192x32xf32>
    %cst_18 = arith.constant dense<0.000000e+00> : vector<16x32xf32>
    %61 = tpu.matmul %59, %60, %cst_18 {dimension_numbers = #tpu.dot_dimension_numbers<[1], [0], [0], [1], [0, 0, 1, 1], [], []>} : vector<16x192xf32>, vector<192x32xf32>, vector<16x32xf32> -> vector<16x32xf32>
    %c1 = arith.constant 1 : index
    %c0_19 = arith.constant 0 : index
    %62 = vector.load %arg7[%c1, %c0_19] : memref<14x192xf32, #tpu.memory_space<vmem>>, vector<1x32xf32>
    %63 = vector.broadcast %62 : vector<1x32xf32> to vector<16x32xf32>
    %64 = arith.addf %61, %63 : vector<16x32xf32>
    %cst_20 = arith.constant 0.000000e+00 : f32
    %65 = vector.broadcast %cst_20 : f32 to vector<16x32xf32>
    %66 = arith.cmpf ogt, %64, %65 : vector<16x32xf32>
    %67 = math.exp %64 : vector<16x32xf32>
    %cst_21 = arith.constant 1.000000e+00 : f32
    %68 = vector.broadcast %cst_21 : f32 to vector<16x32xf32>
    %69 = arith.subf %67, %68 : vector<16x32xf32>
    %70 = arith.select %66, %64, %69 : vector<16x32xi1>, vector<16x32xf32>
    %c0_22 = arith.constant 0 : index
    %c0_23 = arith.constant 0 : index
    %71 = vector.load %arg5[%c0_22, %c0_23] : memref<32x6xf32, #tpu.memory_space<vmem>>, vector<32x6xf32>
    %cst_24 = arith.constant dense<0.000000e+00> : vector<16x6xf32>
    %72 = tpu.matmul %70, %71, %cst_24 {dimension_numbers = #tpu.dot_dimension_numbers<[1], [0], [0], [1], [0, 0, 1, 1], [], []>} : vector<16x32xf32>, vector<32x6xf32>, vector<16x6xf32> -> vector<16x6xf32>
    %c2 = arith.constant 2 : index
    %c0_25 = arith.constant 0 : index
    %73 = vector.load %arg7[%c2, %c0_25] : memref<14x192xf32, #tpu.memory_space<vmem>>, vector<1x6xf32>
    %74 = vector.broadcast %73 : vector<1x6xf32> to vector<16x6xf32>
    %75 = arith.addf %72, %74 : vector<16x6xf32>
    %c0_26 = arith.constant 0 : index
    %c0_27 = arith.constant 0 : index
    %76 = vector.load %arg6[%c0_26, %c0_27] : memref<6x204xf32, #tpu.memory_space<vmem>>, vector<6x6xf32>
    %cst_28 = arith.constant dense<0.000000e+00> : vector<16x6xf32>
    %77 = tpu.matmul %75, %76, %cst_28 {dimension_numbers = #tpu.dot_dimension_numbers<[1], [0], [0], [1], [0, 0, 1, 1], [], []>} : vector<16x6xf32>, vector<6x6xf32>, vector<16x6xf32> -> vector<16x6xf32>
    %c3 = arith.constant 3 : index
    %c0_29 = arith.constant 0 : index
    %78 = vector.load %arg7[%c3, %c0_29] : memref<14x192xf32, #tpu.memory_space<vmem>>, vector<1x6xf32>
    %79 = vector.broadcast %78 : vector<1x6xf32> to vector<16x6xf32>
    %80 = arith.addf %77, %79 : vector<16x6xf32>
    %81 = arith.negf %80 : vector<16x6xf32>
    %82 = math.exp %81 : vector<16x6xf32>
    %cst_30 = arith.constant 1.000000e+00 : f32
    %83 = vector.broadcast %cst_30 : f32 to vector<16x6xf32>
    %84 = arith.addf %83, %82 : vector<16x6xf32>
    %85 = arith.divf %83, %84 : vector<16x6xf32>
    %c0_31 = arith.constant 0 : index
    %c6 = arith.constant 6 : index
    %86 = vector.load %arg6[%c0_31, %c6] : memref<6x204xf32, #tpu.memory_space<vmem>>, vector<6x6xf32>
    %cst_32 = arith.constant dense<0.000000e+00> : vector<16x6xf32>
    %87 = tpu.matmul %75, %86, %cst_32 {dimension_numbers = #tpu.dot_dimension_numbers<[1], [0], [0], [1], [0, 0, 1, 1], [], []>} : vector<16x6xf32>, vector<6x6xf32>, vector<16x6xf32> -> vector<16x6xf32>
    %c4 = arith.constant 4 : index
    %c0_33 = arith.constant 0 : index
    %88 = vector.load %arg7[%c4, %c0_33] : memref<14x192xf32, #tpu.memory_space<vmem>>, vector<1x6xf32>
    %89 = vector.broadcast %88 : vector<1x6xf32> to vector<16x6xf32>
    %90 = arith.addf %87, %89 : vector<16x6xf32>
    %c0_34 = arith.constant 0 : index
    %c832 = arith.constant 832 : index
    %91 = vector.load %arg4[%c0_34, %c832] : memref<192x844xf32, #tpu.memory_space<vmem>>, vector<192x6xf32>
    %cst_35 = arith.constant dense<0.000000e+00> : vector<16x6xf32>
    %92 = tpu.matmul %59, %91, %cst_35 {dimension_numbers = #tpu.dot_dimension_numbers<[1], [0], [0], [1], [0, 0, 1, 1], [], []>} : vector<16x192xf32>, vector<192x6xf32>, vector<16x6xf32> -> vector<16x6xf32>
    %c5 = arith.constant 5 : index
    %c0_36 = arith.constant 0 : index
    %93 = vector.load %arg7[%c5, %c0_36] : memref<14x192xf32, #tpu.memory_space<vmem>>, vector<1x6xf32>
    %94 = vector.broadcast %93 : vector<1x6xf32> to vector<16x6xf32>
    %95 = arith.addf %92, %94 : vector<16x6xf32>
    %96 = arith.mulf %85, %90 : vector<16x6xf32>
    %97 = arith.addf %95, %96 : vector<16x6xf32>
    %c6_37 = arith.constant 6 : index
    %c0_38 = arith.constant 0 : index
    %98 = vector.load %arg7[%c6_37, %c0_38] : memref<14x192xf32, #tpu.memory_space<vmem>>, vector<1x6xf32>
    %c7 = arith.constant 7 : index
    %c0_39 = arith.constant 0 : index
    %99 = vector.load %arg7[%c7, %c0_39] : memref<14x192xf32, #tpu.memory_space<vmem>>, vector<1x6xf32>
    %cst_40 = arith.constant dense<0.000000e+00> : vector<16xf32>
    %100 = vector.multi_reduction <add>, %97, %cst_40 [1] : vector<16x6xf32> to vector<16xf32>
    %101 = vector.shape_cast %100 : vector<16xf32> to vector<16x1xf32>
    %cst_41 = arith.constant 6.000000e+00 : f32
    %102 = vector.broadcast %cst_41 : f32 to vector<16x1xf32>
    %103 = arith.divf %101, %102 : vector<16x1xf32>
    %104 = arith.mulf %97, %97 : vector<16x6xf32>
    %cst_42 = arith.constant dense<0.000000e+00> : vector<16xf32>
    %105 = vector.multi_reduction <add>, %104, %cst_42 [1] : vector<16x6xf32> to vector<16xf32>
    %106 = vector.shape_cast %105 : vector<16xf32> to vector<16x1xf32>
    %cst_43 = arith.constant 6.000000e+00 : f32
    %107 = vector.broadcast %cst_43 : f32 to vector<16x1xf32>
    %108 = arith.divf %106, %107 : vector<16x1xf32>
    %109 = vector.broadcast %103 : vector<16x1xf32> to vector<16x6xf32>
    %110 = arith.subf %97, %109 : vector<16x6xf32>
    %111 = arith.mulf %103, %103 : vector<16x1xf32>
    %112 = arith.subf %108, %111 : vector<16x1xf32>
    %cst_44 = arith.constant 9.99999974E-6 : f32
    %113 = vector.broadcast %cst_44 : f32 to vector<16x1xf32>
    %114 = arith.addf %112, %113 : vector<16x1xf32>
    %115 = math.rsqrt %114 : vector<16x1xf32>
    %116 = vector.broadcast %115 : vector<16x1xf32> to vector<16x6xf32>
    %117 = arith.mulf %110, %116 : vector<16x6xf32>
    %118 = vector.broadcast %98 : vector<1x6xf32> to vector<16x6xf32>
    %119 = arith.mulf %117, %118 : vector<16x6xf32>
    %120 = vector.broadcast %99 : vector<1x6xf32> to vector<16x6xf32>
    %121 = arith.addf %119, %120 : vector<16x6xf32>
    %cst_45 = arith.constant dense<0xFF800000> : vector<16xf32>
    %122 = vector.multi_reduction <maximumf>, %121, %cst_45 [1] : vector<16x6xf32> to vector<16xf32>
    %cst_46 = arith.constant 0xFF800000 : f32
    %123 = vector.broadcast %cst_46 : f32 to vector<16xf32>
    %124 = arith.maximumf %123, %122 : vector<16xf32>
    %125 = vector.shape_cast %124 : vector<16xf32> to vector<16x1xf32>
    %126 = vector.broadcast %125 : vector<16x1xf32> to vector<16x6xf32>
    %127 = arith.subf %121, %126 : vector<16x6xf32>
    %128 = math.exp %127 : vector<16x6xf32>
    %cst_47 = arith.constant dense<0.000000e+00> : vector<16xf32>
    %129 = vector.multi_reduction <add>, %128, %cst_47 [1] : vector<16x6xf32> to vector<16xf32>
    %130 = vector.shape_cast %129 : vector<16xf32> to vector<16x1xf32>
    %131 = vector.broadcast %130 : vector<16x1xf32> to vector<16x6xf32>
    %132 = arith.divf %128, %131 : vector<16x6xf32>
    %c0_48 = arith.constant 0 : index
    %c0_49 = arith.constant 0 : index
    %133 = vector.load %arg4[%c0_48, %c0_49] : memref<192x844xf32, #tpu.memory_space<vmem>>, vector<192x192xf32>
    %cst_50 = arith.constant dense<0.000000e+00> : vector<16x192xf32>
    %134 = tpu.matmul %59, %133, %cst_50 {dimension_numbers = #tpu.dot_dimension_numbers<[1], [0], [0], [1], [0, 0, 1, 1], [], []>} : vector<16x192xf32>, vector<192x192xf32>, vector<16x192xf32> -> vector<16x192xf32>
    %c8 = arith.constant 8 : index
    %c0_51 = arith.constant 0 : index
    %135 = vector.load %arg7[%c8, %c0_51] : memref<14x192xf32, #tpu.memory_space<vmem>>, vector<1x192xf32>
    %136 = vector.broadcast %135 : vector<1x192xf32> to vector<16x192xf32>
    %137 = arith.addf %134, %136 : vector<16x192xf32>
    %cst_52 = arith.constant 0.000000e+00 : f32
    %138 = vector.broadcast %cst_52 : f32 to vector<16x192xf32>
    %139 = arith.cmpf ogt, %137, %138 : vector<16x192xf32>
    %140 = math.exp %137 : vector<16x192xf32>
    %cst_53 = arith.constant 1.000000e+00 : f32
    %141 = vector.broadcast %cst_53 : f32 to vector<16x192xf32>
    %142 = arith.subf %140, %141 : vector<16x192xf32>
    %143 = arith.select %139, %137, %142 : vector<16x192xi1>, vector<16x192xf32>
    %c0_54 = arith.constant 0 : index
    %c192 = arith.constant 192 : index
    %144 = vector.load %arg4[%c0_54, %c192] : memref<192x844xf32, #tpu.memory_space<vmem>>, vector<192x192xf32>
    %cst_55 = arith.constant dense<0.000000e+00> : vector<16x192xf32>
    %145 = tpu.matmul %143, %144, %cst_55 {dimension_numbers = #tpu.dot_dimension_numbers<[1], [0], [0], [1], [0, 0, 1, 1], [], []>} : vector<16x192xf32>, vector<192x192xf32>, vector<16x192xf32> -> vector<16x192xf32>
    %c9 = arith.constant 9 : index
    %c0_56 = arith.constant 0 : index
    %146 = vector.load %arg7[%c9, %c0_56] : memref<14x192xf32, #tpu.memory_space<vmem>>, vector<1x192xf32>
    %147 = vector.broadcast %146 : vector<1x192xf32> to vector<16x192xf32>
    %148 = arith.addf %145, %147 : vector<16x192xf32>
    %c0_57 = arith.constant 0 : index
    %c384 = arith.constant 384 : index
    %149 = vector.load %arg4[%c0_57, %c384] : memref<192x844xf32, #tpu.memory_space<vmem>>, vector<192x192xf32>
    %cst_58 = arith.constant dense<0.000000e+00> : vector<16x192xf32>
    %150 = tpu.matmul %148, %149, %cst_58 {dimension_numbers = #tpu.dot_dimension_numbers<[1], [0], [0], [1], [0, 0, 1, 1], [], []>} : vector<16x192xf32>, vector<192x192xf32>, vector<16x192xf32> -> vector<16x192xf32>
    %c10 = arith.constant 10 : index
    %c0_59 = arith.constant 0 : index
    %151 = vector.load %arg7[%c10, %c0_59] : memref<14x192xf32, #tpu.memory_space<vmem>>, vector<1x192xf32>
    %152 = vector.broadcast %151 : vector<1x192xf32> to vector<16x192xf32>
    %153 = arith.addf %150, %152 : vector<16x192xf32>
    %154 = arith.negf %153 : vector<16x192xf32>
    %155 = math.exp %154 : vector<16x192xf32>
    %cst_60 = arith.constant 1.000000e+00 : f32
    %156 = vector.broadcast %cst_60 : f32 to vector<16x192xf32>
    %157 = arith.addf %156, %155 : vector<16x192xf32>
    %158 = arith.divf %156, %157 : vector<16x192xf32>
    %c0_61 = arith.constant 0 : index
    %c576 = arith.constant 576 : index
    %159 = vector.load %arg4[%c0_61, %c576] : memref<192x844xf32, #tpu.memory_space<vmem>>, vector<192x192xf32>
    %cst_62 = arith.constant dense<0.000000e+00> : vector<16x192xf32>
    %160 = tpu.matmul %148, %159, %cst_62 {dimension_numbers = #tpu.dot_dimension_numbers<[1], [0], [0], [1], [0, 0, 1, 1], [], []>} : vector<16x192xf32>, vector<192x192xf32>, vector<16x192xf32> -> vector<16x192xf32>
    %c11 = arith.constant 11 : index
    %c0_63 = arith.constant 0 : index
    %161 = vector.load %arg7[%c11, %c0_63] : memref<14x192xf32, #tpu.memory_space<vmem>>, vector<1x192xf32>
    %162 = vector.broadcast %161 : vector<1x192xf32> to vector<16x192xf32>
    %163 = arith.addf %160, %162 : vector<16x192xf32>
    %164 = arith.mulf %158, %163 : vector<16x192xf32>
    %165 = arith.addf %59, %164 : vector<16x192xf32>
    %c0_64 = arith.constant 0 : index
    %c12 = arith.constant 12 : index
    %166 = vector.load %arg6[%c0_64, %c12] : memref<6x204xf32, #tpu.memory_space<vmem>>, vector<6x192xf32>
    %c0_65 = arith.constant 0 : index
    %c838 = arith.constant 838 : index
    %167 = vector.load %arg4[%c0_65, %c838] : memref<192x844xf32, #tpu.memory_space<vmem>>, vector<192x6xf32>
    %cst_66 = arith.constant dense<0.000000e+00> : vector<16x6xf32>
    %168 = tpu.matmul %165, %167, %cst_66 {dimension_numbers = #tpu.dot_dimension_numbers<[1], [0], [0], [1], [0, 0, 1, 1], [], []>} : vector<16x192xf32>, vector<192x6xf32>, vector<16x6xf32> -> vector<16x6xf32>
    %cst_67 = arith.constant dense<0.000000e+00> : vector<16x192xf32>
    %169 = tpu.matmul %168, %166, %cst_67 {dimension_numbers = #tpu.dot_dimension_numbers<[1], [0], [0], [1], [0, 0, 1, 1], [], []>} : vector<16x6xf32>, vector<6x192xf32>, vector<16x192xf32> -> vector<16x192xf32>
    %170 = arith.mulf %165, %165 : vector<16x192xf32>
    %cst_68 = arith.constant dense<0.000000e+00> : vector<16x6xf32>
    %171 = tpu.matmul %170, %167, %cst_68 {dimension_numbers = #tpu.dot_dimension_numbers<[1], [0], [0], [1], [0, 0, 1, 1], [], []>} : vector<16x192xf32>, vector<192x6xf32>, vector<16x6xf32> -> vector<16x6xf32>
    %cst_69 = arith.constant dense<0.000000e+00> : vector<16x192xf32>
    %172 = tpu.matmul %171, %166, %cst_69 {dimension_numbers = #tpu.dot_dimension_numbers<[1], [0], [0], [1], [0, 0, 1, 1], [], []>} : vector<16x6xf32>, vector<6x192xf32>, vector<16x192xf32> -> vector<16x192xf32>
    %173 = arith.subf %165, %169 : vector<16x192xf32>
    %174 = arith.mulf %169, %169 : vector<16x192xf32>
    %175 = arith.subf %172, %174 : vector<16x192xf32>
    %cst_70 = arith.constant 9.99999974E-6 : f32
    %176 = vector.broadcast %cst_70 : f32 to vector<16x192xf32>
    %177 = arith.addf %175, %176 : vector<16x192xf32>
    %178 = math.rsqrt %177 : vector<16x192xf32>
    %179 = arith.mulf %173, %178 : vector<16x192xf32>
    %c12_71 = arith.constant 12 : index
    %c0_72 = arith.constant 0 : index
    %180 = vector.load %arg7[%c12_71, %c0_72] : memref<14x192xf32, #tpu.memory_space<vmem>>, vector<1x192xf32>
    %181 = vector.broadcast %180 : vector<1x192xf32> to vector<16x192xf32>
    %182 = arith.mulf %179, %181 : vector<16x192xf32>
    %c13 = arith.constant 13 : index
    %c0_73 = arith.constant 0 : index
    %183 = vector.load %arg7[%c13, %c0_73] : memref<14x192xf32, #tpu.memory_space<vmem>>, vector<1x192xf32>
    %184 = vector.broadcast %183 : vector<1x192xf32> to vector<16x192xf32>
    %185 = arith.addf %182, %184 : vector<16x192xf32>
    %cst_74 = arith.constant dense<0.000000e+00> : vector<16x192xf32>
    %186 = tpu.matmul %132, %166, %cst_74 {dimension_numbers = #tpu.dot_dimension_numbers<[1], [0], [0], [1], [0, 0, 1, 1], [], []>} : vector<16x6xf32>, vector<6x192xf32>, vector<16x192xf32> -> vector<16x192xf32>
    %187 = arith.mulf %185, %186 : vector<16x192xf32>
    %c0_75 = arith.constant 0 : index
    %c800 = arith.constant 800 : index
    %188 = vector.load %arg4[%c0_75, %c800] : memref<192x844xf32, #tpu.memory_space<vmem>>, vector<192x32xf32>
    %cst_76 = arith.constant dense<0.000000e+00> : vector<16x32xf32>
    %189 = tpu.matmul %187, %188, %cst_76 {dimension_numbers = #tpu.dot_dimension_numbers<[1], [0], [0], [1], [0, 0, 1, 1], [], []>} : vector<16x192xf32>, vector<192x32xf32>, vector<16x32xf32> -> vector<16x32xf32>
    %190 = tpu.iota {dimensions = array<i32: 1>} : vector<8x67xi32>
    %c0_77 = arith.constant 0 : index
    %c0_78 = arith.constant 0 : index
    %191 = vector.load %arg2[%c0_77, %c0_78] : memref<8x3xi32, #tpu.memory_space<vmem>>, vector<8x3xi32>
    %cst_79 = arith.constant 0.000000e+00 : f32
    %192 = vector.broadcast %cst_79 : f32 to vector<8x67xf32>
    %193 = vector.extract_strided_slice %191 {offsets = [0, 0], sizes = [8, 1], strides = [1, 1]} : vector<8x3xi32> to vector<8x1xi32>
    %c0_i32_80 = arith.constant 0 : i32
    %194 = vector.broadcast %c0_i32_80 : i32 to vector<8x1xi32>
    %195 = arith.addi %194, %193 : vector<8x1xi32>
    %196 = vector.broadcast %195 : vector<8x1xi32> to vector<8x67xi32>
    %197 = arith.cmpi eq, %190, %196 : vector<8x67xi32>
    %cst_81 = arith.constant 1.000000e+00 : f32
    %cst_82 = arith.constant 0.000000e+00 : f32
    %198 = vector.broadcast %cst_81 : f32 to vector<8x67xf32>
    %199 = vector.broadcast %cst_82 : f32 to vector<8x67xf32>
    %200 = arith.select %197, %198, %199 : vector<8x67xi1>, vector<8x67xf32>
    %201 = arith.addf %192, %200 : vector<8x67xf32>
    %202 = vector.extract_strided_slice %191 {offsets = [0, 1], sizes = [8, 1], strides = [1, 1]} : vector<8x3xi32> to vector<8x1xi32>
    %c12_i32 = arith.constant 12 : i32
    %203 = vector.broadcast %c12_i32 : i32 to vector<8x1xi32>
    %204 = arith.addi %203, %202 : vector<8x1xi32>
    %205 = vector.broadcast %204 : vector<8x1xi32> to vector<8x67xi32>
    %206 = arith.cmpi eq, %190, %205 : vector<8x67xi32>
    %cst_83 = arith.constant 1.000000e+00 : f32
    %cst_84 = arith.constant 0.000000e+00 : f32
    %207 = vector.broadcast %cst_83 : f32 to vector<8x67xf32>
    %208 = vector.broadcast %cst_84 : f32 to vector<8x67xf32>
    %209 = arith.select %206, %207, %208 : vector<8x67xi1>, vector<8x67xf32>
    %210 = arith.addf %201, %209 : vector<8x67xf32>
    %211 = vector.extract_strided_slice %191 {offsets = [0, 2], sizes = [8, 1], strides = [1, 1]} : vector<8x3xi32> to vector<8x1xi32>
    %c43_i32 = arith.constant 43 : i32
    %212 = vector.broadcast %c43_i32 : i32 to vector<8x1xi32>
    %213 = arith.addi %212, %211 : vector<8x1xi32>
    %214 = vector.broadcast %213 : vector<8x1xi32> to vector<8x67xi32>
    %215 = arith.cmpi eq, %190, %214 : vector<8x67xi32>
    %cst_85 = arith.constant 1.000000e+00 : f32
    %cst_86 = arith.constant 0.000000e+00 : f32
    %216 = vector.broadcast %cst_85 : f32 to vector<8x67xf32>
    %217 = vector.broadcast %cst_86 : f32 to vector<8x67xf32>
    %218 = arith.select %215, %216, %217 : vector<8x67xi1>, vector<8x67xf32>
    %219 = arith.addf %210, %218 : vector<8x67xf32>
    %c0_87 = arith.constant 0 : index
    %c0_88 = arith.constant 0 : index
    %220 = vector.load %arg8[%c0_87, %c0_88] : memref<67x96xf32, #tpu.memory_space<vmem>>, vector<67x96xf32>
    %cst_89 = arith.constant dense<0.000000e+00> : vector<8x96xf32>
    %221 = tpu.matmul %219, %220, %cst_89 {dimension_numbers = #tpu.dot_dimension_numbers<[1], [0], [0], [1], [0, 0, 1, 1], [], []>} : vector<8x67xf32>, vector<67x96xf32>, vector<8x96xf32> -> vector<8x96xf32>
    %c0_90 = arith.constant 0 : index
    %c0_91 = arith.constant 0 : index
    %222 = vector.load %arg12[%c0_90, %c0_91] : memref<14x96xf32, #tpu.memory_space<vmem>>, vector<1x96xf32>
    %223 = vector.broadcast %222 : vector<1x96xf32> to vector<8x96xf32>
    %224 = arith.addf %221, %223 : vector<8x96xf32>
    %c0_92 = arith.constant 0 : index
    %c384_93 = arith.constant 384 : index
    %225 = vector.load %arg9[%c0_92, %c384_93] : memref<96x454xf32, #tpu.memory_space<vmem>>, vector<96x32xf32>
    %cst_94 = arith.constant dense<0.000000e+00> : vector<8x32xf32>
    %226 = tpu.matmul %224, %225, %cst_94 {dimension_numbers = #tpu.dot_dimension_numbers<[1], [0], [0], [1], [0, 0, 1, 1], [], []>} : vector<8x96xf32>, vector<96x32xf32>, vector<8x32xf32> -> vector<8x32xf32>
    %c1_95 = arith.constant 1 : index
    %c0_96 = arith.constant 0 : index
    %227 = vector.load %arg12[%c1_95, %c0_96] : memref<14x96xf32, #tpu.memory_space<vmem>>, vector<1x32xf32>
    %228 = vector.broadcast %227 : vector<1x32xf32> to vector<8x32xf32>
    %229 = arith.addf %226, %228 : vector<8x32xf32>
    %cst_97 = arith.constant 0.000000e+00 : f32
    %230 = vector.broadcast %cst_97 : f32 to vector<8x32xf32>
    %231 = arith.cmpf ogt, %229, %230 : vector<8x32xf32>
    %232 = math.exp %229 : vector<8x32xf32>
    %cst_98 = arith.constant 1.000000e+00 : f32
    %233 = vector.broadcast %cst_98 : f32 to vector<8x32xf32>
    %234 = arith.subf %232, %233 : vector<8x32xf32>
    %235 = arith.select %231, %229, %234 : vector<8x32xi1>, vector<8x32xf32>
    %c0_99 = arith.constant 0 : index
    %c0_100 = arith.constant 0 : index
    %236 = vector.load %arg10[%c0_99, %c0_100] : memref<32x3xf32, #tpu.memory_space<vmem>>, vector<32x3xf32>
    %cst_101 = arith.constant dense<0.000000e+00> : vector<8x3xf32>
    %237 = tpu.matmul %235, %236, %cst_101 {dimension_numbers = #tpu.dot_dimension_numbers<[1], [0], [0], [1], [0, 0, 1, 1], [], []>} : vector<8x32xf32>, vector<32x3xf32>, vector<8x3xf32> -> vector<8x3xf32>
    %c2_102 = arith.constant 2 : index
    %c0_103 = arith.constant 0 : index
    %238 = vector.load %arg12[%c2_102, %c0_103] : memref<14x96xf32, #tpu.memory_space<vmem>>, vector<1x3xf32>
    %239 = vector.broadcast %238 : vector<1x3xf32> to vector<8x3xf32>
    %240 = arith.addf %237, %239 : vector<8x3xf32>
    %c0_104 = arith.constant 0 : index
    %c0_105 = arith.constant 0 : index
    %241 = vector.load %arg11[%c0_104, %c0_105] : memref<3x102xf32, #tpu.memory_space<vmem>>, vector<3x3xf32>
    %cst_106 = arith.constant dense<0.000000e+00> : vector<8x3xf32>
    %242 = tpu.matmul %240, %241, %cst_106 {dimension_numbers = #tpu.dot_dimension_numbers<[1], [0], [0], [1], [0, 0, 1, 1], [], []>} : vector<8x3xf32>, vector<3x3xf32>, vector<8x3xf32> -> vector<8x3xf32>
    %c3_107 = arith.constant 3 : index
    %c0_108 = arith.constant 0 : index
    %243 = vector.load %arg12[%c3_107, %c0_108] : memref<14x96xf32, #tpu.memory_space<vmem>>, vector<1x3xf32>
    %244 = vector.broadcast %243 : vector<1x3xf32> to vector<8x3xf32>
    %245 = arith.addf %242, %244 : vector<8x3xf32>
    %246 = arith.negf %245 : vector<8x3xf32>
    %247 = math.exp %246 : vector<8x3xf32>
    %cst_109 = arith.constant 1.000000e+00 : f32
    %248 = vector.broadcast %cst_109 : f32 to vector<8x3xf32>
    %249 = arith.addf %248, %247 : vector<8x3xf32>
    %250 = arith.divf %248, %249 : vector<8x3xf32>
    %c0_110 = arith.constant 0 : index
    %c3_111 = arith.constant 3 : index
    %251 = vector.load %arg11[%c0_110, %c3_111] : memref<3x102xf32, #tpu.memory_space<vmem>>, vector<3x3xf32>
    %cst_112 = arith.constant dense<0.000000e+00> : vector<8x3xf32>
    %252 = tpu.matmul %240, %251, %cst_112 {dimension_numbers = #tpu.dot_dimension_numbers<[1], [0], [0], [1], [0, 0, 1, 1], [], []>} : vector<8x3xf32>, vector<3x3xf32>, vector<8x3xf32> -> vector<8x3xf32>
    %c4_113 = arith.constant 4 : index
    %c0_114 = arith.constant 0 : index
    %253 = vector.load %arg12[%c4_113, %c0_114] : memref<14x96xf32, #tpu.memory_space<vmem>>, vector<1x3xf32>
    %254 = vector.broadcast %253 : vector<1x3xf32> to vector<8x3xf32>
    %255 = arith.addf %252, %254 : vector<8x3xf32>
    %c0_115 = arith.constant 0 : index
    %c448 = arith.constant 448 : index
    %256 = vector.load %arg9[%c0_115, %c448] : memref<96x454xf32, #tpu.memory_space<vmem>>, vector<96x3xf32>
    %cst_116 = arith.constant dense<0.000000e+00> : vector<8x3xf32>
    %257 = tpu.matmul %224, %256, %cst_116 {dimension_numbers = #tpu.dot_dimension_numbers<[1], [0], [0], [1], [0, 0, 1, 1], [], []>} : vector<8x96xf32>, vector<96x3xf32>, vector<8x3xf32> -> vector<8x3xf32>
    %c5_117 = arith.constant 5 : index
    %c0_118 = arith.constant 0 : index
    %258 = vector.load %arg12[%c5_117, %c0_118] : memref<14x96xf32, #tpu.memory_space<vmem>>, vector<1x3xf32>
    %259 = vector.broadcast %258 : vector<1x3xf32> to vector<8x3xf32>
    %260 = arith.addf %257, %259 : vector<8x3xf32>
    %261 = arith.mulf %250, %255 : vector<8x3xf32>
    %262 = arith.addf %260, %261 : vector<8x3xf32>
    %c6_119 = arith.constant 6 : index
    %c0_120 = arith.constant 0 : index
    %263 = vector.load %arg12[%c6_119, %c0_120] : memref<14x96xf32, #tpu.memory_space<vmem>>, vector<1x3xf32>
    %c7_121 = arith.constant 7 : index
    %c0_122 = arith.constant 0 : index
    %264 = vector.load %arg12[%c7_121, %c0_122] : memref<14x96xf32, #tpu.memory_space<vmem>>, vector<1x3xf32>
    %cst_123 = arith.constant dense<0.000000e+00> : vector<8xf32>
    %265 = vector.multi_reduction <add>, %262, %cst_123 [1] : vector<8x3xf32> to vector<8xf32>
    %266 = vector.shape_cast %265 : vector<8xf32> to vector<8x1xf32>
    %cst_124 = arith.constant 3.000000e+00 : f32
    %267 = vector.broadcast %cst_124 : f32 to vector<8x1xf32>
    %268 = arith.divf %266, %267 : vector<8x1xf32>
    %269 = arith.mulf %262, %262 : vector<8x3xf32>
    %cst_125 = arith.constant dense<0.000000e+00> : vector<8xf32>
    %270 = vector.multi_reduction <add>, %269, %cst_125 [1] : vector<8x3xf32> to vector<8xf32>
    %271 = vector.shape_cast %270 : vector<8xf32> to vector<8x1xf32>
    %cst_126 = arith.constant 3.000000e+00 : f32
    %272 = vector.broadcast %cst_126 : f32 to vector<8x1xf32>
    %273 = arith.divf %271, %272 : vector<8x1xf32>
    %274 = vector.broadcast %268 : vector<8x1xf32> to vector<8x3xf32>
    %275 = arith.subf %262, %274 : vector<8x3xf32>
    %276 = arith.mulf %268, %268 : vector<8x1xf32>
    %277 = arith.subf %273, %276 : vector<8x1xf32>
    %cst_127 = arith.constant 9.99999974E-6 : f32
    %278 = vector.broadcast %cst_127 : f32 to vector<8x1xf32>
    %279 = arith.addf %277, %278 : vector<8x1xf32>
    %280 = math.rsqrt %279 : vector<8x1xf32>
    %281 = vector.broadcast %280 : vector<8x1xf32> to vector<8x3xf32>
    %282 = arith.mulf %275, %281 : vector<8x3xf32>
    %283 = vector.broadcast %263 : vector<1x3xf32> to vector<8x3xf32>
    %284 = arith.mulf %282, %283 : vector<8x3xf32>
    %285 = vector.broadcast %264 : vector<1x3xf32> to vector<8x3xf32>
    %286 = arith.addf %284, %285 : vector<8x3xf32>
    %cst_128 = arith.constant dense<0xFF800000> : vector<8xf32>
    %287 = vector.multi_reduction <maximumf>, %286, %cst_128 [1] : vector<8x3xf32> to vector<8xf32>
    %cst_129 = arith.constant 0xFF800000 : f32
    %288 = vector.broadcast %cst_129 : f32 to vector<8xf32>
    %289 = arith.maximumf %288, %287 : vector<8xf32>
    %290 = vector.shape_cast %289 : vector<8xf32> to vector<8x1xf32>
    %291 = vector.broadcast %290 : vector<8x1xf32> to vector<8x3xf32>
    %292 = arith.subf %286, %291 : vector<8x3xf32>
    %293 = math.exp %292 : vector<8x3xf32>
    %cst_130 = arith.constant dense<0.000000e+00> : vector<8xf32>
    %294 = vector.multi_reduction <add>, %293, %cst_130 [1] : vector<8x3xf32> to vector<8xf32>
    %295 = vector.shape_cast %294 : vector<8xf32> to vector<8x1xf32>
    %296 = vector.broadcast %295 : vector<8x1xf32> to vector<8x3xf32>
    %297 = arith.divf %293, %296 : vector<8x3xf32>
    %c0_131 = arith.constant 0 : index
    %c0_132 = arith.constant 0 : index
    %298 = vector.load %arg9[%c0_131, %c0_132] : memref<96x454xf32, #tpu.memory_space<vmem>>, vector<96x96xf32>
    %cst_133 = arith.constant dense<0.000000e+00> : vector<8x96xf32>
    %299 = tpu.matmul %224, %298, %cst_133 {dimension_numbers = #tpu.dot_dimension_numbers<[1], [0], [0], [1], [0, 0, 1, 1], [], []>} : vector<8x96xf32>, vector<96x96xf32>, vector<8x96xf32> -> vector<8x96xf32>
    %c8_134 = arith.constant 8 : index
    %c0_135 = arith.constant 0 : index
    %300 = vector.load %arg12[%c8_134, %c0_135] : memref<14x96xf32, #tpu.memory_space<vmem>>, vector<1x96xf32>
    %301 = vector.broadcast %300 : vector<1x96xf32> to vector<8x96xf32>
    %302 = arith.addf %299, %301 : vector<8x96xf32>
    %cst_136 = arith.constant 0.000000e+00 : f32
    %303 = vector.broadcast %cst_136 : f32 to vector<8x96xf32>
    %304 = arith.cmpf ogt, %302, %303 : vector<8x96xf32>
    %305 = math.exp %302 : vector<8x96xf32>
    %cst_137 = arith.constant 1.000000e+00 : f32
    %306 = vector.broadcast %cst_137 : f32 to vector<8x96xf32>
    %307 = arith.subf %305, %306 : vector<8x96xf32>
    %308 = arith.select %304, %302, %307 : vector<8x96xi1>, vector<8x96xf32>
    %c0_138 = arith.constant 0 : index
    %c96 = arith.constant 96 : index
    %309 = vector.load %arg9[%c0_138, %c96] : memref<96x454xf32, #tpu.memory_space<vmem>>, vector<96x96xf32>
    %cst_139 = arith.constant dense<0.000000e+00> : vector<8x96xf32>
    %310 = tpu.matmul %308, %309, %cst_139 {dimension_numbers = #tpu.dot_dimension_numbers<[1], [0], [0], [1], [0, 0, 1, 1], [], []>} : vector<8x96xf32>, vector<96x96xf32>, vector<8x96xf32> -> vector<8x96xf32>
    %c9_140 = arith.constant 9 : index
    %c0_141 = arith.constant 0 : index
    %311 = vector.load %arg12[%c9_140, %c0_141] : memref<14x96xf32, #tpu.memory_space<vmem>>, vector<1x96xf32>
    %312 = vector.broadcast %311 : vector<1x96xf32> to vector<8x96xf32>
    %313 = arith.addf %310, %312 : vector<8x96xf32>
    %c0_142 = arith.constant 0 : index
    %c192_143 = arith.constant 192 : index
    %314 = vector.load %arg9[%c0_142, %c192_143] : memref<96x454xf32, #tpu.memory_space<vmem>>, vector<96x96xf32>
    %cst_144 = arith.constant dense<0.000000e+00> : vector<8x96xf32>
    %315 = tpu.matmul %313, %314, %cst_144 {dimension_numbers = #tpu.dot_dimension_numbers<[1], [0], [0], [1], [0, 0, 1, 1], [], []>} : vector<8x96xf32>, vector<96x96xf32>, vector<8x96xf32> -> vector<8x96xf32>
    %c10_145 = arith.constant 10 : index
    %c0_146 = arith.constant 0 : index
    %316 = vector.load %arg12[%c10_145, %c0_146] : memref<14x96xf32, #tpu.memory_space<vmem>>, vector<1x96xf32>
    %317 = vector.broadcast %316 : vector<1x96xf32> to vector<8x96xf32>
    %318 = arith.addf %315, %317 : vector<8x96xf32>
    %319 = arith.negf %318 : vector<8x96xf32>
    %320 = math.exp %319 : vector<8x96xf32>
    %cst_147 = arith.constant 1.000000e+00 : f32
    %321 = vector.broadcast %cst_147 : f32 to vector<8x96xf32>
    %322 = arith.addf %321, %320 : vector<8x96xf32>
    %323 = arith.divf %321, %322 : vector<8x96xf32>
    %c0_148 = arith.constant 0 : index
    %c288 = arith.constant 288 : index
    %324 = vector.load %arg9[%c0_148, %c288] : memref<96x454xf32, #tpu.memory_space<vmem>>, vector<96x96xf32>
    %cst_149 = arith.constant dense<0.000000e+00> : vector<8x96xf32>
    %325 = tpu.matmul %313, %324, %cst_149 {dimension_numbers = #tpu.dot_dimension_numbers<[1], [0], [0], [1], [0, 0, 1, 1], [], []>} : vector<8x96xf32>, vector<96x96xf32>, vector<8x96xf32> -> vector<8x96xf32>
    %c11_150 = arith.constant 11 : index
    %c0_151 = arith.constant 0 : index
    %326 = vector.load %arg12[%c11_150, %c0_151] : memref<14x96xf32, #tpu.memory_space<vmem>>, vector<1x96xf32>
    %327 = vector.broadcast %326 : vector<1x96xf32> to vector<8x96xf32>
    %328 = arith.addf %325, %327 : vector<8x96xf32>
    %329 = arith.mulf %323, %328 : vector<8x96xf32>
    %330 = arith.addf %224, %329 : vector<8x96xf32>
    %c0_152 = arith.constant 0 : index
    %c6_153 = arith.constant 6 : index
    %331 = vector.load %arg11[%c0_152, %c6_153] : memref<3x102xf32, #tpu.memory_space<vmem>>, vector<3x96xf32>
    %c0_154 = arith.constant 0 : index
    %c451 = arith.constant 451 : index
    %332 = vector.load %arg9[%c0_154, %c451] : memref<96x454xf32, #tpu.memory_space<vmem>>, vector<96x3xf32>
    %cst_155 = arith.constant dense<0.000000e+00> : vector<8x3xf32>
    %333 = tpu.matmul %330, %332, %cst_155 {dimension_numbers = #tpu.dot_dimension_numbers<[1], [0], [0], [1], [0, 0, 1, 1], [], []>} : vector<8x96xf32>, vector<96x3xf32>, vector<8x3xf32> -> vector<8x3xf32>
    %cst_156 = arith.constant dense<0.000000e+00> : vector<8x96xf32>
    %334 = tpu.matmul %333, %331, %cst_156 {dimension_numbers = #tpu.dot_dimension_numbers<[1], [0], [0], [1], [0, 0, 1, 1], [], []>} : vector<8x3xf32>, vector<3x96xf32>, vector<8x96xf32> -> vector<8x96xf32>
    %335 = arith.mulf %330, %330 : vector<8x96xf32>
    %cst_157 = arith.constant dense<0.000000e+00> : vector<8x3xf32>
    %336 = tpu.matmul %335, %332, %cst_157 {dimension_numbers = #tpu.dot_dimension_numbers<[1], [0], [0], [1], [0, 0, 1, 1], [], []>} : vector<8x96xf32>, vector<96x3xf32>, vector<8x3xf32> -> vector<8x3xf32>
    %cst_158 = arith.constant dense<0.000000e+00> : vector<8x96xf32>
    %337 = tpu.matmul %336, %331, %cst_158 {dimension_numbers = #tpu.dot_dimension_numbers<[1], [0], [0], [1], [0, 0, 1, 1], [], []>} : vector<8x3xf32>, vector<3x96xf32>, vector<8x96xf32> -> vector<8x96xf32>
    %338 = arith.subf %330, %334 : vector<8x96xf32>
    %339 = arith.mulf %334, %334 : vector<8x96xf32>
    %340 = arith.subf %337, %339 : vector<8x96xf32>
    %cst_159 = arith.constant 9.99999974E-6 : f32
    %341 = vector.broadcast %cst_159 : f32 to vector<8x96xf32>
    %342 = arith.addf %340, %341 : vector<8x96xf32>
    %343 = math.rsqrt %342 : vector<8x96xf32>
    %344 = arith.mulf %338, %343 : vector<8x96xf32>
    %c12_160 = arith.constant 12 : index
    %c0_161 = arith.constant 0 : index
    %345 = vector.load %arg12[%c12_160, %c0_161] : memref<14x96xf32, #tpu.memory_space<vmem>>, vector<1x96xf32>
    %346 = vector.broadcast %345 : vector<1x96xf32> to vector<8x96xf32>
    %347 = arith.mulf %344, %346 : vector<8x96xf32>
    %c13_162 = arith.constant 13 : index
    %c0_163 = arith.constant 0 : index
    %348 = vector.load %arg12[%c13_162, %c0_163] : memref<14x96xf32, #tpu.memory_space<vmem>>, vector<1x96xf32>
    %349 = vector.broadcast %348 : vector<1x96xf32> to vector<8x96xf32>
    %350 = arith.addf %347, %349 : vector<8x96xf32>
    %cst_164 = arith.constant dense<0.000000e+00> : vector<8x96xf32>
    %351 = tpu.matmul %297, %331, %cst_164 {dimension_numbers = #tpu.dot_dimension_numbers<[1], [0], [0], [1], [0, 0, 1, 1], [], []>} : vector<8x3xf32>, vector<3x96xf32>, vector<8x96xf32> -> vector<8x96xf32>
    %352 = arith.mulf %350, %351 : vector<8x96xf32>
    %c0_165 = arith.constant 0 : index
    %c416 = arith.constant 416 : index
    %353 = vector.load %arg9[%c0_165, %c416] : memref<96x454xf32, #tpu.memory_space<vmem>>, vector<96x32xf32>
    %cst_166 = arith.constant dense<0.000000e+00> : vector<8x32xf32>
    %354 = tpu.matmul %352, %353, %cst_166 {dimension_numbers = #tpu.dot_dimension_numbers<[1], [0], [0], [1], [0, 0, 1, 1], [], []>} : vector<8x96xf32>, vector<96x32xf32>, vector<8x32xf32> -> vector<8x32xf32>
    %355 = tpu.concatenate %189, %354 in 0 : vector<16x32xf32>, vector<8x32xf32> -> vector<24x32xf32>
    %c0_167 = arith.constant 0 : index
    %c0_168 = arith.constant 0 : index
    %356 = vector.load %arg13[%c0_167, %c0_168] : memref<32x832xf32, #tpu.memory_space<vmem>>, vector<32x128xf32>
    %cst_169 = arith.constant dense<0.000000e+00> : vector<24x128xf32>
    %357 = tpu.matmul %355, %356, %cst_169 {dimension_numbers = #tpu.dot_dimension_numbers<[1], [0], [0], [1], [0, 0, 1, 1], [], []>} : vector<24x32xf32>, vector<32x128xf32>, vector<24x128xf32> -> vector<24x128xf32>
    %c0_170 = arith.constant 0 : index
    %c0_171 = arith.constant 0 : index
    %358 = vector.load %arg14[%c0_170, %c0_171] : memref<26x128xf32, #tpu.memory_space<vmem>>, vector<1x128xf32>
    %359 = vector.broadcast %358 : vector<1x128xf32> to vector<24x128xf32>
    %360 = arith.addf %357, %359 : vector<24x128xf32>
    %c0_172 = arith.constant 0 : index
    %c128 = arith.constant 128 : index
    %361 = vector.load %arg13[%c0_172, %c128] : memref<32x832xf32, #tpu.memory_space<vmem>>, vector<32x128xf32>
    %cst_173 = arith.constant 0.000000e+00 : f32
    %362 = vector.broadcast %cst_173 : f32 to vector<2x32xf32>
    %cst_174 = arith.constant 0.000000e+00 : f32
    %363 = vector.broadcast %cst_174 : f32 to vector<2x32xf32>
    %364 = vector.extract_strided_slice %360 {offsets = [0, 0], sizes = [2, 128], strides = [1, 1]} : vector<24x128xf32> to vector<2x128xf32>
    %cst_175 = arith.constant dense<0.000000e+00> : vector<2x128xf32>
    %365 = tpu.matmul %362, %361, %cst_175 {dimension_numbers = #tpu.dot_dimension_numbers<[1], [0], [0], [1], [0, 0, 1, 1], [], []>} : vector<2x32xf32>, vector<32x128xf32>, vector<2x128xf32> -> vector<2x128xf32>
    %366 = arith.addf %364, %365 : vector<2x128xf32>
    %367 = vector.extract_strided_slice %366 {offsets = [0, 0], sizes = [2, 96], strides = [1, 1]} : vector<2x128xf32> to vector<2x96xf32>
    %368 = arith.negf %367 : vector<2x96xf32>
    %369 = math.exp %368 : vector<2x96xf32>
    %cst_176 = arith.constant 1.000000e+00 : f32
    %370 = vector.broadcast %cst_176 : f32 to vector<2x96xf32>
    %371 = arith.addf %370, %369 : vector<2x96xf32>
    %372 = arith.divf %370, %371 : vector<2x96xf32>
    %373 = vector.extract_strided_slice %366 {offsets = [0, 96], sizes = [2, 32], strides = [1, 1]} : vector<2x128xf32> to vector<2x32xf32>
    %374 = math.tanh %373 : vector<2x32xf32>
    %375 = vector.extract_strided_slice %372 {offsets = [0, 32], sizes = [2, 32], strides = [1, 1]} : vector<2x96xf32> to vector<2x32xf32>
    %376 = arith.mulf %375, %363 : vector<2x32xf32>
    %377 = vector.extract_strided_slice %372 {offsets = [0, 0], sizes = [2, 32], strides = [1, 1]} : vector<2x96xf32> to vector<2x32xf32>
    %378 = arith.mulf %377, %374 : vector<2x32xf32>
    %379 = arith.addf %376, %378 : vector<2x32xf32>
    %380 = vector.extract_strided_slice %372 {offsets = [0, 64], sizes = [2, 32], strides = [1, 1]} : vector<2x96xf32> to vector<2x32xf32>
    %381 = math.tanh %379 : vector<2x32xf32>
    %382 = arith.mulf %380, %381 : vector<2x32xf32>
    %c0_177 = arith.constant 0 : index
    %c0_178 = arith.constant 0 : index
    %383 = vector.load %arg17[%c0_177, %c0_178] : memref<24x32xf32, #tpu.memory_space<vmem>>, vector<2x32xf32>
    tpu.vector_store %arg17[%c0_177, %c0_178], %382 {strides = array<i32>} : memref<24x32xf32, #tpu.memory_space<vmem>>, vector<2x32xf32>,
    %384 = vector.extract_strided_slice %360 {offsets = [2, 0], sizes = [2, 128], strides = [1, 1]} : vector<24x128xf32> to vector<2x128xf32>
    %cst_179 = arith.constant dense<0.000000e+00> : vector<2x128xf32>
    %385 = tpu.matmul %382, %361, %cst_179 {dimension_numbers = #tpu.dot_dimension_numbers<[1], [0], [0], [1], [0, 0, 1, 1], [], []>} : vector<2x32xf32>, vector<32x128xf32>, vector<2x128xf32> -> vector<2x128xf32>
    %386 = arith.addf %384, %385 : vector<2x128xf32>
    %387 = vector.extract_strided_slice %386 {offsets = [0, 0], sizes = [2, 96], strides = [1, 1]} : vector<2x128xf32> to vector<2x96xf32>
    %388 = arith.negf %387 : vector<2x96xf32>
    %389 = math.exp %388 : vector<2x96xf32>
    %cst_180 = arith.constant 1.000000e+00 : f32
    %390 = vector.broadcast %cst_180 : f32 to vector<2x96xf32>
    %391 = arith.addf %390, %389 : vector<2x96xf32>
    %392 = arith.divf %390, %391 : vector<2x96xf32>
    %393 = vector.extract_strided_slice %386 {offsets = [0, 96], sizes = [2, 32], strides = [1, 1]} : vector<2x128xf32> to vector<2x32xf32>
    %394 = math.tanh %393 : vector<2x32xf32>
    %395 = vector.extract_strided_slice %392 {offsets = [0, 32], sizes = [2, 32], strides = [1, 1]} : vector<2x96xf32> to vector<2x32xf32>
    %396 = arith.mulf %395, %379 : vector<2x32xf32>
    %397 = vector.extract_strided_slice %392 {offsets = [0, 0], sizes = [2, 32], strides = [1, 1]} : vector<2x96xf32> to vector<2x32xf32>
    %398 = arith.mulf %397, %394 : vector<2x32xf32>
    %399 = arith.addf %396, %398 : vector<2x32xf32>
    %400 = vector.extract_strided_slice %392 {offsets = [0, 64], sizes = [2, 32], strides = [1, 1]} : vector<2x96xf32> to vector<2x32xf32>
    %401 = math.tanh %399 : vector<2x32xf32>
    %402 = arith.mulf %400, %401 : vector<2x32xf32>
    %c2_181 = arith.constant 2 : index
    %c0_182 = arith.constant 0 : index
    %403 = vector.load %arg17[%c2_181, %c0_182] : memref<24x32xf32, #tpu.memory_space<vmem>>, vector<2x32xf32>
    tpu.vector_store %arg17[%c2_181, %c0_182], %402 {strides = array<i32>} : memref<24x32xf32, #tpu.memory_space<vmem>>, vector<2x32xf32>,
    %404 = vector.extract_strided_slice %360 {offsets = [4, 0], sizes = [2, 128], strides = [1, 1]} : vector<24x128xf32> to vector<2x128xf32>
    %cst_183 = arith.constant dense<0.000000e+00> : vector<2x128xf32>
    %405 = tpu.matmul %402, %361, %cst_183 {dimension_numbers = #tpu.dot_dimension_numbers<[1], [0], [0], [1], [0, 0, 1, 1], [], []>} : vector<2x32xf32>, vector<32x128xf32>, vector<2x128xf32> -> vector<2x128xf32>
    %406 = arith.addf %404, %405 : vector<2x128xf32>
    %407 = vector.extract_strided_slice %406 {offsets = [0, 0], sizes = [2, 96], strides = [1, 1]} : vector<2x128xf32> to vector<2x96xf32>
    %408 = arith.negf %407 : vector<2x96xf32>
    %409 = math.exp %408 : vector<2x96xf32>
    %cst_184 = arith.constant 1.000000e+00 : f32
    %410 = vector.broadcast %cst_184 : f32 to vector<2x96xf32>
    %411 = arith.addf %410, %409 : vector<2x96xf32>
    %412 = arith.divf %410, %411 : vector<2x96xf32>
    %413 = vector.extract_strided_slice %406 {offsets = [0, 96], sizes = [2, 32], strides = [1, 1]} : vector<2x128xf32> to vector<2x32xf32>
    %414 = math.tanh %413 : vector<2x32xf32>
    %415 = vector.extract_strided_slice %412 {offsets = [0, 32], sizes = [2, 32], strides = [1, 1]} : vector<2x96xf32> to vector<2x32xf32>
    %416 = arith.mulf %415, %399 : vector<2x32xf32>
    %417 = vector.extract_strided_slice %412 {offsets = [0, 0], sizes = [2, 32], strides = [1, 1]} : vector<2x96xf32> to vector<2x32xf32>
    %418 = arith.mulf %417, %414 : vector<2x32xf32>
    %419 = arith.addf %416, %418 : vector<2x32xf32>
    %420 = vector.extract_strided_slice %412 {offsets = [0, 64], sizes = [2, 32], strides = [1, 1]} : vector<2x96xf32> to vector<2x32xf32>
    %421 = math.tanh %419 : vector<2x32xf32>
    %422 = arith.mulf %420, %421 : vector<2x32xf32>
    %c4_185 = arith.constant 4 : index
    %c0_186 = arith.constant 0 : index
    %423 = vector.load %arg17[%c4_185, %c0_186] : memref<24x32xf32, #tpu.memory_space<vmem>>, vector<2x32xf32>
    tpu.vector_store %arg17[%c4_185, %c0_186], %422 {strides = array<i32>} : memref<24x32xf32, #tpu.memory_space<vmem>>, vector<2x32xf32>,
    %424 = vector.extract_strided_slice %360 {offsets = [6, 0], sizes = [2, 128], strides = [1, 1]} : vector<24x128xf32> to vector<2x128xf32>
    %cst_187 = arith.constant dense<0.000000e+00> : vector<2x128xf32>
    %425 = tpu.matmul %422, %361, %cst_187 {dimension_numbers = #tpu.dot_dimension_numbers<[1], [0], [0], [1], [0, 0, 1, 1], [], []>} : vector<2x32xf32>, vector<32x128xf32>, vector<2x128xf32> -> vector<2x128xf32>
    %426 = arith.addf %424, %425 : vector<2x128xf32>
    %427 = vector.extract_strided_slice %426 {offsets = [0, 0], sizes = [2, 96], strides = [1, 1]} : vector<2x128xf32> to vector<2x96xf32>
    %428 = arith.negf %427 : vector<2x96xf32>
    %429 = math.exp %428 : vector<2x96xf32>
    %cst_188 = arith.constant 1.000000e+00 : f32
    %430 = vector.broadcast %cst_188 : f32 to vector<2x96xf32>
    %431 = arith.addf %430, %429 : vector<2x96xf32>
    %432 = arith.divf %430, %431 : vector<2x96xf32>
    %433 = vector.extract_strided_slice %426 {offsets = [0, 96], sizes = [2, 32], strides = [1, 1]} : vector<2x128xf32> to vector<2x32xf32>
    %434 = math.tanh %433 : vector<2x32xf32>
    %435 = vector.extract_strided_slice %432 {offsets = [0, 32], sizes = [2, 32], strides = [1, 1]} : vector<2x96xf32> to vector<2x32xf32>
    %436 = arith.mulf %435, %419 : vector<2x32xf32>
    %437 = vector.extract_strided_slice %432 {offsets = [0, 0], sizes = [2, 32], strides = [1, 1]} : vector<2x96xf32> to vector<2x32xf32>
    %438 = arith.mulf %437, %434 : vector<2x32xf32>
    %439 = arith.addf %436, %438 : vector<2x32xf32>
    %440 = vector.extract_strided_slice %432 {offsets = [0, 64], sizes = [2, 32], strides = [1, 1]} : vector<2x96xf32> to vector<2x32xf32>
    %441 = math.tanh %439 : vector<2x32xf32>
    %442 = arith.mulf %440, %441 : vector<2x32xf32>
    %c6_189 = arith.constant 6 : index
    %c0_190 = arith.constant 0 : index
    %443 = vector.load %arg17[%c6_189, %c0_190] : memref<24x32xf32, #tpu.memory_space<vmem>>, vector<2x32xf32>
    tpu.vector_store %arg17[%c6_189, %c0_190], %442 {strides = array<i32>} : memref<24x32xf32, #tpu.memory_space<vmem>>, vector<2x32xf32>,
    %444 = vector.extract_strided_slice %360 {offsets = [8, 0], sizes = [2, 128], strides = [1, 1]} : vector<24x128xf32> to vector<2x128xf32>
    %cst_191 = arith.constant dense<0.000000e+00> : vector<2x128xf32>
    %445 = tpu.matmul %442, %361, %cst_191 {dimension_numbers = #tpu.dot_dimension_numbers<[1], [0], [0], [1], [0, 0, 1, 1], [], []>} : vector<2x32xf32>, vector<32x128xf32>, vector<2x128xf32> -> vector<2x128xf32>
    %446 = arith.addf %444, %445 : vector<2x128xf32>
    %447 = vector.extract_strided_slice %446 {offsets = [0, 0], sizes = [2, 96], strides = [1, 1]} : vector<2x128xf32> to vector<2x96xf32>
    %448 = arith.negf %447 : vector<2x96xf32>
    %449 = math.exp %448 : vector<2x96xf32>
    %cst_192 = arith.constant 1.000000e+00 : f32
    %450 = vector.broadcast %cst_192 : f32 to vector<2x96xf32>
    %451 = arith.addf %450, %449 : vector<2x96xf32>
    %452 = arith.divf %450, %451 : vector<2x96xf32>
    %453 = vector.extract_strided_slice %446 {offsets = [0, 96], sizes = [2, 32], strides = [1, 1]} : vector<2x128xf32> to vector<2x32xf32>
    %454 = math.tanh %453 : vector<2x32xf32>
    %455 = vector.extract_strided_slice %452 {offsets = [0, 32], sizes = [2, 32], strides = [1, 1]} : vector<2x96xf32> to vector<2x32xf32>
    %456 = arith.mulf %455, %439 : vector<2x32xf32>
    %457 = vector.extract_strided_slice %452 {offsets = [0, 0], sizes = [2, 32], strides = [1, 1]} : vector<2x96xf32> to vector<2x32xf32>
    %458 = arith.mulf %457, %454 : vector<2x32xf32>
    %459 = arith.addf %456, %458 : vector<2x32xf32>
    %460 = vector.extract_strided_slice %452 {offsets = [0, 64], sizes = [2, 32], strides = [1, 1]} : vector<2x96xf32> to vector<2x32xf32>
    %461 = math.tanh %459 : vector<2x32xf32>
    %462 = arith.mulf %460, %461 : vector<2x32xf32>
    %c8_193 = arith.constant 8 : index
    %c0_194 = arith.constant 0 : index
    %463 = vector.load %arg17[%c8_193, %c0_194] : memref<24x32xf32, #tpu.memory_space<vmem>>, vector<2x32xf32>
    tpu.vector_store %arg17[%c8_193, %c0_194], %462 {strides = array<i32>} : memref<24x32xf32, #tpu.memory_space<vmem>>, vector<2x32xf32>,
    %464 = vector.extract_strided_slice %360 {offsets = [10, 0], sizes = [2, 128], strides = [1, 1]} : vector<24x128xf32> to vector<2x128xf32>
    %cst_195 = arith.constant dense<0.000000e+00> : vector<2x128xf32>
    %465 = tpu.matmul %462, %361, %cst_195 {dimension_numbers = #tpu.dot_dimension_numbers<[1], [0], [0], [1], [0, 0, 1, 1], [], []>} : vector<2x32xf32>, vector<32x128xf32>, vector<2x128xf32> -> vector<2x128xf32>
    %466 = arith.addf %464, %465 : vector<2x128xf32>
    %467 = vector.extract_strided_slice %466 {offsets = [0, 0], sizes = [2, 96], strides = [1, 1]} : vector<2x128xf32> to vector<2x96xf32>
    %468 = arith.negf %467 : vector<2x96xf32>
    %469 = math.exp %468 : vector<2x96xf32>
    %cst_196 = arith.constant 1.000000e+00 : f32
    %470 = vector.broadcast %cst_196 : f32 to vector<2x96xf32>
    %471 = arith.addf %470, %469 : vector<2x96xf32>
    %472 = arith.divf %470, %471 : vector<2x96xf32>
    %473 = vector.extract_strided_slice %466 {offsets = [0, 96], sizes = [2, 32], strides = [1, 1]} : vector<2x128xf32> to vector<2x32xf32>
    %474 = math.tanh %473 : vector<2x32xf32>
    %475 = vector.extract_strided_slice %472 {offsets = [0, 32], sizes = [2, 32], strides = [1, 1]} : vector<2x96xf32> to vector<2x32xf32>
    %476 = arith.mulf %475, %459 : vector<2x32xf32>
    %477 = vector.extract_strided_slice %472 {offsets = [0, 0], sizes = [2, 32], strides = [1, 1]} : vector<2x96xf32> to vector<2x32xf32>
    %478 = arith.mulf %477, %474 : vector<2x32xf32>
    %479 = arith.addf %476, %478 : vector<2x32xf32>
    %480 = vector.extract_strided_slice %472 {offsets = [0, 64], sizes = [2, 32], strides = [1, 1]} : vector<2x96xf32> to vector<2x32xf32>
    %481 = math.tanh %479 : vector<2x32xf32>
    %482 = arith.mulf %480, %481 : vector<2x32xf32>
    %c10_197 = arith.constant 10 : index
    %c0_198 = arith.constant 0 : index
    %483 = vector.load %arg17[%c10_197, %c0_198] : memref<24x32xf32, #tpu.memory_space<vmem>>, vector<2x32xf32>
    tpu.vector_store %arg17[%c10_197, %c0_198], %482 {strides = array<i32>} : memref<24x32xf32, #tpu.memory_space<vmem>>, vector<2x32xf32>,
    %484 = vector.extract_strided_slice %360 {offsets = [12, 0], sizes = [2, 128], strides = [1, 1]} : vector<24x128xf32> to vector<2x128xf32>
    %cst_199 = arith.constant dense<0.000000e+00> : vector<2x128xf32>
    %485 = tpu.matmul %482, %361, %cst_199 {dimension_numbers = #tpu.dot_dimension_numbers<[1], [0], [0], [1], [0, 0, 1, 1], [], []>} : vector<2x32xf32>, vector<32x128xf32>, vector<2x128xf32> -> vector<2x128xf32>
    %486 = arith.addf %484, %485 : vector<2x128xf32>
    %487 = vector.extract_strided_slice %486 {offsets = [0, 0], sizes = [2, 96], strides = [1, 1]} : vector<2x128xf32> to vector<2x96xf32>
    %488 = arith.negf %487 : vector<2x96xf32>
    %489 = math.exp %488 : vector<2x96xf32>
    %cst_200 = arith.constant 1.000000e+00 : f32
    %490 = vector.broadcast %cst_200 : f32 to vector<2x96xf32>
    %491 = arith.addf %490, %489 : vector<2x96xf32>
    %492 = arith.divf %490, %491 : vector<2x96xf32>
    %493 = vector.extract_strided_slice %486 {offsets = [0, 96], sizes = [2, 32], strides = [1, 1]} : vector<2x128xf32> to vector<2x32xf32>
    %494 = math.tanh %493 : vector<2x32xf32>
    %495 = vector.extract_strided_slice %492 {offsets = [0, 32], sizes = [2, 32], strides = [1, 1]} : vector<2x96xf32> to vector<2x32xf32>
    %496 = arith.mulf %495, %479 : vector<2x32xf32>
    %497 = vector.extract_strided_slice %492 {offsets = [0, 0], sizes = [2, 32], strides = [1, 1]} : vector<2x96xf32> to vector<2x32xf32>
    %498 = arith.mulf %497, %494 : vector<2x32xf32>
    %499 = arith.addf %496, %498 : vector<2x32xf32>
    %500 = vector.extract_strided_slice %492 {offsets = [0, 64], sizes = [2, 32], strides = [1, 1]} : vector<2x96xf32> to vector<2x32xf32>
    %501 = math.tanh %499 : vector<2x32xf32>
    %502 = arith.mulf %500, %501 : vector<2x32xf32>
    %c12_201 = arith.constant 12 : index
    %c0_202 = arith.constant 0 : index
    %503 = vector.load %arg17[%c12_201, %c0_202] : memref<24x32xf32, #tpu.memory_space<vmem>>, vector<2x32xf32>
    tpu.vector_store %arg17[%c12_201, %c0_202], %502 {strides = array<i32>} : memref<24x32xf32, #tpu.memory_space<vmem>>, vector<2x32xf32>,
    %504 = vector.extract_strided_slice %360 {offsets = [14, 0], sizes = [2, 128], strides = [1, 1]} : vector<24x128xf32> to vector<2x128xf32>
    %cst_203 = arith.constant dense<0.000000e+00> : vector<2x128xf32>
    %505 = tpu.matmul %502, %361, %cst_203 {dimension_numbers = #tpu.dot_dimension_numbers<[1], [0], [0], [1], [0, 0, 1, 1], [], []>} : vector<2x32xf32>, vector<32x128xf32>, vector<2x128xf32> -> vector<2x128xf32>
    %506 = arith.addf %504, %505 : vector<2x128xf32>
    %507 = vector.extract_strided_slice %506 {offsets = [0, 0], sizes = [2, 96], strides = [1, 1]} : vector<2x128xf32> to vector<2x96xf32>
    %508 = arith.negf %507 : vector<2x96xf32>
    %509 = math.exp %508 : vector<2x96xf32>
    %cst_204 = arith.constant 1.000000e+00 : f32
    %510 = vector.broadcast %cst_204 : f32 to vector<2x96xf32>
    %511 = arith.addf %510, %509 : vector<2x96xf32>
    %512 = arith.divf %510, %511 : vector<2x96xf32>
    %513 = vector.extract_strided_slice %506 {offsets = [0, 96], sizes = [2, 32], strides = [1, 1]} : vector<2x128xf32> to vector<2x32xf32>
    %514 = math.tanh %513 : vector<2x32xf32>
    %515 = vector.extract_strided_slice %512 {offsets = [0, 32], sizes = [2, 32], strides = [1, 1]} : vector<2x96xf32> to vector<2x32xf32>
    %516 = arith.mulf %515, %499 : vector<2x32xf32>
    %517 = vector.extract_strided_slice %512 {offsets = [0, 0], sizes = [2, 32], strides = [1, 1]} : vector<2x96xf32> to vector<2x32xf32>
    %518 = arith.mulf %517, %514 : vector<2x32xf32>
    %519 = arith.addf %516, %518 : vector<2x32xf32>
    %520 = vector.extract_strided_slice %512 {offsets = [0, 64], sizes = [2, 32], strides = [1, 1]} : vector<2x96xf32> to vector<2x32xf32>
    %521 = math.tanh %519 : vector<2x32xf32>
    %522 = arith.mulf %520, %521 : vector<2x32xf32>
    %c14 = arith.constant 14 : index
    %c0_205 = arith.constant 0 : index
    %523 = vector.load %arg17[%c14, %c0_205] : memref<24x32xf32, #tpu.memory_space<vmem>>, vector<2x32xf32>
    tpu.vector_store %arg17[%c14, %c0_205], %522 {strides = array<i32>} : memref<24x32xf32, #tpu.memory_space<vmem>>, vector<2x32xf32>,
    %524 = vector.extract_strided_slice %360 {offsets = [16, 0], sizes = [2, 128], strides = [1, 1]} : vector<24x128xf32> to vector<2x128xf32>
    %cst_206 = arith.constant dense<0.000000e+00> : vector<2x128xf32>
    %525 = tpu.matmul %522, %361, %cst_206 {dimension_numbers = #tpu.dot_dimension_numbers<[1], [0], [0], [1], [0, 0, 1, 1], [], []>} : vector<2x32xf32>, vector<32x128xf32>, vector<2x128xf32> -> vector<2x128xf32>
    %526 = arith.addf %524, %525 : vector<2x128xf32>
    %527 = vector.extract_strided_slice %526 {offsets = [0, 0], sizes = [2, 96], strides = [1, 1]} : vector<2x128xf32> to vector<2x96xf32>
    %528 = arith.negf %527 : vector<2x96xf32>
    %529 = math.exp %528 : vector<2x96xf32>
    %cst_207 = arith.constant 1.000000e+00 : f32
    %530 = vector.broadcast %cst_207 : f32 to vector<2x96xf32>
    %531 = arith.addf %530, %529 : vector<2x96xf32>
    %532 = arith.divf %530, %531 : vector<2x96xf32>
    %533 = vector.extract_strided_slice %526 {offsets = [0, 96], sizes = [2, 32], strides = [1, 1]} : vector<2x128xf32> to vector<2x32xf32>
    %534 = math.tanh %533 : vector<2x32xf32>
    %535 = vector.extract_strided_slice %532 {offsets = [0, 32], sizes = [2, 32], strides = [1, 1]} : vector<2x96xf32> to vector<2x32xf32>
    %536 = arith.mulf %535, %519 : vector<2x32xf32>
    %537 = vector.extract_strided_slice %532 {offsets = [0, 0], sizes = [2, 32], strides = [1, 1]} : vector<2x96xf32> to vector<2x32xf32>
    %538 = arith.mulf %537, %534 : vector<2x32xf32>
    %539 = arith.addf %536, %538 : vector<2x32xf32>
    %540 = vector.extract_strided_slice %532 {offsets = [0, 64], sizes = [2, 32], strides = [1, 1]} : vector<2x96xf32> to vector<2x32xf32>
    %541 = math.tanh %539 : vector<2x32xf32>
    %542 = arith.mulf %540, %541 : vector<2x32xf32>
    %c16 = arith.constant 16 : index
    %c0_208 = arith.constant 0 : index
    %543 = vector.load %arg17[%c16, %c0_208] : memref<24x32xf32, #tpu.memory_space<vmem>>, vector<2x32xf32>
    tpu.vector_store %arg17[%c16, %c0_208], %542 {strides = array<i32>} : memref<24x32xf32, #tpu.memory_space<vmem>>, vector<2x32xf32>,
    %544 = vector.extract_strided_slice %360 {offsets = [18, 0], sizes = [2, 128], strides = [1, 1]} : vector<24x128xf32> to vector<2x128xf32>
    %cst_209 = arith.constant dense<0.000000e+00> : vector<2x128xf32>
    %545 = tpu.matmul %542, %361, %cst_209 {dimension_numbers = #tpu.dot_dimension_numbers<[1], [0], [0], [1], [0, 0, 1, 1], [], []>} : vector<2x32xf32>, vector<32x128xf32>, vector<2x128xf32> -> vector<2x128xf32>
    %546 = arith.addf %544, %545 : vector<2x128xf32>
    %547 = vector.extract_strided_slice %546 {offsets = [0, 0], sizes = [2, 96], strides = [1, 1]} : vector<2x128xf32> to vector<2x96xf32>
    %548 = arith.negf %547 : vector<2x96xf32>
    %549 = math.exp %548 : vector<2x96xf32>
    %cst_210 = arith.constant 1.000000e+00 : f32
    %550 = vector.broadcast %cst_210 : f32 to vector<2x96xf32>
    %551 = arith.addf %550, %549 : vector<2x96xf32>
    %552 = arith.divf %550, %551 : vector<2x96xf32>
    %553 = vector.extract_strided_slice %546 {offsets = [0, 96], sizes = [2, 32], strides = [1, 1]} : vector<2x128xf32> to vector<2x32xf32>
    %554 = math.tanh %553 : vector<2x32xf32>
    %555 = vector.extract_strided_slice %552 {offsets = [0, 32], sizes = [2, 32], strides = [1, 1]} : vector<2x96xf32> to vector<2x32xf32>
    %556 = arith.mulf %555, %539 : vector<2x32xf32>
    %557 = vector.extract_strided_slice %552 {offsets = [0, 0], sizes = [2, 32], strides = [1, 1]} : vector<2x96xf32> to vector<2x32xf32>
    %558 = arith.mulf %557, %554 : vector<2x32xf32>
    %559 = arith.addf %556, %558 : vector<2x32xf32>
    %560 = vector.extract_strided_slice %552 {offsets = [0, 64], sizes = [2, 32], strides = [1, 1]} : vector<2x96xf32> to vector<2x32xf32>
    %561 = math.tanh %559 : vector<2x32xf32>
    %562 = arith.mulf %560, %561 : vector<2x32xf32>
    %c18 = arith.constant 18 : index
    %c0_211 = arith.constant 0 : index
    %563 = vector.load %arg17[%c18, %c0_211] : memref<24x32xf32, #tpu.memory_space<vmem>>, vector<2x32xf32>
    tpu.vector_store %arg17[%c18, %c0_211], %562 {strides = array<i32>} : memref<24x32xf32, #tpu.memory_space<vmem>>, vector<2x32xf32>,
    %564 = vector.extract_strided_slice %360 {offsets = [20, 0], sizes = [2, 128], strides = [1, 1]} : vector<24x128xf32> to vector<2x128xf32>
    %cst_212 = arith.constant dense<0.000000e+00> : vector<2x128xf32>
    %565 = tpu.matmul %562, %361, %cst_212 {dimension_numbers = #tpu.dot_dimension_numbers<[1], [0], [0], [1], [0, 0, 1, 1], [], []>} : vector<2x32xf32>, vector<32x128xf32>, vector<2x128xf32> -> vector<2x128xf32>
    %566 = arith.addf %564, %565 : vector<2x128xf32>
    %567 = vector.extract_strided_slice %566 {offsets = [0, 0], sizes = [2, 96], strides = [1, 1]} : vector<2x128xf32> to vector<2x96xf32>
    %568 = arith.negf %567 : vector<2x96xf32>
    %569 = math.exp %568 : vector<2x96xf32>
    %cst_213 = arith.constant 1.000000e+00 : f32
    %570 = vector.broadcast %cst_213 : f32 to vector<2x96xf32>
    %571 = arith.addf %570, %569 : vector<2x96xf32>
    %572 = arith.divf %570, %571 : vector<2x96xf32>
    %573 = vector.extract_strided_slice %566 {offsets = [0, 96], sizes = [2, 32], strides = [1, 1]} : vector<2x128xf32> to vector<2x32xf32>
    %574 = math.tanh %573 : vector<2x32xf32>
    %575 = vector.extract_strided_slice %572 {offsets = [0, 32], sizes = [2, 32], strides = [1, 1]} : vector<2x96xf32> to vector<2x32xf32>
    %576 = arith.mulf %575, %559 : vector<2x32xf32>
    %577 = vector.extract_strided_slice %572 {offsets = [0, 0], sizes = [2, 32], strides = [1, 1]} : vector<2x96xf32> to vector<2x32xf32>
    %578 = arith.mulf %577, %574 : vector<2x32xf32>
    %579 = arith.addf %576, %578 : vector<2x32xf32>
    %580 = vector.extract_strided_slice %572 {offsets = [0, 64], sizes = [2, 32], strides = [1, 1]} : vector<2x96xf32> to vector<2x32xf32>
    %581 = math.tanh %579 : vector<2x32xf32>
    %582 = arith.mulf %580, %581 : vector<2x32xf32>
    %c20 = arith.constant 20 : index
    %c0_214 = arith.constant 0 : index
    %583 = vector.load %arg17[%c20, %c0_214] : memref<24x32xf32, #tpu.memory_space<vmem>>, vector<2x32xf32>
    tpu.vector_store %arg17[%c20, %c0_214], %582 {strides = array<i32>} : memref<24x32xf32, #tpu.memory_space<vmem>>, vector<2x32xf32>,
    %584 = vector.extract_strided_slice %360 {offsets = [22, 0], sizes = [2, 128], strides = [1, 1]} : vector<24x128xf32> to vector<2x128xf32>
    %cst_215 = arith.constant dense<0.000000e+00> : vector<2x128xf32>
    %585 = tpu.matmul %582, %361, %cst_215 {dimension_numbers = #tpu.dot_dimension_numbers<[1], [0], [0], [1], [0, 0, 1, 1], [], []>} : vector<2x32xf32>, vector<32x128xf32>, vector<2x128xf32> -> vector<2x128xf32>
    %586 = arith.addf %584, %585 : vector<2x128xf32>
    %587 = vector.extract_strided_slice %586 {offsets = [0, 0], sizes = [2, 96], strides = [1, 1]} : vector<2x128xf32> to vector<2x96xf32>
    %588 = arith.negf %587 : vector<2x96xf32>
    %589 = math.exp %588 : vector<2x96xf32>
    %cst_216 = arith.constant 1.000000e+00 : f32
    %590 = vector.broadcast %cst_216 : f32 to vector<2x96xf32>
    %591 = arith.addf %590, %589 : vector<2x96xf32>
    %592 = arith.divf %590, %591 : vector<2x96xf32>
    %593 = vector.extract_strided_slice %586 {offsets = [0, 96], sizes = [2, 32], strides = [1, 1]} : vector<2x128xf32> to vector<2x32xf32>
    %594 = math.tanh %593 : vector<2x32xf32>
    %595 = vector.extract_strided_slice %592 {offsets = [0, 32], sizes = [2, 32], strides = [1, 1]} : vector<2x96xf32> to vector<2x32xf32>
    %596 = arith.mulf %595, %579 : vector<2x32xf32>
    %597 = vector.extract_strided_slice %592 {offsets = [0, 0], sizes = [2, 32], strides = [1, 1]} : vector<2x96xf32> to vector<2x32xf32>
    %598 = arith.mulf %597, %594 : vector<2x32xf32>
    %599 = arith.addf %596, %598 : vector<2x32xf32>
    %600 = vector.extract_strided_slice %592 {offsets = [0, 64], sizes = [2, 32], strides = [1, 1]} : vector<2x96xf32> to vector<2x32xf32>
    %601 = math.tanh %599 : vector<2x32xf32>
    %602 = arith.mulf %600, %601 : vector<2x32xf32>
    %c22 = arith.constant 22 : index
    %c0_217 = arith.constant 0 : index
    %603 = vector.load %arg17[%c22, %c0_217] : memref<24x32xf32, #tpu.memory_space<vmem>>, vector<2x32xf32>
    tpu.vector_store %arg17[%c22, %c0_217], %602 {strides = array<i32>} : memref<24x32xf32, #tpu.memory_space<vmem>>, vector<2x32xf32>,
    %c0_218 = arith.constant 0 : index
    %c0_219 = arith.constant 0 : index
    %604 = vector.load %arg17[%c0_218, %c0_219] : memref<24x32xf32, #tpu.memory_space<vmem>>, vector<24x32xf32>
    %c0_220 = arith.constant 0 : index
    %c256 = arith.constant 256 : index
    %605 = vector.load %arg13[%c0_220, %c256] : memref<32x832xf32, #tpu.memory_space<vmem>>, vector<32x32xf32>
    %cst_221 = arith.constant dense<0.000000e+00> : vector<24x32xf32>
    %606 = tpu.matmul %604, %605, %cst_221 {dimension_numbers = #tpu.dot_dimension_numbers<[1], [0], [0], [1], [0, 0, 1, 1], [], []>} : vector<24x32xf32>, vector<32x32xf32>, vector<24x32xf32> -> vector<24x32xf32>
    %c1_222 = arith.constant 1 : index
    %c0_223 = arith.constant 0 : index
    %607 = vector.load %arg14[%c1_222, %c0_223] : memref<26x128xf32, #tpu.memory_space<vmem>>, vector<1x32xf32>
    %608 = vector.broadcast %607 : vector<1x32xf32> to vector<24x32xf32>
    %609 = arith.addf %606, %608 : vector<24x32xf32>
    %610 = arith.negf %609 : vector<24x32xf32>
    %611 = math.exp %610 : vector<24x32xf32>
    %cst_224 = arith.constant 1.000000e+00 : f32
    %612 = vector.broadcast %cst_224 : f32 to vector<24x32xf32>
    %613 = arith.addf %612, %611 : vector<24x32xf32>
    %614 = arith.divf %612, %613 : vector<24x32xf32>
    %c0_225 = arith.constant 0 : index
    %c288_226 = arith.constant 288 : index
    %615 = vector.load %arg13[%c0_225, %c288_226] : memref<32x832xf32, #tpu.memory_space<vmem>>, vector<32x32xf32>
    %cst_227 = arith.constant dense<0.000000e+00> : vector<24x32xf32>
    %616 = tpu.matmul %604, %615, %cst_227 {dimension_numbers = #tpu.dot_dimension_numbers<[1], [0], [0], [1], [0, 0, 1, 1], [], []>} : vector<24x32xf32>, vector<32x32xf32>, vector<24x32xf32> -> vector<24x32xf32>
    %c2_228 = arith.constant 2 : index
    %c0_229 = arith.constant 0 : index
    %617 = vector.load %arg14[%c2_228, %c0_229] : memref<26x128xf32, #tpu.memory_space<vmem>>, vector<1x32xf32>
    %618 = vector.broadcast %617 : vector<1x32xf32> to vector<24x32xf32>
    %619 = arith.addf %616, %618 : vector<24x32xf32>
    %620 = arith.mulf %614, %619 : vector<24x32xf32>
    %621 = arith.addf %355, %620 : vector<24x32xf32>
    %c3_230 = arith.constant 3 : index
    %c0_231 = arith.constant 0 : index
    %622 = vector.load %arg14[%c3_230, %c0_231] : memref<26x128xf32, #tpu.memory_space<vmem>>, vector<1x32xf32>
    %c4_232 = arith.constant 4 : index
    %c0_233 = arith.constant 0 : index
    %623 = vector.load %arg14[%c4_232, %c0_233] : memref<26x128xf32, #tpu.memory_space<vmem>>, vector<1x32xf32>
    %cst_234 = arith.constant dense<0.000000e+00> : vector<24xf32>
    %624 = vector.multi_reduction <add>, %621, %cst_234 [1] : vector<24x32xf32> to vector<24xf32>
    %625 = vector.shape_cast %624 : vector<24xf32> to vector<24x1xf32>
    %cst_235 = arith.constant 3.200000e+01 : f32
    %626 = vector.broadcast %cst_235 : f32 to vector<24x1xf32>
    %627 = arith.divf %625, %626 : vector<24x1xf32>
    %628 = arith.mulf %621, %621 : vector<24x32xf32>
    %cst_236 = arith.constant dense<0.000000e+00> : vector<24xf32>
    %629 = vector.multi_reduction <add>, %628, %cst_236 [1] : vector<24x32xf32> to vector<24xf32>
    %630 = vector.shape_cast %629 : vector<24xf32> to vector<24x1xf32>
    %cst_237 = arith.constant 3.200000e+01 : f32
    %631 = vector.broadcast %cst_237 : f32 to vector<24x1xf32>
    %632 = arith.divf %630, %631 : vector<24x1xf32>
    %633 = vector.broadcast %627 : vector<24x1xf32> to vector<24x32xf32>
    %634 = arith.subf %621, %633 : vector<24x32xf32>
    %635 = arith.mulf %627, %627 : vector<24x1xf32>
    %636 = arith.subf %632, %635 : vector<24x1xf32>
    %cst_238 = arith.constant 9.99999974E-6 : f32
    %637 = vector.broadcast %cst_238 : f32 to vector<24x1xf32>
    %638 = arith.addf %636, %637 : vector<24x1xf32>
    %639 = math.rsqrt %638 : vector<24x1xf32>
    %640 = vector.broadcast %639 : vector<24x1xf32> to vector<24x32xf32>
    %641 = arith.mulf %634, %640 : vector<24x32xf32>
    %642 = vector.broadcast %622 : vector<1x32xf32> to vector<24x32xf32>
    %643 = arith.mulf %641, %642 : vector<24x32xf32>
    %644 = vector.broadcast %623 : vector<1x32xf32> to vector<24x32xf32>
    %645 = arith.addf %643, %644 : vector<24x32xf32>
    %c0_239 = arith.constant 0 : index
    %c320 = arith.constant 320 : index
    %646 = vector.load %arg13[%c0_239, %c320] : memref<32x832xf32, #tpu.memory_space<vmem>>, vector<32x32xf32>
    %cst_240 = arith.constant dense<0.000000e+00> : vector<24x32xf32>
    %647 = tpu.matmul %645, %646, %cst_240 {dimension_numbers = #tpu.dot_dimension_numbers<[1], [0], [0], [1], [0, 0, 1, 1], [], []>} : vector<24x32xf32>, vector<32x32xf32>, vector<24x32xf32> -> vector<24x32xf32>
    %c5_241 = arith.constant 5 : index
    %c0_242 = arith.constant 0 : index
    %648 = vector.load %arg14[%c5_241, %c0_242] : memref<26x128xf32, #tpu.memory_space<vmem>>, vector<1x32xf32>
    %649 = vector.broadcast %648 : vector<1x32xf32> to vector<24x32xf32>
    %650 = arith.addf %647, %649 : vector<24x32xf32>
    %cst_243 = arith.constant 0.000000e+00 : f32
    %651 = vector.broadcast %cst_243 : f32 to vector<24x32xf32>
    %652 = arith.cmpf ogt, %650, %651 : vector<24x32xf32>
    %653 = math.exp %650 : vector<24x32xf32>
    %cst_244 = arith.constant 1.000000e+00 : f32
    %654 = vector.broadcast %cst_244 : f32 to vector<24x32xf32>
    %655 = arith.subf %653, %654 : vector<24x32xf32>
    %656 = arith.select %652, %650, %655 : vector<24x32xi1>, vector<24x32xf32>
    %c0_245 = arith.constant 0 : index
    %c352 = arith.constant 352 : index
    %657 = vector.load %arg13[%c0_245, %c352] : memref<32x832xf32, #tpu.memory_space<vmem>>, vector<32x32xf32>
    %cst_246 = arith.constant dense<0.000000e+00> : vector<24x32xf32>
    %658 = tpu.matmul %656, %657, %cst_246 {dimension_numbers = #tpu.dot_dimension_numbers<[1], [0], [0], [1], [0, 0, 1, 1], [], []>} : vector<24x32xf32>, vector<32x32xf32>, vector<24x32xf32> -> vector<24x32xf32>
    %c6_247 = arith.constant 6 : index
    %c0_248 = arith.constant 0 : index
    %659 = vector.load %arg14[%c6_247, %c0_248] : memref<26x128xf32, #tpu.memory_space<vmem>>, vector<1x32xf32>
    %660 = vector.broadcast %659 : vector<1x32xf32> to vector<24x32xf32>
    %661 = arith.addf %658, %660 : vector<24x32xf32>
    %c0_249 = arith.constant 0 : index
    %c384_250 = arith.constant 384 : index
    %662 = vector.load %arg13[%c0_249, %c384_250] : memref<32x832xf32, #tpu.memory_space<vmem>>, vector<32x32xf32>
    %cst_251 = arith.constant dense<0.000000e+00> : vector<24x32xf32>
    %663 = tpu.matmul %661, %662, %cst_251 {dimension_numbers = #tpu.dot_dimension_numbers<[1], [0], [0], [1], [0, 0, 1, 1], [], []>} : vector<24x32xf32>, vector<32x32xf32>, vector<24x32xf32> -> vector<24x32xf32>
    %c7_252 = arith.constant 7 : index
    %c0_253 = arith.constant 0 : index
    %664 = vector.load %arg14[%c7_252, %c0_253] : memref<26x128xf32, #tpu.memory_space<vmem>>, vector<1x32xf32>
    %665 = vector.broadcast %664 : vector<1x32xf32> to vector<24x32xf32>
    %666 = arith.addf %663, %665 : vector<24x32xf32>
    %667 = arith.negf %666 : vector<24x32xf32>
    %668 = math.exp %667 : vector<24x32xf32>
    %cst_254 = arith.constant 1.000000e+00 : f32
    %669 = vector.broadcast %cst_254 : f32 to vector<24x32xf32>
    %670 = arith.addf %669, %668 : vector<24x32xf32>
    %671 = arith.divf %669, %670 : vector<24x32xf32>
    %c0_255 = arith.constant 0 : index
    %c416_256 = arith.constant 416 : index
    %672 = vector.load %arg13[%c0_255, %c416_256] : memref<32x832xf32, #tpu.memory_space<vmem>>, vector<32x32xf32>
    %cst_257 = arith.constant dense<0.000000e+00> : vector<24x32xf32>
    %673 = tpu.matmul %661, %672, %cst_257 {dimension_numbers = #tpu.dot_dimension_numbers<[1], [0], [0], [1], [0, 0, 1, 1], [], []>} : vector<24x32xf32>, vector<32x32xf32>, vector<24x32xf32> -> vector<24x32xf32>
    %c8_258 = arith.constant 8 : index
    %c0_259 = arith.constant 0 : index
    %674 = vector.load %arg14[%c8_258, %c0_259] : memref<26x128xf32, #tpu.memory_space<vmem>>, vector<1x32xf32>
    %675 = vector.broadcast %674 : vector<1x32xf32> to vector<24x32xf32>
    %676 = arith.addf %673, %675 : vector<24x32xf32>
    %677 = arith.mulf %671, %676 : vector<24x32xf32>
    %678 = arith.addf %645, %677 : vector<24x32xf32>
    %c9_260 = arith.constant 9 : index
    %c0_261 = arith.constant 0 : index
    %679 = vector.load %arg14[%c9_260, %c0_261] : memref<26x128xf32, #tpu.memory_space<vmem>>, vector<1x32xf32>
    %c10_262 = arith.constant 10 : index
    %c0_263 = arith.constant 0 : index
    %680 = vector.load %arg14[%c10_262, %c0_263] : memref<26x128xf32, #tpu.memory_space<vmem>>, vector<1x32xf32>
    %cst_264 = arith.constant dense<0.000000e+00> : vector<24xf32>
    %681 = vector.multi_reduction <add>, %678, %cst_264 [1] : vector<24x32xf32> to vector<24xf32>
    %682 = vector.shape_cast %681 : vector<24xf32> to vector<24x1xf32>
    %cst_265 = arith.constant 3.200000e+01 : f32
    %683 = vector.broadcast %cst_265 : f32 to vector<24x1xf32>
    %684 = arith.divf %682, %683 : vector<24x1xf32>
    %685 = arith.mulf %678, %678 : vector<24x32xf32>
    %cst_266 = arith.constant dense<0.000000e+00> : vector<24xf32>
    %686 = vector.multi_reduction <add>, %685, %cst_266 [1] : vector<24x32xf32> to vector<24xf32>
    %687 = vector.shape_cast %686 : vector<24xf32> to vector<24x1xf32>
    %cst_267 = arith.constant 3.200000e+01 : f32
    %688 = vector.broadcast %cst_267 : f32 to vector<24x1xf32>
    %689 = arith.divf %687, %688 : vector<24x1xf32>
    %690 = vector.broadcast %684 : vector<24x1xf32> to vector<24x32xf32>
    %691 = arith.subf %678, %690 : vector<24x32xf32>
    %692 = arith.mulf %684, %684 : vector<24x1xf32>
    %693 = arith.subf %689, %692 : vector<24x1xf32>
    %cst_268 = arith.constant 9.99999974E-6 : f32
    %694 = vector.broadcast %cst_268 : f32 to vector<24x1xf32>
    %695 = arith.addf %693, %694 : vector<24x1xf32>
    %696 = math.rsqrt %695 : vector<24x1xf32>
    %697 = vector.broadcast %696 : vector<24x1xf32> to vector<24x32xf32>
    %698 = arith.mulf %691, %697 : vector<24x32xf32>
    %699 = vector.broadcast %679 : vector<1x32xf32> to vector<24x32xf32>
    %700 = arith.mulf %698, %699 : vector<24x32xf32>
    %701 = vector.broadcast %680 : vector<1x32xf32> to vector<24x32xf32>
    %702 = arith.addf %700, %701 : vector<24x32xf32>
    %c0_269 = arith.constant 0 : index
    %c448_270 = arith.constant 448 : index
    %703 = vector.load %arg13[%c0_269, %c448_270] : memref<32x832xf32, #tpu.memory_space<vmem>>, vector<32x32xf32>
    %cst_271 = arith.constant dense<0.000000e+00> : vector<24x32xf32>
    %704 = tpu.matmul %702, %703, %cst_271 {dimension_numbers = #tpu.dot_dimension_numbers<[1], [0], [0], [1], [0, 0, 1, 1], [], []>} : vector<24x32xf32>, vector<32x32xf32>, vector<24x32xf32> -> vector<24x32xf32>
    %c0_272 = arith.constant 0 : index
    %c480 = arith.constant 480 : index
    %705 = vector.load %arg13[%c0_272, %c480] : memref<32x832xf32, #tpu.memory_space<vmem>>, vector<32x32xf32>
    %cst_273 = arith.constant dense<0.000000e+00> : vector<24x32xf32>
    %706 = tpu.matmul %702, %705, %cst_273 {dimension_numbers = #tpu.dot_dimension_numbers<[1], [0], [0], [1], [0, 0, 1, 1], [], []>} : vector<24x32xf32>, vector<32x32xf32>, vector<24x32xf32> -> vector<24x32xf32>
    %c0_274 = arith.constant 0 : index
    %c512 = arith.constant 512 : index
    %707 = vector.load %arg13[%c0_274, %c512] : memref<32x832xf32, #tpu.memory_space<vmem>>, vector<32x32xf32>
    %cst_275 = arith.constant dense<0.000000e+00> : vector<24x32xf32>
    %708 = tpu.matmul %702, %707, %cst_275 {dimension_numbers = #tpu.dot_dimension_numbers<[1], [0], [0], [1], [0, 0, 1, 1], [], []>} : vector<24x32xf32>, vector<32x32xf32>, vector<24x32xf32> -> vector<24x32xf32>
    %c0_276 = arith.constant 0 : index
    %c0_277 = arith.constant 0 : index
    %709 = vector.load %arg15[%c0_276, %c0_277] : memref<24x24xf32, #tpu.memory_space<vmem>>, vector<24x24xf32>
    %cst_278 = arith.constant 0.000000e+00 : f32
    %710 = vector.broadcast %cst_278 : f32 to vector<24x24xf32>
    %711 = vector.extract_strided_slice %704 {offsets = [0, 0], sizes = [24, 8], strides = [1, 1]} : vector<24x32xf32> to vector<24x8xf32>
    %712 = vector.extract_strided_slice %706 {offsets = [0, 0], sizes = [24, 8], strides = [1, 1]} : vector<24x32xf32> to vector<24x8xf32>
    %cst_279 = arith.constant dense<0.000000e+00> : vector<24x24xf32>
    %713 = tpu.matmul %711, %712, %cst_279 {dimension_numbers = #tpu.dot_dimension_numbers<[1], [1], [0], [0], [0, 0, 1, 0], [], []>} : vector<24x8xf32>, vector<24x8xf32>, vector<24x24xf32> -> vector<24x24xf32>
    %cst_280 = arith.constant 0.353553385 : f32
    %714 = vector.broadcast %cst_280 : f32 to vector<24x24xf32>
    %715 = arith.mulf %713, %714 : vector<24x24xf32>
    %716 = arith.addf %715, %709 : vector<24x24xf32>
    %cst_281 = arith.constant dense<0xFF800000> : vector<24xf32>
    %717 = vector.multi_reduction <maximumf>, %716, %cst_281 [1] : vector<24x24xf32> to vector<24xf32>
    %cst_282 = arith.constant 0xFF800000 : f32
    %718 = vector.broadcast %cst_282 : f32 to vector<24xf32>
    %719 = arith.maximumf %718, %717 : vector<24xf32>
    %720 = vector.shape_cast %719 : vector<24xf32> to vector<24x1xf32>
    %721 = vector.broadcast %720 : vector<24x1xf32> to vector<24x24xf32>
    %722 = arith.subf %716, %721 : vector<24x24xf32>
    %723 = math.exp %722 : vector<24x24xf32>
    %cst_283 = arith.constant dense<0.000000e+00> : vector<24xf32>
    %724 = vector.multi_reduction <add>, %723, %cst_283 [1] : vector<24x24xf32> to vector<24xf32>
    %725 = vector.shape_cast %724 : vector<24xf32> to vector<24x1xf32>
    %726 = vector.broadcast %725 : vector<24x1xf32> to vector<24x24xf32>
    %727 = arith.divf %723, %726 : vector<24x24xf32>
    %728 = arith.addf %710, %727 : vector<24x24xf32>
    %729 = vector.extract_strided_slice %704 {offsets = [0, 8], sizes = [24, 8], strides = [1, 1]} : vector<24x32xf32> to vector<24x8xf32>
    %730 = vector.extract_strided_slice %706 {offsets = [0, 8], sizes = [24, 8], strides = [1, 1]} : vector<24x32xf32> to vector<24x8xf32>
    %cst_284 = arith.constant dense<0.000000e+00> : vector<24x24xf32>
    %731 = tpu.matmul %729, %730, %cst_284 {dimension_numbers = #tpu.dot_dimension_numbers<[1], [1], [0], [0], [0, 0, 1, 0], [], []>} : vector<24x8xf32>, vector<24x8xf32>, vector<24x24xf32> -> vector<24x24xf32>
    %cst_285 = arith.constant 0.353553385 : f32
    %732 = vector.broadcast %cst_285 : f32 to vector<24x24xf32>
    %733 = arith.mulf %731, %732 : vector<24x24xf32>
    %734 = arith.addf %733, %709 : vector<24x24xf32>
    %cst_286 = arith.constant dense<0xFF800000> : vector<24xf32>
    %735 = vector.multi_reduction <maximumf>, %734, %cst_286 [1] : vector<24x24xf32> to vector<24xf32>
    %cst_287 = arith.constant 0xFF800000 : f32
    %736 = vector.broadcast %cst_287 : f32 to vector<24xf32>
    %737 = arith.maximumf %736, %735 : vector<24xf32>
    %738 = vector.shape_cast %737 : vector<24xf32> to vector<24x1xf32>
    %739 = vector.broadcast %738 : vector<24x1xf32> to vector<24x24xf32>
    %740 = arith.subf %734, %739 : vector<24x24xf32>
    %741 = math.exp %740 : vector<24x24xf32>
    %cst_288 = arith.constant dense<0.000000e+00> : vector<24xf32>
    %742 = vector.multi_reduction <add>, %741, %cst_288 [1] : vector<24x24xf32> to vector<24xf32>
    %743 = vector.shape_cast %742 : vector<24xf32> to vector<24x1xf32>
    %744 = vector.broadcast %743 : vector<24x1xf32> to vector<24x24xf32>
    %745 = arith.divf %741, %744 : vector<24x24xf32>
    %746 = arith.addf %728, %745 : vector<24x24xf32>
    %747 = vector.extract_strided_slice %704 {offsets = [0, 16], sizes = [24, 8], strides = [1, 1]} : vector<24x32xf32> to vector<24x8xf32>
    %748 = vector.extract_strided_slice %706 {offsets = [0, 16], sizes = [24, 8], strides = [1, 1]} : vector<24x32xf32> to vector<24x8xf32>
    %cst_289 = arith.constant dense<0.000000e+00> : vector<24x24xf32>
    %749 = tpu.matmul %747, %748, %cst_289 {dimension_numbers = #tpu.dot_dimension_numbers<[1], [1], [0], [0], [0, 0, 1, 0], [], []>} : vector<24x8xf32>, vector<24x8xf32>, vector<24x24xf32> -> vector<24x24xf32>
    %cst_290 = arith.constant 0.353553385 : f32
    %750 = vector.broadcast %cst_290 : f32 to vector<24x24xf32>
    %751 = arith.mulf %749, %750 : vector<24x24xf32>
    %752 = arith.addf %751, %709 : vector<24x24xf32>
    %cst_291 = arith.constant dense<0xFF800000> : vector<24xf32>
    %753 = vector.multi_reduction <maximumf>, %752, %cst_291 [1] : vector<24x24xf32> to vector<24xf32>
    %cst_292 = arith.constant 0xFF800000 : f32
    %754 = vector.broadcast %cst_292 : f32 to vector<24xf32>
    %755 = arith.maximumf %754, %753 : vector<24xf32>
    %756 = vector.shape_cast %755 : vector<24xf32> to vector<24x1xf32>
    %757 = vector.broadcast %756 : vector<24x1xf32> to vector<24x24xf32>
    %758 = arith.subf %752, %757 : vector<24x24xf32>
    %759 = math.exp %758 : vector<24x24xf32>
    %cst_293 = arith.constant dense<0.000000e+00> : vector<24xf32>
    %760 = vector.multi_reduction <add>, %759, %cst_293 [1] : vector<24x24xf32> to vector<24xf32>
    %761 = vector.shape_cast %760 : vector<24xf32> to vector<24x1xf32>
    %762 = vector.broadcast %761 : vector<24x1xf32> to vector<24x24xf32>
    %763 = arith.divf %759, %762 : vector<24x24xf32>
    %764 = arith.addf %746, %763 : vector<24x24xf32>
    %765 = vector.extract_strided_slice %704 {offsets = [0, 24], sizes = [24, 8], strides = [1, 1]} : vector<24x32xf32> to vector<24x8xf32>
    %766 = vector.extract_strided_slice %706 {offsets = [0, 24], sizes = [24, 8], strides = [1, 1]} : vector<24x32xf32> to vector<24x8xf32>
    %cst_294 = arith.constant dense<0.000000e+00> : vector<24x24xf32>
    %767 = tpu.matmul %765, %766, %cst_294 {dimension_numbers = #tpu.dot_dimension_numbers<[1], [1], [0], [0], [0, 0, 1, 0], [], []>} : vector<24x8xf32>, vector<24x8xf32>, vector<24x24xf32> -> vector<24x24xf32>
    %cst_295 = arith.constant 0.353553385 : f32
    %768 = vector.broadcast %cst_295 : f32 to vector<24x24xf32>
    %769 = arith.mulf %767, %768 : vector<24x24xf32>
    %770 = arith.addf %769, %709 : vector<24x24xf32>
    %cst_296 = arith.constant dense<0xFF800000> : vector<24xf32>
    %771 = vector.multi_reduction <maximumf>, %770, %cst_296 [1] : vector<24x24xf32> to vector<24xf32>
    %cst_297 = arith.constant 0xFF800000 : f32
    %772 = vector.broadcast %cst_297 : f32 to vector<24xf32>
    %773 = arith.maximumf %772, %771 : vector<24xf32>
    %774 = vector.shape_cast %773 : vector<24xf32> to vector<24x1xf32>
    %775 = vector.broadcast %774 : vector<24x1xf32> to vector<24x24xf32>
    %776 = arith.subf %770, %775 : vector<24x24xf32>
    %777 = math.exp %776 : vector<24x24xf32>
    %cst_298 = arith.constant dense<0.000000e+00> : vector<24xf32>
    %778 = vector.multi_reduction <add>, %777, %cst_298 [1] : vector<24x24xf32> to vector<24xf32>
    %779 = vector.shape_cast %778 : vector<24xf32> to vector<24x1xf32>
    %780 = vector.broadcast %779 : vector<24x1xf32> to vector<24x24xf32>
    %781 = arith.divf %777, %780 : vector<24x24xf32>
    %782 = arith.addf %764, %781 : vector<24x24xf32>
    %cst_299 = arith.constant 2.500000e-01 : f32
    %783 = vector.broadcast %cst_299 : f32 to vector<24x24xf32>
    %784 = arith.mulf %782, %783 : vector<24x24xf32>
    %cst_300 = arith.constant dense<0.000000e+00> : vector<24x32xf32>
    %785 = tpu.matmul %784, %708, %cst_300 {dimension_numbers = #tpu.dot_dimension_numbers<[1], [0], [0], [1], [0, 0, 1, 1], [], []>} : vector<24x24xf32>, vector<24x32xf32>, vector<24x32xf32> -> vector<24x32xf32>
    %c0_301 = arith.constant 0 : index
    %c544 = arith.constant 544 : index
    %786 = vector.load %arg13[%c0_301, %c544] : memref<32x832xf32, #tpu.memory_space<vmem>>, vector<32x32xf32>
    %cst_302 = arith.constant dense<0.000000e+00> : vector<24x32xf32>
    %787 = tpu.matmul %785, %786, %cst_302 {dimension_numbers = #tpu.dot_dimension_numbers<[1], [0], [0], [1], [0, 0, 1, 1], [], []>} : vector<24x32xf32>, vector<32x32xf32>, vector<24x32xf32> -> vector<24x32xf32>
    %c11_303 = arith.constant 11 : index
    %c0_304 = arith.constant 0 : index
    %788 = vector.load %arg14[%c11_303, %c0_304] : memref<26x128xf32, #tpu.memory_space<vmem>>, vector<1x32xf32>
    %789 = vector.broadcast %788 : vector<1x32xf32> to vector<24x32xf32>
    %790 = arith.addf %787, %789 : vector<24x32xf32>
    %791 = arith.negf %790 : vector<24x32xf32>
    %792 = math.exp %791 : vector<24x32xf32>
    %cst_305 = arith.constant 1.000000e+00 : f32
    %793 = vector.broadcast %cst_305 : f32 to vector<24x32xf32>
    %794 = arith.addf %793, %792 : vector<24x32xf32>
    %795 = arith.divf %793, %794 : vector<24x32xf32>
    %c0_306 = arith.constant 0 : index
    %c576_307 = arith.constant 576 : index
    %796 = vector.load %arg13[%c0_306, %c576_307] : memref<32x832xf32, #tpu.memory_space<vmem>>, vector<32x32xf32>
    %cst_308 = arith.constant dense<0.000000e+00> : vector<24x32xf32>
    %797 = tpu.matmul %785, %796, %cst_308 {dimension_numbers = #tpu.dot_dimension_numbers<[1], [0], [0], [1], [0, 0, 1, 1], [], []>} : vector<24x32xf32>, vector<32x32xf32>, vector<24x32xf32> -> vector<24x32xf32>
    %c12_309 = arith.constant 12 : index
    %c0_310 = arith.constant 0 : index
    %798 = vector.load %arg14[%c12_309, %c0_310] : memref<26x128xf32, #tpu.memory_space<vmem>>, vector<1x32xf32>
    %799 = vector.broadcast %798 : vector<1x32xf32> to vector<24x32xf32>
    %800 = arith.addf %797, %799 : vector<24x32xf32>
    %801 = arith.mulf %795, %800 : vector<24x32xf32>
    %802 = arith.addf %702, %801 : vector<24x32xf32>
    %c13_311 = arith.constant 13 : index
    %c0_312 = arith.constant 0 : index
    %803 = vector.load %arg14[%c13_311, %c0_312] : memref<26x128xf32, #tpu.memory_space<vmem>>, vector<1x32xf32>
    %c14_313 = arith.constant 14 : index
    %c0_314 = arith.constant 0 : index
    %804 = vector.load %arg14[%c14_313, %c0_314] : memref<26x128xf32, #tpu.memory_space<vmem>>, vector<1x32xf32>
    %cst_315 = arith.constant dense<0.000000e+00> : vector<24xf32>
    %805 = vector.multi_reduction <add>, %802, %cst_315 [1] : vector<24x32xf32> to vector<24xf32>
    %806 = vector.shape_cast %805 : vector<24xf32> to vector<24x1xf32>
    %cst_316 = arith.constant 3.200000e+01 : f32
    %807 = vector.broadcast %cst_316 : f32 to vector<24x1xf32>
    %808 = arith.divf %806, %807 : vector<24x1xf32>
    %809 = arith.mulf %802, %802 : vector<24x32xf32>
    %cst_317 = arith.constant dense<0.000000e+00> : vector<24xf32>
    %810 = vector.multi_reduction <add>, %809, %cst_317 [1] : vector<24x32xf32> to vector<24xf32>
    %811 = vector.shape_cast %810 : vector<24xf32> to vector<24x1xf32>
    %cst_318 = arith.constant 3.200000e+01 : f32
    %812 = vector.broadcast %cst_318 : f32 to vector<24x1xf32>
    %813 = arith.divf %811, %812 : vector<24x1xf32>
    %814 = vector.broadcast %808 : vector<24x1xf32> to vector<24x32xf32>
    %815 = arith.subf %802, %814 : vector<24x32xf32>
    %816 = arith.mulf %808, %808 : vector<24x1xf32>
    %817 = arith.subf %813, %816 : vector<24x1xf32>
    %cst_319 = arith.constant 9.99999974E-6 : f32
    %818 = vector.broadcast %cst_319 : f32 to vector<24x1xf32>
    %819 = arith.addf %817, %818 : vector<24x1xf32>
    %820 = math.rsqrt %819 : vector<24x1xf32>
    %821 = vector.broadcast %820 : vector<24x1xf32> to vector<24x32xf32>
    %822 = arith.mulf %815, %821 : vector<24x32xf32>
    %823 = vector.broadcast %803 : vector<1x32xf32> to vector<24x32xf32>
    %824 = arith.mulf %822, %823 : vector<24x32xf32>
    %825 = vector.broadcast %804 : vector<1x32xf32> to vector<24x32xf32>
    %826 = arith.addf %824, %825 : vector<24x32xf32>
    %c0_320 = arith.constant 0 : index
    %c608 = arith.constant 608 : index
    %827 = vector.load %arg13[%c0_320, %c608] : memref<32x832xf32, #tpu.memory_space<vmem>>, vector<32x32xf32>
    %cst_321 = arith.constant dense<0.000000e+00> : vector<24x32xf32>
    %828 = tpu.matmul %826, %827, %cst_321 {dimension_numbers = #tpu.dot_dimension_numbers<[1], [0], [0], [1], [0, 0, 1, 1], [], []>} : vector<24x32xf32>, vector<32x32xf32>, vector<24x32xf32> -> vector<24x32xf32>
    %c15 = arith.constant 15 : index
    %c0_322 = arith.constant 0 : index
    %829 = vector.load %arg14[%c15, %c0_322] : memref<26x128xf32, #tpu.memory_space<vmem>>, vector<1x32xf32>
    %830 = vector.broadcast %829 : vector<1x32xf32> to vector<24x32xf32>
    %831 = arith.addf %828, %830 : vector<24x32xf32>
    %cst_323 = arith.constant 0.000000e+00 : f32
    %832 = vector.broadcast %cst_323 : f32 to vector<24x32xf32>
    %833 = arith.cmpf ogt, %831, %832 : vector<24x32xf32>
    %834 = math.exp %831 : vector<24x32xf32>
    %cst_324 = arith.constant 1.000000e+00 : f32
    %835 = vector.broadcast %cst_324 : f32 to vector<24x32xf32>
    %836 = arith.subf %834, %835 : vector<24x32xf32>
    %837 = arith.select %833, %831, %836 : vector<24x32xi1>, vector<24x32xf32>
    %c0_325 = arith.constant 0 : index
    %c640 = arith.constant 640 : index
    %838 = vector.load %arg13[%c0_325, %c640] : memref<32x832xf32, #tpu.memory_space<vmem>>, vector<32x32xf32>
    %cst_326 = arith.constant dense<0.000000e+00> : vector<24x32xf32>
    %839 = tpu.matmul %837, %838, %cst_326 {dimension_numbers = #tpu.dot_dimension_numbers<[1], [0], [0], [1], [0, 0, 1, 1], [], []>} : vector<24x32xf32>, vector<32x32xf32>, vector<24x32xf32> -> vector<24x32xf32>
    %c16_327 = arith.constant 16 : index
    %c0_328 = arith.constant 0 : index
    %840 = vector.load %arg14[%c16_327, %c0_328] : memref<26x128xf32, #tpu.memory_space<vmem>>, vector<1x32xf32>
    %841 = vector.broadcast %840 : vector<1x32xf32> to vector<24x32xf32>
    %842 = arith.addf %839, %841 : vector<24x32xf32>
    %c0_329 = arith.constant 0 : index
    %c672 = arith.constant 672 : index
    %843 = vector.load %arg13[%c0_329, %c672] : memref<32x832xf32, #tpu.memory_space<vmem>>, vector<32x32xf32>
    %cst_330 = arith.constant dense<0.000000e+00> : vector<24x32xf32>
    %844 = tpu.matmul %842, %843, %cst_330 {dimension_numbers = #tpu.dot_dimension_numbers<[1], [0], [0], [1], [0, 0, 1, 1], [], []>} : vector<24x32xf32>, vector<32x32xf32>, vector<24x32xf32> -> vector<24x32xf32>
    %c17 = arith.constant 17 : index
    %c0_331 = arith.constant 0 : index
    %845 = vector.load %arg14[%c17, %c0_331] : memref<26x128xf32, #tpu.memory_space<vmem>>, vector<1x32xf32>
    %846 = vector.broadcast %845 : vector<1x32xf32> to vector<24x32xf32>
    %847 = arith.addf %844, %846 : vector<24x32xf32>
    %848 = arith.negf %847 : vector<24x32xf32>
    %849 = math.exp %848 : vector<24x32xf32>
    %cst_332 = arith.constant 1.000000e+00 : f32
    %850 = vector.broadcast %cst_332 : f32 to vector<24x32xf32>
    %851 = arith.addf %850, %849 : vector<24x32xf32>
    %852 = arith.divf %850, %851 : vector<24x32xf32>
    %c0_333 = arith.constant 0 : index
    %c704 = arith.constant 704 : index
    %853 = vector.load %arg13[%c0_333, %c704] : memref<32x832xf32, #tpu.memory_space<vmem>>, vector<32x32xf32>
    %cst_334 = arith.constant dense<0.000000e+00> : vector<24x32xf32>
    %854 = tpu.matmul %842, %853, %cst_334 {dimension_numbers = #tpu.dot_dimension_numbers<[1], [0], [0], [1], [0, 0, 1, 1], [], []>} : vector<24x32xf32>, vector<32x32xf32>, vector<24x32xf32> -> vector<24x32xf32>
    %c18_335 = arith.constant 18 : index
    %c0_336 = arith.constant 0 : index
    %855 = vector.load %arg14[%c18_335, %c0_336] : memref<26x128xf32, #tpu.memory_space<vmem>>, vector<1x32xf32>
    %856 = vector.broadcast %855 : vector<1x32xf32> to vector<24x32xf32>
    %857 = arith.addf %854, %856 : vector<24x32xf32>
    %858 = arith.mulf %852, %857 : vector<24x32xf32>
    %859 = arith.addf %826, %858 : vector<24x32xf32>
    %c19 = arith.constant 19 : index
    %c0_337 = arith.constant 0 : index
    %860 = vector.load %arg14[%c19, %c0_337] : memref<26x128xf32, #tpu.memory_space<vmem>>, vector<1x32xf32>
    %c20_338 = arith.constant 20 : index
    %c0_339 = arith.constant 0 : index
    %861 = vector.load %arg14[%c20_338, %c0_339] : memref<26x128xf32, #tpu.memory_space<vmem>>, vector<1x32xf32>
    %cst_340 = arith.constant dense<0.000000e+00> : vector<24xf32>
    %862 = vector.multi_reduction <add>, %859, %cst_340 [1] : vector<24x32xf32> to vector<24xf32>
    %863 = vector.shape_cast %862 : vector<24xf32> to vector<24x1xf32>
    %cst_341 = arith.constant 3.200000e+01 : f32
    %864 = vector.broadcast %cst_341 : f32 to vector<24x1xf32>
    %865 = arith.divf %863, %864 : vector<24x1xf32>
    %866 = arith.mulf %859, %859 : vector<24x32xf32>
    %cst_342 = arith.constant dense<0.000000e+00> : vector<24xf32>
    %867 = vector.multi_reduction <add>, %866, %cst_342 [1] : vector<24x32xf32> to vector<24xf32>
    %868 = vector.shape_cast %867 : vector<24xf32> to vector<24x1xf32>
    %cst_343 = arith.constant 3.200000e+01 : f32
    %869 = vector.broadcast %cst_343 : f32 to vector<24x1xf32>
    %870 = arith.divf %868, %869 : vector<24x1xf32>
    %871 = vector.broadcast %865 : vector<24x1xf32> to vector<24x32xf32>
    %872 = arith.subf %859, %871 : vector<24x32xf32>
    %873 = arith.mulf %865, %865 : vector<24x1xf32>
    %874 = arith.subf %870, %873 : vector<24x1xf32>
    %cst_344 = arith.constant 9.99999974E-6 : f32
    %875 = vector.broadcast %cst_344 : f32 to vector<24x1xf32>
    %876 = arith.addf %874, %875 : vector<24x1xf32>
    %877 = math.rsqrt %876 : vector<24x1xf32>
    %878 = vector.broadcast %877 : vector<24x1xf32> to vector<24x32xf32>
    %879 = arith.mulf %872, %878 : vector<24x32xf32>
    %880 = vector.broadcast %860 : vector<1x32xf32> to vector<24x32xf32>
    %881 = arith.mulf %879, %880 : vector<24x32xf32>
    %882 = vector.broadcast %861 : vector<1x32xf32> to vector<24x32xf32>
    %883 = arith.addf %881, %882 : vector<24x32xf32>
    %c0_345 = arith.constant 0 : index
    %c736 = arith.constant 736 : index
    %884 = vector.load %arg13[%c0_345, %c736] : memref<32x832xf32, #tpu.memory_space<vmem>>, vector<32x32xf32>
    %cst_346 = arith.constant dense<0.000000e+00> : vector<24x32xf32>
    %885 = tpu.matmul %883, %884, %cst_346 {dimension_numbers = #tpu.dot_dimension_numbers<[1], [0], [0], [1], [0, 0, 1, 1], [], []>} : vector<24x32xf32>, vector<32x32xf32>, vector<24x32xf32> -> vector<24x32xf32>
    %c21 = arith.constant 21 : index
    %c0_347 = arith.constant 0 : index
    %886 = vector.load %arg14[%c21, %c0_347] : memref<26x128xf32, #tpu.memory_space<vmem>>, vector<1x32xf32>
    %887 = vector.broadcast %886 : vector<1x32xf32> to vector<24x32xf32>
    %888 = arith.addf %885, %887 : vector<24x32xf32>
    %889 = arith.negf %888 : vector<24x32xf32>
    %890 = math.exp %889 : vector<24x32xf32>
    %cst_348 = arith.constant 1.000000e+00 : f32
    %891 = vector.broadcast %cst_348 : f32 to vector<24x32xf32>
    %892 = arith.addf %891, %890 : vector<24x32xf32>
    %893 = arith.divf %891, %892 : vector<24x32xf32>
    %c0_349 = arith.constant 0 : index
    %c768_350 = arith.constant 768 : index
    %894 = vector.load %arg13[%c0_349, %c768_350] : memref<32x832xf32, #tpu.memory_space<vmem>>, vector<32x32xf32>
    %cst_351 = arith.constant dense<0.000000e+00> : vector<24x32xf32>
    %895 = tpu.matmul %883, %894, %cst_351 {dimension_numbers = #tpu.dot_dimension_numbers<[1], [0], [0], [1], [0, 0, 1, 1], [], []>} : vector<24x32xf32>, vector<32x32xf32>, vector<24x32xf32> -> vector<24x32xf32>
    %c22_352 = arith.constant 22 : index
    %c0_353 = arith.constant 0 : index
    %896 = vector.load %arg14[%c22_352, %c0_353] : memref<26x128xf32, #tpu.memory_space<vmem>>, vector<1x32xf32>
    %897 = vector.broadcast %896 : vector<1x32xf32> to vector<24x32xf32>
    %898 = arith.addf %895, %897 : vector<24x32xf32>
    %899 = arith.mulf %893, %898 : vector<24x32xf32>
    %900 = arith.addf %645, %899 : vector<24x32xf32>
    %c23 = arith.constant 23 : index
    %c0_354 = arith.constant 0 : index
    %901 = vector.load %arg14[%c23, %c0_354] : memref<26x128xf32, #tpu.memory_space<vmem>>, vector<1x32xf32>
    %c24 = arith.constant 24 : index
    %c0_355 = arith.constant 0 : index
    %902 = vector.load %arg14[%c24, %c0_355] : memref<26x128xf32, #tpu.memory_space<vmem>>, vector<1x32xf32>
    %cst_356 = arith.constant dense<0.000000e+00> : vector<24xf32>
    %903 = vector.multi_reduction <add>, %900, %cst_356 [1] : vector<24x32xf32> to vector<24xf32>
    %904 = vector.shape_cast %903 : vector<24xf32> to vector<24x1xf32>
    %cst_357 = arith.constant 3.200000e+01 : f32
    %905 = vector.broadcast %cst_357 : f32 to vector<24x1xf32>
    %906 = arith.divf %904, %905 : vector<24x1xf32>
    %907 = arith.mulf %900, %900 : vector<24x32xf32>
    %cst_358 = arith.constant dense<0.000000e+00> : vector<24xf32>
    %908 = vector.multi_reduction <add>, %907, %cst_358 [1] : vector<24x32xf32> to vector<24xf32>
    %909 = vector.shape_cast %908 : vector<24xf32> to vector<24x1xf32>
    %cst_359 = arith.constant 3.200000e+01 : f32
    %910 = vector.broadcast %cst_359 : f32 to vector<24x1xf32>
    %911 = arith.divf %909, %910 : vector<24x1xf32>
    %912 = vector.broadcast %906 : vector<24x1xf32> to vector<24x32xf32>
    %913 = arith.subf %900, %912 : vector<24x32xf32>
    %914 = arith.mulf %906, %906 : vector<24x1xf32>
    %915 = arith.subf %911, %914 : vector<24x1xf32>
    %cst_360 = arith.constant 9.99999974E-6 : f32
    %916 = vector.broadcast %cst_360 : f32 to vector<24x1xf32>
    %917 = arith.addf %915, %916 : vector<24x1xf32>
    %918 = math.rsqrt %917 : vector<24x1xf32>
    %919 = vector.broadcast %918 : vector<24x1xf32> to vector<24x32xf32>
    %920 = arith.mulf %913, %919 : vector<24x32xf32>
    %921 = vector.broadcast %901 : vector<1x32xf32> to vector<24x32xf32>
    %922 = arith.mulf %920, %921 : vector<24x32xf32>
    %923 = vector.broadcast %902 : vector<1x32xf32> to vector<24x32xf32>
    %924 = arith.addf %922, %923 : vector<24x32xf32>
    %925 = vector.extract_strided_slice %924 {offsets = [16, 0], sizes = [8, 32], strides = [1, 1]} : vector<24x32xf32> to vector<8x32xf32>
    %c0_361 = arith.constant 0 : index
    %c800_362 = arith.constant 800 : index
    %926 = vector.load %arg13[%c0_361, %c800_362] : memref<32x832xf32, #tpu.memory_space<vmem>>, vector<32x32xf32>
    %cst_363 = arith.constant dense<0.000000e+00> : vector<8x32xf32>
    %927 = tpu.matmul %925, %926, %cst_363 {dimension_numbers = #tpu.dot_dimension_numbers<[1], [0], [0], [1], [0, 0, 1, 1], [], []>} : vector<8x32xf32>, vector<32x32xf32>, vector<8x32xf32> -> vector<8x32xf32>
    %c25 = arith.constant 25 : index
    %c0_364 = arith.constant 0 : index
    %928 = vector.load %arg14[%c25, %c0_364] : memref<26x128xf32, #tpu.memory_space<vmem>>, vector<1x32xf32>
    %929 = vector.broadcast %928 : vector<1x32xf32> to vector<8x32xf32>
    %930 = arith.addf %927, %929 : vector<8x32xf32>
    %931 = vector.extract_strided_slice %930 {offsets = [0, 0], sizes = [1, 6], strides = [1, 1]} : vector<8x32xf32> to vector<1x6xf32>
    %c0_365 = arith.constant 0 : index
    %c0_366 = arith.constant 0 : index
    %c0_367 = arith.constant 0 : index
    %932 = vector.load %arg16[%c0_365, %c0_366, %c0_367] : memref<2x4x6xf32, #tpu.memory_space<vmem>>, vector<1x1x6xf32>
    %933 = vector.shape_cast %932 : vector<1x1x6xf32> to vector<1x6xf32>
    %934 = vector.shape_cast %931 : vector<1x6xf32> to vector<1x1x6xf32>
    tpu.vector_store %arg16[%c0_365, %c0_366, %c0_367], %934 {strides = array<i32>} : memref<2x4x6xf32, #tpu.memory_space<vmem>>, vector<1x1x6xf32>,
    %935 = vector.extract_strided_slice %930 {offsets = [2, 0], sizes = [1, 6], strides = [1, 1]} : vector<8x32xf32> to vector<1x6xf32>
    %c0_368 = arith.constant 0 : index
    %c1_369 = arith.constant 1 : index
    %c0_370 = arith.constant 0 : index
    %936 = vector.load %arg16[%c0_368, %c1_369, %c0_370] : memref<2x4x6xf32, #tpu.memory_space<vmem>>, vector<1x1x6xf32>
    %937 = vector.shape_cast %936 : vector<1x1x6xf32> to vector<1x6xf32>
    %938 = vector.shape_cast %935 : vector<1x6xf32> to vector<1x1x6xf32>
    tpu.vector_store %arg16[%c0_368, %c1_369, %c0_370], %938 {strides = array<i32>} : memref<2x4x6xf32, #tpu.memory_space<vmem>>, vector<1x1x6xf32>,
    %939 = vector.extract_strided_slice %930 {offsets = [4, 0], sizes = [1, 6], strides = [1, 1]} : vector<8x32xf32> to vector<1x6xf32>
    %c0_371 = arith.constant 0 : index
    %c2_372 = arith.constant 2 : index
    %c0_373 = arith.constant 0 : index
    %940 = vector.load %arg16[%c0_371, %c2_372, %c0_373] : memref<2x4x6xf32, #tpu.memory_space<vmem>>, vector<1x1x6xf32>
    %941 = vector.shape_cast %940 : vector<1x1x6xf32> to vector<1x6xf32>
    %942 = vector.shape_cast %939 : vector<1x6xf32> to vector<1x1x6xf32>
    tpu.vector_store %arg16[%c0_371, %c2_372, %c0_373], %942 {strides = array<i32>} : memref<2x4x6xf32, #tpu.memory_space<vmem>>, vector<1x1x6xf32>,
    %943 = vector.extract_strided_slice %930 {offsets = [6, 0], sizes = [1, 6], strides = [1, 1]} : vector<8x32xf32> to vector<1x6xf32>
    %c0_374 = arith.constant 0 : index
    %c3_375 = arith.constant 3 : index
    %c0_376 = arith.constant 0 : index
    %944 = vector.load %arg16[%c0_374, %c3_375, %c0_376] : memref<2x4x6xf32, #tpu.memory_space<vmem>>, vector<1x1x6xf32>
    %945 = vector.shape_cast %944 : vector<1x1x6xf32> to vector<1x6xf32>
    %946 = vector.shape_cast %943 : vector<1x6xf32> to vector<1x1x6xf32>
    tpu.vector_store %arg16[%c0_374, %c3_375, %c0_376], %946 {strides = array<i32>} : memref<2x4x6xf32, #tpu.memory_space<vmem>>, vector<1x1x6xf32>,
    %947 = vector.extract_strided_slice %930 {offsets = [1, 0], sizes = [1, 6], strides = [1, 1]} : vector<8x32xf32> to vector<1x6xf32>
    %c1_377 = arith.constant 1 : index
    %c0_378 = arith.constant 0 : index
    %c0_379 = arith.constant 0 : index
    %948 = vector.load %arg16[%c1_377, %c0_378, %c0_379] : memref<2x4x6xf32, #tpu.memory_space<vmem>>, vector<1x1x6xf32>
    %949 = vector.shape_cast %948 : vector<1x1x6xf32> to vector<1x6xf32>
    %950 = vector.shape_cast %947 : vector<1x6xf32> to vector<1x1x6xf32>
    tpu.vector_store %arg16[%c1_377, %c0_378, %c0_379], %950 {strides = array<i32>} : memref<2x4x6xf32, #tpu.memory_space<vmem>>, vector<1x1x6xf32>,
    %951 = vector.extract_strided_slice %930 {offsets = [3, 0], sizes = [1, 6], strides = [1, 1]} : vector<8x32xf32> to vector<1x6xf32>
    %c1_380 = arith.constant 1 : index
    %c1_381 = arith.constant 1 : index
    %c0_382 = arith.constant 0 : index
    %952 = vector.load %arg16[%c1_380, %c1_381, %c0_382] : memref<2x4x6xf32, #tpu.memory_space<vmem>>, vector<1x1x6xf32>
    %953 = vector.shape_cast %952 : vector<1x1x6xf32> to vector<1x6xf32>
    %954 = vector.shape_cast %951 : vector<1x6xf32> to vector<1x1x6xf32>
    tpu.vector_store %arg16[%c1_380, %c1_381, %c0_382], %954 {strides = array<i32>} : memref<2x4x6xf32, #tpu.memory_space<vmem>>, vector<1x1x6xf32>,
    %955 = vector.extract_strided_slice %930 {offsets = [5, 0], sizes = [1, 6], strides = [1, 1]} : vector<8x32xf32> to vector<1x6xf32>
    %c1_383 = arith.constant 1 : index
    %c2_384 = arith.constant 2 : index
    %c0_385 = arith.constant 0 : index
    %956 = vector.load %arg16[%c1_383, %c2_384, %c0_385] : memref<2x4x6xf32, #tpu.memory_space<vmem>>, vector<1x1x6xf32>
    %957 = vector.shape_cast %956 : vector<1x1x6xf32> to vector<1x6xf32>
    %958 = vector.shape_cast %955 : vector<1x6xf32> to vector<1x1x6xf32>
    tpu.vector_store %arg16[%c1_383, %c2_384, %c0_385], %958 {strides = array<i32>} : memref<2x4x6xf32, #tpu.memory_space<vmem>>, vector<1x1x6xf32>,
    %959 = vector.extract_strided_slice %930 {offsets = [7, 0], sizes = [1, 6], strides = [1, 1]} : vector<8x32xf32> to vector<1x6xf32>
    %c1_386 = arith.constant 1 : index
    %c3_387 = arith.constant 3 : index
    %c0_388 = arith.constant 0 : index
    %960 = vector.load %arg16[%c1_386, %c3_387, %c0_388] : memref<2x4x6xf32, #tpu.memory_space<vmem>>, vector<1x1x6xf32>
    %961 = vector.shape_cast %960 : vector<1x1x6xf32> to vector<1x6xf32>
    %962 = vector.shape_cast %959 : vector<1x6xf32> to vector<1x1x6xf32>
    tpu.vector_store %arg16[%c1_386, %c3_387, %c0_388], %962 {strides = array<i32>} : memref<2x4x6xf32, #tpu.memory_space<vmem>>, vector<1x1x6xf32>,
    return
  }
}

</mosaic_0001>

<bundles_post_ra>
// kernel: tft_forward.1
= control target key start
LH: loop header
LB: loop body
LE: loop exit
PB: predicated region body
PF: predicated region fallthrough
CT: control target
= control target key end

     0   :  { %s15053_s0 = inlined_call_operand.vmem [shape: f32[16,3], index: 0, kind: input, shape index: {}]   ;;  %s15054_s1 = inlined_call_operand.vmem [shape: s32[16,3], index: 1, kind: input, shape index: {}]   ;;  %s15055_s2 = inlined_call_operand.vmem [shape: s32[8,3], index: 2, kind: input, shape index: {}]   ;;  %s15056_s3 = inlined_call_operand.hbm [shape: f32[70,192], index: 3, kind: input, shape index: {}]   ;;  %s15057_s4 = inlined_call_operand.hbm [shape: f32[192,844], index: 4, kind: input, shape index: {}]   ;;  %s15058_s5 = inlined_call_operand.vmem [shape: f32[32,6], index: 5, kind: input, shape index: {}]   ;;  %s15059_s6 = inlined_call_operand.hbm [shape: f32[6,204], index: 6, kind: input, shape index: {}]   ;;  %s15060_s7 = inlined_call_operand.hbm [shape: f32[14,192], index: 7, kind: input, shape index: {}]   ;;  %s15061_s8 = inlined_call_operand.hbm [shape: f32[67,96], index: 8, kind: input, shape index: {}]   ;;  %s15062_s9 = inlined_call_operand.hbm [shape: f32[96,454], index: 9, kind: input, shape index: {}]   ;;  %s15063_s10 = inlined_call_operand.vmem [shape: f32[32,3], index: 10, kind: input, shape index: {}]   ;;  %s15064_s11 = inlined_call_operand.hbm [shape: f32[3,102], index: 11, kind: input, shape index: {}]   ;;  %s15065_s12 = inlined_call_operand.hbm [shape: f32[14,96], index: 12, kind: input, shape index: {}]   ;;  %s15066_s13 = inlined_call_operand.vmem [shape: f32[32,832], index: 13, kind: input, shape index: {}]   ;;  %s15067_s14 = inlined_call_operand.hbm [shape: f32[26,128], index: 14, kind: input, shape index: {}]   ;;  %s15068_s15 = inlined_call_operand.vmem [shape: f32[24,24], index: 15, kind: input, shape index: {}]   ;;  %s15069_s16 = inlined_call_operand.vmem [shape: f32[2,4,6], index: 16, kind: output, shape index: {}]  }
   0x1   :  { %15084 = sst [smem:[#allocation25_spill]] %s15053_s0 }
   0x2   :  { %15085 = sst [smem:[#allocation26_spill]] %s15069_s16 }
   0x3   :  { %21 = vsyncpa [#allocation4], 0 }
   0x4   :  { %22 = vsyncpa [#allocation6], 0 }
   0x5   :  { %23 = vsyncpa [#allocation9], 0 }
   0x6   :  { %24 = vsyncpa [#allocation12], 0 }
   0x7   :  { %25 = vsyncpa [#allocation15], 0  ;;  %s12521_s21 = smov [#allocation5]   ;;  %s12313_s25 = scalar_lea.hbm %s15057_s4, 21504 }
   0x8   :  { %s49_s22 = sshll.u32 %s12521_s21, 4  ;;  %p12314_p0 = scmp.ne.s32.totalorder %s15057_s4, %s12313_s25  ;;  %s50_s22 = int_to_ptr.vmem [resolvable:$true] %s49_s22 }
   0x9   :  { %p12317_p1 = scmp.lt.u32.totalorder %s12313_s25, %s15057_s4 }
   0xb   :  { %p12319_p2 = pnand %p12317_p1, %p12314_p0 }
   0xd   :  { %12322 = shalt.err (!%p12319_p2)
}
   0xe   :  { %s12323_s30 = scalar_lea.vmem %s50_s22, 21504  ;;  %p12328_p4 = scmp.lt.s32.totalorder %s50_s22, %s50_s22 }
   0xf   :  { %p12324_p3 = scmp.ne.s32.totalorder %s50_s22, %s12323_s30  ;;  %p12329_p5 = scmp.lt.s32.totalorder %s12323_s30, %s12323_s30 }
  0x11   :  { %p12330_p6 = por %p12329_p5, %p12328_p4 }
  0x13   :  { %p12331_p7 = pnand %p12330_p6, %p12324_p3 }
  0x15   :  { %12334 = shalt.err (!%p12331_p7)
}
  0x16   :  { %s12522_s0 = smov 896   ;;  %s12523_s17 = smov 56  }
  0x17   :  { %55 = dma.hbm_to_vmem [thread:$0]  %s15057_s4, 21504, %s50_s22, [#allocation6], %s12522_s0, %s12522_s0, %s12523_s17  }
  0x18   :  { %s12524_s20 = smov [#allocation8]   ;;  %s12525_s23 = smov [#allocation11]  }
  0x19   :  { %s73_s21 = sshll.u32 %s12524_s20, 4  ;;  %s97_s24 = sshll.u32 %s12525_s23, 4  ;;  %s74_s21 = int_to_ptr.vmem [resolvable:$true] %s73_s21  ;;  %s98_s24 = int_to_ptr.vmem [resolvable:$true] %s97_s24 }
  0x1a   :  { %s12335_s27 = scalar_lea.hbm %s15060_s7, 512 }
  0x1b   :  { %p12336_p8 = scmp.ne.s32.totalorder %s15060_s7, %s12335_s27  ;;  %p12339_p9 = scmp.lt.u32.totalorder %s12335_s27, %s15060_s7 }
  0x1d   :  { %p12341_p10 = pnand %p12339_p9, %p12336_p8 }
  0x1f   :  { %12344 = shalt.err (!%p12341_p10)
}
  0x20   :  { %s12345_s4 = scalar_lea.vmem %s74_s21, 512  ;;  %p12350_p12 = scmp.lt.s32.totalorder %s74_s21, %s74_s21 }
  0x21   :  { %p12346_p11 = scmp.ne.s32.totalorder %s74_s21, %s12345_s4  ;;  %p12351_p13 = scmp.lt.s32.totalorder %s12345_s4, %s12345_s4 }
  0x23   :  { %p12352_p0 = por %p12351_p13, %p12350_p12 }
  0x25   :  { %p12353_p1 = pnand %p12352_p0, %p12346_p11 }
  0x27   :  { %12356 = shalt.err (!%p12353_p1)
}
  0x28   :  { %s12526_s22 = smov 256   ;;  %s12527_s0 = smov 16  }
  0x29   :  { %79 = dma.hbm_to_vmem [thread:$0]  %s15060_s7, 512, %s74_s21, [#allocation9], %s12526_s22, %s12526_s22, %s12527_s0  }
  0x2a   :  { %s12357_s20 = scalar_lea.hbm %s15062_s9, 6144 }
  0x2b   :  { %p12358_p2 = scmp.ne.s32.totalorder %s15062_s9, %s12357_s20  ;;  %p12361_p3 = scmp.lt.u32.totalorder %s12357_s20, %s15062_s9 }
  0x2d   :  { %p12363_p4 = pnand %p12361_p3, %p12358_p2 }
  0x2f   :  { %12366 = shalt.err (!%p12363_p4)
}
  0x30   :  { %s12367_s28 = scalar_lea.vmem %s98_s24, 6144  ;;  %p12372_p6 = scmp.lt.s32.totalorder %s98_s24, %s98_s24 }
  0x31   :  { %p12368_p5 = scmp.ne.s32.totalorder %s98_s24, %s12367_s28  ;;  %p12373_p7 = scmp.lt.s32.totalorder %s12367_s28, %s12367_s28 }
  0x33   :  { %p12374_p8 = por %p12373_p7, %p12372_p6 }
  0x35   :  { %p12375_p9 = pnand %p12374_p8, %p12368_p5 }
  0x37   :  { %12378 = shalt.err (!%p12375_p9)
}
  0x38   :  { %s12528_s7 = smov 512   ;;  %s12529_s21 = smov 32  }
  0x39   :  { %103 = dma.hbm_to_vmem [thread:$0]  %s15062_s9, 6144, %s98_s24, [#allocation12], %s12528_s7, %s12528_s7, %s12529_s21  }
  0x3a   :  { %s12530_s4 = smov [#allocation14]   ;;  %s12531_s18 = smov [#allocation3]  }
  0x3b   :  { %s121_s17 = sshll.u32 %s12530_s4, 4  ;;  %s37_s16 = sshll.u32 %s12531_s18, 4  ;;  %s122_s17 = int_to_ptr.vmem [resolvable:$true] %s121_s17  ;;  %s38_s16 = int_to_ptr.vmem [resolvable:$true] %s37_s16 }
  0x3c   :  { %s12379_s23 = scalar_lea.hbm %s15065_s12, 256 }
  0x3d   :  { %p12380_p10 = scmp.ne.s32.totalorder %s15065_s12, %s12379_s23  ;;  %p12383_p11 = scmp.lt.u32.totalorder %s12379_s23, %s15065_s12 }
  0x3f   :  { %p12385_p12 = pnand %p12383_p11, %p12380_p10 }
  0x41   :  { %12388 = shalt.err (!%p12385_p12)
}
  0x42   :  { %s12389_s9 = scalar_lea.vmem %s122_s17, 256  ;;  %p12394_p0 = scmp.lt.s32.totalorder %s122_s17, %s122_s17 }
  0x43   :  { %p12390_p13 = scmp.ne.s32.totalorder %s122_s17, %s12389_s9  ;;  %p12395_p1 = scmp.lt.s32.totalorder %s12389_s9, %s12389_s9 }
  0x45   :  { %p12396_p2 = por %p12395_p1, %p12394_p0 }
  0x47   :  { %p12397_p3 = pnand %p12396_p2, %p12390_p13 }
  0x49   :  { %12400 = shalt.err (!%p12397_p3)
}
  0x4a   :  { %s12532_s24 = smov 128   ;;  %s12533_s7 = smov 8  }
  0x4b   :  { %127 = dma.hbm_to_vmem [thread:$0]  %s15065_s12, 256, %s122_s17, [#allocation15], %s12532_s24, %s12532_s24, %s12533_s7  }
  0x4c   :  { %s12401_s19 = scalar_lea.hbm %s15056_s3, 2304 }
  0x4d   :  { %p12402_p4 = scmp.ne.s32.totalorder %s15056_s3, %s12401_s19  ;;  %p12405_p5 = scmp.lt.u32.totalorder %s12401_s19, %s15056_s3 }
  0x4f   :  { %p12407_p6 = pnand %p12405_p5, %p12402_p4 }
  0x51   :  { %12410 = shalt.err (!%p12407_p6)
}
  0x52   :  { %s12411_s27 = scalar_lea.vmem %s38_s16, 2304  ;;  %p12416_p8 = scmp.lt.s32.totalorder %s38_s16, %s38_s16 }
  0x53   :  { %p12412_p7 = scmp.ne.s32.totalorder %s38_s16, %s12411_s27  ;;  %p12417_p9 = scmp.lt.s32.totalorder %s12411_s27, %s12411_s27 }
  0x55   :  { %p12418_p10 = por %p12417_p9, %p12416_p8 }
  0x57   :  { %p12419_p11 = pnand %p12418_p10, %p12412_p7 }
  0x59   :  { %12422 = shalt.err (!%p12419_p11)
}
  0x5a   :  { %43 = dma.hbm_to_vmem [thread:$0]  %s15056_s3, 2304, %s38_s16, [#allocation4], %s12526_s22, %s12526_s22, %s12527_s0  }
  0x5b   :  { %s12534_s28 = smov [#allocation7]   ;;  %s12535_s29 = smov [#allocation10]  }
  0x5c   :  { %s64_s9 = sshll.u32 %s12534_s28, 4  ;;  %s85_s30 = sshll.u32 %s12535_s29, 4  ;;  %s65_s9 = int_to_ptr.vmem [resolvable:$true] %s64_s9  ;;  %s86_s30 = int_to_ptr.vmem [resolvable:$true] %s85_s30 }
  0x5d   :  { %s12423_s19 = scalar_lea.hbm %s15059_s6, 256 }
  0x5e   :  { %p12424_p12 = scmp.ne.s32.totalorder %s15059_s6, %s12423_s19  ;;  %p12427_p13 = scmp.lt.u32.totalorder %s12423_s19, %s15059_s6 }
  0x60   :  { %p12429_p0 = pnand %p12427_p13, %p12424_p12 }
  0x62   :  { %12432 = shalt.err (!%p12429_p0)
}
  0x63   :  { %s12433_s3 = scalar_lea.vmem %s65_s9, 256  ;;  %p12438_p2 = scmp.lt.s32.totalorder %s65_s9, %s65_s9 }
  0x64   :  { %p12434_p1 = scmp.ne.s32.totalorder %s65_s9, %s12433_s3  ;;  %p12439_p3 = scmp.lt.s32.totalorder %s12433_s3, %s12433_s3 }
  0x66   :  { %p12440_p4 = por %p12439_p3, %p12438_p2 }
  0x68   :  { %p12441_p5 = pnand %p12440_p4, %p12434_p1 }
  0x6a   :  { %12444 = shalt.err (!%p12441_p5)
}
  0x6b   :  { %67 = dma.hbm_to_vmem [thread:$0]  %s15059_s6, 256, %s65_s9, [#allocation6]  }
  0x6c   :  { %s12445_s12 = scalar_lea.hbm %s15061_s8, 1152 }
  0x6d   :  { %p12446_p6 = scmp.ne.s32.totalorder %s15061_s8, %s12445_s12  ;;  %p12449_p7 = scmp.lt.u32.totalorder %s12445_s12, %s15061_s8 }
  0x6f   :  { %p12451_p8 = pnand %p12449_p7, %p12446_p6 }
  0x71   :  { %12454 = shalt.err (!%p12451_p8)
}
  0x72   :  { %s12455_s18 = scalar_lea.vmem %s86_s30, 1152  ;;  %p12460_p10 = scmp.lt.s32.totalorder %s86_s30, %s86_s30 }
  0x73   :  { %p12456_p9 = scmp.ne.s32.totalorder %s86_s30, %s12455_s18  ;;  %p12461_p11 = scmp.lt.s32.totalorder %s12455_s18, %s12455_s18 }
  0x75   :  { %p12462_p12 = por %p12461_p11, %p12460_p10 }
  0x77   :  { %p12463_p13 = pnand %p12462_p12, %p12456_p9 }
  0x79   :  { %12466 = shalt.err (!%p12463_p13)
}
  0x7a   :  { %91 = dma.hbm_to_vmem [thread:$0]  %s15061_s8, 1152, %s86_s30, [#allocation9], %s12532_s24, %s12532_s24, %s12533_s7  }
  0x7b   :  { %s12536_s19 = smov [#allocation13]   ;;  %s12537_s23 = smov [#allocation16]  }
  0x7c   :  { %s112_s20 = sshll.u32 %s12536_s19, 4  ;;  %s135_s25 = sshll.u32 %s12537_s23, 4  ;;  %s113_s20 = int_to_ptr.vmem [resolvable:$true] %s112_s20  ;;  %s136_s25 = int_to_ptr.vmem [resolvable:$true] %s135_s25 }
  0x7d   :  { %s12467_s22 = scalar_lea.hbm %s15064_s11, 64 }
  0x7e   :  { %p12468_p0 = scmp.ne.s32.totalorder %s15064_s11, %s12467_s22  ;;  %p12471_p1 = scmp.lt.u32.totalorder %s12467_s22, %s15064_s11 }
  0x80   :  { %p12473_p2 = pnand %p12471_p1, %p12468_p0 }
  0x82   :  { %12476 = shalt.err (!%p12473_p2)
}
  0x83   :  { %s12477_s8 = scalar_lea.vmem %s113_s20, 64  ;;  %p12482_p4 = scmp.lt.s32.totalorder %s113_s20, %s113_s20 }
  0x84   :  { %p12478_p3 = scmp.ne.s32.totalorder %s113_s20, %s12477_s8  ;;  %p12483_p5 = scmp.lt.s32.totalorder %s12477_s8, %s12477_s8 }
  0x86   :  { %p12484_p6 = por %p12483_p5, %p12482_p4 }
  0x88   :  { %p12485_p7 = pnand %p12484_p6, %p12478_p3 }
  0x8a   :  { %12488 = shalt.err (!%p12485_p7)
}
  0x8b   :  { %115 = dma.hbm_to_vmem [thread:$0]  %s15064_s11, 64, %s113_s20, [#allocation12]  }
  0x8c   :  { %s12489_s4 = scalar_lea.hbm %s15067_s14, 512 }
  0x8d   :  { %p12490_p8 = scmp.ne.s32.totalorder %s15067_s14, %s12489_s4  ;;  %p12493_p9 = scmp.lt.u32.totalorder %s12489_s4, %s15067_s14 }
  0x8f   :  { %p12495_p10 = pnand %p12493_p9, %p12490_p8 }
  0x91   :  { %12498 = shalt.err (!%p12495_p10)
}
  0x92   :  { %s12499_s23 = scalar_lea.vmem %s136_s25, 512  ;;  %p12504_p12 = scmp.lt.s32.totalorder %s136_s25, %s136_s25 }
  0x93   :  { %p12500_p11 = scmp.ne.s32.totalorder %s136_s25, %s12499_s23  ;;  %p12505_p13 = scmp.lt.s32.totalorder %s12499_s23, %s12499_s23 }
  0x95   :  { %p12506_p0 = por %p12505_p13, %p12504_p12 }
  0x97   :  { %p12507_p1 = pnand %p12506_p0, %p12500_p11 }
  0x99   :  { %12510 = shalt.err (!%p12507_p1)
}
  0x9a   :  { %141 = dma.hbm_to_vmem [thread:$0]  %s15067_s14, 512, %s136_s25, [#allocation15], %s12532_s24, %s12532_s24, %s12533_s7  }
  0x9b   :  { %12511 = dma.done.wait [#allocation4], 2304  }
  0x9c   :  { %12512 = vsyncadd [#allocation4], 4294964992 }
  0x9d   :  { %12513 = dma.done.wait [#allocation6], 21760  }
  0x9e   :  { %12514 = vsyncadd [#allocation6], 4294945536 }
  0x9f   :  { %12515 = dma.done.wait [#allocation9], 1664  }
  0xa0   :  { %12516 = vsyncadd [#allocation9], 4294965632 }
  0xa1   :  { %12517 = dma.done.wait [#allocation12], 6208  }
  0xa2   :  { %12518 = vsyncadd [#allocation12], 4294961088 }
  0xa3   :  { %12519 = dma.done.wait [#allocation15], 768  }
  0xa4   :  { %12520 = vsyncadd [#allocation15], 4294966528  ;;  %v15074_v0 = vmov 2   ;;  %v12539_v1 = vmov 0   ;;  %s15086_s22 = sld [smem:[#allocation25_spill]]  ;;  %v175_v4 = vld [vmem:[%s15054_s1] sm:$0xff] }
  0xa5   :  { %11126 = vset.pattern.permute.xlu1 %v15074_v0  ;;  %11124 = vset.pattern.permute.xlu0 %v12539_v1  ;;  %v12540_v5 = vmov 1   ;;  %v218_v6 = vadd.s32 3, %v175_v4  ;;  %v261_v7 = vld [vmem:[#allocation3 + $0x8] sm:$0xff]  ;;  %v263_v8 = vld [vmem:[#allocation3 + $0x18] sm:$0xff]  ;;  %v260_v10 = vld [vmem:[#allocation3] sm:$0xff]  ;;  %v232_v13 = vadd.s32 15, %v175_v4 }
  0xa6   :  { %v10310_v9 = vpack.c.bf16 %v263_v8, %v261_v7  ;;  %v262_v11 = vld [vmem:[#allocation3 + $0x10] sm:$0xff]  ;;  %v15072_v14 = vmov 0.0   ;;  %v265_v15 = vld [vmem:[#allocation3 + $0x28] sm:$0xff]  ;;  %v267_v16 = vld [vmem:[#allocation3 + $0x38] sm:$0xff]  ;;  %v246_v32 = vadd.s32 46, %v175_v4  ;;  %vm297_vm0 = vcmask 1045504  }
  0xa7   :  { %v10312_v12 = vpack.c.bf16 %v262_v11, %v260_v10  ;;  %368 = vmatprep.mubr.f32.mxu0 %v15072_v14  ;;  %v176_v17 = vld [vmem:[%s15054_s1 + $0x8] sm:$0xff]  ;;  %v10314_v18 = vpack.c.bf16 %v267_v16, %v265_v15  ;;  %v264_v19 = vld [vmem:[#allocation3 + $0x20] sm:$0xff]  ;;  %v269_v24 = vld [vmem:[#allocation3 + $0x48] sm:$0xff]  ;;  %v15076_v43 = vmov 0.0|0.0   ;;  %vm290_vm9 = vcmask 572416   ;;  %s12543_s4 = smov 122  }
  0xa8   :  { %10311 = vmatprep.subr.bf16.mxu0 %v10310_v9  ;;  %v266_v20 = vld [vmem:[#allocation3 + $0x30] sm:$0xff]  ;;  %v219_v22 = vadd.s32 3, %v176_v17  ;;  %v233_v23 = vadd.s32 15, %v176_v17  ;;  %v271_v25 = vld [vmem:[#allocation3 + $0x58] sm:$0xff]  ;;  %v268_v27 = vld [vmem:[#allocation3 + $0x40] sm:$0xff]  ;;  %v247_v37 = vadd.s32 46, %v176_v17  ;;  %10326 = vmatprep.subr.bf16.mxu1 %v15076_v43 }
  0xa9   :  { %10313 = vmatpush1.bf16.msra.mxu0 %v10312_v12  ;;  %v10316_v21 = vpack.c.bf16 %v266_v20, %v264_v19  ;;  %v10318_v26 = vpack.c.bf16 %v271_v25, %v269_v24  ;;  %v270_v28 = vld [vmem:[#allocation3 + $0x50] sm:$0xff]  ;;  %v273_v30 = vld [vmem:[#allocation3 + $0x68] sm:$0xff]  ;;  %v275_v31 = vld [vmem:[#allocation3 + $0x78] sm:$0xff]  ;;  %vm406_vm11 = vcmask 523264   ;;  %s12544_s18 = smov 64   ;;  %vm503_vm12 = vcmask 261120  }
  0xaa   :  { %v173_v2 = vld [vmem:[%s15086_s22] sm:$0xff]  ;;  %v174_v3 = vld [vmem:[%s15086_s22 + $0x8] sm:$0xff]  ;;  %10315 = vmatprep.subr.bf16.mxu0 %v10314_v18  ;;  %v10320_v29 = vpack.c.bf16 %v270_v28, %v268_v27  ;;  %v10322_v33 = vpack.c.bf16 %v275_v31, %v273_v30  ;;  %v272_v34 = vld [vmem:[#allocation3 + $0x60] sm:$0xff]  ;;  %vm587_vm15 = vcmask 48128   ;;  %s12546_s6 = smov 116   ;;  %s12549_s23 = smov 125  }
  0xab   :  { %207 = vperm.xlu1 %11126, %v173_v2   ;;  %180 = vperm.xlu0 %11124, %v173_v2   ;;  %v274_v35 = vld [vmem:[#allocation3 + $0x70] sm:$0xff]  ;;  %v277_v38 = vld [vmem:[#allocation3 + $0x88] sm:$0x3f]  ;;  %v276_v39 = vld [vmem:[#allocation3 + $0x80] sm:$0x3f]  ;;  %s12551_s9 = smov 120  }
  0xac   :  { %v10324_v36 = vpack.c.bf16 %v274_v35, %v272_v34  ;;  %v12784_v40 = vld [vmem:[#allocation5 + $0x30] sm:$0xff]  ;;  %v12786_v41 = vld [vmem:[#allocation5 + $0x68] sm:$0xff]  ;;  %v12788_v42 = vld [vmem:[#allocation5 + $0xa0] sm:$0xff]  ;;  %s12552_s19 = smov 112  }
  0xad   :  { %10317 = vmatpush1.bf16.msra.mxu0 %v10316_v21  ;;  %v10327_v44 = vpack.c.bf16 %v12786_v41, %v12784_v40  ;;  %v12794_v45 = vld [vmem:[#allocation5 + $0xd8] sm:$0xff]  ;;  %v12799_v47 = vld [vmem:[#allocation5 + $0x110] sm:$0xff]  ;;  %v12801_v48 = vld [vmem:[#allocation5 + $0x148] sm:$0xff] }
  0xae   :  { %10319 = vmatprep.subr.bf16.mxu0 %v10318_v26  ;;  %v10330_v46 = vpack.c.bf16 %v12794_v45, %v12788_v42  ;;  %v10333_v49 = vpack.c.bf16 %v12801_v48, %v12799_v47  ;;  %v12806_v50 = vld [vmem:[#allocation5 + $0x180] sm:$0xff]  ;;  %v12808_v51 = vld [vmem:[#allocation5 + $0x1b8] sm:$0xff]  ;;  %v12813_v53 = vld [vmem:[#allocation5 + $0x1f0] sm:$0xff] }
  0xaf   :  { %11127 = vset.pattern.permute.xlu1 %v12539_v1  ;;  %11125 = vset.pattern.permute.xlu0 %v12540_v5  ;;  %v10336_v52 = vpack.c.bf16 %v12808_v51, %v12806_v50  ;;  %v12815_v54 = vld [vmem:[#allocation5 + $0x228] sm:$0xff]  ;;  %v12820_v56 = vld [vmem:[#allocation5 + $0x260] sm:$0xff]  ;;  %v12822_v57 = vld [vmem:[#allocation5 + $0x298] sm:$0xff] }
  0xb0   :  { %185 = vperm.xlu1 %11127, %v174_v3   ;;  %194 = vperm.xlu0 %11125, %v173_v2   ;;  %v10339_v55 = vpack.c.bf16 %v12815_v54, %v12813_v53  ;;  %v10342_v58 = vpack.c.bf16 %v12822_v57, %v12820_v56  ;;  %v12827_v59 = vld [vmem:[#allocation5 + $0x2d0] sm:$0xff]  ;;  %v12829_v60 = vld [vmem:[#allocation5 + $0x308] sm:$0xff]  ;;  %v12834_v62 = vld [vmem:[#allocation5 + $0x340] sm:$0xff] }
  0xb1   :  { %10321 = vmatpush1.bf16.msra.mxu0 %v10320_v29  ;;  %10328 = vmatpush1.bf16.msra.mxu1 %v10327_v44  ;;  %v10345_v61 = vpack.c.bf16 %v12829_v60, %v12827_v59  ;;  %v12836_v63 = vld [vmem:[#allocation5 + $0x378] sm:$0xff]  ;;  %v12841_v2 = vld [vmem:[#allocation5 + $0x3b0] sm:$0xff]  ;;  %v12857_v9 = vld [vmem:[#allocation5 + $0x4c8] sm:$0xff] }
  0xb2   :  { %10323 = vmatprep.subr.bf16.mxu0 %v10322_v33  ;;  %10329 = vmatprep.subr.bf16.mxu1 %v15076_v43  ;;  %v12855_v8 = vld [vmem:[#allocation5 + $0x490] sm:$0xff] }
  0xb3   :  { %v10357_v10 = vpack.c.bf16 %v12857_v9, %v12855_v8 }
  0xb4   :  { %221 = vperm.xlu1 %11127, %v218_v6   ;;  %198 = vperm.xlu0 %11125, %v174_v3   ;;  %v12850_v6 = vld [vmem:[#allocation5 + $0x458] sm:$0xff] }
  0xb5   :  { %10325 = vmatpush1.bf16.msra.mxu0 %v10324_v36  ;;  %10331 = vmatpush1.bf16.msra.mxu1 %v10330_v46 }
  0xb6   :  { %8842 = vmatprep.subr.msk.mxu0 %vm297_vm0, %v277_v38  ;;  %10332 = vmatprep.subr.bf16.mxu1 %v15076_v43 }
  0xb8   :  { %11128 = vset.pattern.permute.xlu1 %v12540_v5  ;;  %11129 = vset.pattern.permute.xlu0 %v15074_v0 }
  0xb9   :  { %235 = vperm.xlu1 %11128, %v232_v13   ;;  %211 = vperm.xlu0 %11129, %v174_v3   ;;  %v12843_v3 = vld [vmem:[#allocation5 + $0x3e8] sm:$0xff]  ;;  %v171_v13 = vlaneseq }
  0xba   :  { %8843 = vmatpush1.msk.msra.mxu0 %vm297_vm0, %v276_v39  ;;  %10334 = vmatpush1.bf16.msra.mxu1 %v10333_v49  ;;  %v10351_v4 = vpack.c.bf16 %v12843_v3, %v12841_v2 }
  0xbb   :  { %10335 = vmatprep.subr.bf16.mxu1 %v15076_v43  ;;  %v12863_v17 = vand.u32 127, %v171_v13 }
  0xbd   :  { %11130 = vset.pattern.permute.xlu1 %v12539_v1  ;;  %11132 = vset.pattern.permute.xlu0 %v12540_v5  ;;  %15087 = vst [vmem:[#allocation22_spill] sm:$0xff] %v12863_v17  ;;  %vm177_vm1 = vcmp.eq.s32.totalorder %v12863_v17, 0  ;;  %vm192_vm2 = vcmp.eq.s32.totalorder %v12863_v17, 1  ;;  %vm205_vm3 = vcmp.eq.s32.totalorder %v12863_v17, 2 }
  0xbe   :  { %224 = vperm.xlu1 %11130, %v219_v22   ;;  %238 = vperm.xlu0 %11132, %v233_v23  }
  0xbf   :  { %10337 = vmatpush1.bf16.msra.mxu1 %v10336_v52 }
  0xc0   :  { %10338 = vmatprep.subr.bf16.mxu1 %v15076_v43 }
  0xc2   :  { %11131 = vset.pattern.permute.xlu1 %v15074_v0  ;;  %11493 = vset.pattern.permute.xlu0 %v12539_v1  ;;  %v10348_v1 = vpack.c.bf16 %v12836_v63, %v12834_v62  ;;  %v1037_v0 = vld [vmem:[#allocation5 + $0x428] sm:$0xff] }
  0xc3   :  { %249 = vperm.xlu1 %11131, %v246_v32   ;;  %10340 = vmatpush1.bf16.msra.mxu1 %v10339_v55 }
  0xc4   :  { %10341 = vmatprep.subr.bf16.mxu1 %v15076_v43 }
  0xc7   :  { %252 = vperm.xlu1 %11131, %v247_v37   ;;  %10343 = vmatpush1.bf16.msra.mxu1 %v10342_v58 }
  0xc8   :  { %10344 = vmatprep.subr.bf16.mxu1 %v15076_v43 }
  0xcb   :  { %11494 = vset.pattern.permute.xlu1 %v12540_v5  ;;  %10346 = vmatpush1.bf16.msra.mxu1 %v10345_v61  ;;  %v12848_v5 = vld [vmem:[#allocation5 + $0x420] sm:$0xff] }
  0xcc   :  { %10347 = vmatprep.subr.bf16.mxu1 %v15076_v43  ;;  %v10354_v7 = vpack.c.bf16 %v12850_v6, %v12848_v5 }
  0xcf   :  { %10349 = vmatpush1.bf16.msra.mxu1 %v10348_v1 }
  0xd0   :  { %10350 = vmatprep.subr.bf16.mxu1 %v15076_v43 }
  0xd3   :  { %10352 = vmatpush1.bf16.msra.mxu1 %v10351_v4  ;;  %v12885_v4 = vld [vmem:[#allocation5 + $0x500] sm:$0xff] }
  0xd4   :  { %10353 = vmatprep.subr.bf16.mxu1 %v15076_v43 }
  0xd7   :  { %10355 = vmatpush1.bf16.msra.mxu1 %v10354_v7  ;;  %v12887_v7 = vld [vmem:[#allocation5 + $0x538] sm:$0xff] }
  0xd8   :  { %10356 = vmatprep.subr.bf16.mxu1 %v15076_v43 }
  0xdb   :  { %10358 = vmatpush1.bf16.msra.mxu1 %v10357_v10  ;;  %v10360_v10 = vpack.c.bf16 %v12887_v7, %v12885_v4 }
  0xdc   :  { %10359 = vmatprep.subr.bf16.mxu1 %v15076_v43  ;;  %v1039_v43 = vld [vmem:[#allocation5 + $0x460] sm:$0xff] }
  0xdf   :  { %10361 = vmatpush1.bf16.msra.mxu1 %v10360_v10  ;;  %v1011_v10 = vld [vmem:[#allocation5 + $0x150] sm:$0xff] }
 0x12a   :  { %v208_v11 = vpop.permute.xlu1 %207  ;;  %v181_v12 = vpop.permute.xlu0 %180 }
 0x12b   :  { %v188_v20 = vsel %vm177_vm1, %v181_v12, 0.0  ;;  %v214_v25 = vsel %vm205_vm3, %v208_v11, 0.0  ;;  %v12891_v11 = vld [vmem:[#allocation5 + $0x8] sm:$0xff]  ;;  %v12893_v12 = vld [vmem:[#allocation5 + $0x40] sm:$0xff] }
 0x12f   :  { %v186_v15 = vpop.permute.xlu1 %185  ;;  %v195_v16 = vpop.permute.xlu0 %194 }
 0x130   :  { %v201_v21 = vsel %vm192_vm2, %v195_v16, 0.0  ;;  %v189_v29 = vsel %vm177_vm1, %v186_v15, 0.0  ;;  %v10406_v15 = vpack.c.bf16 %v12893_v12, %v12891_v11  ;;  %v281_v16 = vshrl.u32 %v171_v13, 7 }
 0x131   :  { %v203_v23 = vadd.f32 %v201_v21, %v188_v20 }
 0x132   :  { %10407 = vmatprep.subr.bf16.mxu1 %v10406_v15  ;;  %v12899_v20 = vsub.s32 0, %v281_v16  ;;  %v1013_v15 = vld [vmem:[#allocation5 + $0x188] sm:$0xff] }
 0x133   :  { %v222_v18 = vpop.permute.xlu1 %221  ;;  %v199_v19 = vpop.permute.xlu0 %198  ;;  %v216_v27 = vadd.f32 %v214_v25, %v203_v23  ;;  %v999_v23 = vld [vmem:[#allocation5] sm:$0xff] }
 0x134   :  { %vm226_vm4 = vcmp.eq.s32.totalorder %v12863_v17, %v222_v18  ;;  %v202_v26 = vsel %vm192_vm2, %v199_v19, 0.0  ;;  %v12897_v18 = vsub.s32 1, %v281_v16  ;;  %v278_v19 = vld [vmem:[#allocation8] ss:$8 sm:$0x3]  ;;  %15089 = vst [vmem:[#allocation24_spill] sm:$0xff] %v12899_v20 }
 0x135   :  { %v228_v30 = vsel %vm226_vm4, 1.0, %v15072_v14  ;;  %v204_v33 = vadd.f32 %v202_v26, %v189_v29  ;;  %v12903_v26 = vld [vmem:[#allocation5 + $0x78] sm:$0xff]  ;;  %v12937_v16 = vld [vmem:[#allocation5 + $0x1c8] sm:$0xff] }
 0x136   :  { %v230_v36 = vadd.f32 %v228_v30, %v216_v27  ;;  %15088 = vst [vmem:[#allocation23_spill] sm:$0xff] %v12897_v18  ;;  %v287_v21 = vrot.slane %v278_v19, %v12897_v18  ;;  %v12905_v27 = vld [vmem:[#allocation5 + $0xb0] sm:$0xff]  ;;  %v1045_v18 = vld [vmem:[#allocation5 + $0x508] sm:$0xff] }
 0x138   :  { %v236_v22 = vpop.permute.xlu1 %235  ;;  %v212_v24 = vpop.permute.xlu0 %211 }
 0x139   :  { %vm240_vm5 = vcmp.eq.s32.totalorder %v12863_v17, %v236_v22  ;;  %v215_v31 = vsel %vm205_vm3, %v212_v24, 0.0  ;;  %v283_v22 = vrot.slane %v278_v19, %v12899_v20  ;;  %v1001_v24 = vld [vmem:[#allocation5 + $0x38] sm:$0xff]  ;;  %v12939_v19 = vld [vmem:[#allocation5 + $0x200] sm:$0xff]  ;;  %v1043_v20 = vld [vmem:[#allocation5 + $0x4d0] sm:$0xff] }
 0x13a   :  { %v242_v34 = vsel %vm240_vm5, 1.0, %v15072_v14  ;;  %v217_v37 = vadd.f32 %v215_v31, %v204_v33  ;;  %v10408_v13 = vpack.c.bf16 %v1001_v24, %v999_v23  ;;  %v10410_v31 = vpack.c.bf16 %v12905_v27, %v12903_v26  ;;  %v1005_v33 = vld [vmem:[#allocation5 + $0xa8] sm:$0xff]  ;;  %v1015_v23 = vld [vmem:[#allocation5 + $0x1c0] sm:$0xff]  ;;  %v1017_v24 = vld [vmem:[#allocation5 + $0x1f8] sm:$0xff] }
 0x13b   :  { %v244_v39 = vadd.f32 %v242_v34, %v230_v36  ;;  %v12917_v36 = vld [vmem:[#allocation5 + $0x120] sm:$0xff]  ;;  %vm2208_vm5 = vcmask 949248  }
 0x13d   :  { %v225_v28 = vpop.permute.xlu1 %224  ;;  %v239_v32 = vpop.permute.xlu0 %238 }
 0x13e   :  { %vm227_vm6 = vcmp.eq.s32.totalorder %v12863_v17, %v225_v28  ;;  %vm241_vm7 = vcmp.eq.s32.totalorder %v12863_v17, %v239_v32  ;;  %v1003_v32 = vld [vmem:[#allocation5 + $0x70] sm:$0xff] }
 0x13f   :  { %v229_v35 = vsel %vm227_vm6, 1.0, %v15072_v14  ;;  %v243_v46 = vsel %vm241_vm7, 1.0, %v15072_v14  ;;  %vm12547_vm6 = vmmov 0  }
 0x140   :  { %v231_v44 = vadd.f32 %v229_v35, %v217_v37  ;;  %v12915_v35 = vld [vmem:[#allocation5 + $0xe8] sm:$0xff] }
 0x142   :  { %v250_v38 = vpop.permute.xlu1 %249  ;;  %v245_v58 = vadd.f32 %v243_v46, %v231_v44  ;;  %v10414_v46 = vpack.c.bf16 %v12917_v36, %v12915_v35 }
 0x143   :  { %vm254_vm8 = vcmp.eq.s32.totalorder %v12863_v17, %v250_v38 }
 0x144   :  { %v256_v49 = vsel %vm254_vm8, 1.0, %v15072_v14 }
 0x145   :  { %v258_v52 = vadd.f32 %v256_v49, %v244_v39  ;;  %v10412_v39 = vpack.c.bf16 %v1005_v33, %v1003_v32  ;;  %v1007_v49 = vld [vmem:[#allocation5 + $0xe0] sm:$0xff]  ;;  %v1019_v32 = vld [vmem:[#allocation5 + $0x230] sm:$0xff]  ;;  %v1021_v33 = vld [vmem:[#allocation5 + $0x268] sm:$0xff] }
 0x146   :  { %v253_v55 = vpop.permute.xlu1 %252 }
 0x147   :  { %vm255_vm10 = vcmp.eq.s32.totalorder %v12863_v17, %v253_v55  ;;  %8844 = vmatmul.mubr.msk.f32.vlgmr.msra.gmra.mrb[0].mxu0 %vm290_vm9, %v258_v52  ;;  %v1009_v52 = vld [vmem:[#allocation5 + $0x118] sm:$0xff] }
 0x148   :  { %v257_v61 = vsel %vm255_vm10, 1.0, %v15072_v14  ;;  %374 = vmatprep.mubr.f32.mxu0 %v15072_v14  ;;  %v12928_v55 = vld [vmem:[#allocation5 + $0x158] sm:$0xff]  ;;  %v1035_v14 = vld [vmem:[#allocation5 + $0x3f0] sm:$0xff]  ;;  %vm2802_vm10 = vcmask 1042432  }
 0x149   :  { %v259_v1 = vadd.f32 %v257_v61, %v245_v58  ;;  %v12930_v58 = vld [vmem:[#allocation5 + $0x190] sm:$0xff]  ;;  %v10416_v61 = vpack.c.bf16 %v1009_v52, %v1007_v49  ;;  %v1023_v49 = vld [vmem:[#allocation5 + $0x2a0] sm:$0xff]  ;;  %v1025_v52 = vld [vmem:[#allocation5 + $0x2d8] sm:$0xff] }
 0x14a   :  { %v1041_v17 = vld [vmem:[#allocation5 + $0x498] sm:$0xff] }
 0x14b   :  { %8845 = vmatmul.mubr.msk.f32.gmra.mrb[2].mxu0 %vm290_vm9, %v259_v1  ;;  %v10418_v1 = vpack.c.bf16 %v12930_v58, %v12928_v55 }
 0x21a   :  { %v370_v25 = vpop.f32.mrb[0].mxu0 }
 0x21b   :  { %v372_v28 = vpop.f32.mrb[1].mxu0  ;;  %v12909_v30 = vadd.f32 %v370_v25, %v283_v22  ;;  %v12943_v25 = vld [vmem:[#allocation5 + $0x238] sm:$0xff] }
 0x21c   :  { %v12907_v29 = vadd.f32 %v372_v28, %v287_v21  ;;  %v12945_v28 = vld [vmem:[#allocation5 + $0x270] sm:$0xff] }
 0x21e   :  { %v376_v34 = vpop.f32.mrb[2].mxu0  ;;  %8846 = vmatprep.mubr.msk.f32.mxu1 %vm406_vm11, %v12907_v29 }
 0x21f   :  { %v378_v37 = vpop.f32.mrb[3].mxu0  ;;  %478 = vmatmul.mubr.f32.vlgmr.msra.gmra.mrb[0].mxu1 %v12909_v30  ;;  %v12922_v44 = vadd.f32 %v376_v34, %v283_v22  ;;  %v10422_v22 = vpack.c.bf16 %v12939_v19, %v12937_v16  ;;  %v12949_v34 = vld [vmem:[#allocation5 + $0x2a8] sm:$0xff] }
 0x220   :  { %v12920_v38 = vadd.f32 %v378_v37, %v287_v21  ;;  %10409 = vmatpush1.bf16.msra.mxu1 %v10408_v13  ;;  %v10420_v21 = vpack.c.bf16 %v1013_v15, %v1011_v10  ;;  %v10424_v13 = vpack.c.bf16 %v1017_v24, %v1015_v23  ;;  %v12951_v37 = vld [vmem:[#allocation5 + $0x2e0] sm:$0xff]  ;;  %v10432_v10 = vpack.c.bf16 %v1025_v52, %v1023_v49  ;;  %v12961_v23 = vld [vmem:[#allocation5 + $0x388] sm:$0xff] }
 0x221   :  { %10411 = vmatprep.subr.bf16.mxu1 %v10410_v31  ;;  %v10426_v31 = vpack.c.bf16 %v12945_v28, %v12943_v25  ;;  %v12963_v24 = vld [vmem:[#allocation5 + $0x3c0] sm:$0xff] }
 0x222   :  { %8847 = vmatprep.mubr.msk.f32.mxu1 %vm406_vm11, %v12920_v38 }
 0x223   :  { %483 = vmatmul.mubr.f32.gmra.mrb[2].mxu1 %v12922_v44 }
 0x224   :  { %10413 = vmatpush1.bf16.msra.mxu1 %v10412_v39  ;;  %8862 = vmatprep.mubr.msk.f32.mxu1 %vm406_vm11, %v12907_v29  ;;  %v10428_v39 = vpack.c.bf16 %v1021_v33, %v1019_v32  ;;  %v1031_v32 = vld [vmem:[#allocation5 + $0x380] sm:$0xff]  ;;  %v1033_v33 = vld [vmem:[#allocation5 + $0x3b8] sm:$0xff] }
 0x225   :  { %10415 = vmatprep.subr.bf16.mxu1 %v10414_v46  ;;  %v10430_v46 = vpack.c.bf16 %v12951_v37, %v12949_v34  ;;  %v10440_v49 = vpack.c.bf16 %v1033_v33, %v1031_v32  ;;  %v10448_v32 = vpack.c.bf16 %v1041_v17, %v1039_v43  ;;  %v499_v43 = vld [vmem:[%s15058_s5 + $0x8] sm:$0xff] }
 0x228   :  { %10417 = vmatpush1.bf16.msra.mxu1 %v10416_v61  ;;  %v12955_v61 = vld [vmem:[#allocation5 + $0x318] sm:$0xff] }
 0x229   :  { %10419 = vmatprep.subr.bf16.mxu1 %v10418_v1  ;;  %v12957_v1 = vld [vmem:[#allocation5 + $0x350] sm:$0xff] }
 0x22a   :  { %v10434_v15 = vpack.c.bf16 %v12957_v1, %v12955_v61 }
 0x22c   :  { %10421 = vmatpush1.bf16.msra.mxu1 %v10420_v21  ;;  %v1027_v21 = vld [vmem:[#allocation5 + $0x310] sm:$0xff] }
 0x22d   :  { %10423 = vmatprep.subr.bf16.mxu1 %v10422_v22  ;;  %v1029_v22 = vld [vmem:[#allocation5 + $0x348] sm:$0xff] }
 0x230   :  { %10425 = vmatpush1.bf16.msra.mxu1 %v10424_v13  ;;  %v10436_v13 = vpack.c.bf16 %v1029_v22, %v1027_v21  ;;  %v10444_v21 = vpack.c.bf16 %v1037_v0, %v1035_v14  ;;  %v10452_v0 = vpack.c.bf16 %v1045_v18, %v1043_v20  ;;  %v498_v14 = vld [vmem:[%s15058_s5] sm:$0xff]  ;;  %v500_v18 = vld [vmem:[%s15058_s5 + $0x10] sm:$0xff]  ;;  %v501_v20 = vld [vmem:[%s15058_s5 + $0x18] sm:$0xff]  ;;  %s12545_s5 = smov 58  }
 0x231   :  { %10427 = vmatprep.subr.bf16.mxu1 %v10426_v31  ;;  %v10438_v31 = vpack.c.bf16 %v12963_v24, %v12961_v23  ;;  %v10362_v17 = vpack.c.bf16 %v499_v43, %v498_v14  ;;  %v1184_v14 = vld [vmem:[#allocation5 + $0x2e8] sm:$0xff]  ;;  %v1186_v43 = vld [vmem:[#allocation5 + $0x320] sm:$0xff] }
 0x233   :  { %10363 = vmatprep.subr.bf16.mxu0 %v10362_v17 }
 0x234   :  { %10429 = vmatpush1.bf16.msra.mxu1 %v10428_v39  ;;  %v12967_v39 = vld [vmem:[#allocation5 + $0x3f8] sm:$0xff]  ;;  %10365 = vmatpush3.bf16.msra.mxu0 %v10362_v17 }
 0x235   :  { %10431 = vmatprep.subr.bf16.mxu1 %v10430_v46  ;;  %v12969_v46 = vld [vmem:[#allocation5 + $0x430] sm:$0xff]  ;;  %v1188_v17 = vld [vmem:[#allocation5 + $0x358] sm:$0xff] }
 0x236   :  { %v10442_v52 = vpack.c.bf16 %v12969_v46, %v12967_v39 }
 0x238   :  { %10433 = vmatpush1.bf16.msra.mxu1 %v10432_v10  ;;  %v12973_v10 = vld [vmem:[#allocation5 + $0x468] sm:$0xff] }
 0x239   :  { %10435 = vmatprep.subr.bf16.mxu1 %v10434_v15  ;;  %v12975_v15 = vld [vmem:[#allocation5 + $0x4a0] sm:$0xff] }
 0x23a   :  { %v10446_v22 = vpack.c.bf16 %v12975_v15, %v12973_v10 }
 0x23c   :  { %10437 = vmatpush1.bf16.msra.mxu1 %v10436_v13  ;;  %v12979_v13 = vld [vmem:[#allocation5 + $0x4d8] sm:$0xff] }
 0x23d   :  { %10439 = vmatprep.subr.bf16.mxu1 %v10438_v31  ;;  %v12981_v31 = vld [vmem:[#allocation5 + $0x510] sm:$0xff] }
 0x23e   :  { %v10450_v33 = vpack.c.bf16 %v12981_v31, %v12979_v13 }
 0x240   :  { %10441 = vmatpush1.bf16.msra.mxu1 %v10440_v49  ;;  %v10366_v49 = vpack.c.bf16 %v501_v20, %v500_v18  ;;  %v1190_v18 = vld [vmem:[#allocation5 + $0x390] sm:$0xff]  ;;  %v1192_v20 = vld [vmem:[#allocation5 + $0x3c8] sm:$0xff] }
 0x241   :  { %10443 = vmatprep.subr.bf16.mxu1 %v10442_v52  ;;  %v13001_v52 = vld [vmem:[#allocation7] sm:$0x3f] }
 0x242   :  { %10367 = vmatprep.subr.bf16.mxu0 %v10366_v49  ;;  %685 = vrot.lane.b32.xlu1 %v13001_v52, %s12543_s4 }
 0x243   :  { %10369 = vmatpush3.bf16.msra.mxu0 %v10366_v49  ;;  %v1194_v49 = vld [vmem:[#allocation5 + $0x400] sm:$0xff] }
 0x244   :  { %10445 = vmatpush1.bf16.msra.mxu1 %v10444_v21  ;;  %v11133_v21 = vpack.i.bf16 %v12786_v41, %v12784_v40  ;;  %9476 = vmatprep.subr.msk.mxu0 %vm297_vm0, %v13001_v52  ;;  %v11148_v40 = vpack.i.bf16 %v12808_v51, %v12806_v50  ;;  %v11153_v41 = vpack.i.bf16 %v12815_v54, %v12813_v53  ;;  %v1158_v53 = vld [vmem:[#allocation5 + $0x10] sm:$0xff] }
 0x245   :  { %10447 = vmatprep.subr.bf16.mxu1 %v10446_v22  ;;  %v11138_v22 = vpack.i.bf16 %v12794_v45, %v12788_v42  ;;  %v11158_v42 = vpack.i.bf16 %v12822_v57, %v12820_v56  ;;  %v11163_v45 = vpack.i.bf16 %v12829_v60, %v12827_v59  ;;  %v11178_v50 = vpack.i.bf16 %v12850_v6, %v12848_v5  ;;  %v1160_v56 = vld [vmem:[#allocation5 + $0x48] sm:$0xff]  ;;  %v1162_v59 = vld [vmem:[#allocation5 + $0x80] sm:$0xff] }
 0x246   :  { %11134 = vrot.lane.b32.xlu0 %v11133_v21, %s12544_s18  ;;  %v11183_v51 = vpack.i.bf16 %v12857_v9, %v12855_v8  ;;  %v11188_v54 = vpack.i.bf16 %v12887_v7, %v12885_v4  ;;  %v11193_v57 = vpack.i.bf16 %v1158_v53, %v12891_v11  ;;  %v11198_v60 = vpack.i.bf16 %v1160_v56, %v12893_v12  ;;  %v1168_v5 = vld [vmem:[#allocation5 + $0x128] sm:$0xff]  ;;  %v1170_v8 = vld [vmem:[#allocation5 + $0x160] sm:$0xff]  ;;  %v1172_v4 = vld [vmem:[#allocation5 + $0x198] sm:$0xff] }
 0x247   :  { %11139 = vrot.lane.b32.xlu1 %v11138_v22, %s12544_s18  ;;  %v11218_v9 = vpack.i.bf16 %v1168_v5, %v12917_v36  ;;  %v11223_v7 = vpack.i.bf16 %v1170_v8, %v12928_v55  ;;  %v1174_v11 = vld [vmem:[#allocation5 + $0x1d0] sm:$0xff]  ;;  %v11228_v12 = vpack.i.bf16 %v1172_v4, %v12930_v58  ;;  %v1196_v21 = vld [vmem:[#allocation5 + $0x438] sm:$0xff]  ;;  %v13109_v8 = vld [vmem:[#allocation5 + $0x20] sm:$0xff] }
 0x248   :  { %10449 = vmatpush1.bf16.msra.mxu1 %v10448_v32  ;;  %v11143_v32 = vpack.i.bf16 %v12801_v48, %v12799_v47  ;;  %v11168_v47 = vpack.i.bf16 %v12836_v63, %v12834_v62  ;;  %v11173_v48 = vpack.i.bf16 %v12843_v3, %v12841_v2  ;;  %v1164_v62 = vld [vmem:[#allocation5 + $0xb8] sm:$0xff]  ;;  %v11203_v63 = vpack.i.bf16 %v1162_v59, %v12903_v26  ;;  %v1166_v2 = vld [vmem:[#allocation5 + $0xf0] sm:$0xff]  ;;  %v1176_v26 = vld [vmem:[#allocation5 + $0x208] sm:$0xff] }
 0x249   :  { %10451 = vmatprep.subr.bf16.mxu1 %v10450_v33  ;;  %v11208_v3 = vpack.i.bf16 %v1164_v62, %v12905_v27  ;;  %v11213_v6 = vpack.i.bf16 %v1166_v2, %v12915_v35  ;;  %v11233_v27 = vpack.i.bf16 %v1174_v11, %v12937_v16  ;;  %v1178_v35 = vld [vmem:[#allocation5 + $0x240] sm:$0xff]  ;;  %v11238_v36 = vpack.i.bf16 %v1176_v26, %v12939_v19  ;;  %v1180_v33 = vld [vmem:[#allocation5 + $0x278] sm:$0xff]  ;;  %v1198_v22 = vld [vmem:[#allocation5 + $0x470] sm:$0xff] }
 0x24a   :  { %11144 = vrot.lane.b32.xlu0 %v11143_v32, %s12544_s18  ;;  %v11243_v55 = vpack.i.bf16 %v1178_v35, %v12943_v25  ;;  %v11248_v58 = vpack.i.bf16 %v1180_v33, %v12945_v28  ;;  %v11258_v19 = vpack.i.bf16 %v1184_v14, %v12951_v37  ;;  %v11263_v25 = vpack.i.bf16 %v1186_v43, %v12955_v61  ;;  %v405_v32 = vld [vmem:[#allocation8 + $0x1] ss:$0 sm:$0xff]  ;;  %v13107_v5 = vld [vmem:[#allocation5 + $0x58] sm:$0xff]  ;;  %v13112_v4 = vld [vmem:[#allocation5 + $0xc8] sm:$0xff] }
 0x24b   :  { %11149 = vrot.lane.b32.xlu1 %v11148_v40, %s12544_s18  ;;  %v11268_v28 = vpack.i.bf16 %v1188_v17, %v12957_v1  ;;  %v11278_v37 = vpack.i.bf16 %v1192_v20, %v12963_v24  ;;  %v11283_v61 = vpack.i.bf16 %v1194_v49, %v12967_v39  ;;  %v11288_v1 = vpack.i.bf16 %v1196_v21, %v12969_v46  ;;  %v1202_v24 = vld [vmem:[#allocation5 + $0x4e0] sm:$0xff]  ;;  %v1690_v26 = vld [vmem:[#allocation5 + $0x98] sm:$0xff]  ;;  %v1700_v43 = vld [vmem:[#allocation5 + $0x1b0] sm:$0xff] }
 0x24c   :  { %10453 = vmatpush1.bf16.msra.mxu1 %v10452_v0  ;;  %v1182_v0 = vld [vmem:[#allocation5 + $0x2b0] sm:$0xff]  ;;  %v11303_v46 = vpack.i.bf16 %v1202_v24, %v12979_v13  ;;  %v1696_v33 = vld [vmem:[#allocation5 + $0x140] sm:$0xff]  ;;  %v1698_v17 = vld [vmem:[#allocation5 + $0x178] sm:$0xff] }
 0x24d   :  { %v11253_v16 = vpack.i.bf16 %v1182_v0, %v12949_v34  ;;  %v11273_v34 = vpack.i.bf16 %v1190_v18, %v12961_v23  ;;  %v1200_v23 = vld [vmem:[#allocation5 + $0x4a8] sm:$0xff]  ;;  %v1704_v20 = vld [vmem:[#allocation5 + $0x220] sm:$0xff] }
 0x24e   :  { %11154 = vrot.lane.b32.xlu0 %v11153_v41, %s12544_s18  ;;  %v11293_v41 = vpack.i.bf16 %v1198_v22, %v12973_v10  ;;  %v11298_v39 = vpack.i.bf16 %v1200_v23, %v12975_v15  ;;  %v1694_v0 = vld [vmem:[#allocation5 + $0x108] sm:$0xff]  ;;  %v1706_v23 = vld [vmem:[#allocation5 + $0x258] sm:$0xff] }
 0x24f   :  { %1125 = vmatmul.mubr.f32.vlgmr.msra.gmra.mrb[4].mxu1 %v12909_v30  ;;  %11159 = vrot.lane.b32.xlu1 %v11158_v42, %s12544_s18  ;;  %v1702_v49 = vld [vmem:[#allocation5 + $0x1e8] sm:$0xff] }
 0x250   :  { %8863 = vmatprep.mubr.msk.f32.mxu1 %vm406_vm11, %v12920_v38  ;;  %v13145_v22 = vld [vmem:[#allocation5 + $0x288] sm:$0xff] }
 0x252   :  { %11164 = vrot.lane.b32.xlu0 %v11163_v45, %s12544_s18 }
 0x253   :  { %1131 = vmatmul.mubr.f32.gmra.mrb[6].mxu1 %v12922_v44  ;;  %11169 = vrot.lane.b32.xlu1 %v11168_v47, %s12544_s18 }
 0x256   :  { %11174 = vrot.lane.b32.xlu0 %v11173_v48, %s12544_s18 }
 0x257   :  { %11179 = vrot.lane.b32.xlu1 %v11178_v50, %s12544_s18  ;;  %v1204_v50 = vld [vmem:[#allocation5 + $0x518] sm:$0xff] }
 0x258   :  { %v11308_v10 = vpack.i.bf16 %v1204_v50, %v12981_v31  ;;  %v1712_v50 = vld [vmem:[#allocation5 + $0x300] sm:$0xff] }
 0x25a   :  { %11184 = vrot.lane.b32.xlu0 %v11183_v51, %s12544_s18 }
 0x25b   :  { %11189 = vrot.lane.b32.xlu1 %v11188_v54, %s12544_s18 }
 0x25e   :  { %11194 = vrot.lane.b32.xlu0 %v11193_v57, %s12544_s18 }
 0x25f   :  { %11199 = vrot.lane.b32.xlu1 %v11198_v60, %s12544_s18 }
 0x262   :  { %11204 = vrot.lane.b32.xlu0 %v11203_v63, %s12544_s18 }
 0x263   :  { %11209 = vrot.lane.b32.xlu1 %v11208_v3, %s12544_s18 }
 0x266   :  { %11214 = vrot.lane.b32.xlu0 %v11213_v6, %s12544_s18  ;;  %v1688_v6 = vld [vmem:[#allocation5 + $0x60] sm:$0xff] }
 0x267   :  { %11219 = vrot.lane.b32.xlu1 %v11218_v9, %s12544_s18  ;;  %v1686_v9 = vld [vmem:[#allocation5 + $0x28] sm:$0xff] }
 0x268   :  { %v11313_v11 = vpack.i.bf16 %v1686_v9, %v13109_v8 }
 0x26a   :  { %11224 = vrot.lane.b32.xlu0 %v11223_v7, %s12544_s18  ;;  %v1692_v7 = vld [vmem:[#allocation5 + $0xd0] sm:$0xff] }
 0x26b   :  { %11229 = vrot.lane.b32.xlu1 %v11228_v12, %s12544_s18  ;;  %v13115_v12 = vld [vmem:[#allocation5 + $0x90] sm:$0xff] }
 0x26c   :  { %v11323_v35 = vpack.i.bf16 %v1690_v26, %v13115_v12  ;;  %v13172_v26 = vld [vmem:[#allocation5 + $0x330] sm:$0xff] }
 0x26e   :  { %11234 = vrot.lane.b32.xlu0 %v11233_v27, %s12544_s18  ;;  %v11328_v27 = vpack.i.bf16 %v1692_v7, %v13112_v4 }
 0x26f   :  { %11239 = vrot.lane.b32.xlu1 %v11238_v36, %s12544_s18  ;;  %v13121_v36 = vld [vmem:[#allocation5 + $0x138] sm:$0xff] }
 0x272   :  { %11244 = vrot.lane.b32.xlu0 %v11243_v55, %s12544_s18  ;;  %v13123_v55 = vld [vmem:[#allocation5 + $0x100] sm:$0xff] }
 0x273   :  { %11249 = vrot.lane.b32.xlu1 %v11248_v58, %s12544_s18  ;;  %v11338_v58 = vpack.i.bf16 %v1696_v33, %v13121_v36  ;;  %v11333_v14 = vpack.i.bf16 %v1694_v0, %v13123_v55 }
 0x276   :  { %11254 = vrot.lane.b32.xlu0 %v11253_v16, %s12544_s18  ;;  %v13129_v16 = vld [vmem:[#allocation5 + $0x1a8] sm:$0xff] }
 0x277   :  { %11259 = vrot.lane.b32.xlu1 %v11258_v19, %s12544_s18  ;;  %v13131_v19 = vld [vmem:[#allocation5 + $0x170] sm:$0xff] }
 0x278   :  { %v11343_v18 = vpack.i.bf16 %v1698_v17, %v13131_v19 }
 0x27a   :  { %11264 = vrot.lane.b32.xlu0 %v11263_v25, %s12544_s18  ;;  %v11348_v25 = vpack.i.bf16 %v1700_v43, %v13129_v16 }
 0x27b   :  { %11269 = vrot.lane.b32.xlu1 %v11268_v28, %s12544_s18  ;;  %v13137_v28 = vld [vmem:[#allocation5 + $0x218] sm:$0xff] }
 0x27c   :  { %v11358_v21 = vpack.i.bf16 %v1704_v20, %v13137_v28  ;;  %v13188_v20 = vld [vmem:[#allocation5 + $0x3a0] sm:$0xff] }
 0x27e   :  { %11274 = vrot.lane.b32.xlu0 %v11273_v34, %s12544_s18  ;;  %v13139_v34 = vld [vmem:[#allocation5 + $0x1e0] sm:$0xff] }
 0x27f   :  { %11279 = vrot.lane.b32.xlu1 %v11278_v37, %s12544_s18 }
 0x282   :  { %11284 = vrot.lane.b32.xlu0 %v11283_v61, %s12544_s18  ;;  %v11353_v61 = vpack.i.bf16 %v1702_v49, %v13139_v34  ;;  %v1718_v49 = vld [vmem:[#allocation5 + $0x3a8] sm:$0xff] }
 0x283   :  { %11289 = vrot.lane.b32.xlu1 %v11288_v1, %s12544_s18 }
 0x286   :  { %11294 = vrot.lane.b32.xlu0 %v11293_v41, %s12544_s18  ;;  %v502_v41 = vld [vmem:[#allocation8 + $0x2] ss:$0 sm:$0xff] }
 0x287   :  { %11299 = vrot.lane.b32.xlu1 %v11298_v39, %s12544_s18 }
 0x28a   :  { %11304 = vrot.lane.b32.xlu0 %v11303_v46, %s12544_s18 }
 0x28b   :  { %11309 = vrot.lane.b32.xlu1 %v11308_v10, %s12544_s18  ;;  %v13157_v10 = vld [vmem:[#allocation5 + $0x2c0] sm:$0xff] }
 0x28e   :  { %11314 = vrot.lane.b32.xlu0 %v11313_v11, %s12544_s18 }
 0x292   :  { %11324 = vrot.lane.b32.xlu0 %v11323_v35, %s12544_s18  ;;  %v15090_v35 = vmov 0.0|0.0  }
 0x296   :  { %11334 = vrot.lane.b32.xlu0 %v11333_v14, %s12544_s18  ;;  %v1720_v14 = vld [vmem:[#allocation5 + $0x3e0] sm:$0xff] }
 0x29a   :  { %11344 = vrot.lane.b32.xlu0 %v11343_v18, %s12544_s18 }
 0x29e   :  { %11354 = vrot.lane.b32.xlu0 %v11353_v61, %s12544_s18  ;;  %v11393_v61 = vpack.i.bf16 %v1718_v49, %v13188_v20 }
 0x2b4   :  { %v13103_v3 = vpop.permute.xlu1 %685 }
 0x2b8   :  { %v11135_v1 = vpop.permute.xlu0 %11134 }
 0x2b9   :  { %v11140_v37 = vpop.permute.xlu1 %11139 }
 0x2ba   :  { %v11142_v9 = vunpack.i.h.bf16 %v11140_v37  ;;  %v11141_v7 = vunpack.i.l.bf16 %v11140_v37 }
 0x2bc   :  { %v10374_v43 = vpack.c.bf16 %v11142_v9, %v11141_v7  ;;  %v13223_v7 = vld [vmem:[#allocation5 + $0x528] sm:$0xff] }
 0x2f2   :  { %v479_v40 = vpop.f32.mrb[0].mxu1 }
 0x2f3   :  { %v480_v42 = vadd.f32 %v479_v40, %v405_v32  ;;  %v481_v45 = vpop.f32.mrb[1].mxu1  ;;  %v13147_v40 = vld [vmem:[#allocation5 + $0x250] sm:$0xff] }
 0x2f4   :  { %v13149_v45 = vpop.permute.xlu1 %11149  ;;  %v11363_v39 = vpack.i.bf16 %v1706_v23, %v13147_v40 }
 0x2f5   :  { %v490_v47 = vmul.f32 1.442695, %v480_v42  ;;  %vm488_vm13 = vcmp.gt.f32.partialorder %v480_v42, 0.0 }
 0x2f6   :  { %v484_v48 = vpop.f32.mrb[2].mxu1  ;;  %11364 = vrot.lane.b32.xlu0 %v11363_v39, %s12544_s18  ;;  %v1722_v39 = vld [vmem:[#allocation5 + $0x418] sm:$0xff] }
 0x2f7   :  { %11942 = vpow2.f32 %v490_v47  ;;  %v485_v51 = vadd.f32 %v484_v48, %v405_v32  ;;  %v486_v53 = vpop.f32.mrb[3].mxu1  ;;  %v1708_v32 = vld [vmem:[#allocation5 + $0x290] sm:$0xff]  ;;  %v13155_v48 = vld [vmem:[#allocation5 + $0x2f8] sm:$0xff] }
 0x2f8   :  { %v11368_v24 = vpack.i.bf16 %v1708_v32, %v13145_v22  ;;  %v11136_v53 = vunpack.i.l.bf16 %v11135_v1  ;;  %v13197_v32 = vld [vmem:[#allocation5 + $0x448] sm:$0xff] }
 0x2f9   :  { %v492_v54 = vmul.f32 1.442695, %v485_v51  ;;  %vm489_vm14 = vcmp.gt.f32.partialorder %v485_v51, 0.0 }
 0x2fb   :  { %11944 = vpow2.f32 %v492_v54  ;;  %v11145_v54 = vpop.permute.xlu0 %11144 }
 0x2fc   :  { %v11147_v17 = vunpack.i.h.bf16 %v11145_v54 }
 0x2ff   :  { %v11155_v11 = vpop.permute.xlu0 %11154 }
 0x301   :  { %v11943_v15 = vpop.eup %11942 }
 0x302   :  { %v8848_v56 = vadd.f32 -1.0, %v11943_v15  ;;  %v1710_v15 = vld [vmem:[#allocation5 + $0x2c8] sm:$0xff] }
 0x303   :  { %v13186_v18 = vpop.permute.xlu0 %11164 }
 0x304   :  { %v496_v57 = vsel %vm488_vm13, %v480_v42, %v8848_v56  ;;  %vm2798_vm13 = vcmask 547840  }
 0x305   :  { %v11945_v59 = vpop.eup %11944  ;;  %9473 = vmatprep.mubr.msk.f32.mxu0 %vm503_vm12, %v496_v57  ;;  %v13160_v57 = vpop.permute.xlu1 %11159 }
 0x306   :  { %v8849_v13 = vadd.f32 -1.0, %v11945_v59  ;;  %v11378_v59 = vpack.i.bf16 %v1712_v50, %v13155_v48 }
 0x308   :  { %v497_v60 = vsel %vm489_vm14, %v485_v51, %v8849_v13  ;;  %v11137_v51 = vunpack.i.h.bf16 %v11135_v1  ;;  %v11373_v13 = vpack.i.bf16 %v1710_v15, %v13157_v10  ;;  %v1724_v1 = vld [vmem:[#allocation5 + $0x450] sm:$0xff]  ;;  %v11157_v15 = vunpack.i.h.bf16 %v11155_v11 }
 0x309   :  { %9474 = vmatmul.mubr.msk.f32.vlgmr.msra.gmra.mrb[4].mxu0 %vm503_vm12, %v497_v60  ;;  %v13167_v60 = vld [vmem:[#allocation5 + $0x368] sm:$0xff]  ;;  %v13175_v33 = vpop.permute.xlu1 %11169 }
 0x30a   :  { %9477 = vmatpush3.msk.msra.mxu0 %vm297_vm0, %v13001_v52  ;;  %v11318_v52 = vpack.i.bf16 %v1688_v6, %v13107_v5  ;;  %v1716_v6 = vld [vmem:[#allocation5 + $0x370] sm:$0xff]  ;;  %11374 = vrot.lane.b32.xlu0 %v11373_v13, %s12544_s18  ;;  %v13216_v13 = vld [vmem:[#allocation5 + $0x480] sm:$0xff] }
 0x30b   :  { %9481 = vmatprep.subr.msk.mxu0 %vm297_vm0, %v13103_v3  ;;  %v11388_v0 = vpack.i.bf16 %v1716_v6, %v13167_v60  ;;  %v1726_v6 = vld [vmem:[#allocation5 + $0x488] sm:$0xff] }
 0x30c   :  { %11319 = vrot.lane.b32.xlu1 %v11318_v52, %s12544_s18  ;;  %v10371_v52 = vpack.c.bf16 %v11137_v51, %v11136_v53  ;;  %v13212_v53 = vld [vmem:[#allocation5 + $0x4b8] sm:$0xff]  ;;  %v11413_v9 = vpack.i.bf16 %v1726_v6, %v13216_v13  ;;  %v11171_v6 = vunpack.i.l.bf16 %v13175_v33 }
 0x30d   :  { %v13191_v37 = vpop.permute.xlu1 %11179 }
 0x310   :  { %11329 = vrot.lane.b32.xlu1 %v11328_v27, %s12544_s18  ;;  %v1714_v27 = vld [vmem:[#allocation5 + $0x338] sm:$0xff] }
 0x311   :  { %v13206_v50 = vpop.permute.xlu1 %11189 }
 0x314   :  { %11339 = vrot.lane.b32.xlu1 %v11338_v58, %s12544_s18  ;;  %v13182_v58 = vld [vmem:[#allocation5 + $0x3d8] sm:$0xff] }
 0x318   :  { %11349 = vrot.lane.b32.xlu1 %v11348_v25, %s12544_s18  ;;  %v11146_v25 = vunpack.i.l.bf16 %v11145_v54 }
 0x31a   :  { %v10377_v23 = vpack.c.bf16 %v11147_v17, %v11146_v25  ;;  %v13231_v17 = vld [vmem:[#allocation5 + $0x4f0] sm:$0xff]  ;;  %v1730_v25 = vld [vmem:[#allocation5 + $0x4f8] sm:$0xff] }
 0x31c   :  { %11359 = vrot.lane.b32.xlu1 %v11358_v21, %s12544_s18  ;;  %v11398_v21 = vpack.i.bf16 %v1720_v14, %v13182_v58  ;;  %v13227_v14 = vpop.permute.xlu1 %11199 }
 0x320   :  { %11369 = vrot.lane.b32.xlu1 %v11368_v24, %s12544_s18  ;;  %v13201_v24 = vpop.permute.xlu0 %11174 }
 0x322   :  { %v13095_v31 = vpop.f32.mrb[4].mxu1 }
 0x323   :  { %v13097_v62 = vpop.f32.mrb[5].mxu1 }
 0x324   :  { %11379 = vrot.lane.b32.xlu1 %v11378_v59, %s12544_s18  ;;  %v13214_v59 = vpop.permute.xlu0 %11184 }
 0x326   :  { %v13099_v63 = vpop.f32.mrb[6].mxu1 }
 0x327   :  { %v13101_v2 = vpop.f32.mrb[7].mxu1 }
 0x328   :  { %11389 = vrot.lane.b32.xlu1 %v11388_v0, %s12544_s18 }
 0x32c   :  { %11399 = vrot.lane.b32.xlu1 %v11398_v21, %s12544_s18  ;;  %v11423_v21 = vpack.i.bf16 %v1730_v25, %v13231_v17  ;;  %v11177_v25 = vunpack.i.h.bf16 %v13201_v24 }
 0x3dc   :  { %v9475_v42 = vpop.f32.mrb[4].mxu0 }
 0x3dd   :  { %v576_v47 = vpop.f32.mrb[5].mxu0  ;;  %v582_v56 = vadd.f32 %v9475_v42, %v502_v41  ;;  %v11151_v42 = vunpack.i.l.bf16 %v13149_v45 }
 0x3de   :  { %v577_v46 = vadd.f32 %v576_v47, %v502_v41  ;;  %v11152_v41 = vunpack.i.h.bf16 %v13149_v45  ;;  %v13203_v47 = vld [vmem:[#allocation5 + $0x410] sm:$0xff]  ;;  %v1728_v45 = vld [vmem:[#allocation5 + $0x4c0] sm:$0xff] }
 0x3df   :  { %v11403_v51 = vpack.i.bf16 %v1722_v39, %v13203_v47  ;;  %v12253_v39 = vld [vmem:[#allocation5 + $0xd8] sm:$0xff] }
 0x3e0   :  { %9478 = vmatprep.mubr.msk.f32.mxu0 %vm587_vm15, %v577_v46  ;;  %v10380_v54 = vpack.c.bf16 %v11152_v41, %v11151_v42  ;;  %v12252_v42 = vld [vmem:[#allocation5 + $0xa0] sm:$0xff] }
 0x3e1   :  { %9479 = vmatmul.mubr.msk.f32.vlgmr.msra.gmra.mrb[6].mxu0 %vm587_vm15, %v582_v56 }
 0x3e2   :  { %9482 = vmatpush3.msk.msra.mxu0 %vm297_vm0, %v13103_v3  ;;  %9483 = vmatprep.mubr.msk.f32.mxu0 %vm587_vm15, %v577_v46  ;;  %v11383_v3 = vpack.i.bf16 %v1714_v27, %v13172_v26  ;;  %v11408_v46 = vpack.i.bf16 %v1724_v1, %v13197_v32  ;;  %v1732_v27 = vld [vmem:[#allocation5 + $0x530] sm:$0xff]  ;;  %v11166_v1 = vunpack.i.l.bf16 %v13186_v18 }
 0x3e3   :  { %10370 = vmatprep.subr.bf16.mxu0 %v15090_v35  ;;  %v11428_v49 = vpack.i.bf16 %v1732_v27, %v13223_v7  ;;  %v12256_v27 = vld [vmem:[#allocation5 + $0x180] sm:$0xff] }
 0x3e4   :  { %11384 = vrot.lane.b32.xlu0 %v11383_v3, %s12544_s18  ;;  %11409 = vrot.lane.b32.xlu1 %v11408_v46, %s12544_s18  ;;  %v11161_v3 = vunpack.i.l.bf16 %v13160_v57  ;;  %v11438_v46 = vpack.i.bf16 %v12253_v39, %v12252_v42 }
 0x3e5   :  { %9484 = vmatmul.mubr.msk.f32.vlgmr.msra.gmra.mrb[8].mxu0 %vm587_vm15, %v582_v56  ;;  %v11156_v56 = vunpack.i.l.bf16 %v11155_v11  ;;  %v11162_v11 = vunpack.i.h.bf16 %v13160_v57  ;;  %v11167_v57 = vunpack.i.h.bf16 %v13186_v18  ;;  %v11172_v18 = vunpack.i.h.bf16 %v13175_v33 }
 0x3e6   :  { %10372 = vmatpush1.bf16.msra.mxu0 %v10371_v52  ;;  %8860 = vmatprep.mubr.msk.f32.mxu0 %vm406_vm11, %v12907_v29  ;;  %v11418_v52 = vpack.i.bf16 %v1728_v45, %v13212_v53  ;;  %v12254_v45 = vld [vmem:[#allocation5 + $0x30] sm:$0xff]  ;;  %v11176_v33 = vunpack.i.l.bf16 %v13201_v24  ;;  %v11181_v24 = vunpack.i.l.bf16 %v13191_v37 }
 0x3e7   :  { %10373 = vmatprep.subr.bf16.mxu0 %v15090_v35  ;;  %v10383_v0 = vpack.c.bf16 %v11157_v15, %v11156_v56  ;;  %v10389_v56 = vpack.c.bf16 %v11167_v57, %v11166_v1  ;;  %v12258_v57 = vld [vmem:[#allocation5 + $0x260] sm:$0xff]  ;;  %v12259_v1 = vld [vmem:[#allocation5 + $0x298] sm:$0xff] }
 0x3e8   :  { %11394 = vrot.lane.b32.xlu0 %v11393_v61, %s12544_s18  ;;  %11419 = vrot.lane.b32.xlu1 %v11418_v52, %s12544_s18  ;;  %v10386_v61 = vpack.c.bf16 %v11162_v11, %v11161_v3  ;;  %v15091_v52 = vld [vmem:[#allocation23_spill] sm:$0xff]  ;;  %v10392_v3 = vpack.c.bf16 %v11172_v18, %v11171_v6  ;;  %v11458_v42 = vpack.i.bf16 %v12259_v1, %v12258_v57  ;;  %v11192_v6 = vunpack.i.h.bf16 %v13206_v50 }
 0x3e9   :  { %v10395_v39 = vpack.c.bf16 %v11177_v25, %v11176_v33 }
 0x3ea   :  { %10375 = vmatpush1.bf16.msra.mxu0 %v10374_v43  ;;  %v13229_v43 = vpop.permute.xlu0 %11194 }
 0x3eb   :  { %10376 = vmatprep.subr.bf16.mxu0 %v15090_v35  ;;  %v11196_v25 = vunpack.i.l.bf16 %v13229_v43 }
 0x3ec   :  { %11404 = vrot.lane.b32.xlu0 %v11403_v51, %s12544_s18  ;;  %11429 = vrot.lane.b32.xlu1 %v11428_v49, %s12544_s18  ;;  %v13246_v51 = vld [vmem:[#allocation8 + $0x10] ss:$8 sm:$0x3] }
 0x3ee   :  { %10378 = vmatpush1.bf16.msra.mxu0 %v10377_v23  ;;  %v13241_v23 = vpop.permute.xlu1 %11209  ;;  %v13243_v41 = vpop.permute.xlu0 %11204 }
 0x3ef   :  { %10379 = vmatprep.subr.bf16.mxu0 %v15090_v35  ;;  %v11212_v57 = vunpack.i.h.bf16 %v13241_v23  ;;  %v11211_v1 = vunpack.i.l.bf16 %v13241_v23 }
 0x3f0   :  { %11414 = vrot.lane.b32.xlu0 %v11413_v9, %s12544_s18  ;;  %v13254_v9 = vrot.slane %v13246_v51, %v15091_v52  ;;  %11439 = vrot.lane.b32.xlu1 %v11438_v46, %s12545_s5  ;;  %v11182_v46 = vunpack.i.h.bf16 %v13191_v37 }
 0x3f2   :  { %10381 = vmatpush1.bf16.msra.mxu0 %v10380_v54  ;;  %v12255_v54 = vld [vmem:[#allocation5 + $0x68] sm:$0xff]  ;;  %v13260_v49 = vpop.permute.xlu1 %11219  ;;  %v10398_v18 = vpack.c.bf16 %v11182_v46, %v11181_v24 }
 0x3f3   :  { %10382 = vmatprep.subr.bf16.mxu0 %v15090_v35  ;;  %v11433_v15 = vpack.i.bf16 %v12255_v54, %v12254_v45 }
 0x3f4   :  { %11424 = vrot.lane.b32.xlu0 %v11423_v21, %s12544_s18  ;;  %v13262_v21 = vpop.permute.xlu0 %11214 }
 0x3f6   :  { %10384 = vmatpush1.bf16.msra.mxu0 %v10383_v0  ;;  %v12257_v0 = vld [vmem:[#allocation5 + $0x1b8] sm:$0xff]  ;;  %v13274_v54 = vpop.permute.xlu1 %11229 }
 0x3f7   :  { %10385 = vmatprep.subr.bf16.mxu0 %v15090_v35  ;;  %v11448_v11 = vpack.i.bf16 %v12257_v0, %v12256_v27  ;;  %v11191_v27 = vunpack.i.l.bf16 %v13206_v50  ;;  %v11202_v0 = vunpack.i.h.bf16 %v13227_v14  ;;  %v11206_v50 = vunpack.i.l.bf16 %v13243_v41 }
 0x3f8   :  { %11434 = vrot.lane.b32.xlu0 %v11433_v15, %s12545_s5  ;;  %v13276_v15 = vpop.permute.xlu0 %11224 }
 0x3f9   :  { %11449 = vrot.lane.b32.xlu1 %v11448_v11, %s12545_s5  ;;  %v11201_v11 = vunpack.i.l.bf16 %v13227_v14 }
 0x3fa   :  { %10387 = vmatpush1.bf16.msra.mxu0 %v10386_v61  ;;  %v13267_v61 = vadd.f32 %v13097_v62, %v13254_v9  ;;  %v11187_v62 = vunpack.i.h.bf16 %v13214_v59 }
 0x3fb   :  { %10388 = vmatprep.subr.bf16.mxu0 %v15090_v35  ;;  %v1363_v14 = vsel %vm406_vm11, %v11201_v11, %v11202_v0 }
 0x3fc   :  { %v1143_v45 = vmul.f32 1.442695, %v13267_v61  ;;  %v11235_v33 = vpop.permute.xlu0 %11234  ;;  %vm1138_vm1 = vcmp.gt.f32.partialorder %v13267_v61, 0.0 }
 0x3fd   :  { %11459 = vrot.lane.b32.xlu1 %v11458_v42, %s12545_s5  ;;  %v11207_v42 = vunpack.i.h.bf16 %v13243_v41  ;;  %v11222_v41 = vunpack.i.h.bf16 %v13260_v49 }
 0x3fe   :  { %10390 = vmatpush1.bf16.msra.mxu0 %v10389_v56  ;;  %v11186_v56 = vunpack.i.l.bf16 %v13214_v59  ;;  %11946 = vpow2.f32 %v1143_v45  ;;  %v11240_v59 = vpop.permute.xlu1 %11239 }
 0x3ff   :  { %10391 = vmatprep.subr.bf16.mxu0 %v15090_v35  ;;  %v1364_v23 = vsel %vm406_vm11, %v11206_v50, %v11207_v42 }
 0x400   :  { %v10401_v37 = vpack.c.bf16 %v11187_v62, %v11186_v56  ;;  %v13298_v45 = vpop.permute.xlu0 %11244  ;;  %v1365_v62 = vsel %vm406_vm11, %v11211_v1, %v11212_v57 }
 0x401   :  { %v10460_v11 = vpack.c.bf16 %v1365_v62, %v1364_v23  ;;  %v11242_v62 = vunpack.i.h.bf16 %v11240_v59  ;;  %v11241_v23 = vunpack.i.l.bf16 %v11240_v59 }
 0x402   :  { %10393 = vmatpush1.bf16.msra.mxu0 %v10392_v3  ;;  %v11197_v3 = vunpack.i.h.bf16 %v13229_v43  ;;  %v13296_v24 = vpop.permute.xlu1 %11249 }
 0x403   :  { %10394 = vmatprep.subr.bf16.mxu0 %v15090_v35  ;;  %v11252_v59 = vunpack.i.h.bf16 %v13296_v24 }
 0x404   :  { %v1362_v46 = vsel %vm406_vm11, %v11196_v25, %v11197_v3  ;;  %v10454_v43 = vpack.c.bf16 %v11202_v0, %v11197_v3  ;;  %v10458_v0 = vpack.c.bf16 %v11212_v57, %v11207_v42  ;;  %v11231_v57 = vunpack.i.l.bf16 %v13274_v54 }
 0x405   :  { %v10456_v56 = vpack.c.bf16 %v1363_v14, %v1362_v46  ;;  %v11227_v42 = vunpack.i.h.bf16 %v13276_v15  ;;  %v11226_v14 = vunpack.i.l.bf16 %v13276_v15 }
 0x406   :  { %10396 = vmatpush1.bf16.msra.mxu0 %v10395_v39  ;;  %v10404_v39 = vpack.c.bf16 %v11192_v6, %v11191_v27  ;;  %v11217_v6 = vunpack.i.h.bf16 %v13262_v21  ;;  %v11216_v27 = vunpack.i.l.bf16 %v13262_v21  ;;  %v11232_v21 = vunpack.i.h.bf16 %v13274_v54 }
 0x407   :  { %10397 = vmatprep.subr.bf16.mxu0 %v15090_v35 }
 0x408   :  { %v1366_v1 = vsel %vm406_vm11, %v11216_v27, %v11217_v6  ;;  %v10462_v50 = vpack.c.bf16 %v11222_v41, %v11217_v6  ;;  %v1369_v54 = vsel %vm406_vm11, %v11231_v57, %v11232_v21  ;;  %v10466_v15 = vpack.c.bf16 %v11232_v21, %v11227_v42 }
 0x409   :  { %v1371_v27 = vsel %vm406_vm11, %v11241_v23, %v11242_v62 }
 0x40a   :  { %10399 = vmatpush1.bf16.msra.mxu0 %v10398_v18  ;;  %v11947_v18 = vpop.eup %11946 }
 0x40b   :  { %10400 = vmatprep.subr.bf16.mxu0 %v15090_v35  ;;  %v8865_v3 = vadd.f32 -1.0, %v11947_v18  ;;  %v11236_v18 = vunpack.i.l.bf16 %v11235_v33 }
 0x40d   :  { %v1154_v46 = vsel %vm1138_vm1, %v13267_v61, %v8865_v3  ;;  %v11247_v3 = vunpack.i.h.bf16 %v13298_v45 }
 0x40e   :  { %10402 = vmatpush1.bf16.msra.mxu0 %v10401_v37  ;;  %v11221_v37 = vunpack.i.l.bf16 %v13260_v49  ;;  %v11260_v49 = vpop.permute.xlu1 %11259 }
 0x40f   :  { %10403 = vmatprep.subr.bf16.mxu0 %v15090_v35  ;;  %v11261_v21 = vunpack.i.l.bf16 %v11260_v49  ;;  %v10474_v23 = vpack.c.bf16 %v11252_v59, %v11247_v3 }
 0x410   :  { %v1367_v25 = vsel %vm406_vm11, %v11221_v37, %v11222_v41  ;;  %v1368_v41 = vsel %vm406_vm11, %v11226_v14, %v11227_v42 }
 0x412   :  { %10405 = vmatpush1.bf16.msra.mxu0 %v10404_v39  ;;  %v11255_v39 = vpop.permute.xlu0 %11254  ;;  %v11270_v37 = vpop.permute.xlu1 %11269 }
 0x413   :  { %10455 = vmatprep.subr.bf16.mxu0 %v10454_v43  ;;  %v10464_v43 = vpack.c.bf16 %v1367_v25, %v1366_v1  ;;  %v11246_v25 = vunpack.i.l.bf16 %v13298_v45  ;;  %v11257_v57 = vunpack.i.h.bf16 %v11255_v39  ;;  %v11256_v42 = vunpack.i.l.bf16 %v11255_v39 }
 0x414   :  { %v11272_v39 = vunpack.i.h.bf16 %v11270_v37 }
 0x415   :  { %926 = vmatmul.mubr.f32.vlgmr.msra.gmra.mrb[10].mxu0 %v12909_v30 }
 0x416   :  { %8861 = vmatprep.mubr.msk.f32.mxu0 %vm406_vm11, %v12920_v38  ;;  %10457 = vmatpush1.bf16.msra.mxu0 %v10456_v56  ;;  %v11237_v56 = vunpack.i.h.bf16 %v11235_v33  ;;  %v11265_v6 = vpop.permute.xlu0 %11264  ;;  %v11251_v33 = vunpack.i.l.bf16 %v13296_v24  ;;  %v11280_v14 = vpop.permute.xlu1 %11279 }
 0x417   :  { %10459 = vmatprep.subr.bf16.mxu0 %v10458_v0  ;;  %v10468_v0 = vpack.c.bf16 %v1369_v54, %v1368_v41  ;;  %v11271_v41 = vunpack.i.l.bf16 %v11270_v37  ;;  %v13340_v37 = vadd.f32 %v13101_v2, %v13254_v9 }
 0x418   :  { %v1370_v61 = vsel %vm406_vm11, %v11236_v18, %v11237_v56  ;;  %v1374_v18 = vsel %vm406_vm11, %v11256_v42, %v11257_v57 }
 0x419   :  { %931 = vmatmul.mubr.f32.gmra.mrb[12].mxu0 %v12922_v44  ;;  %v10472_v1 = vpack.c.bf16 %v1371_v27, %v1370_v61  ;;  %v11266_v27 = vunpack.i.l.bf16 %v11265_v6  ;;  %v1147_v9 = vmul.f32 1.442695, %v13340_v37  ;;  %vm1140_vm3 = vcmp.gt.f32.partialorder %v13340_v37, 0.0 }
 0x41a   :  { %10461 = vmatpush1.bf16.msra.mxu0 %v10460_v11  ;;  %8868 = vmatprep.mubr.msk.f32.mxu0 %vm406_vm11, %v1154_v46  ;;  %v10470_v11 = vpack.c.bf16 %v11242_v62, %v11237_v56  ;;  %v11275_v46 = vpop.permute.xlu0 %11274  ;;  %v1372_v62 = vsel %vm406_vm11, %v11246_v25, %v11247_v3  ;;  %v15092_v56 = vld [vmem:[#allocation24_spill] sm:$0xff]  ;;  %v11290_v61 = vpop.permute.xlu1 %11289 }
 0x41b   :  { %10463 = vmatprep.subr.bf16.mxu0 %v10462_v50  ;;  %v11262_v50 = vunpack.i.h.bf16 %v11260_v49  ;;  %v1053_v24 = vrot.slane %v13246_v51, %v15092_v56  ;;  %v11282_v51 = vunpack.i.h.bf16 %v11280_v14  ;;  %v11277_v3 = vunpack.i.h.bf16 %v11275_v46 }
 0x41c   :  { %v11276_v25 = vunpack.i.l.bf16 %v11275_v46 }
 0x41d   :  { %v1375_v45 = vsel %vm406_vm11, %v11261_v21, %v11262_v50  ;;  %v10478_v49 = vpack.c.bf16 %v11262_v50, %v11257_v57  ;;  %v10486_v46 = vpack.c.bf16 %v11282_v51, %v11277_v3 }
 0x41e   :  { %10465 = vmatpush1.bf16.msra.mxu0 %v10464_v43  ;;  %v1373_v43 = vsel %vm406_vm11, %v11251_v33, %v11252_v59  ;;  %v10480_v59 = vpack.c.bf16 %v1375_v45, %v1374_v18  ;;  %v11281_v33 = vunpack.i.l.bf16 %v11280_v14  ;;  %v1378_v42 = vsel %vm406_vm11, %v11276_v25, %v11277_v3  ;;  %v12262_v25 = vld [vmem:[#allocation5 + $0x110] sm:$0xff] }
 0x41f   :  { %10467 = vmatprep.subr.bf16.mxu0 %v10466_v15  ;;  %v10476_v54 = vpack.c.bf16 %v1373_v43, %v1372_v62  ;;  %v11267_v15 = vunpack.i.h.bf16 %v11265_v6  ;;  %v11300_v43 = vpop.permute.xlu1 %11299  ;;  %v11291_v45 = vunpack.i.l.bf16 %v11290_v61 }
 0x420   :  { %v1379_v57 = vsel %vm406_vm11, %v11281_v33, %v11282_v51  ;;  %v12260_v51 = vld [vmem:[#allocation5 + $0x340] sm:$0xff]  ;;  %v12261_v33 = vld [vmem:[#allocation5 + $0x378] sm:$0xff] }
 0x421   :  { %v1376_v50 = vsel %vm406_vm11, %v11266_v27, %v11267_v15  ;;  %v10482_v21 = vpack.c.bf16 %v11272_v39, %v11267_v15  ;;  %v11468_v3 = vpack.i.bf16 %v12261_v33, %v12260_v51 }
 0x422   :  { %10469 = vmatpush1.bf16.msra.mxu0 %v10468_v0  ;;  %v11285_v0 = vpop.permute.xlu0 %11284 }
 0x423   :  { %10471 = vmatprep.subr.bf16.mxu0 %v10470_v11  ;;  %v13334_v11 = vadd.f32 %v13095_v31, %v1053_v24  ;;  %v13344_v31 = vadd.f32 %v13099_v63, %v1053_v24  ;;  %v11287_v18 = vunpack.i.h.bf16 %v11285_v0  ;;  %v11286_v2 = vunpack.i.l.bf16 %v11285_v0  ;;  %11469 = vrot.lane.b32.xlu1 %v11468_v3, %s12545_s5 }
 0x424   :  { %v10488_v63 = vpack.c.bf16 %v1379_v57, %v1378_v42  ;;  %v11302_v24 = vunpack.i.h.bf16 %v11300_v43 }
 0x425   :  { %v1141_v6 = vmul.f32 1.442695, %v13334_v11  ;;  %v1380_v27 = vsel %vm406_vm11, %v11286_v2, %v11287_v18  ;;  %v12266_v2 = vld [vmem:[#allocation5 + $0x1f0] sm:$0xff]  ;;  %vm1137_vm2 = vcmp.gt.f32.partialorder %v13334_v11, 0.0  ;;  %vm1139_vm4 = vcmp.gt.f32.partialorder %v13344_v31, 0.0 }
 0x426   :  { %10473 = vmatpush1.bf16.msra.mxu0 %v10472_v1  ;;  %v1377_v1 = vsel %vm406_vm11, %v11271_v41, %v11272_v39  ;;  %v11295_v62 = vpop.permute.xlu0 %11294 }
 0x427   :  { %10475 = vmatprep.subr.bf16.mxu0 %v10474_v23  ;;  %v10484_v14 = vpack.c.bf16 %v1377_v1, %v1376_v50  ;;  %v11292_v23 = vunpack.i.h.bf16 %v11290_v61  ;;  %v11297_v39 = vunpack.i.h.bf16 %v11295_v62  ;;  %v11296_v41 = vunpack.i.l.bf16 %v11295_v62  ;;  %v11310_v61 = vpop.permute.xlu1 %11309  ;;  %v12263_v1 = vld [vmem:[#allocation5 + $0x148] sm:$0xff] }
 0x428   :  { %11948 = vpow2.f32 %v1141_v6  ;;  %v11443_v50 = vpack.i.bf16 %v12263_v1, %v12262_v25 }
 0x429   :  { %v1381_v15 = vsel %vm406_vm11, %v11291_v45, %v11292_v23  ;;  %11950 = vpow2.f32 %v1147_v9  ;;  %v1382_v6 = vsel %vm406_vm11, %v11296_v41, %v11297_v39  ;;  %v10494_v42 = vpack.c.bf16 %v11302_v24, %v11297_v39  ;;  %v12265_v45 = vld [vmem:[#allocation5 + $0x458] sm:$0xff]  ;;  %v12267_v9 = vld [vmem:[#allocation5 + $0x228] sm:$0xff] }
 0x42a   :  { %10477 = vmatpush1.bf16.msra.mxu0 %v10476_v54  ;;  %v1145_v54 = vmul.f32 1.442695, %v13344_v31  ;;  %v11305_v0 = vpop.permute.xlu0 %11304  ;;  %v10492_v57 = vpack.c.bf16 %v1381_v15, %v1380_v27  ;;  %11444 = vrot.lane.b32.xlu0 %v11443_v50, %s12545_s5  ;;  %v12268_v15 = vld [vmem:[#allocation5 + $0x500] sm:$0xff]  ;;  %v12269_v27 = vld [vmem:[#allocation5 + $0x538] sm:$0xff] }
 0x42b   :  { %10479 = vmatprep.subr.bf16.mxu0 %v10478_v49  ;;  %v11301_v49 = vunpack.i.l.bf16 %v11300_v43  ;;  %v11307_v43 = vunpack.i.h.bf16 %v11305_v0  ;;  %v11306_v62 = vunpack.i.l.bf16 %v11305_v0  ;;  %v12271_v0 = vld [vmem:[#allocation5 + $0x308] sm:$0xff] }
 0x42c   :  { %11952 = vpow2.f32 %v1145_v54  ;;  %v11453_v54 = vpack.i.bf16 %v12267_v9, %v12266_v2  ;;  %v2047_v9 = vld [vmem:[#allocation7] sm:$0x3f] }
 0x42e   :  { %10481 = vmatpush1.bf16.msra.mxu0 %v10480_v59  ;;  %v10490_v59 = vpack.c.bf16 %v11292_v23, %v11287_v18  ;;  %v12264_v23 = vld [vmem:[#allocation5 + $0x420] sm:$0xff]  ;;  %11454 = vrot.lane.b32.xlu0 %v11453_v54, %s12545_s5 }
 0x42f   :  { %10483 = vmatprep.subr.bf16.mxu0 %v10482_v21  ;;  %v1383_v21 = vsel %vm406_vm11, %v11301_v49, %v11302_v24  ;;  %v11478_v18 = vpack.i.bf16 %v12265_v45, %v12264_v23  ;;  %v1384_v24 = vsel %vm406_vm11, %v11306_v62, %v11307_v43  ;;  %v12274_v45 = vld [vmem:[#allocation5 + $0x490] sm:$0xff] }
 0x431   :  { %11479 = vrot.lane.b32.xlu1 %v11478_v18, %s12545_s5  ;;  %v12275_v18 = vld [vmem:[#allocation5 + $0x4c8] sm:$0xff] }
 0x432   :  { %10485 = vmatpush1.bf16.msra.mxu0 %v10484_v14  ;;  %v11312_v14 = vunpack.i.h.bf16 %v11310_v61  ;;  %v11949_v41 = vpop.eup %11948  ;;  %v11483_v2 = vpack.i.bf16 %v12275_v18, %v12274_v45 }
 0x433   :  { %10487 = vmatprep.subr.bf16.mxu0 %v10486_v46  ;;  %v11311_v46 = vunpack.i.l.bf16 %v11310_v61  ;;  %v12270_v61 = vld [vmem:[#allocation5 + $0x2d0] sm:$0xff]  ;;  %v11951_v33 = vpop.eup %11950  ;;  %v8864_v1 = vadd.f32 -1.0, %v11949_v41 }
 0x434   :  { %v10498_v39 = vpack.c.bf16 %v11312_v14, %v11307_v43  ;;  %v11463_v51 = vpack.i.bf16 %v12271_v0, %v12270_v61  ;;  %v8867_v50 = vadd.f32 -1.0, %v11951_v33  ;;  %v2763_v43 = vld [vmem:[%s15055_s2] sm:$0xff]  ;;  %v10502_v0 = vpack.c.bf16 %v13107_v5, %v13109_v8  ;;  %s12548_s2 = smov 96  }
 0x435   :  { %v1385_v49 = vsel %vm406_vm11, %v11311_v46, %v11312_v14  ;;  %v1153_v14 = vsel %vm1137_vm2, %v13334_v11, %v8864_v1  ;;  %v2770_v23 = vadd.s32 12, %v2763_v43  ;;  %v2777_v54 = vadd.s32 43, %v2763_v43  ;;  %v1517_v33 = vld [vmem:[#allocation5 + $0x18] sm:$0xff] }
 0x436   :  { %10489 = vmatpush1.bf16.msra.mxu0 %v10488_v63  ;;  %v10496_v63 = vpack.c.bf16 %v1383_v21, %v1382_v6  ;;  %v10500_v3 = vpack.c.bf16 %v1385_v49, %v1384_v24  ;;  %v11953_v25 = vpop.eup %11952  ;;  %11464 = vrot.lane.b32.xlu0 %v11463_v51, %s12545_s5  ;;  %v12272_v21 = vld [vmem:[#allocation5 + $0x3b0] sm:$0xff]  ;;  %v12273_v6 = vld [vmem:[#allocation5 + $0x3e8] sm:$0xff]  ;;  %v1156_v62 = vsel %vm1140_vm3, %v13340_v37, %v8867_v50  ;;  %v11320_v37 = vpop.permute.xlu1 %11319  ;;  %vm4840_vm2 = vcmask 257026  }
 0x437   :  { %10491 = vmatprep.subr.bf16.mxu0 %v10490_v59  ;;  %v11488_v59 = vpack.i.bf16 %v12269_v27, %v12268_v15  ;;  %v8866_v46 = vadd.f32 -1.0, %v11953_v25  ;;  %v11315_v49 = vpop.permute.xlu0 %11314  ;;  %v11322_v24 = vunpack.i.h.bf16 %v11320_v37  ;;  %10503 = vmatprep.subr.bf16.mxu1 %v10502_v0  ;;  %v10506_v5 = vpack.c.bf16 %v13112_v4, %v13115_v12  ;;  %v1525_v4 = vld [vmem:[#allocation5 + $0xf8] sm:$0xff]  ;;  %v1527_v12 = vld [vmem:[#allocation5 + $0x130] sm:$0xff] }
 0x438   :  { %v11317_v41 = vunpack.i.h.bf16 %v11315_v49  ;;  %v11316_v15 = vunpack.i.l.bf16 %v11315_v49  ;;  %v10510_v49 = vpack.c.bf16 %v13121_v36, %v13123_v55  ;;  %v10514_v36 = vpack.c.bf16 %v13129_v16, %v13131_v19  ;;  %v1535_v16 = vld [vmem:[#allocation5 + $0x210] sm:$0xff] }
 0x439   :  { %11489 = vrot.lane.b32.xlu1 %v11488_v59, %s12545_s5  ;;  %v1155_v11 = vsel %vm1139_vm4, %v13344_v31, %v8866_v46  ;;  %vm5064_vm3 = vcmask 261126   ;;  %vm4952_vm4 = vcmask 259076  }
 0x43a   :  { %10493 = vmatpush1.bf16.msra.mxu0 %v10492_v57  ;;  %v11473_v57 = vpack.i.bf16 %v12273_v6, %v12272_v21  ;;  %v1890_v27 = vsel %vm406_vm11, %v11316_v15, %v11317_v41  ;;  %v11330_v59 = vpop.permute.xlu1 %11329  ;;  %v10550_v51 = vpack.c.bf16 %v11322_v24, %v11317_v41  ;;  %v10512_v15 = vpack.c.bf16 %v1527_v12, %v1525_v4 }
 0x43b   :  { %10495 = vmatprep.subr.bf16.mxu0 %v10494_v42  ;;  %v2048_v42 = vld [vmem:[#allocation7 + $0x8] sm:$0x3f]  ;;  %v11325_v61 = vpop.permute.xlu0 %11324  ;;  %v11332_v25 = vunpack.i.h.bf16 %v11330_v59  ;;  %v11331_v1 = vunpack.i.l.bf16 %v11330_v59 }
 0x43c   :  { %11474 = vrot.lane.b32.xlu0 %v11473_v57, %s12545_s5  ;;  %v11327_v50 = vunpack.i.h.bf16 %v11325_v61  ;;  %v11326_v21 = vunpack.i.l.bf16 %v11325_v61 }
 0x43d   :  { %2206 = vrot.lane.b32.xlu1 %v2048_v42, %s12546_s6  ;;  %v1893_v42 = vsel %vm406_vm11, %v11331_v1, %v11332_v25 }
 0x43e   :  { %10497 = vmatpush1.bf16.msra.mxu0 %v10496_v63  ;;  %v15093_v63 = vmov 2   ;;  %v11340_v46 = vpop.permute.xlu1 %11339  ;;  %v10554_v8 = vpack.c.bf16 %v11332_v25, %v11327_v50  ;;  %v1531_v25 = vld [vmem:[#allocation5 + $0x1a0] sm:$0xff] }
 0x43f   :  { %10499 = vmatprep.subr.bf16.mxu0 %v10498_v39  ;;  %v11321_v39 = vunpack.i.l.bf16 %v11320_v37  ;;  %v11342_v45 = vunpack.i.h.bf16 %v11340_v46  ;;  %v11341_v18 = vunpack.i.l.bf16 %v11340_v46 }
 0x440   :  { %11484 = vrot.lane.b32.xlu0 %v11483_v2, %s12545_s5 }
 0x441   :  { %2772 = vperm.xlu1 %11494, %v2770_v23   ;;  %v1891_v31 = vsel %vm406_vm11, %v11321_v39, %v11322_v24  ;;  %v1523_v23 = vld [vmem:[#allocation5 + $0xc0] sm:$0xff] }
 0x442   :  { %10501 = vmatpush1.bf16.msra.mxu0 %v10500_v3  ;;  %v1519_v3 = vld [vmem:[#allocation5 + $0x50] sm:$0xff]  ;;  %v10552_v57 = vpack.c.bf16 %v1891_v31, %v1890_v27  ;;  %v11350_v39 = vpop.permute.xlu1 %11349 }
 0x443   :  { %10551 = vmatprep.subr.bf16.mxu0 %v10550_v51  ;;  %v10504_v6 = vpack.c.bf16 %v1519_v3, %v1517_v33  ;;  %v11352_v27 = vunpack.i.h.bf16 %v11350_v39  ;;  %v11351_v59 = vunpack.i.l.bf16 %v11350_v39  ;;  %v1529_v3 = vld [vmem:[#allocation5 + $0x168] sm:$0xff] }
 0x444   :  { %2204 = vrot.lane.b32.xlu0 %v2047_v9, %s12546_s6 }
 0x445   :  { %1505 = vmatmul.mubr.f32.vlgmr.msra.gmra.mrb[14].mxu0 %v1153_v14  ;;  %11495 = vset.pattern.permute.xlu1 %v15093_v63  ;;  %v1892_v14 = vsel %vm406_vm11, %v11326_v21, %v11327_v50  ;;  %v1897_v51 = vsel %vm406_vm11, %v11351_v59, %v11352_v27  ;;  %v10516_v21 = vpack.c.bf16 %v1531_v25, %v1529_v3 }
 0x446   :  { %8869 = vmatprep.mubr.msk.f32.mxu0 %vm406_vm11, %v1156_v62  ;;  %2779 = vperm.xlu1 %11495, %v2777_v54   ;;  %v1521_v62 = vld [vmem:[#allocation5 + $0x88] sm:$0xff]  ;;  %v10556_v54 = vpack.c.bf16 %v1893_v42, %v1892_v14  ;;  %v11360_v1 = vpop.permute.xlu1 %11359 }
 0x447   :  { %10505 = vmatpush1.bf16.msra.mxu1 %v10504_v6  ;;  %10553 = vmatpush1.bf16.msra.mxu0 %v10552_v57  ;;  %v10508_v9 = vpack.c.bf16 %v1523_v23, %v1521_v62  ;;  %v10518_v57 = vpack.c.bf16 %v13137_v28, %v13139_v34  ;;  %v11362_v42 = vunpack.i.h.bf16 %v11360_v1  ;;  %v11361_v14 = vunpack.i.l.bf16 %v11360_v1 }
 0x448   :  { %2765 = vperm.xlu0 %11493, %v2763_v43   ;;  %v11335_v43 = vpop.permute.xlu0 %11334  ;;  %10507 = vmatprep.subr.bf16.mxu1 %v10506_v5  ;;  %v1533_v5 = vld [vmem:[#allocation5 + $0x1d8] sm:$0xff]  ;;  %v10522_v28 = vpack.c.bf16 %v13145_v22, %v13147_v40  ;;  %v10526_v22 = vpack.c.bf16 %v13155_v48, %v13157_v10  ;;  %v10530_v48 = vpack.c.bf16 %v13167_v60, %v13172_v26 }
 0x449   :  { %1511 = vmatmul.mubr.f32.gmra.mrb[16].mxu0 %v1155_v11  ;;  %v11337_v2 = vunpack.i.h.bf16 %v11335_v43  ;;  %v11336_v11 = vunpack.i.l.bf16 %v11335_v43  ;;  %10555 = vmatprep.subr.bf16.mxu0 %v10554_v8  ;;  %v1899_v19 = vsel %vm406_vm11, %v11361_v14, %v11362_v42  ;;  %v10534_v60 = vpack.c.bf16 %v13182_v58, %v13188_v20 }
 0x44a   :  { %v11370_v23 = vpop.permute.xlu1 %11369  ;;  %v10538_v58 = vpack.c.bf16 %v13197_v32, %v13203_v47  ;;  %v10542_v32 = vpack.c.bf16 %v13212_v53, %v13216_v13 }
 0x44b   :  { %v1894_v37 = vsel %vm406_vm11, %v11336_v11, %v11337_v2  ;;  %v10558_v24 = vpack.c.bf16 %v11342_v45, %v11337_v2  ;;  %10509 = vmatpush1.bf16.msra.mxu1 %v10508_v9  ;;  %10557 = vmatpush1.bf16.msra.mxu0 %v10556_v54  ;;  %v11372_v34 = vunpack.i.h.bf16 %v11370_v23  ;;  %v11371_v11 = vunpack.i.l.bf16 %v11370_v23 }
 0x44c   :  { %11941 = vset.pattern.permute.xlu0 %v15093_v63  ;;  %v1895_v63 = vsel %vm406_vm11, %v11341_v18, %v11342_v45  ;;  %v11345_v41 = vpop.permute.xlu0 %11344  ;;  %10511 = vmatprep.subr.bf16.mxu1 %v10510_v49  ;;  %v10520_v18 = vpack.c.bf16 %v1535_v16, %v1533_v5 }
 0x44d   :  { %v10560_v31 = vpack.c.bf16 %v1895_v63, %v1894_v37  ;;  %v11347_v61 = vunpack.i.h.bf16 %v11345_v41  ;;  %v11346_v0 = vunpack.i.l.bf16 %v11345_v41  ;;  %10559 = vmatprep.subr.bf16.mxu0 %v10558_v24  ;;  %v1537_v63 = vld [vmem:[#allocation5 + $0x248] sm:$0xff]  ;;  %v1539_v37 = vld [vmem:[#allocation5 + $0x280] sm:$0xff]  ;;  %v1901_v49 = vsel %vm406_vm11, %v11371_v11, %v11372_v34 }
 0x44e   :  { %v11380_v12 = vpop.permute.xlu1 %11379  ;;  %v10524_v41 = vpack.c.bf16 %v1539_v37, %v1537_v63 }
 0x44f   :  { %v1896_v33 = vsel %vm406_vm11, %v11346_v0, %v11347_v61  ;;  %v10562_v55 = vpack.c.bf16 %v11352_v27, %v11347_v61  ;;  %10513 = vmatpush1.bf16.msra.mxu1 %v10512_v15  ;;  %10561 = vmatpush1.bf16.msra.mxu0 %v10560_v31  ;;  %v11382_v40 = vunpack.i.h.bf16 %v11380_v12  ;;  %v11381_v31 = vunpack.i.l.bf16 %v11380_v12  ;;  %v1541_v61 = vld [vmem:[#allocation5 + $0x2b8] sm:$0xff]  ;;  %v1543_v0 = vld [vmem:[#allocation5 + $0x2f0] sm:$0xff]  ;;  %v1553_v12 = vld [vmem:[#allocation5 + $0x408] sm:$0xff] }
 0x450   :  { %v11355_v50 = vpop.permute.xlu0 %11354  ;;  %v10564_v6 = vpack.c.bf16 %v1897_v51, %v1896_v33  ;;  %10515 = vmatprep.subr.bf16.mxu1 %v10514_v36  ;;  %v10528_v25 = vpack.c.bf16 %v1543_v0, %v1541_v61 }
 0x451   :  { %v11357_v46 = vunpack.i.h.bf16 %v11355_v50  ;;  %v11356_v43 = vunpack.i.l.bf16 %v11355_v50  ;;  %10563 = vmatprep.subr.bf16.mxu0 %v10562_v55  ;;  %v1903_v51 = vsel %vm406_vm11, %v11381_v31, %v11382_v40 }
 0x452   :  { %v11390_v55 = vpop.permute.xlu1 %11389 }
 0x453   :  { %v1898_v8 = vsel %vm406_vm11, %v11356_v43, %v11357_v46  ;;  %v10566_v62 = vpack.c.bf16 %v11362_v42, %v11357_v46  ;;  %10517 = vmatpush1.bf16.msra.mxu1 %v10516_v21  ;;  %10565 = vmatpush1.bf16.msra.mxu0 %v10564_v6  ;;  %v11392_v10 = vunpack.i.h.bf16 %v11390_v55  ;;  %v11391_v50 = vunpack.i.l.bf16 %v11390_v55  ;;  %v1547_v42 = vld [vmem:[#allocation5 + $0x360] sm:$0xff] }
 0x454   :  { %v11365_v45 = vpop.permute.xlu0 %11364  ;;  %v10568_v2 = vpack.c.bf16 %v1899_v19, %v1898_v8  ;;  %10519 = vmatprep.subr.bf16.mxu1 %v10518_v57  ;;  %v1545_v57 = vld [vmem:[#allocation5 + $0x328] sm:$0xff] }
 0x455   :  { %v11367_v9 = vunpack.i.h.bf16 %v11365_v45  ;;  %v11366_v54 = vunpack.i.l.bf16 %v11365_v45  ;;  %10567 = vmatprep.subr.bf16.mxu0 %v10566_v62  ;;  %v1905_v14 = vsel %vm406_vm11, %v11391_v50, %v11392_v10  ;;  %v10532_v19 = vpack.c.bf16 %v1547_v42, %v1545_v57 }
 0x456   :  { %v11400_v5 = vpop.permute.xlu1 %11399 }
 0x457   :  { %v1900_v24 = vsel %vm406_vm11, %v11366_v54, %v11367_v9  ;;  %v10570_v4 = vpack.c.bf16 %v11372_v34, %v11367_v9  ;;  %10521 = vmatpush1.bf16.msra.mxu1 %v10520_v18  ;;  %10569 = vmatpush1.bf16.msra.mxu0 %v10568_v2  ;;  %v11402_v26 = vunpack.i.h.bf16 %v11400_v5  ;;  %v11401_v62 = vunpack.i.l.bf16 %v11400_v5  ;;  %v1549_v18 = vld [vmem:[#allocation5 + $0x398] sm:$0xff]  ;;  %v1551_v2 = vld [vmem:[#allocation5 + $0x3d0] sm:$0xff]  ;;  %v1563_v5 = vld [vmem:[#allocation5 + $0x520] sm:$0xff] }
 0x458   :  { %v11375_v39 = vpop.permute.xlu0 %11374  ;;  %v10572_v15 = vpack.c.bf16 %v1901_v49, %v1900_v24  ;;  %10523 = vmatprep.subr.bf16.mxu1 %v10522_v28  ;;  %v10536_v63 = vpack.c.bf16 %v1551_v2, %v1549_v18 }
 0x459   :  { %v11377_v27 = vunpack.i.h.bf16 %v11375_v39  ;;  %v11376_v59 = vunpack.i.l.bf16 %v11375_v39  ;;  %10571 = vmatprep.subr.bf16.mxu0 %v10570_v4  ;;  %v1907_v28 = vsel %vm406_vm11, %v11401_v62, %v11402_v26  ;;  %v1555_v39 = vld [vmem:[#allocation5 + $0x440] sm:$0xff] }
 0x45a   :  { %v11410_v9 = vpop.permute.xlu1 %11409 }
 0x45b   :  { %v1902_v33 = vsel %vm406_vm11, %v11376_v59, %v11377_v27  ;;  %v10574_v36 = vpack.c.bf16 %v11382_v40, %v11377_v27  ;;  %10525 = vmatpush1.bf16.msra.mxu1 %v10524_v41  ;;  %10573 = vmatpush1.bf16.msra.mxu0 %v10572_v15  ;;  %v11412_v20 = vunpack.i.h.bf16 %v11410_v9  ;;  %v11411_v49 = vunpack.i.l.bf16 %v11410_v9 }
 0x45c   :  { %v11385_v3 = vpop.permute.xlu0 %11384  ;;  %v10576_v1 = vpack.c.bf16 %v1903_v51, %v1902_v33  ;;  %10527 = vmatprep.subr.bf16.mxu1 %v10526_v22  ;;  %v10540_v27 = vpack.c.bf16 %v1555_v39, %v1553_v12  ;;  %v1557_v33 = vld [vmem:[#allocation5 + $0x478] sm:$0xff] }
 0x45d   :  { %v11387_v21 = vunpack.i.h.bf16 %v11385_v3  ;;  %v11386_v6 = vunpack.i.l.bf16 %v11385_v3  ;;  %10575 = vmatprep.subr.bf16.mxu0 %v10574_v36  ;;  %v1909_v41 = vsel %vm406_vm11, %v11411_v49, %v11412_v20  ;;  %v1559_v36 = vld [vmem:[#allocation5 + $0x4b0] sm:$0xff] }
 0x45e   :  { %v11420_v40 = vpop.permute.xlu1 %11419 }
 0x45f   :  { %v1904_v46 = vsel %vm406_vm11, %v11386_v6, %v11387_v21  ;;  %v10578_v43 = vpack.c.bf16 %v11392_v10, %v11387_v21  ;;  %10529 = vmatpush1.bf16.msra.mxu1 %v10528_v25  ;;  %10577 = vmatpush1.bf16.msra.mxu0 %v10576_v1  ;;  %v11422_v47 = vunpack.i.h.bf16 %v11420_v40  ;;  %v11421_v61 = vunpack.i.l.bf16 %v11420_v40  ;;  %v764_v40 = vld [vmem:[#allocation8 + $0x5] ss:$0 sm:$0xff] }
 0x460   :  { %v11395_v16 = vpop.permute.xlu0 %11394  ;;  %v10580_v8 = vpack.c.bf16 %v1905_v14, %v1904_v46  ;;  %10531 = vmatprep.subr.bf16.mxu1 %v10530_v48  ;;  %v10544_v10 = vpack.c.bf16 %v1559_v36, %v1557_v33  ;;  %v10546_v14 = vpack.c.bf16 %v13223_v7, %v13231_v17  ;;  %v586_v17 = vld [vmem:[#allocation8 + $0x3] ss:$0 sm:$0xff] }
 0x461   :  { %v11397_v23 = vunpack.i.h.bf16 %v11395_v16  ;;  %v11396_v45 = vunpack.i.l.bf16 %v11395_v16  ;;  %10579 = vmatprep.subr.bf16.mxu0 %v10578_v43  ;;  %v1911_v55 = vsel %vm406_vm11, %v11421_v61, %v11422_v47  ;;  %v1561_v43 = vld [vmem:[#allocation5 + $0x4e8] sm:$0xff] }
 0x462   :  { %v11430_v1 = vpop.permute.xlu1 %11429  ;;  %v10548_v16 = vpack.c.bf16 %v1563_v5, %v1561_v43 }
 0x463   :  { %v1906_v34 = vsel %vm406_vm11, %v11396_v45, %v11397_v23  ;;  %v10582_v11 = vpack.c.bf16 %v11402_v26, %v11397_v23  ;;  %10533 = vmatpush1.bf16.msra.mxu1 %v10532_v19  ;;  %10581 = vmatpush1.bf16.msra.mxu0 %v10580_v8  ;;  %v11432_v53 = vunpack.i.h.bf16 %v11430_v1  ;;  %v11431_v13 = vunpack.i.l.bf16 %v11430_v1 }
 0x464   :  { %v11405_v54 = vpop.permute.xlu0 %11404  ;;  %v10584_v37 = vpack.c.bf16 %v1907_v28, %v1906_v34  ;;  %10535 = vmatprep.subr.bf16.mxu1 %v10534_v60 }
 0x465   :  { %v11407_v24 = vunpack.i.h.bf16 %v11405_v54  ;;  %v11406_v4 = vunpack.i.l.bf16 %v11405_v54  ;;  %10583 = vmatprep.subr.bf16.mxu0 %v10582_v11  ;;  %v1913_v57 = vsel %vm406_vm11, %v11431_v13, %v11432_v53 }
 0x466   :  { %v13425_v8 = vpop.permute.xlu1 %11439 }
 0x467   :  { %v1908_v15 = vsel %vm406_vm11, %v11406_v4, %v11407_v24  ;;  %v10586_v22 = vpack.c.bf16 %v11412_v20, %v11407_v24  ;;  %10537 = vmatpush1.bf16.msra.mxu1 %v10536_v63  ;;  %10585 = vmatpush1.bf16.msra.mxu0 %v10584_v37  ;;  %v684_v24 = vld [vmem:[#allocation8 + $0x4] ss:$0 sm:$0xff] }
 0x468   :  { %v11415_v31 = vpop.permute.xlu0 %11414  ;;  %v10588_v59 = vpack.c.bf16 %v1909_v41, %v1908_v15  ;;  %10539 = vmatprep.subr.bf16.mxu1 %v10538_v58 }
 0x469   :  { %v11417_v0 = vunpack.i.h.bf16 %v11415_v31  ;;  %v11416_v51 = vunpack.i.l.bf16 %v11415_v31  ;;  %10587 = vmatprep.subr.bf16.mxu0 %v10586_v22 }
 0x46b   :  { %v1910_v3 = vsel %vm406_vm11, %v11416_v51, %v11417_v0  ;;  %v10590_v25 = vpack.c.bf16 %v11422_v47, %v11417_v0  ;;  %10541 = vmatpush1.bf16.msra.mxu1 %v10540_v27  ;;  %10589 = vmatpush1.bf16.msra.mxu0 %v10588_v59  ;;  %v13427_v60 = vpop.permute.xlu1 %11449 }
 0x46c   :  { %v11425_v48 = vpop.permute.xlu0 %11424  ;;  %v10592_v50 = vpack.c.bf16 %v1911_v55, %v1910_v3  ;;  %10543 = vmatprep.subr.bf16.mxu1 %v10542_v32 }
 0x46d   :  { %v11427_v21 = vunpack.i.h.bf16 %v11425_v48  ;;  %v11426_v6 = vunpack.i.l.bf16 %v11425_v48  ;;  %10591 = vmatprep.subr.bf16.mxu0 %v10590_v25 }
 0x46f   :  { %v1912_v42 = vsel %vm406_vm11, %v11426_v6, %v11427_v21  ;;  %10545 = vmatpush1.bf16.msra.mxu1 %v10544_v10  ;;  %10593 = vmatpush1.bf16.msra.mxu0 %v10592_v50  ;;  %v10594_v46 = vpack.c.bf16 %v11432_v53, %v11427_v21  ;;  %v13429_v26 = vpop.permute.xlu1 %11459  ;;  %v1206_v21 = vld [vmem:[#allocation8 + $0x11] ss:$8 sm:$0x3] }
 0x470   :  { %v10596_v19 = vpack.c.bf16 %v1913_v57, %v1912_v42  ;;  %10547 = vmatprep.subr.bf16.mxu1 %v10546_v14  ;;  %v11435_v48 = vpop.permute.xlu0 %11434  ;;  %v1215_v6 = vrot.slane %v1206_v21, %v15091_v52 }
 0x471   :  { %10595 = vmatprep.subr.bf16.mxu0 %v10594_v46  ;;  %v11437_v57 = vunpack.i.h.bf16 %v11435_v48  ;;  %v11436_v42 = vunpack.i.l.bf16 %v11435_v48  ;;  %v1211_v46 = vrot.slane %v1206_v21, %v15092_v56 }
 0x473   :  { %10549 = vmatpush1.bf16.msra.mxu1 %v10548_v16  ;;  %10597 = vmatpush1.bf16.msra.mxu0 %v10596_v19  ;;  %v11442_v19 = vunpack.i.h.bf16 %v13425_v8 }
 0x474   :  { %10598 = vmatprep.subr.bf16.mxu1 %v15090_v35 }
 0x495   :  { %v13431_v62 = vpop.permute.xlu1 %11469 }
 0x49c   :  { %v11445_v10 = vpop.permute.xlu0 %11444 }
 0x4a0   :  { %v11455_v50 = vpop.permute.xlu0 %11454 }
 0x4a3   :  { %v13433_v7 = vpop.permute.xlu1 %11479 }
 0x4a8   :  { %v11465_v53 = vpop.permute.xlu0 %11464 }
 0x4ab   :  { %v13435_v2 = vpop.permute.xlu1 %11489 }
 0x4ac   :  { %v11492_v48 = vunpack.i.h.bf16 %v13435_v2 }
 0x4ae   :  { %v13455_v13 = vpop.permute.xlu0 %11474 }
 0x4af   :  { %v13437_v63 = vpop.permute.xlu1 %2206 }
 0x4b0   :  { %8880 = vmatprep.subr.msk.mxu0 %vm297_vm0, %v13437_v63 }
 0x4b2   :  { %v13458_v14 = vpop.permute.xlu0 %11484 }
 0x4b4   :  { %v9480_v23 = vpop.f32.mrb[6].mxu0 }
 0x4b5   :  { %v669_v45 = vadd.f32 %v9480_v23, %v586_v17  ;;  %v663_v18 = vpop.f32.mrb[7].mxu0  ;;  %v13463_v23 = vpack.c.bf16 %v11437_v57, %v11436_v42 }
 0x4b6   :  { %v664_v28 = vadd.f32 %v663_v18, %v586_v17  ;;  %v11441_v17 = vunpack.i.l.bf16 %v13425_v8  ;;  %v11446_v8 = vunpack.i.l.bf16 %v11445_v10 }
 0x4b7   :  { %v8856_v34 = vmul.f32 -1.442695, %v669_v45 }
 0x4b8   :  { %v8855_v11 = vmul.f32 -1.442695, %v664_v28  ;;  %v9485_v9 = vpop.f32.mrb[8].mxu0  ;;  %v2205_v28 = vpop.permute.xlu0 %2204 }
 0x4b9   :  { %11954 = vpow2.f32 %v8856_v34  ;;  %v755_v54 = vpop.f32.mrb[9].mxu0  ;;  %v761_v4 = vadd.f32 %v9485_v9, %v684_v24 }
 0x4ba   :  { %11956 = vpow2.f32 %v8855_v11  ;;  %v756_v39 = vadd.f32 %v755_v54, %v684_v24  ;;  %v13468_v11 = vsel %vm2208_vm5, %v2205_v28, %v13437_v63  ;;  %v13470_v54 = vpack.c.bf16 %v11442_v19, %v11441_v17 }
 0x4c3   :  { %v11955_v37 = vpop.eup %11954 }
 0x4c4   :  { %v11957_v58 = vpop.eup %11956  ;;  %v679_v20 = vadd.f32 1.0, %v11955_v37  ;;  %v11447_v37 = vunpack.i.h.bf16 %v11445_v10 }
 0x4c5   :  { %v678_v49 = vadd.f32 1.0, %v11957_v58 }
 0x4c6   :  { %11958 = vrcp.f32 %v679_v20  ;;  %v11452_v20 = vunpack.i.h.bf16 %v13427_v60  ;;  %v13481_v24 = vpack.c.bf16 %v11447_v37, %v11446_v8  ;;  %v940_v37 = vld [vmem:[#allocation8 + $0x6] ss:$0 sm:$0xff] }
 0x4c7   :  { %11960 = vrcp.f32 %v678_v49  ;;  %v11451_v49 = vunpack.i.l.bf16 %v13427_v60  ;;  %v11461_v60 = vunpack.i.l.bf16 %v13429_v26 }
 0x4d0   :  { %v11959_v12 = vpop.eup %11958 }
 0x4d1   :  { %v11961_v41 = vpop.eup %11960  ;;  %v937_v15 = vmul.f32 %v11959_v12, %v761_v4  ;;  %v15094_v4 = vmov 0.0   ;;  %v13486_v12 = vpack.c.bf16 %v11452_v20, %v11451_v49 }
 0x4d2   :  { %v936_v22 = vmul.f32 %v11961_v41, %v756_v39  ;;  %v11457_v39 = vunpack.i.h.bf16 %v11455_v50  ;;  %v11456_v41 = vunpack.i.l.bf16 %v11455_v50 }
 0x4e8   :  { %v927_v31 = vpop.f32.mrb[10].mxu0 }
 0x4e9   :  { %v928_v27 = vadd.f32 %v927_v31, %v764_v40  ;;  %v929_v59 = vpop.f32.mrb[11].mxu0  ;;  %v11467_v31 = vunpack.i.h.bf16 %v11465_v53 }
 0x4ea   :  { %v11472_v59 = vunpack.i.h.bf16 %v13431_v62 }
 0x4eb   :  { %v13441_v32 = vadd.f32 %v936_v22, %v928_v27  ;;  %v13492_v22 = vpack.c.bf16 %v11457_v39, %v11456_v41  ;;  %v11466_v27 = vunpack.i.l.bf16 %v11465_v53  ;;  %v13537_v53 = vpop.permute.xlu1 %2772 }
 0x4ec   :  { %v932_v47 = vpop.f32.mrb[12].mxu0 }
 0x4ed   :  { %v933_v61 = vadd.f32 %v932_v47, %v764_v40  ;;  %v934_v0 = vpop.f32.mrb[13].mxu0  ;;  %v942_v51 = vsel %vm587_vm15, %v13441_v32, 0.0  ;;  %v951_v33 = vmul.f32 %v13441_v32, %v13441_v32  ;;  %v11471_v47 = vunpack.i.l.bf16 %v13431_v62 }
 0x4ee   :  { %943 = vadd.xlane.f32.xlu0 %v942_v51  ;;  %v11477_v0 = vunpack.i.h.bf16 %v13455_v13  ;;  %v11476_v51 = vunpack.i.l.bf16 %v13455_v13  ;;  %v11481_v62 = vunpack.i.l.bf16 %v13433_v7 }
 0x4ef   :  { %v13447_v36 = vadd.f32 %v937_v15, %v933_v61  ;;  %v953_v55 = vsel %vm587_vm15, %v951_v33, 0.0  ;;  %v11462_v15 = vunpack.i.h.bf16 %v13429_v26  ;;  %v13502_v61 = vpack.c.bf16 %v11467_v31, %v11466_v27  ;;  %v13541_v13 = vpop.permute.xlu1 %2779 }
 0x4f0   :  { %954 = vadd.xlane.f32.xlu1 %v953_v55  ;;  %v13506_v26 = vpack.c.bf16 %v11472_v59, %v11471_v47  ;;  %v11482_v33 = vunpack.i.h.bf16 %v13433_v7  ;;  %v13514_v55 = vpack.c.bf16 %v11477_v0, %v11476_v51  ;;  %v11491_v7 = vunpack.i.l.bf16 %v13435_v2  ;;  %v13539_v2 = vpop.permute.xlu0 %2765  ;;  %v1566_v59 = vld [vmem:[#allocation8 + $0x12] ss:$8 sm:$0x3] }
 0x4f1   :  { %v945_v3 = vsel %vm587_vm15, %v13447_v36, 0.0  ;;  %v952_v25 = vmul.f32 %v13447_v36, %v13447_v36  ;;  %v13496_v40 = vpack.c.bf16 %v11462_v15, %v11461_v60  ;;  %v1571_v47 = vrot.slane %v1566_v59, %v15092_v56 }
 0x4f2   :  { %946 = vadd.xlane.f32.xlu0 %v945_v3  ;;  %v13518_v3 = vpack.c.bf16 %v11482_v33, %v11481_v62  ;;  %v13530_v50 = vpack.c.bf16 %v11492_v48, %v11491_v7 }
 0x4f3   :  { %v956_v1 = vsel %vm587_vm15, %v952_v25, 0.0  ;;  %v11487_v25 = vunpack.i.h.bf16 %v13458_v14 }
 0x4f6   :  { %957 = vadd.xlane.f32.xlu0 %v956_v1  ;;  %v11486_v1 = vunpack.i.l.bf16 %v13458_v14 }
 0x4f8   :  { %v13526_v10 = vpack.c.bf16 %v11487_v25, %v11486_v1 }
 0x518   :  { %v1506_v43 = vpop.f32.mrb[14].mxu0 }
 0x519   :  { %v1508_v5 = vpop.f32.mrb[15].mxu0  ;;  %v1507_v45 = vadd.f32 %v1506_v43, %v1211_v46 }
 0x51a   :  { %v1509_v16 = vadd.f32 %v1508_v5, %v1215_v6 }
 0x51c   :  { %v1512_v18 = vpop.f32.mrb[16].mxu0  ;;  %8870 = vmatprep.mubr.msk.f32.mxu1 %vm406_vm11, %v1509_v16  ;;  %8876 = vmatprep.mubr.msk.f32.mxu0 %vm406_vm11, %v1509_v16 }
 0x51d   :  { %v1514_v34 = vpop.f32.mrb[17].mxu0  ;;  %1649 = vmatmul.mubr.f32.vlgmr.msra.gmra.mrb[8].mxu1 %v1507_v45  ;;  %2027 = vmatmul.mubr.f32.vlgmr.msra.gmra.mrb[18].mxu0 %v1507_v45  ;;  %v1513_v58 = vadd.f32 %v1512_v18, %v1211_v46 }
 0x51e   :  { %v1515_v9 = vadd.f32 %v1514_v34, %v1215_v6  ;;  %10600 = vmatpush1.bf16.msra.mxu1 %v13463_v23  ;;  %8881 = vmatpush1.msk.msra.mxu0 %vm297_vm0, %v13468_v11 }
 0x51f   :  { %10601 = vmatprep.subr.bf16.mxu1 %v15090_v35  ;;  %10634 = vmatprep.subr.bf16.mxu0 %v15090_v35 }
 0x520   :  { %8871 = vmatprep.mubr.msk.f32.mxu1 %vm406_vm11, %v1515_v9  ;;  %8877 = vmatprep.mubr.msk.f32.mxu0 %vm406_vm11, %v1515_v9 }
 0x521   :  { %1655 = vmatmul.mubr.f32.gmra.mrb[10].mxu1 %v1513_v58  ;;  %2033 = vmatmul.mubr.f32.gmra.mrb[20].mxu0 %v1513_v58  ;;  %v941_v58 = vld [vmem:[#allocation8 + $0x7] ss:$0 sm:$0xff] }
 0x522   :  { %10603 = vmatpush1.bf16.msra.mxu1 %v13470_v54  ;;  %2284 = vmatprep.mubr.f32.mxu0 %v15094_v4 }
 0x523   :  { %10604 = vmatprep.subr.bf16.mxu1 %v15090_v35 }
 0x526   :  { %10606 = vmatpush1.bf16.msra.mxu1 %v13481_v24 }
 0x527   :  { %10607 = vmatprep.subr.bf16.mxu1 %v15090_v35 }
 0x52a   :  { %10609 = vmatpush1.bf16.msra.mxu1 %v13486_v12 }
 0x52b   :  { %10610 = vmatprep.subr.bf16.mxu1 %v15090_v35 }
 0x52e   :  { %10612 = vmatpush1.bf16.msra.mxu1 %v13492_v22 }
 0x52f   :  { %10613 = vmatprep.subr.bf16.mxu1 %v15090_v35 }
 0x532   :  { %10615 = vmatpush1.bf16.msra.mxu1 %v13496_v40 }
 0x533   :  { %10616 = vmatprep.subr.bf16.mxu1 %v15090_v35 }
 0x536   :  { %10618 = vmatpush1.bf16.msra.mxu1 %v13502_v61 }
 0x537   :  { %10619 = vmatprep.subr.bf16.mxu1 %v15090_v35 }
 0x53a   :  { %10621 = vmatpush1.bf16.msra.mxu1 %v13506_v26 }
 0x53b   :  { %10622 = vmatprep.subr.bf16.mxu1 %v15090_v35 }
 0x53e   :  { %10624 = vmatpush1.bf16.msra.mxu1 %v13514_v55 }
 0x53f   :  { %10625 = vmatprep.subr.bf16.mxu1 %v15090_v35 }
 0x542   :  { %10627 = vmatpush1.bf16.msra.mxu1 %v13518_v3 }
 0x543   :  { %10628 = vmatprep.subr.bf16.mxu1 %v15090_v35 }
 0x546   :  { %10630 = vmatpush1.bf16.msra.mxu1 %v13526_v10 }
 0x547   :  { %10631 = vmatprep.subr.bf16.mxu1 %v15090_v35 }
 0x54a   :  { %10633 = vmatpush1.bf16.msra.mxu1 %v13530_v50 }
 0x54b   :  { %8886 = vmatprep.subr.msk.mxu1 %vm297_vm0, %v13437_v63 }
 0x57b   :  { %v944_v21 = vpop.xlane.xlu0 %943 }
 0x57c   :  { %v949_v6 = vmul.f32 0.16666667, %v944_v21 }
 0x57d   :  { %v955_v57 = vpop.xlane.xlu1 %954 }
 0x57e   :  { %v963_v42 = vmul.f32 %v949_v6, %v949_v6  ;;  %v959_v14 = vmul.f32 0.16666667, %v955_v57  ;;  %v961_v34 = vsub.f32 %v13441_v32, %v949_v6 }
 0x57f   :  { %v947_v46 = vpop.xlane.xlu0 %946 }
 0x580   :  { %v965_v43 = vsub.f32 %v959_v14, %v963_v42  ;;  %v950_v5 = vmul.f32 0.16666667, %v947_v46 }
 0x582   :  { %v967_v16 = vadd.f32 1e-05, %v965_v43  ;;  %v964_v17 = vmul.f32 %v950_v5, %v950_v5  ;;  %v962_v49 = vsub.f32 %v13447_v36, %v950_v5  ;;  %v1575_v36 = vrot.slane %v1566_v59, %v15091_v52 }
 0x583   :  { %v958_v19 = vpop.xlane.xlu0 %957 }
 0x584   :  { %11962 = vrsqrt.f32 %v967_v16  ;;  %v960_v45 = vmul.f32 0.16666667, %v958_v19 }
 0x586   :  { %v966_v18 = vsub.f32 %v960_v45, %v964_v17 }
 0x588   :  { %v968_v28 = vadd.f32 1e-05, %v966_v18 }
 0x58a   :  { %11964 = vrsqrt.f32 %v968_v28 }
 0x58e   :  { %v11963_v9 = vpop.eup %11962 }
 0x58f   :  { %v971_v8 = vmul.f32 %v11963_v9, %v961_v34  ;;  %v1734_v34 = vld [vmem:[#allocation8 + $0x13] ss:$8 sm:$0x3] }
 0x591   :  { %v973_v20 = vmul.f32 %v971_v8, %v940_v37  ;;  %v1739_v8 = vrot.slane %v1734_v34, %v15092_v56 }
 0x593   :  { %v13545_v39 = vadd.f32 %v973_v20, %v941_v58 }
 0x594   :  { %v11965_v41 = vpop.eup %11964 }
 0x595   :  { %v977_v15 = vsel %vm587_vm15, %v13545_v39, -inf  ;;  %v972_v60 = vmul.f32 %v11965_v41, %v962_v49 }
 0x596   :  { %978 = vmax.xlane.f32.xlu1 %v977_v15 }
 0x597   :  { %v974_v31 = vmul.f32 %v972_v60, %v940_v37 }
 0x599   :  { %v13549_v27 = vadd.f32 %v974_v31, %v941_v58  ;;  %v1743_v58 = vrot.slane %v1734_v34, %v15091_v52  ;;  %v13648_v34 = vld [vmem:[#allocation11 + $0x38] sm:$0xff] }
 0x59b   :  { %v980_v32 = vsel %vm587_vm15, %v13549_v27, -inf }
 0x59c   :  { %981 = vmax.xlane.f32.xlu0 %v980_v32 }
 0x5f0   :  { %v1650_v0 = vpop.f32.mrb[8].mxu1  ;;  %v2028_v51 = vpop.f32.mrb[18].mxu0 }
 0x5f1   :  { %v1651_v33 = vadd.f32 %v1650_v0, %v1571_v47  ;;  %v1652_v62 = vpop.f32.mrb[9].mxu1  ;;  %v2030_v25 = vpop.f32.mrb[19].mxu0  ;;  %v2029_v20 = vadd.f32 %v2028_v51, %v1739_v8 }
 0x5f2   :  { %v1653_v1 = vadd.f32 %v1652_v62, %v1575_v36  ;;  %v2031_v41 = vadd.f32 %v2030_v25, %v1743_v58 }
 0x5f3   :  { %v8872_v48 = vmul.f32 -1.442695, %v1651_v33 }
 0x5f4   :  { %v8873_v7 = vmul.f32 -1.442695, %v1653_v1  ;;  %v1656_v21 = vpop.f32.mrb[10].mxu1  ;;  %v2034_v6 = vpop.f32.mrb[20].mxu0 }
 0x5f5   :  { %11966 = vpow2.f32 %v8872_v48  ;;  %v1657_v57 = vadd.f32 %v1656_v21, %v1571_v47  ;;  %v1658_v42 = vpop.f32.mrb[11].mxu1  ;;  %v2036_v14 = vpop.f32.mrb[21].mxu0  ;;  %v2035_v32 = vadd.f32 %v2034_v6, %v1739_v8  ;;  %v13655_v8 = vld [vmem:[#allocation11 + $0x78] sm:$0xff] }
 0x5f6   :  { %11968 = vpow2.f32 %v8873_v7  ;;  %v1659_v46 = vadd.f32 %v1658_v42, %v1575_v36  ;;  %v2037_v36 = vadd.f32 %v2036_v14, %v1743_v58 }
 0x5f7   :  { %v8874_v43 = vmul.f32 -1.442695, %v1657_v57 }
 0x5f8   :  { %v8875_v5 = vmul.f32 -1.442695, %v1659_v46 }
 0x5f9   :  { %11970 = vpow2.f32 %v8874_v43  ;;  %v15095_v43 = vld [vmem:[#allocation22_spill] sm:$0xff] }
 0x5fa   :  { %11972 = vpow2.f32 %v8875_v5  ;;  %vm2774_vm7 = vcmp.eq.s32.totalorder %v15095_v43, %v13537_v53  ;;  %vm2767_vm8 = vcmp.eq.s32.totalorder %v15095_v43, %v13539_v2  ;;  %v2790_v5 = vld [vmem:[#allocation10 + $0x30] sm:$0xff]  ;;  %vm2781_vm9 = vcmp.eq.s32.totalorder %v15095_v43, %v13541_v13  ;;  %v2792_v2 = vld [vmem:[#allocation10 + $0x40] sm:$0x7]  ;;  %v12293_v43 = vld [vmem:[#allocation5 + $0x378] sm:$0xff] }
 0x5fb   :  { %v2782_v53 = vsel %vm2781_vm9, 1.0, %v15094_v4  ;;  %v13646_v13 = vld [vmem:[#allocation11 + $0x18] sm:$0xff]  ;;  %vm7021_vm9 = vcmask 64512  }
 0x5ff   :  { %v11967_v16 = vpop.eup %11966 }
 0x600   :  { %v11969_v19 = vpop.eup %11968  ;;  %v1673_v17 = vadd.f32 1.0, %v11967_v16  ;;  %v2791_v16 = vld [vmem:[#allocation10 + $0x38] sm:$0xff] }
 0x601   :  { %v1674_v45 = vadd.f32 1.0, %v11969_v19  ;;  %v2775_v19 = vsel %vm2774_vm7, 1.0, %v15094_v4 }
 0x602   :  { %11974 = vrcp.f32 %v1673_v17  ;;  %v2768_v17 = vsel %vm2767_vm8, 1.0, %v15094_v4 }
 0x603   :  { %v11971_v18 = vpop.eup %11970  ;;  %11976 = vrcp.f32 %v1674_v45  ;;  %v10716_v45 = vpack.c.bf16 %v2791_v16, %v2790_v5  ;;  %v12294_v16 = vld [vmem:[#allocation5 + $0x490] sm:$0xff] }
 0x604   :  { %v11973_v28 = vpop.eup %11972  ;;  %v1675_v9 = vadd.f32 1.0, %v11971_v18  ;;  %v2776_v18 = vadd.f32 %v2775_v19, %v2768_v17  ;;  %v12295_v19 = vld [vmem:[#allocation5 + $0x4c8] sm:$0xff] }
 0x605   :  { %v1676_v37 = vadd.f32 1.0, %v11973_v28  ;;  %v11546_v17 = vpack.i.bf16 %v12295_v19, %v12294_v16 }
 0x606   :  { %11978 = vrcp.f32 %v1675_v9  ;;  %v2783_v28 = vadd.f32 %v2782_v53, %v2776_v18  ;;  %v10719_v9 = vpack.c.bf16 %v13648_v34, %v13646_v13  ;;  %v12297_v18 = vld [vmem:[#allocation5 + $0x458] sm:$0xff] }
 0x607   :  { %11980 = vrcp.f32 %v1676_v37  ;;  %v13653_v37 = vld [vmem:[#allocation11 + $0x58] sm:$0xff] }
 0x608   :  { %v10722_v58 = vpack.c.bf16 %v13655_v8, %v13653_v37 }
 0x60c   :  { %v11975_v49 = vpop.eup %11974 }
 0x60d   :  { %v11977_v15 = vpop.eup %11976  ;;  %v2039_v60 = vmul.f32 %v11975_v49, %v2029_v20  ;;  %v13660_v20 = vld [vmem:[#allocation11 + $0x98] sm:$0xff] }
 0x60e   :  { %v2040_v31 = vmul.f32 %v11977_v15, %v2031_v41  ;;  %v13662_v49 = vld [vmem:[#allocation11 + $0xb8] sm:$0xff] }
 0x60f   :  { %v13561_v33 = vadd.f32 %v2039_v60, %v12909_v30  ;;  %v10725_v41 = vpack.c.bf16 %v13662_v49, %v13660_v20  ;;  %v13667_v15 = vld [vmem:[#allocation11 + $0xd8] sm:$0xff] }
 0x610   :  { %v11979_v59 = vpop.eup %11978  ;;  %v13558_v47 = vadd.f32 %v2040_v31, %v12907_v29  ;;  %v13669_v60 = vld [vmem:[#allocation11 + $0xf8] sm:$0xff] }
 0x611   :  { %v11981_v0 = vpop.eup %11980  ;;  %v2041_v62 = vmul.f32 %v11979_v59, %v2035_v32  ;;  %v10728_v31 = vpack.c.bf16 %v13669_v60, %v13667_v15  ;;  %v13674_v32 = vld [vmem:[#allocation11 + $0x118] sm:$0xff] }
 0x612   :  { %v2042_v1 = vmul.f32 %v11981_v0, %v2037_v36  ;;  %8878 = vmatprep.mubr.msk.f32.mxu1 %vm406_vm11, %v13558_v47  ;;  %v2298_v14 = vmul.f32 %v13558_v47, %v13558_v47  ;;  %v13676_v59 = vld [vmem:[#allocation11 + $0x138] sm:$0xff] }
 0x613   :  { %2192 = vmatmul.mubr.f32.vlgmr.msra.gmra.mrb[12].mxu1 %v13561_v33  ;;  %v13572_v29 = vadd.f32 %v2041_v62, %v12922_v44  ;;  %v10731_v36 = vpack.c.bf16 %v13676_v59, %v13674_v32  ;;  %v13680_v0 = vld [vmem:[#allocation11 + $0x158] sm:$0xff] }
 0x614   :  { %v13567_v51 = vadd.f32 %v2042_v1, %v12920_v38  ;;  %8887 = vmatpush1.msk.msra.mxu1 %vm297_vm0, %v13468_v11  ;;  %v13682_v62 = vld [vmem:[#allocation11 + $0x178] sm:$0xff] }
 0x615   :  { %8890 = vmatprep.subr.msk.mxu1 %vm297_vm0, %v13437_v63  ;;  %v10734_v1 = vpack.c.bf16 %v13682_v62, %v13680_v0 }
 0x616   :  { %8879 = vmatprep.mubr.msk.f32.mxu1 %vm406_vm11, %v13567_v51 }
 0x617   :  { %2197 = vmatmul.mubr.f32.gmra.mrb[14].mxu1 %v13572_v29 }
 0x618   :  { %2452 = vmatprep.mubr.f32.mxu1 %v15094_v4 }
 0x623   :  { %v979_v30 = vpop.xlane.xlu1 %978 }
 0x624   :  { %v983_v38 = vsub.f32 %v13545_v39, %v979_v30  ;;  %v12276_v30 = vld [vmem:[#allocation5 + $0x30] sm:$0xff] }
 0x626   :  { %v985_v25 = vmul.f32 1.442695, %v983_v38  ;;  %v12277_v38 = vld [vmem:[#allocation5 + $0x68] sm:$0xff] }
 0x628   :  { %11982 = vpow2.f32 %v985_v25  ;;  %v11496_v25 = vpack.i.bf16 %v12277_v38, %v12276_v30 }
 0x629   :  { %v982_v48 = vpop.xlane.xlu0 %981 }
 0x62a   :  { %v984_v7 = vsub.f32 %v13549_v27, %v982_v48  ;;  %v12278_v48 = vld [vmem:[#allocation5 + $0xa0] sm:$0xff] }
 0x62c   :  { %v987_v44 = vmul.f32 1.442695, %v984_v7  ;;  %v12279_v7 = vld [vmem:[#allocation5 + $0xd8] sm:$0xff] }
 0x62e   :  { %11984 = vpow2.f32 %v987_v44  ;;  %v11501_v44 = vpack.i.bf16 %v12279_v7, %v12278_v48 }
 0x632   :  { %v13582_v21 = vpop.eup %11982 }
 0x633   :  { %v989_v63 = vsel %vm587_vm15, %v13582_v21, 0.0 }
 0x634   :  { %990 = vadd.xlane.f32.xlu1 %v989_v63  ;;  %v12280_v63 = vld [vmem:[#allocation5 + $0x110] sm:$0xff] }
 0x638   :  { %v13586_v6 = vpop.eup %11984 }
 0x639   :  { %v992_v57 = vsel %vm587_vm15, %v13586_v6, 0.0 }
 0x63a   :  { %993 = vadd.xlane.f32.xlu0 %v992_v57  ;;  %v12281_v57 = vld [vmem:[#allocation5 + $0x148] sm:$0xff] }
 0x645   :  { %11497 = vrot.lane.b32.xlu1 %v11496_v25, %s12548_s2 }
 0x650   :  { %11502 = vrot.lane.b32.xlu0 %v11501_v44, %s12548_s2 }
 0x6c7   :  { %v994_v30 = vpop.xlane.xlu0 %993 }
 0x6e6   :  { %v2193_v39 = vpop.f32.mrb[12].mxu1 }
 0x6e7   :  { %v2195_v42 = vpop.f32.mrb[13].mxu1  ;;  %8882 = vmatmul.mubr.msk.f32.vlgmr.msra.gmra.mrb[22].mxu0 %vm587_vm15, %v2193_v39  ;;  %v11506_v39 = vpack.i.bf16 %v12281_v57, %v12280_v63 }
 0x6e8   :  { %10636 = vmatpush1.bf16.msra.mxu0 %v13463_v23  ;;  %2290 = vmatprep.mubr.f32.mxu0 %v15094_v4  ;;  %v2784_v23 = vld [vmem:[#allocation10] sm:$0xff] }
 0x6e9   :  { %10637 = vmatprep.subr.bf16.mxu0 %v15090_v35  ;;  %v12282_v42 = vld [vmem:[#allocation5 + $0x1f0] sm:$0xff]  ;;  %11507 = vrot.lane.b32.xlu1 %v11506_v39, %s12548_s2  ;;  %v13720_v39 = vld [vmem:[#allocation11] sm:$0xff] }
 0x6ea   :  { %v2198_v27 = vpop.f32.mrb[14].mxu1 }
 0x6eb   :  { %v2200_v46 = vpop.f32.mrb[15].mxu1  ;;  %8883 = vmatmul.mubr.msk.f32.gmra.mrb[24].mxu0 %vm587_vm15, %v2198_v27  ;;  %v12283_v27 = vld [vmem:[#allocation5 + $0x228] sm:$0xff] }
 0x6ec   :  { %10639 = vmatpush1.bf16.msra.mxu0 %v13470_v54  ;;  %8884 = vmatprep.mubr.msk.f32.mxu0 %vm406_vm11, %v2298_v14  ;;  %v2785_v54 = vld [vmem:[#allocation10 + $0x8] sm:$0xff]  ;;  %v11516_v14 = vpack.i.bf16 %v12283_v27, %v12282_v42  ;;  %v12284_v46 = vld [vmem:[#allocation5 + $0x180] sm:$0xff] }
 0x6ed   :  { %10640 = vmatprep.subr.bf16.mxu0 %v15090_v35  ;;  %v13722_v42 = vld [vmem:[#allocation11 + $0x20] sm:$0xff] }
 0x6ee   :  { %11517 = vrot.lane.b32.xlu0 %v11516_v14, %s12548_s2  ;;  %v8896_v27 = vld [vmem:[#allocation14] ss:$0 sm:$0xff] }
 0x6f0   :  { %10642 = vmatpush1.bf16.msra.mxu0 %v13481_v24  ;;  %v10707_v24 = vpack.c.bf16 %v2785_v54, %v2784_v23  ;;  %v12285_v23 = vld [vmem:[#allocation5 + $0x1b8] sm:$0xff] }
 0x6f1   :  { %10643 = vmatprep.subr.bf16.mxu0 %v15090_v35  ;;  %v11511_v54 = vpack.i.bf16 %v12285_v23, %v12284_v46  ;;  %v10761_v46 = vpack.c.bf16 %v13722_v42, %v13720_v39 }
 0x6f3   :  { %11512 = vrot.lane.b32.xlu1 %v11511_v54, %s12548_s2  ;;  %v13728_v54 = vld [vmem:[#allocation11 + $0x40] sm:$0xff] }
 0x6f4   :  { %10645 = vmatpush1.bf16.msra.mxu0 %v13486_v12  ;;  %v2297_v12 = vmul.f32 %v13561_v33, %v13561_v33 }
 0x6f5   :  { %10646 = vmatprep.subr.bf16.mxu0 %v15090_v35 }
 0x6f8   :  { %10648 = vmatpush1.bf16.msra.mxu0 %v13492_v22  ;;  %v2786_v22 = vld [vmem:[#allocation10 + $0x10] sm:$0xff] }
 0x6f9   :  { %10649 = vmatprep.subr.bf16.mxu0 %v15090_v35 }
 0x6fc   :  { %10651 = vmatpush1.bf16.msra.mxu0 %v13496_v40  ;;  %v2787_v40 = vld [vmem:[#allocation10 + $0x18] sm:$0xff] }
 0x6fd   :  { %10652 = vmatprep.subr.bf16.mxu0 %v15090_v35 }
 0x700   :  { %10654 = vmatpush1.bf16.msra.mxu0 %v13502_v61  ;;  %v2300_v61 = vmul.f32 %v13567_v51, %v13567_v51 }
 0x701   :  { %10655 = vmatprep.subr.bf16.mxu0 %v15090_v35 }
 0x704   :  { %10657 = vmatpush1.bf16.msra.mxu0 %v13506_v26  ;;  %v10710_v26 = vpack.c.bf16 %v2787_v40, %v2786_v22  ;;  %v12288_v40 = vld [vmem:[#allocation5 + $0x260] sm:$0xff] }
 0x705   :  { %10658 = vmatprep.subr.bf16.mxu0 %v15090_v35 }
 0x708   :  { %10660 = vmatpush1.bf16.msra.mxu0 %v13514_v55  ;;  %v2299_v55 = vmul.f32 %v13572_v29, %v13572_v29 }
 0x709   :  { %10661 = vmatprep.subr.bf16.mxu0 %v15090_v35 }
 0x70c   :  { %10663 = vmatpush1.bf16.msra.mxu0 %v13518_v3  ;;  %v2788_v3 = vld [vmem:[#allocation10 + $0x20] sm:$0xff] }
 0x70d   :  { %10664 = vmatprep.subr.bf16.mxu0 %v15090_v35 }
 0x710   :  { %10666 = vmatpush1.bf16.msra.mxu0 %v13526_v10  ;;  %v2789_v10 = vld [vmem:[#allocation10 + $0x28] sm:$0xff] }
 0x711   :  { %10667 = vmatprep.subr.bf16.mxu0 %v15090_v35 }
 0x714   :  { %10669 = vmatpush1.bf16.msra.mxu0 %v13530_v50  ;;  %v10713_v50 = vpack.c.bf16 %v2789_v10, %v2788_v3  ;;  %v12291_v3 = vld [vmem:[#allocation5 + $0x3e8] sm:$0xff] }
 0x715   :  { %10706 = vmatprep.subr.bf16.mxu0 %v15090_v35 }
 0x717   :  { %2372 = vmatmul.mubr.f32.vlgmr.msra.gmra.mrb[26].mxu0 %v2297_v12  ;;  %v12287_v12 = vld [vmem:[#allocation5 + $0x308] sm:$0xff] }
 0x718   :  { %8885 = vmatprep.mubr.msk.f32.mxu0 %vm406_vm11, %v2300_v61  ;;  %10708 = vmatpush3.bf16.msra.mxu0 %v10707_v24  ;;  %v12286_v24 = vld [vmem:[#allocation5 + $0x2d0] sm:$0xff]  ;;  %v12289_v61 = vld [vmem:[#allocation5 + $0x298] sm:$0xff] }
 0x719   :  { %10709 = vmatprep.subr.bf16.mxu0 %v15090_v35  ;;  %v11526_v22 = vpack.i.bf16 %v12287_v12, %v12286_v24  ;;  %v13730_v24 = vld [vmem:[#allocation11 + $0x60] sm:$0xff] }
 0x71a   :  { %v13739_v12 = vld [vmem:[#allocation11 + $0x80] sm:$0xff] }
 0x71b   :  { %2377 = vmatmul.mubr.f32.gmra.mrb[28].mxu0 %v2299_v55  ;;  %11527 = vrot.lane.b32.xlu0 %v11526_v22, %s12548_s2  ;;  %v12290_v55 = vld [vmem:[#allocation5 + $0x3b0] sm:$0xff]  ;;  %v13741_v22 = vld [vmem:[#allocation11 + $0xa0] sm:$0xff] }
 0x71c   :  { %10711 = vmatpush3.bf16.msra.mxu0 %v10710_v26  ;;  %9504 = vmatprep.mubr.msk.f32.mxu0 %vm12547_vm6, %v15094_v4  ;;  %v11521_v26 = vpack.i.bf16 %v12289_v61, %v12288_v40  ;;  %v11536_v10 = vpack.i.bf16 %v12291_v3, %v12290_v55  ;;  %v10767_v40 = vpack.c.bf16 %v13741_v22, %v13739_v12  ;;  %v13746_v61 = vld [vmem:[#allocation11 + $0xc0] sm:$0xff] }
 0x71d   :  { %10712 = vmatprep.subr.bf16.mxu0 %v15090_v35  ;;  %v13752_v3 = vld [vmem:[#allocation11 + $0x100] sm:$0xff] }
 0x71e   :  { %11522 = vrot.lane.b32.xlu1 %v11521_v26, %s12548_s2  ;;  %v13748_v26 = vld [vmem:[#allocation11 + $0xe0] sm:$0xff] }
 0x71f   :  { %11537 = vrot.lane.b32.xlu0 %v11536_v10, %s12548_s2  ;;  %v10770_v55 = vpack.c.bf16 %v13748_v26, %v13746_v61  ;;  %v13754_v10 = vld [vmem:[#allocation11 + $0x120] sm:$0xff] }
 0x720   :  { %10714 = vmatpush3.bf16.msra.mxu0 %v10713_v50  ;;  %v12292_v50 = vld [vmem:[#allocation5 + $0x340] sm:$0xff] }
 0x721   :  { %10715 = vmatprep.subr.bf16.mxu0 %v15090_v35  ;;  %v11531_v5 = vpack.i.bf16 %v12293_v43, %v12292_v50  ;;  %v10773_v50 = vpack.c.bf16 %v13754_v10, %v13752_v3 }
 0x723   :  { %11532 = vrot.lane.b32.xlu1 %v11531_v5, %s12548_s2  ;;  %11547 = vrot.lane.b32.xlu0 %v11546_v17, %s12548_s2  ;;  %v11503_v5 = vpop.permute.xlu0 %11502 }
 0x724   :  { %10717 = vmatpush3.bf16.msra.mxu0 %v10716_v45  ;;  %v12296_v45 = vld [vmem:[#allocation5 + $0x420] sm:$0xff]  ;;  %v11505_v17 = vunpack.i.h.bf16 %v11503_v5 }
 0x725   :  { %9502 = vmatprep.subr.mxu0 %v15094_v4  ;;  %v11541_v53 = vpack.i.bf16 %v12297_v18, %v12296_v45  ;;  %v11504_v45 = vunpack.i.l.bf16 %v11503_v5  ;;  %v13760_v18 = vld [vmem:[#allocation11 + $0x140] sm:$0xff] }
 0x727   :  { %11542 = vrot.lane.b32.xlu1 %v11541_v53, %s12548_s2  ;;  %v13762_v53 = vld [vmem:[#allocation11 + $0x160] sm:$0xff] }
 0x728   :  { %9503 = vmatpush3.msk.msra.mxu0 %vm2802_vm10, %v2792_v2  ;;  %v12298_v2 = vld [vmem:[#allocation5 + $0x500] sm:$0xff] }
 0x729   :  { %9505 = vmatmul.mubr.msk.f32.vlgmr.msra.gmra.mrb[30].mxu0 %vm2798_vm13, %v2783_v28  ;;  %10718 = vmatprep.subr.bf16.mxu0 %v15090_v35  ;;  %v12299_v28 = vld [vmem:[#allocation5 + $0x538] sm:$0xff]  ;;  %vm7126_vm13 = vcmask 195584  }
 0x72a   :  { %9531 = vmatprep.mubr.msk.f32.mxu0 %vm12547_vm6, %v15094_v4  ;;  %10720 = vmatpush3.bf16.msra.mxu0 %v10719_v9  ;;  %v11551_v9 = vpack.i.bf16 %v12299_v28, %v12298_v2 }
 0x72b   :  { %10721 = vmatprep.subr.bf16.mxu0 %v15090_v35 }
 0x72c   :  { %11552 = vrot.lane.b32.xlu1 %v11551_v9, %s12548_s2  ;;  %v10776_v9 = vpack.c.bf16 %v13762_v53, %v13760_v18 }
 0x72e   :  { %10723 = vmatpush3.bf16.msra.mxu0 %v10722_v58 }
 0x72f   :  { %10724 = vmatprep.subr.bf16.mxu0 %v15090_v35 }
 0x732   :  { %10726 = vmatpush3.bf16.msra.mxu0 %v10725_v41 }
 0x733   :  { %10727 = vmatprep.subr.bf16.mxu0 %v15090_v35 }
 0x736   :  { %10729 = vmatpush3.bf16.msra.mxu0 %v10728_v31 }
 0x737   :  { %10730 = vmatprep.subr.bf16.mxu0 %v15090_v35 }
 0x73a   :  { %10732 = vmatpush3.bf16.msra.mxu0 %v10731_v36 }
 0x73b   :  { %10733 = vmatprep.subr.bf16.mxu0 %v15090_v35 }
 0x73e   :  { %10735 = vmatpush3.bf16.msra.mxu0 %v10734_v1  ;;  %v991_v1 = vpop.xlane.xlu1 %990 }
 0x73f   :  { %10760 = vmatprep.subr.bf16.mxu0 %v15090_v35  ;;  %11986 = vrcp.f32 %v991_v1  ;;  %v10674_v1 = vpack.c.bf16 %v11505_v17, %v11504_v45 }
 0x740   :  { %11988 = vrcp.f32 %v994_v30 }
 0x742   :  { %v11498_v43 = vpop.permute.xlu1 %11497 }
 0x743   :  { %v11500_v16 = vunpack.i.h.bf16 %v11498_v43  ;;  %v11499_v19 = vunpack.i.l.bf16 %v11498_v43 }
 0x745   :  { %v10671_v2 = vpack.c.bf16 %v11500_v16, %v11499_v19 }
 0x749   :  { %v11987_v48 = vpop.eup %11986 }
 0x74a   :  { %v996_v63 = vmul.f32 %v11987_v48, %v13582_v21  ;;  %v11989_v57 = vpop.eup %11988 }
 0x75b   :  { %v11508_v28 = vpop.permute.xlu1 %11507 }
 0x75c   :  { %v11510_v30 = vunpack.i.h.bf16 %v11508_v28 }
 0x7ba   :  { %v13700_v58 = vpop.f32.mrb[22].mxu0 }
 0x7bb   :  { %v13702_v41 = vpop.f32.mrb[23].mxu0 }
 0x7be   :  { %v13704_v31 = vpop.f32.mrb[24].mxu0 }
 0x7bf   :  { %v13706_v36 = vpop.f32.mrb[25].mxu0 }
 0x7ea   :  { %v2373_v38 = vpop.f32.mrb[26].mxu0 }
 0x7eb   :  { %v2375_v25 = vpop.f32.mrb[27].mxu0  ;;  %8888 = vmatmul.mubr.msk.f32.vlgmr.msra.gmra.mrb[16].mxu1 %vm587_vm15, %v2373_v38  ;;  %v11509_v38 = vunpack.i.l.bf16 %v11508_v28 }
 0x7ec   :  { %8891 = vmatpush1.msk.msra.mxu1 %vm297_vm0, %v13468_v11  ;;  %2458 = vmatprep.mubr.f32.mxu1 %v15094_v4  ;;  %v998_v11 = vmul.f32 %v11989_v57, %v13586_v6  ;;  %vm2893_vm0 = vcmask 785408   ;;  %v10764_v6 = vpack.c.bf16 %v13730_v24, %v13728_v54  ;;  %v11513_v25 = vpop.permute.xlu1 %11512 }
 0x7ed   :  { %10670 = vmatprep.subr.bf16.mxu1 %v15090_v35  ;;  %v10677_v48 = vpack.c.bf16 %v11510_v30, %v11509_v38 }
 0x7ee   :  { %v2378_v7 = vpop.f32.mrb[28].mxu0 }
 0x7ef   :  { %v2380_v44 = vpop.f32.mrb[29].mxu0  ;;  %8889 = vmatmul.mubr.msk.f32.gmra.mrb[18].mxu1 %vm587_vm15, %v2378_v7  ;;  %v11515_v7 = vunpack.i.h.bf16 %v11513_v25 }
 0x7f0   :  { %2593 = vmatprep.mubr.f32.mxu1 %v15094_v4  ;;  %v11514_v44 = vunpack.i.l.bf16 %v11513_v25 }
 0x7f2   :  { %v10680_v57 = vpack.c.bf16 %v11515_v7, %v11514_v44 }
 0x7f3   :  { %8892 = vmatmul.mubr.msk.f32.vlgmr.msra.gmra.mrb[20].mxu1 %vm587_vm15, %v996_v63  ;;  %v11518_v63 = vpop.permute.xlu0 %11517 }
 0x7f4   :  { %2599 = vmatprep.mubr.f32.mxu1 %v15094_v4  ;;  %10672 = vmatpush1.bf16.msra.mxu1 %v10671_v2 }
 0x7f5   :  { %10673 = vmatprep.subr.bf16.mxu1 %v15090_v35 }
 0x7f7   :  { %8893 = vmatmul.mubr.msk.f32.gmra.mrb[22].mxu1 %vm587_vm15, %v998_v11  ;;  %v11520_v11 = vunpack.i.h.bf16 %v11518_v63  ;;  %vm3060_vm15 = vcmask 23552  }
 0x7f8   :  { %10675 = vmatpush1.bf16.msra.mxu1 %v10674_v1 }
 0x7f9   :  { %10676 = vmatprep.subr.bf16.mxu1 %v15090_v35 }
 0x7fc   :  { %v2872_v14 = vpop.f32.mrb[30].mxu0  ;;  %10678 = vmatpush1.bf16.msra.mxu1 %v10677_v48 }
 0x7fd   :  { %v13726_v21 = vadd.f32 %v8896_v27, %v2872_v14  ;;  %v9506_v23 = vpop.f32.mrb[31].mxu0  ;;  %v11519_v27 = vunpack.i.l.bf16 %v11518_v63  ;;  %10679 = vmatprep.subr.bf16.mxu1 %v15090_v35  ;;  %v11523_v14 = vpop.permute.xlu1 %11522 }
 0x7fe   :  { %v11525_v23 = vunpack.i.h.bf16 %v11523_v14 }
 0x7ff   :  { %9532 = vmatmul.mubr.msk.f32.vlgmr.msra.gmra.mrb[32].mxu0 %vm2893_vm0, %v13726_v21 }
 0x800   :  { %10762 = vmatpush3.bf16.msra.mxu0 %v10761_v46  ;;  %9606 = vmatprep.mubr.msk.f32.mxu0 %vm12547_vm6, %v15094_v4  ;;  %v10683_v46 = vpack.c.bf16 %v11520_v11, %v11519_v27 }
 0x801   :  { %10763 = vmatprep.subr.bf16.mxu0 %v15090_v35  ;;  %10681 = vmatpush1.bf16.msra.mxu1 %v10680_v57  ;;  %v11533_v16 = vpop.permute.xlu1 %11532 }
 0x802   :  { %10682 = vmatprep.subr.bf16.mxu1 %v15090_v35  ;;  %v11535_v19 = vunpack.i.h.bf16 %v11533_v16  ;;  %v11534_v17 = vunpack.i.l.bf16 %v11533_v16 }
 0x804   :  { %10765 = vmatpush3.bf16.msra.mxu0 %v10764_v6  ;;  %v11524_v6 = vunpack.i.l.bf16 %v11523_v14  ;;  %v10692_v45 = vpack.c.bf16 %v11535_v19, %v11534_v17  ;;  %v13868_v19 = vld [vmem:[#allocation11 + $0x148] sm:$0xff] }
 0x805   :  { %10766 = vmatprep.subr.bf16.mxu0 %v15090_v35  ;;  %10684 = vmatpush1.bf16.msra.mxu1 %v10683_v46  ;;  %v11543_v30 = vpop.permute.xlu1 %11542  ;;  %v11636_v17 = vpack.i.bf16 %v13868_v19, %v13760_v18 }
 0x806   :  { %10685 = vmatprep.subr.bf16.mxu1 %v15090_v35  ;;  %v11545_v38 = vunpack.i.h.bf16 %v11543_v30  ;;  %v11544_v25 = vunpack.i.l.bf16 %v11543_v30 }
 0x808   :  { %10768 = vmatpush3.bf16.msra.mxu0 %v10767_v40  ;;  %v11528_v40 = vpop.permute.xlu0 %11527  ;;  %v10698_v48 = vpack.c.bf16 %v11545_v38, %v11544_v25 }
 0x809   :  { %10769 = vmatprep.subr.bf16.mxu0 %v15090_v35  ;;  %v11529_v43 = vunpack.i.l.bf16 %v11528_v40  ;;  %v11553_v11 = vpop.permute.xlu1 %11552 }
 0x80a   :  { %v11555_v27 = vunpack.i.h.bf16 %v11553_v11  ;;  %v11554_v14 = vunpack.i.l.bf16 %v11553_v11 }
 0x80c   :  { %10771 = vmatpush3.bf16.msra.mxu0 %v10770_v55  ;;  %v10686_v55 = vpack.c.bf16 %v11525_v23, %v11524_v6  ;;  %v11538_v2 = vpop.permute.xlu0 %11537  ;;  %v10704_v46 = vpack.c.bf16 %v11555_v27, %v11554_v14  ;;  %v13786_v23 = vpack.i.bf16 %v13648_v34, %v13646_v13  ;;  %v13788_v6 = vld [vmem:[#allocation13] sm:$0x7]  ;;  %v13805_v13 = vpack.i.bf16 %v13669_v60, %v13667_v15  ;;  %v13827_v15 = vld [vmem:[#allocation11 + $0x48] sm:$0xff] }
 0x80d   :  { %10772 = vmatprep.subr.bf16.mxu0 %v15090_v35  ;;  %v11540_v28 = vunpack.i.h.bf16 %v11538_v2  ;;  %3148 = vrot.lane.b32.xlu0 %v13788_v6, %s12549_s23  ;;  %v13811_v34 = vpack.i.bf16 %v13676_v59, %v13674_v32  ;;  %v11596_v32 = vpack.i.bf16 %v13827_v15, %v13728_v54  ;;  %v13836_v59 = vld [vmem:[#allocation11 + $0x68] sm:$0xff]  ;;  %s12553_s23 = smov 104  }
 0x80e   :  { %10687 = vmatpush1.bf16.msra.mxu1 %v10686_v55  ;;  %11557 = vrot.lane.b32.xlu1 %v13786_v23, %s12544_s18  ;;  %v13799_v55 = vpack.i.bf16 %v13662_v49, %v13660_v20  ;;  %v13825_v49 = vld [vmem:[#allocation11 + $0x28] sm:$0xff] }
 0x80f   :  { %10688 = vmatprep.subr.bf16.mxu1 %v15090_v35  ;;  %v11591_v60 = vpack.i.bf16 %v13825_v49, %v13722_v42  ;;  %v13846_v42 = vld [vmem:[#allocation11 + $0xa8] sm:$0xff] }
 0x810   :  { %10774 = vmatpush3.bf16.msra.mxu0 %v10773_v50  ;;  %v11530_v50 = vunpack.i.h.bf16 %v11528_v40  ;;  %v11548_v7 = vpop.permute.xlu0 %11547  ;;  %v13793_v40 = vpack.i.bf16 %v13655_v8, %v13653_v37  ;;  %v13813_v37 = vld [vmem:[#allocation11 + $0x8] sm:$0xff]  ;;  %v13819_v8 = vpack.i.bf16 %v13682_v62, %v13680_v0  ;;  %v11601_v62 = vpack.i.bf16 %v13836_v59, %v13730_v24 }
 0x811   :  { %10775 = vmatprep.subr.bf16.mxu0 %v15090_v35  ;;  %v11550_v44 = vunpack.i.h.bf16 %v11548_v7  ;;  %v11549_v63 = vunpack.i.l.bf16 %v11548_v7  ;;  %v11586_v20 = vpack.i.bf16 %v13813_v37, %v13720_v39  ;;  %v13838_v0 = vld [vmem:[#allocation11 + $0x88] sm:$0xff]  ;;  %v11611_v54 = vpack.i.bf16 %v13846_v42, %v13741_v22 }
 0x812   :  { %v10689_v5 = vpack.c.bf16 %v11530_v50, %v11529_v43  ;;  %11562 = vrot.lane.b32.xlu0 %v13793_v40, %s12544_s18  ;;  %11567 = vrot.lane.b32.xlu1 %v13799_v55, %s12544_s18  ;;  %v11606_v39 = vpack.i.bf16 %v13838_v0, %v13739_v12  ;;  %v13848_v50 = vld [vmem:[#allocation11 + $0xc8] sm:$0xff] }
 0x813   :  { %v10701_v57 = vpack.c.bf16 %v11550_v44, %v11549_v63  ;;  %v11616_v43 = vpack.i.bf16 %v13848_v50, %v13746_v61  ;;  %v13856_v24 = vld [vmem:[#allocation11 + $0xe8] sm:$0xff] }
 0x814   :  { %10777 = vmatpush3.bf16.msra.mxu0 %v10776_v9  ;;  %10690 = vmatpush1.bf16.msra.mxu1 %v10689_v5  ;;  %v11539_v9 = vunpack.i.l.bf16 %v11538_v2  ;;  %v13858_v5 = vld [vmem:[#allocation11 + $0x108] sm:$0xff]  ;;  %v11621_v12 = vpack.i.bf16 %v13856_v24, %v13748_v26 }
 0x815   :  { %10796 = vmatprep.subr.bf16.mxu0 %v15090_v35  ;;  %10691 = vmatprep.subr.bf16.mxu1 %v15090_v35  ;;  %v11626_v16 = vpack.i.bf16 %v13858_v5, %v13752_v3  ;;  %v13866_v22 = vld [vmem:[#allocation11 + $0x128] sm:$0xff] }
 0x816   :  { %v10695_v1 = vpack.c.bf16 %v11540_v28, %v11539_v9  ;;  %11572 = vrot.lane.b32.xlu0 %v13805_v13, %s12544_s18  ;;  %11577 = vrot.lane.b32.xlu1 %v13811_v34, %s12544_s18  ;;  %v11631_v61 = vpack.i.bf16 %v13866_v22, %v13754_v10  ;;  %v13876_v26 = vld [vmem:[#allocation11 + $0x168] sm:$0xff]  ;;  %v2470_v10 = vmul.f32 %v13702_v41, %v13702_v41 }
 0x817   :  { %9607 = vmatmul.mubr.msk.f32.vlgmr.msra.gmra.mrb[34].mxu0 %vm2893_vm0, %v13726_v21  ;;  %v11641_v3 = vpack.i.bf16 %v13876_v26, %v13762_v53  ;;  %v2472_v53 = vmul.f32 %v13706_v36, %v13706_v36  ;;  %v2490_v14 = vld [vmem:[#allocation8 + $0x14] ss:$8 sm:$0x3] }
 0x818   :  { %9660 = vmatprep.mubr.msk.f32.mxu0 %vm12547_vm6, %v15094_v4  ;;  %10693 = vmatpush1.bf16.msra.mxu1 %v10692_v45  ;;  %v2469_v45 = vmul.f32 %v13700_v58, %v13700_v58 }
 0x819   :  { %10694 = vmatprep.subr.bf16.mxu1 %v15090_v35 }
 0x81a   :  { %11582 = vrot.lane.b32.xlu0 %v13819_v8, %s12544_s18  ;;  %11587 = vrot.lane.b32.xlu1 %v11586_v20, %s12529_s21  ;;  %v2507_v20 = vld [vmem:[#allocation8 + $0x15] ss:$8 sm:$0x3] }
 0x81c   :  { %10696 = vmatpush1.bf16.msra.mxu1 %v10695_v1  ;;  %v2471_v1 = vmul.f32 %v13704_v31, %v13704_v31 }
 0x81d   :  { %10697 = vmatprep.subr.bf16.mxu1 %v15090_v35 }
 0x81e   :  { %11592 = vrot.lane.b32.xlu0 %v11591_v60, %s12529_s21  ;;  %11597 = vrot.lane.b32.xlu1 %v11596_v32, %s12529_s21  ;;  %v2465_v32 = vsub.f32 %v13561_v33, %v13700_v58  ;;  %v8899_v33 = vld [vmem:[#allocation14 + $0x1] ss:$0 sm:$0xff] }
 0x820   :  { %10699 = vmatpush1.bf16.msra.mxu1 %v10698_v48 }
 0x821   :  { %10700 = vmatprep.subr.bf16.mxu1 %v15090_v35 }
 0x822   :  { %11602 = vrot.lane.b32.xlu0 %v11601_v62, %s12529_s21  ;;  %11607 = vrot.lane.b32.xlu1 %v11606_v39, %s12529_s21  ;;  %v2495_v62 = vrot.slane %v2490_v14, %v15092_v56 }
 0x824   :  { %10702 = vmatpush1.bf16.msra.mxu1 %v10701_v57 }
 0x825   :  { %10703 = vmatprep.subr.bf16.mxu1 %v15090_v35 }
 0x826   :  { %11612 = vrot.lane.b32.xlu0 %v11611_v54, %s12529_s21  ;;  %11617 = vrot.lane.b32.xlu1 %v11616_v43, %s12529_s21  ;;  %v2466_v54 = vsub.f32 %v13558_v47, %v13702_v41  ;;  %v2499_v43 = vrot.slane %v2490_v14, %v15091_v52 }
 0x828   :  { %10705 = vmatpush1.bf16.msra.mxu1 %v10704_v46 }
 0x829   :  { %10736 = vmatprep.subr.bf16.mxu1 %v15090_v35 }
 0x82a   :  { %11622 = vrot.lane.b32.xlu0 %v11621_v12, %s12529_s21  ;;  %11627 = vrot.lane.b32.xlu1 %v11626_v16, %s12529_s21 }
 0x82e   :  { %11632 = vrot.lane.b32.xlu0 %v11631_v61, %s12529_s21  ;;  %11637 = vrot.lane.b32.xlu1 %v11636_v17, %s12529_s21  ;;  %v2512_v61 = vrot.slane %v2507_v20, %v15092_v56  ;;  %v2972_v56 = vld [vmem:[%s15063_s10] sm:$0xff] }
 0x832   :  { %11642 = vrot.lane.b32.xlu0 %v11641_v3, %s12529_s21  ;;  %v2516_v3 = vrot.slane %v2507_v20, %v15091_v52  ;;  %v2973_v52 = vld [vmem:[%s15063_s10 + $0x8] sm:$0xff] }
 0x8be   :  { %v2454_v2 = vpop.f32.mrb[16].mxu1 }
 0x8bf   :  { %v2473_v28 = vsub.f32 %v2454_v2, %v2469_v45  ;;  %v2456_v18 = vpop.f32.mrb[17].mxu1  ;;  %v2467_v45 = vsub.f32 %v13572_v29, %v13704_v31  ;;  %v2468_v2 = vsub.f32 %v13567_v51, %v13706_v36 }
 0x8c0   :  { %v2474_v9 = vsub.f32 %v2456_v18, %v2470_v10 }
 0x8c1   :  { %v2477_v30 = vadd.f32 1e-05, %v2473_v28 }
 0x8c2   :  { %v2478_v38 = vadd.f32 1e-05, %v2474_v9  ;;  %v2460_v25 = vpop.f32.mrb[18].mxu1 }
 0x8c3   :  { %11990 = vrsqrt.f32 %v2477_v30  ;;  %v2475_v48 = vsub.f32 %v2460_v25, %v2471_v1  ;;  %v2462_v7 = vpop.f32.mrb[19].mxu1 }
 0x8c4   :  { %11992 = vrsqrt.f32 %v2478_v38  ;;  %v2476_v44 = vsub.f32 %v2462_v7, %v2472_v53 }
 0x8c5   :  { %v2479_v63 = vadd.f32 1e-05, %v2475_v48  ;;  %v10737_v48 = vpack.c.bf16 %v2973_v52, %v2972_v56  ;;  %v3149_v52 = vpop.permute.xlu0 %3148 }
 0x8c6   :  { %v2480_v57 = vadd.f32 1e-05, %v2476_v44  ;;  %v2595_v11 = vpop.f32.mrb[20].mxu1  ;;  %v2974_v44 = vld [vmem:[%s15063_s10 + $0x10] sm:$0xff] }
 0x8c7   :  { %11994 = vrsqrt.f32 %v2479_v63  ;;  %v2597_v27 = vpop.f32.mrb[21].mxu1  ;;  %v2975_v63 = vld [vmem:[%s15063_s10 + $0x18] sm:$0xff]  ;;  %s12550_s10 = smov 61  }
 0x8c8   :  { %11996 = vrsqrt.f32 %v2480_v57 }
 0x8ca   :  { %v2601_v46 = vpop.f32.mrb[22].mxu1 }
 0x8cb   :  { %v2603_v60 = vpop.f32.mrb[23].mxu1 }
 0x8cd   :  { %v11991_v39 = vpop.eup %11990 }
 0x8ce   :  { %v11993_v12 = vpop.eup %11992  ;;  %v2485_v16 = vmul.f32 %v11991_v39, %v2465_v32  ;;  %v3677_v39 = vld [vmem:[#allocation11 + $0x10] sm:$0xff] }
 0x8cf   :  { %v2486_v17 = vmul.f32 %v11993_v12, %v2466_v54  ;;  %v3681_v54 = vld [vmem:[#allocation11 + $0x50] sm:$0xff]  ;;  %v11646_v12 = vpack.i.bf16 %v3677_v39, %v13813_v37 }
 0x8d0   :  { %v2502_v10 = vmul.f32 %v2495_v62, %v2485_v16 }
 0x8d1   :  { %v11995_v58 = vpop.eup %11994  ;;  %v2503_v28 = vmul.f32 %v2499_v43, %v2486_v17  ;;  %11647 = vrot.lane.b32.xlu1 %v11646_v12, %s12544_s18 }
 0x8d2   :  { %v11997_v47 = vpop.eup %11996  ;;  %v2519_v41 = vadd.f32 %v2512_v61, %v2502_v10  ;;  %v2487_v18 = vmul.f32 %v11995_v58, %v2467_v45  ;;  %v2963_v9 = vpop.f32.mrb[32].mxu0  ;;  %v3687_v45 = vld [vmem:[#allocation11 + $0xb0] sm:$0xff] }
 0x8d3   :  { %v2520_v29 = vadd.f32 %v2516_v3, %v2503_v28  ;;  %v2488_v31 = vmul.f32 %v11997_v47, %v2468_v2  ;;  %v2964_v1 = vadd.f32 %v8899_v33, %v2963_v9  ;;  %v9533_v30 = vpop.f32.mrb[33].mxu0  ;;  %v11671_v37 = vpack.i.bf16 %v3687_v45, %v13846_v42  ;;  %v3691_v33 = vld [vmem:[#allocation11 + $0xf0] sm:$0xff] }
 0x8d4   :  { %v2606_v53 = vmul.f32 %v2595_v11, %v2519_v41  ;;  %v2504_v38 = vmul.f32 %v2495_v62, %v2487_v18  ;;  %v3693_v58 = vld [vmem:[#allocation11 + $0x110] sm:$0xff]  ;;  %v11558_v30 = vpop.permute.xlu1 %11557 }
 0x8d5   :  { %v2607_v51 = vmul.f32 %v2597_v27, %v2520_v29  ;;  %v2505_v36 = vmul.f32 %v2499_v43, %v2488_v31  ;;  %v2968_v25 = vmul.f32 1.442695, %v2964_v1  ;;  %v10740_v27 = vpack.c.bf16 %v2975_v63, %v2974_v44  ;;  %v3679_v43 = vld [vmem:[#allocation11 + $0x30] sm:$0xff] }
 0x8d6   :  { %v2521_v7 = vadd.f32 %v2512_v61, %v2504_v38  ;;  %vm2967_vm14 = vcmp.gt.f32.partialorder %v2964_v1, 0.0  ;;  %v11651_v16 = vpack.i.bf16 %v3679_v43, %v13825_v49  ;;  %v3683_v61 = vld [vmem:[#allocation11 + $0x70] sm:$0xff]  ;;  %v11706_v41 = vpack.i.bf16 %v3679_v43, %v3677_v39 }
 0x8d7   :  { %v2522_v57 = vadd.f32 %v2516_v3, %v2505_v36  ;;  %11998 = vpow2.f32 %v2968_v25  ;;  %8894 = vmatprep.mubr.msk.f32.mxu1 %vm406_vm11, %v2607_v51  ;;  %v11661_v17 = vpack.i.bf16 %v3683_v61, %v13836_v59  ;;  %v3685_v3 = vld [vmem:[#allocation11 + $0x90] sm:$0xff]  ;;  %v11681_v59 = vpack.i.bf16 %v3691_v33, %v13856_v24 }
 0x8d8   :  { %v2608_v14 = vmul.f32 %v2601_v46, %v2521_v7  ;;  %2753 = vmatmul.mubr.f32.vlgmr.msra.gmra.mrb[24].mxu1 %v2606_v53  ;;  %11652 = vrot.lane.b32.xlu0 %v11651_v16, %s12544_s18  ;;  %v11666_v10 = vpack.i.bf16 %v3685_v3, %v13838_v0  ;;  %v3689_v49 = vld [vmem:[#allocation11 + $0xd0] sm:$0xff]  ;;  %v11686_v0 = vpack.i.bf16 %v3693_v58, %v13858_v5  ;;  %v8902_v53 = vld [vmem:[#allocation14 + $0x2] ss:$0 sm:$0xff]  ;;  %v11560_v51 = vunpack.i.h.bf16 %v11558_v30  ;;  %v11568_v36 = vpop.permute.xlu1 %11567 }
 0x8d9   :  { %v2609_v11 = vmul.f32 %v2603_v60, %v2522_v57  ;;  %10738 = vmatpush3.bf16.msra.mxu1 %v10737_v48  ;;  %v3695_v2 = vld [vmem:[#allocation11 + $0x130] sm:$0xff]  ;;  %v11711_v5 = vpack.i.bf16 %v3683_v61, %v3681_v54  ;;  %v11721_v18 = vpack.i.bf16 %v3691_v33, %v3689_v49 }
 0x8da   :  { %10739 = vmatprep.subr.bf16.mxu1 %v15090_v35  ;;  %v11691_v42 = vpack.i.bf16 %v3695_v2, %v13866_v22  ;;  %v3697_v28 = vld [vmem:[#allocation11 + $0x150] sm:$0xff]  ;;  %v11716_v22 = vpack.i.bf16 %v3687_v45, %v3685_v3 }
 0x8db   :  { %8895 = vmatprep.mubr.msk.f32.mxu1 %vm406_vm11, %v2609_v11  ;;  %v3699_v47 = vld [vmem:[#allocation11 + $0x170] sm:$0xff]  ;;  %v11569_v11 = vunpack.i.l.bf16 %v11568_v36 }
 0x8dc   :  { %2758 = vmatmul.mubr.f32.gmra.mrb[26].mxu1 %v2608_v14  ;;  %11662 = vrot.lane.b32.xlu0 %v11661_v17, %s12544_s18  ;;  %v11701_v24 = vpack.i.bf16 %v3699_v47, %v13876_v26  ;;  %v11731_v9 = vpack.i.bf16 %v3699_v47, %v3697_v28  ;;  %v11578_v63 = vpop.permute.xlu1 %11577  ;;  %v11570_v14 = vunpack.i.h.bf16 %v11568_v36 }
 0x8dd   :  { %10741 = vmatpush3.bf16.msra.mxu1 %v10740_v27  ;;  %9542 = vmatprep.mubr.msk.f32.mxu1 %vm12547_vm6, %v15094_v4  ;;  %v11580_v43 = vunpack.i.h.bf16 %v11578_v63  ;;  %v11579_v12 = vunpack.i.l.bf16 %v11578_v63 }
 0x8de   :  { %9545 = vmatprep.subr.mxu1 %v15094_v4 }
 0x8df   :  { %v10755_v61 = vpack.c.bf16 %v11580_v43, %v11579_v12 }
 0x8e0   :  { %11672 = vrot.lane.b32.xlu0 %v11671_v37, %s12544_s18  ;;  %v11588_v27 = vpop.permute.xlu1 %11587 }
 0x8e1   :  { %v11999_v20 = vpop.eup %11998  ;;  %v11590_v3 = vunpack.i.h.bf16 %v11588_v27  ;;  %v11589_v45 = vunpack.i.l.bf16 %v11588_v27 }
 0x8e2   :  { %v8901_v32 = vadd.f32 -1.0, %v11999_v20 }
 0x8e4   :  { %v2971_v62 = vsel %vm2967_vm14, %v2964_v1, %v8901_v32  ;;  %11682 = vrot.lane.b32.xlu0 %v11681_v59, %s12544_s18  ;;  %v11563_v1 = vpop.permute.xlu0 %11562  ;;  %v10749_v32 = vpack.c.bf16 %v11570_v14, %v11569_v11  ;;  %v11598_v39 = vpop.permute.xlu1 %11597 }
 0x8e5   :  { %9543 = vmatmul.mubr.msk.f32.vlgmr.msra.gmra.mrb[28].mxu1 %vm503_vm12, %v2971_v62  ;;  %v11565_v7 = vunpack.i.h.bf16 %v11563_v1  ;;  %v11564_v44 = vunpack.i.l.bf16 %v11563_v1 }
 0x8e6   :  { %9546 = vmatpush3.msk.msra.mxu1 %vm2802_vm10, %v13788_v6  ;;  %9547 = vmatprep.mubr.msk.f32.mxu1 %vm12547_vm6, %v15094_v4  ;;  %v11656_v6 = vpack.i.bf16 %v3681_v54, %v13827_v15  ;;  %v11676_v15 = vpack.i.bf16 %v3689_v49, %v13848_v50  ;;  %v11696_v50 = vpack.i.bf16 %v3697_v28, %v13868_v19 }
 0x8e7   :  { %9550 = vmatprep.subr.mxu1 %v15094_v4  ;;  %v11726_v19 = vpack.i.bf16 %v3695_v2, %v3693_v58  ;;  %v10746_v57 = vpack.c.bf16 %v11565_v7, %v11564_v44  ;;  %v3579_v58 = vsel %vm503_vm12, %v11589_v45, %v11590_v3 }
 0x8e8   :  { %11657 = vrot.lane.b32.xlu1 %v11656_v6, %s12544_s18  ;;  %11692 = vrot.lane.b32.xlu0 %v11691_v42, %s12544_s18  ;;  %v11608_v49 = vpop.permute.xlu1 %11607  ;;  %v11599_v42 = vunpack.i.l.bf16 %v11598_v39 }
 0x8ea   :  { %v13927_v46 = vpop.f32.mrb[34].mxu0 }
 0x8eb   :  { %v9608_v60 = vpop.f32.mrb[35].mxu0 }
 0x8ec   :  { %11667 = vrot.lane.b32.xlu1 %v11666_v10, %s12544_s18  ;;  %11702 = vrot.lane.b32.xlu0 %v11701_v24, %s12544_s18 }
 0x8f0   :  { %11677 = vrot.lane.b32.xlu1 %v11676_v15, %s12544_s18  ;;  %11712 = vrot.lane.b32.xlu0 %v11711_v5, %s12548_s2  ;;  %v8915_v15 = vld [vmem:[#allocation14 + $0x8] ss:$0 sm:$0xff] }
 0x8f4   :  { %11687 = vrot.lane.b32.xlu1 %v11686_v0, %s12544_s18  ;;  %11722 = vrot.lane.b32.xlu0 %v11721_v18, %s12548_s2  ;;  %v11600_v0 = vunpack.i.h.bf16 %v11598_v39  ;;  %v11609_v18 = vunpack.i.l.bf16 %v11608_v49 }
 0x8f8   :  { %11697 = vrot.lane.b32.xlu1 %v11696_v50, %s12544_s18  ;;  %11732 = vrot.lane.b32.xlu0 %v11731_v9, %s12548_s2  ;;  %v11618_v50 = vpop.permute.xlu1 %11617 }
 0x8fc   :  { %11707 = vrot.lane.b32.xlu1 %v11706_v41, %s12548_s2  ;;  %11742 = vrot.lane.b32.xlu0 %v13793_v40, %s12550_s10  ;;  %v11559_v40 = vunpack.i.l.bf16 %v11558_v30  ;;  %v3470_v41 = vadd.f32 %v8915_v15, %v13927_v46 }
 0x8fe   :  { %vm3473_vm1 = vcmp.gt.f32.partialorder %v3470_v41, 0.0 }
 0x900   :  { %11717 = vrot.lane.b32.xlu1 %v11716_v22, %s12548_s2  ;;  %v11610_v22 = vunpack.i.h.bf16 %v11608_v49  ;;  %11752 = vrot.lane.b32.xlu0 %v13805_v13, %s12550_s10 }
 0x902   :  { %v3583_v1 = vsel %vm503_vm12, %v11609_v18, %v11610_v22 }
 0x904   :  { %11727 = vrot.lane.b32.xlu1 %v11726_v19, %s12548_s2  ;;  %11762 = vrot.lane.b32.xlu0 %v13819_v8, %s12550_s10 }
 0x908   :  { %11737 = vrot.lane.b32.xlu1 %v13786_v23, %s12550_s10  ;;  %v11573_v23 = vpop.permute.xlu0 %11572 }
 0x909   :  { %v11575_v62 = vunpack.i.h.bf16 %v11573_v23  ;;  %v11574_v60 = vunpack.i.l.bf16 %v11573_v23 }
 0x90b   :  { %v10752_v16 = vpack.c.bf16 %v11575_v62, %v11574_v60 }
 0x90c   :  { %11747 = vrot.lane.b32.xlu1 %v13799_v55, %s12550_s10  ;;  %v11583_v48 = vpop.permute.xlu0 %11582 }
 0x90d   :  { %v11585_v6 = vunpack.i.h.bf16 %v11583_v48  ;;  %v11584_v17 = vunpack.i.l.bf16 %v11583_v48 }
 0x90f   :  { %v10758_v59 = vpack.c.bf16 %v11585_v6, %v11584_v17 }
 0x910   :  { %11757 = vrot.lane.b32.xlu1 %v13811_v34, %s12550_s10  ;;  %v10743_v34 = vpack.c.bf16 %v11560_v51, %v11559_v40  ;;  %v11593_v20 = vpop.permute.xlu0 %11592  ;;  %v11619_v51 = vunpack.i.l.bf16 %v11618_v50 }
 0x911   :  { %v11595_v10 = vunpack.i.h.bf16 %v11593_v20  ;;  %v11594_v37 = vunpack.i.l.bf16 %v11593_v20 }
 0x913   :  { %v3580_v2 = vsel %vm503_vm12, %v11594_v37, %v11595_v10 }
 0x914   :  { %v11603_v54 = vpop.permute.xlu0 %11602  ;;  %v10779_v5 = vpack.c.bf16 %v3580_v2, %v3579_v58 }
 0x915   :  { %v11605_v28 = vunpack.i.h.bf16 %v11603_v54  ;;  %v11604_v47 = vunpack.i.l.bf16 %v11603_v54 }
 0x918   :  { %v11613_v33 = vpop.permute.xlu0 %11612 }
 0x919   :  { %v11615_v19 = vunpack.i.h.bf16 %v11613_v33  ;;  %v11614_v9 = vunpack.i.l.bf16 %v11613_v33 }
 0x91b   :  { %v3584_v46 = vsel %vm503_vm12, %v11614_v9, %v11615_v19 }
 0x91c   :  { %v11623_v24 = vpop.permute.xlu0 %11622 }
 0x91d   :  { %v11625_v40 = vunpack.i.h.bf16 %v11623_v24  ;;  %v11624_v36 = vunpack.i.l.bf16 %v11623_v24 }
 0x91f   :  { %v3586_v63 = vsel %vm503_vm12, %v11624_v36, %v11625_v40 }
 0x920   :  { %v11633_v23 = vpop.permute.xlu0 %11632 }
 0x921   :  { %v11634_v7 = vunpack.i.l.bf16 %v11633_v23 }
 0x924   :  { %v11643_v14 = vpop.permute.xlu0 %11642 }
 0x925   :  { %v11645_v60 = vunpack.i.h.bf16 %v11643_v14  ;;  %v11644_v39 = vunpack.i.l.bf16 %v11643_v14 }
 0x927   :  { %v3590_v12 = vsel %vm503_vm12, %v11644_v39, %v11645_v60 }
 0x94a   :  { %v11653_v10 = vpop.permute.xlu0 %11652 }
 0x94b   :  { %v11654_v8 = vunpack.i.l.bf16 %v11653_v10 }
 0x94e   :  { %v11663_v49 = vpop.permute.xlu0 %11662 }
 0x94f   :  { %v11665_v18 = vunpack.i.h.bf16 %v11663_v49  ;;  %v11664_v19 = vunpack.i.l.bf16 %v11663_v49 }
 0x952   :  { %v11673_v15 = vpop.permute.xlu0 %11672 }
 0x956   :  { %v11683_v58 = vpop.permute.xlu0 %11682 }
 0x9ab   :  { %v13967_v26 = vpop.f32.mrb[24].mxu1 }
 0x9ac   :  { %v2756_v56 = vpop.f32.mrb[25].mxu1 }
 0x9ad   :  { %v3581_v56 = vsel %vm503_vm12, %v11599_v42, %v11600_v0  ;;  %v14019_v0 = vpop.permute.xlu0 %11692 }
 0x9af   :  { %v13969_v29 = vpop.f32.mrb[26].mxu1 }
 0x9b0   :  { %v2761_v31 = vpop.f32.mrb[27].mxu1 }
 0x9b1   :  { %v3474_v31 = vmul.f32 1.442695, %v3470_v41  ;;  %v14021_v42 = vpop.permute.xlu0 %11702 }
 0x9b3   :  { %12000 = vpow2.f32 %v3474_v31 }
 0x9b5   :  { %v11713_v9 = vpop.permute.xlu0 %11712 }
 0x9b6   :  { %v11715_v40 = vunpack.i.h.bf16 %v11713_v9  ;;  %v11714_v36 = vunpack.i.l.bf16 %v11713_v9 }
 0x9b8   :  { %v3050_v38 = vpop.f32.mrb[28].mxu1 }
 0x9b9   :  { %v3051_v55 = vadd.f32 %v8902_v53, %v3050_v38  ;;  %v9544_v25 = vpop.f32.mrb[29].mxu1  ;;  %v11628_v53 = vpop.permute.xlu1 %11627  ;;  %v11620_v38 = vunpack.i.h.bf16 %v11618_v50  ;;  %v11655_v50 = vunpack.i.h.bf16 %v11653_v10 }
 0x9ba   :  { %v11630_v25 = vunpack.i.h.bf16 %v11628_v53  ;;  %v11629_v48 = vunpack.i.l.bf16 %v11628_v53  ;;  %v11675_v53 = vunpack.i.h.bf16 %v11673_v15 }
 0x9bb   :  { %9548 = vmatmul.mubr.msk.f32.vlgmr.msra.gmra.mrb[30].mxu1 %vm3060_vm15, %v3051_v55  ;;  %v3585_v44 = vsel %vm503_vm12, %v11619_v51, %v11620_v38  ;;  %v3780_v38 = vsel %vm406_vm11, %v11664_v19, %v11665_v18  ;;  %v11674_v51 = vunpack.i.l.bf16 %v11673_v15 }
 0x9bc   :  { %9551 = vmatpush3.msk.msra.mxu1 %vm2802_vm10, %v3149_v52  ;;  %9552 = vmatprep.mubr.msk.f32.mxu1 %vm12547_vm6, %v15094_v4  ;;  %v3582_v52 = vsel %vm503_vm12, %v11604_v47, %v11605_v28  ;;  %v3587_v11 = vsel %vm503_vm12, %v11629_v48, %v11630_v25  ;;  %v10788_v20 = vpack.c.bf16 %v3586_v63, %v3585_v44 }
 0x9bd   :  { %10742 = vmatprep.subr.bf16.mxu1 %v15090_v35  ;;  %v10782_v30 = vpack.c.bf16 %v3582_v52, %v3581_v56  ;;  %v3778_v52 = vsel %vm406_vm11, %v11654_v8, %v11655_v50 }
 0x9bf   :  { %9553 = vmatmul.mubr.msk.f32.vlgmr.msra.gmra.mrb[32].mxu1 %vm3060_vm15, %v3051_v55  ;;  %v10785_v55 = vpack.c.bf16 %v3584_v46, %v3583_v1 }
 0x9c0   :  { %10744 = vmatpush3.bf16.msra.mxu1 %v10743_v34  ;;  %9579 = vmatprep.mubr.msk.f32.mxu1 %vm12547_vm6, %v15094_v4  ;;  %v11635_v34 = vunpack.i.h.bf16 %v11633_v23 }
 0x9c1   :  { %10745 = vmatprep.subr.bf16.mxu1 %v15090_v35 }
 0x9c2   :  { %v3588_v27 = vsel %vm503_vm12, %v11634_v7, %v11635_v34  ;;  %v10818_v34 = vpack.c.bf16 %v11715_v40, %v11714_v36  ;;  %v11723_v7 = vpop.permute.xlu0 %11722 }
 0x9c3   :  { %v10791_v54 = vpack.c.bf16 %v3588_v27, %v3587_v11  ;;  %v3782_v11 = vsel %vm406_vm11, %v11674_v51, %v11675_v53  ;;  %v11685_v27 = vunpack.i.h.bf16 %v11683_v58  ;;  %v11724_v60 = vunpack.i.l.bf16 %v11723_v7 }
 0x9c4   :  { %10747 = vmatpush3.bf16.msra.mxu1 %v10746_v57  ;;  %v11638_v57 = vpop.permute.xlu1 %11637 }
 0x9c5   :  { %10748 = vmatprep.subr.bf16.mxu1 %v15090_v35  ;;  %v11639_v62 = vunpack.i.l.bf16 %v11638_v57 }
 0x9c8   :  { %10750 = vmatpush3.bf16.msra.mxu1 %v10749_v32  ;;  %v11640_v32 = vunpack.i.h.bf16 %v11638_v57  ;;  %v11648_v3 = vpop.permute.xlu1 %11647 }
 0x9c9   :  { %10751 = vmatprep.subr.bf16.mxu1 %v15090_v35  ;;  %v11650_v28 = vunpack.i.h.bf16 %v11648_v3  ;;  %v11649_v47 = vunpack.i.l.bf16 %v11648_v3 }
 0x9ca   :  { %v3589_v43 = vsel %vm503_vm12, %v11639_v62, %v11640_v32  ;;  %v11725_v62 = vunpack.i.h.bf16 %v11723_v7 }
 0x9cb   :  { %v3777_v56 = vsel %vm406_vm11, %v11649_v47, %v11650_v28 }
 0x9cc   :  { %10753 = vmatpush3.bf16.msra.mxu1 %v10752_v16  ;;  %v12001_v16 = vpop.eup %12000  ;;  %v11658_v45 = vpop.permute.xlu1 %11657  ;;  %v10824_v3 = vpack.c.bf16 %v11725_v62, %v11724_v60 }
 0x9cd   :  { %10754 = vmatprep.subr.bf16.mxu1 %v15090_v35  ;;  %v8917_v6 = vadd.f32 -1.0, %v12001_v16  ;;  %v11660_v24 = vunpack.i.h.bf16 %v11658_v45 }
 0x9cf   :  { %v3477_v17 = vsel %vm3473_vm1, %v3470_v41, %v8917_v6  ;;  %v11659_v41 = vunpack.i.l.bf16 %v11658_v45  ;;  %v11695_v6 = vunpack.i.h.bf16 %v14019_v0  ;;  %vm8818_vm1 = vcmask 43010  }
 0x9d0   :  { %10756 = vmatpush3.bf16.msra.mxu1 %v10755_v61  ;;  %v10794_v61 = vpack.c.bf16 %v3590_v12, %v3589_v43  ;;  %v11668_v37 = vpop.permute.xlu1 %11667 }
 0x9d1   :  { %10757 = vmatprep.subr.bf16.mxu1 %v15090_v35  ;;  %v11670_v31 = vunpack.i.h.bf16 %v11668_v37  ;;  %v3779_v46 = vsel %vm406_vm11, %v11659_v41, %v11660_v24 }
 0x9d2   :  { %v10800_v57 = vpack.c.bf16 %v3780_v38, %v3779_v46  ;;  %v8908_v46 = vld [vmem:[#allocation14 + $0x4] ss:$0 sm:$0xff] }
 0x9d4   :  { %10759 = vmatpush3.bf16.msra.mxu1 %v10758_v59  ;;  %v11678_v33 = vpop.permute.xlu1 %11677 }
 0x9d5   :  { %10778 = vmatprep.subr.bf16.mxu1 %v15090_v35  ;;  %v11680_v44 = vunpack.i.h.bf16 %v11678_v33  ;;  %v11679_v63 = vunpack.i.l.bf16 %v11678_v33 }
 0x9d7   :  { %9580 = vmatmul.mubr.msk.f32.vlgmr.msra.gmra.mrb[34].mxu1 %vm2893_vm0, %v13726_v21  ;;  %v3783_v16 = vsel %vm406_vm11, %v11679_v63, %v11680_v44 }
 0x9d8   :  { %10780 = vmatpush3.bf16.msra.mxu1 %v10779_v5  ;;  %9633 = vmatprep.mubr.msk.f32.mxu1 %vm12547_vm6, %v15094_v4  ;;  %v14015_v59 = vpop.permute.xlu1 %11687 }
 0x9d9   :  { %10781 = vmatprep.subr.bf16.mxu1 %v15090_v35  ;;  %v11689_v43 = vunpack.i.l.bf16 %v14015_v59 }
 0x9dc   :  { %10783 = vmatpush3.bf16.msra.mxu1 %v10782_v30  ;;  %v14017_v2 = vpop.permute.xlu1 %11697  ;;  %v11669_v30 = vunpack.i.l.bf16 %v11668_v37  ;;  %v11733_v37 = vpop.permute.xlu0 %11732 }
 0x9dd   :  { %10784 = vmatprep.subr.bf16.mxu1 %v15090_v35  ;;  %v11700_v33 = vunpack.i.h.bf16 %v14017_v2  ;;  %v11735_v47 = vunpack.i.h.bf16 %v11733_v37  ;;  %v11734_v50 = vunpack.i.l.bf16 %v11733_v37 }
 0x9de   :  { %v3781_v14 = vsel %vm406_vm11, %v11669_v30, %v11670_v31  ;;  %v8911_v30 = vld [vmem:[#allocation14 + $0x5] ss:$0 sm:$0xff] }
 0x9df   :  { %v10803_v12 = vpack.c.bf16 %v3782_v11, %v3781_v14  ;;  %v10830_v41 = vpack.c.bf16 %v11735_v47, %v11734_v50  ;;  %v8918_v14 = vld [vmem:[#allocation14 + $0x9] ss:$0 sm:$0xff] }
 0x9e0   :  { %10786 = vmatpush3.bf16.msra.mxu1 %v10785_v55  ;;  %v11708_v13 = vpop.permute.xlu1 %11707  ;;  %v10797_v55 = vpack.c.bf16 %v3778_v52, %v3777_v56 }
 0x9e1   :  { %10787 = vmatprep.subr.bf16.mxu1 %v15090_v35  ;;  %v11710_v5 = vunpack.i.h.bf16 %v11708_v13  ;;  %v11709_v22 = vunpack.i.l.bf16 %v11708_v13  ;;  %v11704_v13 = vunpack.i.l.bf16 %v14021_v42 }
 0x9e2   :  { %10798 = vmatpush3.bf16.msra.mxu0 %v10797_v55 }
 0x9e3   :  { %v10815_v23 = vpack.c.bf16 %v11710_v5, %v11709_v22  ;;  %10799 = vmatprep.subr.bf16.mxu0 %v15090_v35  ;;  %v8904_v5 = vld [vmem:[#allocation14 + $0x3] ss:$0 sm:$0xff] }
 0x9e4   :  { %10789 = vmatpush3.bf16.msra.mxu1 %v10788_v20  ;;  %v11718_v1 = vpop.permute.xlu1 %11717  ;;  %v11684_v20 = vunpack.i.l.bf16 %v11683_v58 }
 0x9e5   :  { %10790 = vmatprep.subr.bf16.mxu1 %v15090_v35  ;;  %v11720_v25 = vunpack.i.h.bf16 %v11718_v1  ;;  %v11719_v48 = vunpack.i.l.bf16 %v11718_v1 }
 0x9e6   :  { %10801 = vmatpush3.bf16.msra.mxu0 %v10800_v57  ;;  %v11743_v57 = vpop.permute.xlu0 %11742 }
 0x9e7   :  { %v10821_v32 = vpack.c.bf16 %v11720_v25, %v11719_v48  ;;  %10802 = vmatprep.subr.bf16.mxu0 %v15090_v35 }
 0x9e8   :  { %10792 = vmatpush3.bf16.msra.mxu1 %v10791_v54  ;;  %v11728_v39 = vpop.permute.xlu1 %11727  ;;  %v11690_v54 = vunpack.i.h.bf16 %v14015_v59  ;;  %v11699_v59 = vunpack.i.l.bf16 %v14017_v2 }
 0x9e9   :  { %10793 = vmatprep.subr.bf16.mxu1 %v15090_v35  ;;  %v11730_v45 = vunpack.i.h.bf16 %v11728_v39  ;;  %v11729_v10 = vunpack.i.l.bf16 %v11728_v39 }
 0x9ea   :  { %v3785_v49 = vsel %vm406_vm11, %v11689_v43, %v11690_v54  ;;  %10804 = vmatpush3.bf16.msra.mxu0 %v10803_v12  ;;  %v3787_v24 = vsel %vm406_vm11, %v11699_v59, %v11700_v33 }
 0x9eb   :  { %10805 = vmatprep.subr.bf16.mxu0 %v15090_v35  ;;  %v10827_v28 = vpack.c.bf16 %v11730_v45, %v11729_v10 }
 0x9ec   :  { %10795 = vmatpush3.bf16.msra.mxu1 %v10794_v61  ;;  %v3784_v61 = vsel %vm406_vm11, %v11684_v20, %v11685_v27  ;;  %v11738_v7 = vpop.permute.xlu1 %11737  ;;  %v11745_v20 = vunpack.i.h.bf16 %v11743_v57 }
 0x9ed   :  { %10814 = vmatprep.subr.bf16.mxu1 %v15090_v35  ;;  %v10806_v15 = vpack.c.bf16 %v3784_v61, %v3783_v16  ;;  %v11740_v44 = vunpack.i.h.bf16 %v11738_v7  ;;  %v11739_v63 = vunpack.i.l.bf16 %v11738_v7  ;;  %v11753_v16 = vpop.permute.xlu0 %11752 }
 0x9ef   :  { %9634 = vmatmul.mubr.msk.f32.vlgmr.msra.gmra.mrb[36].mxu1 %vm2893_vm0, %v3477_v17  ;;  %v11694_v17 = vunpack.i.l.bf16 %v14019_v0  ;;  %v11705_v0 = vunpack.i.h.bf16 %v14021_v42  ;;  %10807 = vmatpush3.bf16.msra.mxu0 %v10806_v15  ;;  %v14057_v27 = vpack.c.bf16 %v11740_v44, %v11739_v63  ;;  %v4529_v63 = vld [vmem:[%s15066_s13 + $0x70] sm:$0xff] }
 0x9f0   :  { %9687 = vmatprep.mubr.msk.f32.mxu1 %vm12547_vm6, %v15094_v4  ;;  %10816 = vmatpush3.bf16.msra.mxu1 %v10815_v23  ;;  %v11748_v39 = vpop.permute.xlu1 %11747 }
 0x9f1   :  { %10817 = vmatprep.subr.bf16.mxu1 %v15090_v35  ;;  %v3786_v58 = vsel %vm406_vm11, %v11694_v17, %v11695_v6  ;;  %v3788_v2 = vsel %vm406_vm11, %v11704_v13, %v11705_v0  ;;  %10808 = vmatprep.subr.bf16.mxu0 %v15090_v35  ;;  %v11750_v43 = vunpack.i.h.bf16 %v11748_v39  ;;  %v11749_v12 = vunpack.i.l.bf16 %v11748_v39  ;;  %v12301_v39 = vld [vmem:[#allocation11 + $0x18] sm:$0xff] }
 0x9f2   :  { %v10809_v8 = vpack.c.bf16 %v3786_v58, %v3785_v49  ;;  %v10812_v42 = vpack.c.bf16 %v3788_v2, %v3787_v24  ;;  %v11755_v6 = vunpack.i.h.bf16 %v11753_v16  ;;  %v11754_v17 = vunpack.i.l.bf16 %v11753_v16  ;;  %v11763_v49 = vpop.permute.xlu0 %11762  ;;  %v12304_v16 = vld [vmem:[#allocation11 + $0xb8] sm:$0xff] }
 0x9f3   :  { %v10839_v61 = vpack.c.bf16 %v11750_v43, %v11749_v12  ;;  %v11765_v15 = vunpack.i.h.bf16 %v11763_v49  ;;  %v11764_v59 = vunpack.i.l.bf16 %v11763_v49  ;;  %v12303_v12 = vld [vmem:[#allocation11 + $0x98] sm:$0xff]  ;;  %vm4731_vm11 = vcmask 254976  }
 0x9f4   :  { %10819 = vmatpush3.bf16.msra.mxu1 %v10818_v34  ;;  %10810 = vmatpush3.bf16.msra.mxu0 %v10809_v8  ;;  %v10842_v45 = vpack.c.bf16 %v11755_v6, %v11754_v17  ;;  %v12305_v6 = vld [vmem:[#allocation11 + $0x58] sm:$0xff] }
 0x9f5   :  { %10820 = vmatprep.subr.bf16.mxu1 %v15090_v35  ;;  %10811 = vmatprep.subr.bf16.mxu0 %v15090_v35  ;;  %v10848_v58 = vpack.c.bf16 %v11765_v15, %v11764_v59  ;;  %v12306_v17 = vld [vmem:[#allocation11 + $0x78] sm:$0xff] }
 0x9f6   :  { %v12309_v49 = vld [vmem:[#allocation11 + $0xd8] sm:$0xff] }
 0x9f7   :  { %v12311_v59 = vld [vmem:[#allocation11 + $0x158] sm:$0xff] }
 0x9f8   :  { %10822 = vmatpush3.bf16.msra.mxu1 %v10821_v32  ;;  %10813 = vmatpush3.bf16.msra.mxu0 %v10812_v42  ;;  %v11744_v32 = vunpack.i.l.bf16 %v11743_v57  ;;  %v8913_v42 = vld [vmem:[#allocation14 + $0x6] ss:$0 sm:$0xff] }
 0x9f9   :  { %10823 = vmatprep.subr.bf16.mxu1 %v15090_v35  ;;  %10832 = vmatprep.subr.bf16.mxu0 %v15090_v35  ;;  %v4530_v57 = vld [vmem:[%s15066_s13 + $0xa8] sm:$0xff] }
 0x9fa   :  { %v14061_v54 = vpack.c.bf16 %v11745_v20, %v11744_v32 }
 0x9fc   :  { %10825 = vmatpush3.bf16.msra.mxu1 %v10824_v3  ;;  %v11758_v3 = vpop.permute.xlu1 %11757 }
 0x9fd   :  { %10826 = vmatprep.subr.bf16.mxu1 %v15090_v35  ;;  %v11760_v10 = vunpack.i.h.bf16 %v11758_v3  ;;  %v11759_v37 = vunpack.i.l.bf16 %v11758_v3  ;;  %v11771_v3 = vpack.i.bf16 %v12306_v17, %v12305_v6 }
 0x9ff   :  { %v10845_v33 = vpack.c.bf16 %v11760_v10, %v11759_v37  ;;  %v12308_v10 = vld [vmem:[#allocation11 + $0x138] sm:$0xff] }
 0xa00   :  { %10828 = vmatpush3.bf16.msra.mxu1 %v10827_v28 }
 0xa01   :  { %10829 = vmatprep.subr.bf16.mxu1 %v15090_v35 }
 0xa04   :  { %10831 = vmatpush3.bf16.msra.mxu1 %v10830_v41 }
 0xa05   :  { %9717 = vmatprep.subr.mxu1 %v15094_v4 }
 0xa8e   :  { %v3133_v22 = vpop.f32.mrb[30].mxu1 }
 0xa8f   :  { %v3134_v18 = vadd.f32 %v8904_v5, %v3133_v22  ;;  %v9549_v19 = vpop.f32.mrb[31].mxu1  ;;  %v8914_v22 = vld [vmem:[#allocation14 + $0x7] ss:$0 sm:$0xff] }
 0xa91   :  { %v8907_v9 = vmul.f32 -1.442695, %v3134_v18 }
 0xa92   :  { %v3218_v56 = vpop.f32.mrb[32].mxu1 }
 0xa93   :  { %12002 = vpow2.f32 %v8907_v9  ;;  %v9554_v52 = vpop.f32.mrb[33].mxu1  ;;  %v3219_v53 = vadd.f32 %v8908_v46, %v3218_v56  ;;  %v12300_v56 = vld [vmem:[#allocation13] sm:$0x7] }
 0xa94   :  { %v8920_v52 = vld [vmem:[#allocation14 + $0xa] ss:$0 sm:$0xff] }
 0xa9d   :  { %v12003_v31 = vpop.eup %12002 }
 0xa9e   :  { %v3140_v1 = vadd.f32 1.0, %v12003_v31 }
 0xaa0   :  { %12004 = vrcp.f32 %v3140_v1 }
 0xaaa   :  { %v12005_v23 = vpop.eup %12004  ;;  %v3341_v38 = vpop.f32.mrb[34].mxu1 }
 0xaab   :  { %v3345_v51 = vmul.f32 %v12005_v23, %v3219_v53  ;;  %v3342_v40 = vadd.f32 %v8911_v30, %v3341_v38  ;;  %v9581_v36 = vpop.f32.mrb[35].mxu1 }
 0xaad   :  { %v3346_v55 = vadd.f32 %v3345_v51, %v3342_v40  ;;  %v8923_v40 = vld [vmem:[#allocation14 + $0xb] ss:$0 sm:$0xff] }
 0xaaf   :  { %v3349_v25 = vsel %vm3060_vm15, %v3346_v55, 0.0  ;;  %v3354_v48 = vmul.f32 %v3346_v55, %v3346_v55 }
 0xab0   :  { %3350 = vadd.xlane.f32.xlu1 %v3349_v25 }
 0xab1   :  { %v3355_v34 = vsel %vm3060_vm15, %v3354_v48, 0.0 }
 0xab2   :  { %3356 = vadd.xlane.f32.xlu0 %v3355_v34  ;;  %v4528_v34 = vld [vmem:[%s15066_s13 + $0x38] sm:$0xff] }
 0xac2   :  { %v3672_v11 = vpop.f32.mrb[36].mxu1 }
 0xac3   :  { %v3673_v62 = vadd.f32 %v8918_v14, %v3672_v11  ;;  %v9635_v60 = vpop.f32.mrb[37].mxu1  ;;  %v10890_v14 = vpack.c.bf16 %v4530_v57, %v4529_v63 }
 0xac5   :  { %9661 = vmatmul.mubr.msk.f32.vlgmr.msra.gmra.mrb[36].mxu0 %vm2893_vm0, %v3673_v62  ;;  %9688 = vmatmul.mubr.msk.f32.vlgmr.msra.gmra.mrb[38].mxu1 %vm2893_vm0, %v3673_v62 }
 0xac6   :  { %10834 = vmatpush3.bf16.msra.mxu0 %v14057_v27  ;;  %9714 = vmatprep.mubr.msk.f32.mxu0 %vm12547_vm6, %v15094_v4 }
 0xac7   :  { %10835 = vmatprep.subr.bf16.mxu0 %v15090_v35  ;;  %9719 = vmatprep.mubr.msk.f32.mxu1 %vm12547_vm6, %v15094_v4 }
 0xaca   :  { %10837 = vmatpush3.bf16.msra.mxu0 %v14061_v54 }
 0xacb   :  { %10838 = vmatprep.subr.bf16.mxu0 %v15090_v35 }
 0xace   :  { %10840 = vmatpush3.bf16.msra.mxu0 %v10839_v61 }
 0xacf   :  { %10841 = vmatprep.subr.bf16.mxu0 %v15090_v35 }
 0xad2   :  { %10843 = vmatpush3.bf16.msra.mxu0 %v10842_v45 }
 0xad3   :  { %10844 = vmatprep.subr.bf16.mxu0 %v15090_v35 }
 0xad6   :  { %10846 = vmatpush3.bf16.msra.mxu0 %v10845_v33 }
 0xad7   :  { %10847 = vmatprep.subr.bf16.mxu0 %v15090_v35 }
 0xada   :  { %10849 = vmatpush3.bf16.msra.mxu0 %v10848_v58 }
 0xadb   :  { %10850 = vmatprep.subr.bf16.mxu0 %v15090_v35 }
 0xb3d   :  { %v3351_v0 = vpop.xlane.xlu1 %3350 }
 0xb3e   :  { %v3353_v13 = vmul.f32 0.33333334, %v3351_v0 }
 0xb3f   :  { %v3357_v28 = vpop.xlane.xlu0 %3356 }
 0xb40   :  { %v3360_v47 = vmul.f32 %v3353_v13, %v3353_v13  ;;  %v3358_v50 = vmul.f32 0.33333334, %v3357_v28  ;;  %v3359_v2 = vsub.f32 %v3346_v55, %v3353_v13 }
 0xb42   :  { %v3361_v8 = vsub.f32 %v3358_v50, %v3360_v47 }
 0xb44   :  { %v3362_v24 = vadd.f32 1e-05, %v3361_v8 }
 0xb46   :  { %12006 = vrsqrt.f32 %v3362_v24 }
 0xb50   :  { %v12007_v41 = vpop.eup %12006 }
 0xb51   :  { %v3364_v5 = vmul.f32 %v12007_v41, %v3359_v2 }
 0xb53   :  { %v3369_v18 = vmul.f32 %v8913_v42, %v3364_v5 }
 0xb55   :  { %v3374_v19 = vadd.f32 %v8914_v22, %v3369_v18 }
 0xb57   :  { %v3375_v9 = vsel %vm3060_vm15, %v3374_v19, -inf }
 0xb58   :  { %3376 = vmax.xlane.f32.xlu0 %v3375_v9 }
 0xb6e   :  { %4102 = vrot.lane.b32.xlu0 %v12300_v56, %s12543_s4 }
 0xb98   :  { %v3870_v31 = vpop.f32.mrb[36].mxu0  ;;  %v3987_v1 = vpop.f32.mrb[38].mxu1 }
 0xb99   :  { %v3871_v46 = vadd.f32 %v8920_v52, %v3870_v31  ;;  %v9662_v30 = vpop.f32.mrb[37].mxu0  ;;  %v9689_v53 = vpop.f32.mrb[39].mxu1  ;;  %v3988_v36 = vadd.f32 %v8923_v40, %v3987_v1 }
 0xb9b   :  { %v8922_v23 = vmul.f32 -1.442695, %v3871_v46 }
 0xb9d   :  { %12008 = vpow2.f32 %v8922_v23 }
 0xba7   :  { %v12009_v38 = vpop.eup %12008 }
 0xba8   :  { %v3877_v51 = vadd.f32 1.0, %v12009_v38 }
 0xbaa   :  { %12010 = vrcp.f32 %v3877_v51 }
 0xbb4   :  { %v12011_v55 = vpop.eup %12010 }
 0xbb5   :  { %v3991_v25 = vmul.f32 %v12011_v55, %v3988_v36 }
 0xbb7   :  { %v14078_v48 = vadd.f32 %v3991_v25, %v13726_v21  ;;  %v4527_v21 = vld [vmem:[%s15066_s13] sm:$0xff] }
 0xbb8   :  { %v10887_v7 = vpack.c.bf16 %v4528_v34, %v4527_v21 }
 0xbb9   :  { %9715 = vmatmul.mubr.msk.f32.vlgmr.msra.gmra.mrb[38].mxu0 %vm2893_vm0, %v14078_v48  ;;  %v4179_v44 = vmul.f32 %v14078_v48, %v14078_v48 }
 0xbba   :  { %10852 = vmatpush3.bf16.msra.mxu0 %v14057_v27  ;;  %9746 = vmatprep.mubr.msk.f32.mxu0 %vm12547_vm6, %v15094_v4 }
 0xbbb   :  { %10853 = vmatprep.subr.bf16.mxu0 %v15090_v35 }
 0xbbe   :  { %10855 = vmatpush3.bf16.msra.mxu0 %v14061_v54  ;;  %v12302_v54 = vld [vmem:[#allocation11 + $0x38] sm:$0xff] }
 0xbbf   :  { %10856 = vmatprep.subr.bf16.mxu0 %v15090_v35  ;;  %v11766_v43 = vpack.i.bf16 %v12302_v54, %v12301_v39 }
 0xbc2   :  { %10858 = vmatpush3.bf16.msra.mxu0 %v10839_v61  ;;  %v11776_v61 = vpack.i.bf16 %v12304_v16, %v12303_v12 }
 0xbc3   :  { %10859 = vmatprep.subr.bf16.mxu0 %v15090_v35 }
 0xbc4   :  { %11777 = vrot.lane.b32.xlu0 %v11776_v61, %s12548_s2 }
 0xbc6   :  { %10861 = vmatpush3.bf16.msra.mxu0 %v10842_v45  ;;  %v12307_v45 = vld [vmem:[#allocation11 + $0x118] sm:$0xff] }
 0xbc7   :  { %10862 = vmatprep.subr.bf16.mxu0 %v15090_v35  ;;  %v11786_v37 = vpack.i.bf16 %v12308_v10, %v12307_v45 }
 0xbc9   :  { %11787 = vrot.lane.b32.xlu0 %v11786_v37, %s12548_s2  ;;  %v8931_v37 = vld [vmem:[#allocation14 + $0xc] ss:$0 sm:$0xff] }
 0xbca   :  { %10864 = vmatpush3.bf16.msra.mxu0 %v10845_v33  ;;  %v12310_v33 = vld [vmem:[#allocation11 + $0xf8] sm:$0xff] }
 0xbcb   :  { %10865 = vmatprep.subr.bf16.mxu0 %v15090_v35  ;;  %v11781_v15 = vpack.i.bf16 %v12310_v33, %v12309_v49  ;;  %v8932_v33 = vld [vmem:[#allocation14 + $0xd] ss:$0 sm:$0xff] }
 0xbce   :  { %10867 = vmatpush3.bf16.msra.mxu0 %v10848_v58  ;;  %v12312_v58 = vld [vmem:[#allocation11 + $0x178] sm:$0xff] }
 0xbcf   :  { %10886 = vmatprep.subr.bf16.mxu0 %v15090_v35  ;;  %v11791_v0 = vpack.i.bf16 %v12312_v58, %v12311_v59 }
 0xbd1   :  { %9747 = vmatmul.mubr.msk.f32.vlgmr.msra.gmra.mrb[40].mxu0 %vm2893_vm0, %v4179_v44 }
 0xbd2   :  { %10888 = vmatpush3.bf16.msra.mxu0 %v10887_v7  ;;  %9794 = vmatprep.mubr.msk.f32.mxu0 %vm12547_vm6, %v15094_v4 }
 0xbd3   :  { %10889 = vmatprep.subr.bf16.mxu0 %v15090_v35 }
 0xbd6   :  { %10891 = vmatpush3.bf16.msra.mxu0 %v10890_v14 }
 0xbd7   :  { %10898 = vmatprep.subr.bf16.mxu0 %v15090_v35 }
 0xbd9   :  { %9795 = vmatmul.mubr.msk.f32.vlgmr.msra.gmra.mrb[42].mxu0 %vm503_vm12, %v13967_v26 }
 0xbda   :  { %9797 = vmatprep.mubr.msk.f32.mxu0 %vm12547_vm6, %v15094_v4 }
 0xbdd   :  { %9798 = vmatmul.mubr.msk.f32.gmra.mrb[44].mxu0 %vm503_vm12, %v13969_v29 }
 0xbde   :  { %9800 = vmatprep.mubr.msk.f32.mxu0 %vm12547_vm6, %v15094_v4 }
 0xbe5   :  { %v3377_v11 = vpop.xlane.xlu0 %3376 }
 0xbe6   :  { %v3378_v27 = vsub.f32 %v3374_v19, %v3377_v11  ;;  %v4625_v11 = vld [vmem:[%s15066_s13 + $0x8] sm:$0xff] }
 0xbe8   :  { %v3379_v20 = vmul.f32 1.442695, %v3378_v27  ;;  %v4626_v27 = vld [vmem:[%s15066_s13 + $0x40] sm:$0xff] }
 0xbe9   :  { %v4103_v60 = vpop.permute.xlu0 %4102 }
 0xbea   :  { %12012 = vpow2.f32 %v3379_v20  ;;  %9718 = vmatpush3.msk.msra.mxu1 %vm2802_vm10, %v4103_v60  ;;  %v14157_v20 = vpack.c.bf16 %v4626_v27, %v4625_v11 }
 0xbeb   :  { %9749 = vmatprep.subr.mxu1 %v15094_v4 }
 0xbec   :  { %10900 = vmatpush3.bf16.msra.mxu0 %v14157_v20 }
 0xbed   :  { %10901 = vmatprep.subr.bf16.mxu0 %v15090_v35 }
 0xbf4   :  { %v12013_v32 = vpop.eup %12012 }
 0xbf5   :  { %v3381_v62 = vsel %vm3060_vm15, %v12013_v32, 0.0 }
 0xbf6   :  { %3382 = vadd.xlane.f32.xlu1 %v3381_v62  ;;  %v4628_v62 = vld [vmem:[%s15066_s13 + $0xb0] sm:$0xff] }
 0xc07   :  { %11767 = vrot.lane.b32.xlu1 %v11766_v43, %s12548_s2 }
 0xc0b   :  { %11772 = vrot.lane.b32.xlu1 %v11771_v3, %s12548_s2 }
 0xc0f   :  { %11782 = vrot.lane.b32.xlu1 %v11781_v15, %s12548_s2 }
 0xc13   :  { %11792 = vrot.lane.b32.xlu1 %v11791_v0, %s12548_s2 }
 0xc36   :  { %v11778_v30 = vpop.permute.xlu0 %11777 }
 0xc37   :  { %v11780_v53 = vunpack.i.h.bf16 %v11778_v30  ;;  %v11779_v23 = vunpack.i.l.bf16 %v11778_v30 }
 0xc39   :  { %v10875_v38 = vpack.c.bf16 %v11780_v53, %v11779_v23 }
 0xc3b   :  { %v11788_v25 = vpop.permute.xlu0 %11787 }
 0xc3c   :  { %v11790_v21 = vunpack.i.h.bf16 %v11788_v25  ;;  %v11789_v34 = vunpack.i.l.bf16 %v11788_v25 }
 0xc3e   :  { %v10881_v7 = vpack.c.bf16 %v11790_v21, %v11789_v34 }
 0xc83   :  { %v3383_v47 = vpop.xlane.xlu1 %3382 }
 0xc84   :  { %12014 = vrcp.f32 %v3383_v47 }
 0xc87   :  { %v11768_v18 = vpop.permute.xlu1 %11767 }
 0xc88   :  { %v11770_v19 = vunpack.i.h.bf16 %v11768_v18  ;;  %v11769_v9 = vunpack.i.l.bf16 %v11768_v18 }
 0xc8a   :  { %v10869_v56 = vpack.c.bf16 %v11770_v19, %v11769_v9 }
 0xc8b   :  { %v11773_v52 = vpop.permute.xlu1 %11772 }
 0xc8c   :  { %v4098_v13 = vpop.f32.mrb[38].mxu0  ;;  %v11775_v31 = vunpack.i.h.bf16 %v11773_v52  ;;  %v11774_v1 = vunpack.i.l.bf16 %v11773_v52 }
 0xc8d   :  { %v9716_v28 = vpop.f32.mrb[39].mxu0  ;;  %9720 = vmatmul.mubr.msk.f32.vlgmr.msra.gmra.mrb[40].mxu1 %vm3060_vm15, %v4098_v13  ;;  %v14192_v13 = vld [vmem:[#allocation16] ss:$0 sm:$0xff] }
 0xc8e   :  { %9750 = vmatpush3.msk.msra.mxu1 %vm2802_vm10, %v4103_v60  ;;  %9751 = vmatprep.mubr.msk.f32.mxu1 %vm12547_vm6, %v15094_v4  ;;  %v12015_v50 = vpop.eup %12014  ;;  %v10872_v46 = vpack.c.bf16 %v11775_v31, %v11774_v1 }
 0xc8f   :  { %9754 = vmatprep.subr.mxu1 %v15094_v4  ;;  %v3385_v2 = vmul.f32 %v12015_v50, %v12013_v32  ;;  %v11783_v51 = vpop.permute.xlu1 %11782  ;;  %v4627_v32 = vld [vmem:[%s15066_s13 + $0x78] sm:$0xff] }
 0xc90   :  { %v11785_v40 = vunpack.i.h.bf16 %v11783_v51  ;;  %v11784_v36 = vunpack.i.l.bf16 %v11783_v51 }
 0xc92   :  { %v10878_v55 = vpack.c.bf16 %v11785_v40, %v11784_v36 }
 0xc93   :  { %v11793_v44 = vpop.permute.xlu1 %11792 }
 0xc94   :  { %v11795_v63 = vunpack.i.h.bf16 %v11793_v44  ;;  %v11794_v57 = vunpack.i.l.bf16 %v11793_v44 }
 0xc96   :  { %v10884_v14 = vpack.c.bf16 %v11795_v63, %v11794_v57 }
 0xca4   :  { %v4249_v8 = vpop.f32.mrb[40].mxu0 }
 0xca5   :  { %v9748_v24 = vpop.f32.mrb[41].mxu0  ;;  %9752 = vmatmul.mubr.msk.f32.vlgmr.msra.gmra.mrb[42].mxu1 %vm3060_vm15, %v4249_v8 }
 0xca6   :  { %9755 = vmatpush3.msk.msra.mxu1 %vm2802_vm10, %v4103_v60  ;;  %9756 = vmatprep.mubr.msk.f32.mxu1 %vm12547_vm6, %v15094_v4  ;;  %v14167_v60 = vpack.c.bf16 %v4628_v62, %v4627_v32  ;;  %vm14622_vm10 = vmpackc.low %vm7021_vm9, %vm7021_vm9 }
 0xca7   :  { %10868 = vmatprep.subr.bf16.mxu1 %v15090_v35 }
 0xca8   :  { %10903 = vmatpush3.bf16.msra.mxu0 %v14167_v60 }
 0xca9   :  { %9757 = vmatmul.mubr.msk.f32.vlgmr.msra.gmra.mrb[44].mxu1 %vm3060_vm15, %v3385_v2  ;;  %10910 = vmatprep.subr.bf16.mxu0 %v15090_v35 }
 0xcaa   :  { %9783 = vmatprep.mubr.msk.f32.mxu1 %vm12547_vm6, %v15094_v4  ;;  %10870 = vmatpush3.bf16.msra.mxu1 %v10869_v56 }
 0xcab   :  { %10871 = vmatprep.subr.bf16.mxu1 %v15090_v35 }
 0xcac   :  { %v14141_v41 = vpop.f32.mrb[42].mxu0 }
 0xcad   :  { %v9796_v42 = vpop.f32.mrb[43].mxu0  ;;  %v14196_v28 = vadd.f32 %v14192_v13, %v14141_v41 }
 0xcae   :  { %10873 = vmatpush3.bf16.msra.mxu1 %v10872_v46 }
 0xcaf   :  { %10874 = vmatprep.subr.bf16.mxu1 %v15090_v35 }
 0xcb0   :  { %v14143_v5 = vpop.f32.mrb[44].mxu0 }
 0xcb1   :  { %v9799_v22 = vpop.f32.mrb[45].mxu0 }
 0xcb2   :  { %10876 = vmatpush3.bf16.msra.mxu1 %v10875_v38 }
 0xcb3   :  { %10877 = vmatprep.subr.bf16.mxu1 %v15090_v35 }
 0xcb6   :  { %10879 = vmatpush3.bf16.msra.mxu1 %v10878_v55 }
 0xcb7   :  { %10880 = vmatprep.subr.bf16.mxu1 %v15090_v35 }
 0xcba   :  { %10882 = vmatpush3.bf16.msra.mxu1 %v10881_v7 }
 0xcbb   :  { %10883 = vmatprep.subr.bf16.mxu1 %v15090_v35 }
 0xcbe   :  { %10885 = vmatpush3.bf16.msra.mxu1 %v10884_v14 }
 0xcbf   :  { %10892 = vmatprep.subr.bf16.mxu1 %v15090_v35 }
 0xd60   :  { %v4175_v39 = vpop.f32.mrb[40].mxu1 }
 0xd61   :  { %v9721_v54 = vpop.f32.mrb[41].mxu1  ;;  %v4327_v43 = vmul.f32 %v4175_v39, %v4175_v39  ;;  %v4326_v45 = vsub.f32 %v14078_v48, %v4175_v39 }
 0xd78   :  { %v4322_v12 = vpop.f32.mrb[42].mxu1 }
 0xd79   :  { %v4328_v16 = vsub.f32 %v4322_v12, %v4327_v43  ;;  %v9753_v61 = vpop.f32.mrb[43].mxu1 }
 0xd7b   :  { %v4329_v6 = vadd.f32 1e-05, %v4328_v16 }
 0xd7c   :  { %v4413_v17 = vpop.f32.mrb[44].mxu1 }
 0xd7d   :  { %12016 = vrsqrt.f32 %v4329_v6  ;;  %v9758_v3 = vpop.f32.mrb[45].mxu1 }
 0xd87   :  { %v12017_v10 = vpop.eup %12016 }
 0xd88   :  { %v4331_v49 = vmul.f32 %v12017_v10, %v4326_v45 }
 0xd8a   :  { %v4337_v15 = vmul.f32 %v8931_v37, %v4331_v49 }
 0xd8c   :  { %v4343_v59 = vadd.f32 %v8932_v33, %v4337_v15 }
 0xd8e   :  { %v4417_v58 = vmul.f32 %v4413_v17, %v4343_v59 }
 0xd90   :  { %9784 = vmatmul.mubr.msk.f32.vlgmr.msra.gmra.mrb[46].mxu1 %vm2893_vm0, %v4417_v58 }
 0xd91   :  { %10894 = vmatpush3.bf16.msra.mxu1 %v14157_v20  ;;  %9811 = vmatprep.mubr.msk.f32.mxu1 %vm12547_vm6, %v15094_v4 }
 0xd92   :  { %10895 = vmatprep.subr.bf16.mxu1 %v15090_v35 }
 0xd95   :  { %10897 = vmatpush3.bf16.msra.mxu1 %v14167_v60 }
 0xd96   :  { %10904 = vmatprep.subr.bf16.mxu1 %v15090_v35 }
 0xd98   :  { %9812 = vmatmul.mubr.f32.vlgmr.msra.gmra.mrb[48].mxu1 %v15094_v4 }
 0xd99   :  { %10906 = vmatpush3.bf16.msra.mxu1 %v14157_v20  ;;  %9833 = vmatprep.mubr.msk.f32.mxu1 %vm12547_vm6, %v15094_v4 }
 0xd9a   :  { %10907 = vmatprep.subr.bf16.mxu1 %v15090_v35 }
 0xd9d   :  { %10909 = vmatpush3.bf16.msra.mxu1 %v14167_v60 }
 0xd9e   :  { %10916 = vmatprep.subr.bf16.mxu1 %v15090_v35 }
 0xe63   :  { %v14186_v48 = vpop.f32.mrb[46].mxu1 }
 0xe64   :  { %v9785_v0 = vpop.f32.mrb[47].mxu1  ;;  %9801 = vmatmul.mubr.msk.f32.gmra.mrb[46].mxu0 %vm503_vm12, %v14186_v48 }
 0xe65   :  { %9822 = vmatprep.mubr.msk.f32.mxu0 %vm12547_vm6, %v15094_v4 }
 0xe6b   :  { %v4698_v47 = vpop.f32.mrb[48].mxu1 }
 0xe6c   :  { %v4702_v50 = vadd.f32 %v4698_v47, %v14196_v28  ;;  %v9813_v8 = vpop.f32.mrb[49].mxu1 }
 0xe6e   :  { %12018 = vtanh.f32 %v4702_v50  ;;  %v8940_v2 = vmul.f32 -1.442695, %v4702_v50 }
 0xe70   :  { %12020 = vpow2.f32 %v8940_v2 }
 0xe78   :  { %v12019_v24 = vpop.eup %12018 }
 0xe79   :  { %4712 = vrot.lane.b32.xlu0 %v12019_v24, %s12529_s21 }
 0xe7a   :  { %v12021_v42 = vpop.eup %12020 }
 0xe7b   :  { %v4706_v22 = vadd.f32 1.0, %v12021_v42 }
 0xe7d   :  { %12022 = vrcp.f32 %v4706_v22 }
 0xe87   :  { %v12023_v18 = vpop.eup %12022 }
 0xe88   :  { %v4710_v52 = vmul.f32 0.0, %v12023_v18 }
 0xeeb   :  { %v4713_v19 = vpop.permute.xlu0 %4712 }
 0xeec   :  { %v4715_v9 = vmul.f32 %v12023_v18, %v4713_v19 }
 0xeee   :  { %4717 = vrot.lane.b32.xlu1 %v4715_v9, %s12529_s21 }
 0xf37   :  { %v14201_v41 = vpop.f32.mrb[46].mxu0 }
 0xf38   :  { %v9802_v56 = vpop.f32.mrb[47].mxu0 }
 0xf60   :  { %v4718_v31 = vpop.permute.xlu1 %4717 }
 0xf61   :  { %v4720_v1 = vadd.f32 %v4718_v31, %v4710_v52 }
 0xf63   :  { %12024 = vtanh.f32 %v4720_v1  ;;  %v4817_v57 = vrot.slane %v4720_v1, 6 }
 0xf6d   :  { %v12025_v46 = vpop.eup %12024 }
 0xf6e   :  { %4723 = vrot.lane.b32.xlu0 %v12025_v46, %s12529_s21 }
 0xfe0   :  { %v4724_v30 = vpop.permute.xlu0 %4723 }
 0xfe1   :  { %v4726_v53 = vmul.f32 %v12023_v18, %v4724_v30 }
 0xfe3   :  { %4728 = vrot.lane.b32.xlu1 %v4726_v53, %s12544_s18 }
0x1055   :  { %v4729_v23 = vpop.permute.xlu1 %4728 }
0x1056   :  { %4732 = vst.msk [vmem:[#allocation2] sm:$0x3] %vm4731_vm11, %v4729_v23  ;;  %9823 = vmatmul.mubr.msk.f32.vlgmr.msra.gmra.mrb[48].mxu0 %vm503_vm12, %v4729_v23 }
0x1057   :  { %10912 = vmatpush3.bf16.msra.mxu0 %v14157_v20  ;;  %9844 = vmatprep.mubr.msk.f32.mxu0 %vm12547_vm6, %v15094_v4 }
0x1058   :  { %10913 = vmatprep.subr.bf16.mxu0 %v15090_v35 }
0x105b   :  { %10915 = vmatpush3.bf16.msra.mxu0 %v14167_v60 }
0x105c   :  { %10922 = vmatprep.subr.bf16.mxu0 %v15090_v35 }
0x1129   :  { %v4801_v38 = vpop.f32.mrb[48].mxu0 }
0x112a   :  { %v4806_v51 = vrot.slane %v4801_v38, 6  ;;  %v9824_v40 = vpop.f32.mrb[49].mxu0 }
0x112c   :  { %v4808_v36 = vadd.f32 %v4806_v51, %v14196_v28 }
0x112e   :  { %12026 = vtanh.f32 %v4808_v36  ;;  %v8942_v25 = vmul.f32 -1.442695, %v4808_v36 }
0x1130   :  { %12028 = vpow2.f32 %v8942_v25 }
0x1138   :  { %v12027_v55 = vpop.eup %12026 }
0x1139   :  { %4821 = vrot.lane.b32.xlu0 %v12027_v55, %s12529_s21 }
0x113a   :  { %v12029_v21 = vpop.eup %12028 }
0x113b   :  { %v4812_v34 = vadd.f32 1.0, %v12029_v21  ;;  %v14260_v21 = vadd.f32 %v14192_v13, %v14143_v5 }
0x113d   :  { %12030 = vrcp.f32 %v4812_v34 }
0x1147   :  { %v12031_v7 = vpop.eup %12030 }
0x1148   :  { %v4819_v14 = vmul.f32 %v12031_v7, %v4817_v57 }
0x11ab   :  { %v4822_v44 = vpop.permute.xlu0 %4821 }
0x11ac   :  { %v4824_v63 = vmul.f32 %v12031_v7, %v4822_v44 }
0x11ae   :  { %4826 = vrot.lane.b32.xlu1 %v4824_v63, %s12529_s21 }
0x1220   :  { %v4827_v11 = vpop.permute.xlu1 %4826 }
0x1221   :  { %v4829_v27 = vadd.f32 %v4827_v11, %v4819_v14 }
0x1223   :  { %12032 = vtanh.f32 %v4829_v27  ;;  %v4929_v15 = vrot.slane %v4829_v27, 6 }
0x122d   :  { %v12033_v32 = vpop.eup %12032 }
0x122e   :  { %4832 = vrot.lane.b32.xlu0 %v12033_v32, %s12529_s21 }
0x12a0   :  { %v4833_v62 = vpop.permute.xlu0 %4832 }
0x12a1   :  { %v14217_v39 = vmul.f32 %v12031_v7, %v4833_v62 }
0x12a3   :  { %v4842_v54 = vrot.slane %v14217_v39, 2 }
0x12a5   :  { %4843 = vrot.lane.b32.xlu1 %v4842_v54, %s12544_s18 }
0x1317   :  { %v4844_v43 = vpop.permute.xlu1 %4843 }
0x1318   :  { %9834 = vmatmul.mubr.msk.f32.vlgmr.msra.gmra.mrb[50].mxu1 %vm503_vm12, %v4844_v43 }
0x1319   :  { %10918 = vmatpush3.bf16.msra.mxu1 %v14157_v20  ;;  %9855 = vmatprep.mubr.msk.f32.mxu1 %vm12547_vm6, %v15094_v4 }
0x131a   :  { %10919 = vmatprep.subr.bf16.mxu1 %v15090_v35 }
0x131d   :  { %10921 = vmatpush3.bf16.msra.mxu1 %v14167_v60 }
0x131e   :  { %10928 = vmatprep.subr.bf16.mxu1 %v15090_v35 }
0x13eb   :  { %v4913_v12 = vpop.f32.mrb[50].mxu1 }
0x13ec   :  { %v4918_v16 = vrot.slane %v4913_v12, 4  ;;  %v9835_v61 = vpop.f32.mrb[51].mxu1 }
0x13ee   :  { %v4920_v6 = vadd.f32 %v4918_v16, %v14196_v28 }
0x13f0   :  { %12034 = vtanh.f32 %v4920_v6  ;;  %v8944_v3 = vmul.f32 -1.442695, %v4920_v6 }
0x13f2   :  { %12036 = vpow2.f32 %v8944_v3 }
0x13fa   :  { %v12035_v17 = vpop.eup %12034 }
0x13fb   :  { %4933 = vrot.lane.b32.xlu0 %v12035_v17, %s12529_s21 }
0x13fc   :  { %v12037_v45 = vpop.eup %12036 }
0x13fd   :  { %v4924_v10 = vadd.f32 1.0, %v12037_v45 }
0x13ff   :  { %12038 = vrcp.f32 %v4924_v10 }
0x1409   :  { %v12039_v37 = vpop.eup %12038 }
0x140a   :  { %v4931_v59 = vmul.f32 %v12039_v37, %v4929_v15 }
0x146d   :  { %v4934_v49 = vpop.permute.xlu0 %4933 }
0x146e   :  { %v4936_v33 = vmul.f32 %v12039_v37, %v4934_v49 }
0x1470   :  { %4938 = vrot.lane.b32.xlu1 %v4936_v33, %s12529_s21 }
0x14e2   :  { %v4939_v58 = vpop.permute.xlu1 %4938 }
0x14e3   :  { %v4941_v0 = vadd.f32 %v4939_v58, %v4931_v59 }
0x14e5   :  { %12040 = vtanh.f32 %v4941_v0  ;;  %v5041_v53 = vrot.slane %v4941_v0, 6 }
0x14ef   :  { %v12041_v47 = vpop.eup %12040 }
0x14f0   :  { %4944 = vrot.lane.b32.xlu0 %v12041_v47, %s12529_s21 }
0x1562   :  { %v4945_v50 = vpop.permute.xlu0 %4944 }
0x1563   :  { %v14232_v8 = vmul.f32 %v12039_v37, %v4945_v50 }
0x1565   :  { %v4954_v24 = vrot.slane %v14232_v8, 4 }
0x1567   :  { %4955 = vrot.lane.b32.xlu1 %v4954_v24, %s12544_s18 }
0x15d9   :  { %v4956_v2 = vpop.permute.xlu1 %4955 }
0x15da   :  { %9845 = vmatmul.mubr.msk.f32.vlgmr.msra.gmra.mrb[50].mxu0 %vm503_vm12, %v4956_v2 }
0x15db   :  { %10924 = vmatpush3.bf16.msra.mxu0 %v14157_v20  ;;  %9866 = vmatprep.mubr.msk.f32.mxu0 %vm12547_vm6, %v15094_v4 }
0x15dc   :  { %10925 = vmatprep.subr.bf16.mxu0 %v15090_v35 }
0x15df   :  { %10927 = vmatpush3.bf16.msra.mxu0 %v14167_v60 }
0x15e0   :  { %10934 = vmatprep.subr.bf16.mxu0 %v15090_v35 }
0x16ad   :  { %v5025_v42 = vpop.f32.mrb[50].mxu0 }
0x16ae   :  { %v5030_v22 = vrot.slane %v5025_v42, 2  ;;  %v9846_v18 = vpop.f32.mrb[51].mxu0 }
0x16b0   :  { %v5032_v19 = vadd.f32 %v5030_v22, %v14196_v28 }
0x16b2   :  { %12042 = vtanh.f32 %v5032_v19  ;;  %v8946_v56 = vmul.f32 -1.442695, %v5032_v19 }
0x16b4   :  { %12044 = vpow2.f32 %v8946_v56 }
0x16bc   :  { %v12043_v9 = vpop.eup %12042 }
0x16bd   :  { %5045 = vrot.lane.b32.xlu0 %v12043_v9, %s12529_s21 }
0x16be   :  { %v12045_v52 = vpop.eup %12044 }
0x16bf   :  { %v5036_v31 = vadd.f32 1.0, %v12045_v52 }
0x16c1   :  { %12046 = vrcp.f32 %v5036_v31 }
0x16cb   :  { %v12047_v1 = vpop.eup %12046 }
0x16cc   :  { %v5043_v23 = vmul.f32 %v12047_v1, %v5041_v53 }
0x172f   :  { %v5046_v46 = vpop.permute.xlu0 %5045 }
0x1730   :  { %v5048_v30 = vmul.f32 %v12047_v1, %v5046_v46 }
0x1732   :  { %5050 = vrot.lane.b32.xlu1 %v5048_v30, %s12529_s21 }
0x17a4   :  { %v5051_v38 = vpop.permute.xlu1 %5050 }
0x17a5   :  { %v5053_v51 = vadd.f32 %v5051_v38, %v5043_v23 }
0x17a7   :  { %12048 = vtanh.f32 %v5053_v51  ;;  %v5150_v5 = vrot.slane %v5053_v51, 6 }
0x17b1   :  { %v12049_v28 = vpop.eup %12048 }
0x17b2   :  { %5056 = vrot.lane.b32.xlu0 %v12049_v28, %s12529_s21 }
0x1824   :  { %v5057_v40 = vpop.permute.xlu0 %5056 }
0x1825   :  { %v14247_v36 = vmul.f32 %v12047_v1, %v5057_v40 }
0x1827   :  { %v5066_v55 = vrot.slane %v14247_v36, 6 }
0x1829   :  { %5067 = vrot.lane.b32.xlu1 %v5066_v55, %s12544_s18 }
0x189b   :  { %v5068_v25 = vpop.permute.xlu1 %5067 }
0x189c   :  { %9856 = vmatmul.mubr.msk.f32.vlgmr.msra.gmra.mrb[52].mxu1 %vm503_vm12, %v5068_v25 }
0x189d   :  { %10930 = vmatpush3.bf16.msra.mxu1 %v14157_v20  ;;  %9877 = vmatprep.mubr.msk.f32.mxu1 %vm12547_vm6, %v15094_v4 }
0x189e   :  { %10931 = vmatprep.subr.bf16.mxu1 %v15090_v35 }
0x18a1   :  { %10933 = vmatpush3.bf16.msra.mxu1 %v14167_v60 }
0x18a2   :  { %10940 = vmatprep.subr.bf16.mxu1 %v15090_v35 }
0x196f   :  { %v5137_v34 = vpop.f32.mrb[52].mxu1 }
0x1970   :  { %v5141_v7 = vadd.f32 %v5137_v34, %v14260_v21  ;;  %v9857_v44 = vpop.f32.mrb[53].mxu1 }
0x1972   :  { %12050 = vtanh.f32 %v5141_v7  ;;  %v8948_v57 = vmul.f32 -1.442695, %v5141_v7 }
0x1974   :  { %12052 = vpow2.f32 %v8948_v57 }
0x197c   :  { %v12051_v63 = vpop.eup %12050 }
0x197d   :  { %5154 = vrot.lane.b32.xlu0 %v12051_v63, %s12529_s21 }
0x197e   :  { %v12053_v14 = vpop.eup %12052 }
0x197f   :  { %v5145_v11 = vadd.f32 1.0, %v12053_v14 }
0x1981   :  { %12054 = vrcp.f32 %v5145_v11 }
0x198b   :  { %v12055_v27 = vpop.eup %12054 }
0x198c   :  { %v5152_v54 = vmul.f32 %v12055_v27, %v5150_v5 }
0x19ef   :  { %v5155_v32 = vpop.permute.xlu0 %5154 }
0x19f0   :  { %v5157_v62 = vmul.f32 %v12055_v27, %v5155_v32 }
0x19f2   :  { %5159 = vrot.lane.b32.xlu1 %v5157_v62, %s12529_s21 }
0x1a64   :  { %v5160_v43 = vpop.permute.xlu1 %5159 }
0x1a65   :  { %v5162_v12 = vadd.f32 %v5160_v43, %v5152_v54 }
0x1a67   :  { %12056 = vtanh.f32 %v5162_v12  ;;  %v5258_v50 = vrot.slane %v5162_v12, 6 }
0x1a71   :  { %v12057_v16 = vpop.eup %12056 }
0x1a72   :  { %5165 = vrot.lane.b32.xlu0 %v12057_v16, %s12529_s21 }
0x1ae4   :  { %v5166_v61 = vpop.permute.xlu0 %5165 }
0x1ae5   :  { %v5168_v6 = vmul.f32 %v12055_v27, %v5166_v61 }
0x1ae7   :  { %5170 = vrot.lane.b32.xlu1 %v5168_v6, %s12544_s18 }
0x1b59   :  { %v5171_v17 = vpop.permute.xlu1 %5170 }
0x1b5a   :  { %5173 = vst.msk [vmem:[#allocation2 + $0x8] sm:$0x3] %vm4731_vm11, %v5171_v17  ;;  %9867 = vmatmul.mubr.msk.f32.vlgmr.msra.gmra.mrb[52].mxu0 %vm503_vm12, %v5171_v17 }
0x1b5b   :  { %10936 = vmatpush3.bf16.msra.mxu0 %v14157_v20  ;;  %9888 = vmatprep.mubr.msk.f32.mxu0 %vm12547_vm6, %v15094_v4 }
0x1b5c   :  { %10937 = vmatprep.subr.bf16.mxu0 %v15090_v35 }
0x1b5f   :  { %10939 = vmatpush3.bf16.msra.mxu0 %v14167_v60 }
0x1b60   :  { %10946 = vmatprep.subr.bf16.mxu0 %v15090_v35 }
0x1c2d   :  { %v5242_v3 = vpop.f32.mrb[52].mxu0 }
0x1c2e   :  { %v5247_v45 = vrot.slane %v5242_v3, 6  ;;  %v9868_v10 = vpop.f32.mrb[53].mxu0 }
0x1c30   :  { %v5249_v37 = vadd.f32 %v5247_v45, %v14260_v21 }
0x1c32   :  { %12058 = vtanh.f32 %v5249_v37  ;;  %v8950_v33 = vmul.f32 -1.442695, %v5249_v37 }
0x1c34   :  { %12060 = vpow2.f32 %v8950_v33 }
0x1c3c   :  { %v12059_v49 = vpop.eup %12058 }
0x1c3d   :  { %5262 = vrot.lane.b32.xlu0 %v12059_v49, %s12529_s21 }
0x1c3e   :  { %v12061_v15 = vpop.eup %12060 }
0x1c3f   :  { %v5253_v59 = vadd.f32 1.0, %v12061_v15 }
0x1c41   :  { %12062 = vrcp.f32 %v5253_v59 }
0x1c4b   :  { %v12063_v58 = vpop.eup %12062 }
0x1c4c   :  { %v5260_v24 = vmul.f32 %v12063_v58, %v5258_v50 }
0x1caf   :  { %v5263_v0 = vpop.permute.xlu0 %5262 }
0x1cb0   :  { %v5265_v47 = vmul.f32 %v12063_v58, %v5263_v0 }
0x1cb2   :  { %5267 = vrot.lane.b32.xlu1 %v5265_v47, %s12529_s21 }
0x1d24   :  { %v5268_v2 = vpop.permute.xlu1 %5267 }
0x1d25   :  { %v5270_v42 = vadd.f32 %v5268_v2, %v5260_v24 }
0x1d27   :  { %12064 = vtanh.f32 %v5270_v42  ;;  %v5369_v55 = vrot.slane %v5270_v42, 6 }
0x1d31   :  { %v12065_v22 = vpop.eup %12064 }
0x1d32   :  { %5273 = vrot.lane.b32.xlu0 %v12065_v22, %s12529_s21 }
0x1da4   :  { %v5274_v18 = vpop.permute.xlu0 %5273 }
0x1da5   :  { %v14279_v19 = vmul.f32 %v12063_v58, %v5274_v18  ;;  %v14322_v58 = vadd.f32 %v14192_v13, %v14201_v41 }
0x1da7   :  { %v5282_v9 = vrot.slane %v14279_v19, 2 }
0x1da9   :  { %5283 = vrot.lane.b32.xlu1 %v5282_v9, %s12544_s18 }
0x1e1b   :  { %v5284_v56 = vpop.permute.xlu1 %5283 }
0x1e1c   :  { %9878 = vmatmul.mubr.msk.f32.vlgmr.msra.gmra.mrb[54].mxu1 %vm503_vm12, %v5284_v56 }
0x1e1d   :  { %10942 = vmatpush3.bf16.msra.mxu1 %v14157_v20  ;;  %9899 = vmatprep.mubr.msk.f32.mxu1 %vm12547_vm6, %v15094_v4 }
0x1e1e   :  { %10943 = vmatprep.subr.bf16.mxu1 %v15090_v35 }
0x1e21   :  { %10945 = vmatpush3.bf16.msra.mxu1 %v14167_v60 }
0x1e22   :  { %10952 = vmatprep.subr.bf16.mxu1 %v15090_v35 }
0x1eef   :  { %v5353_v52 = vpop.f32.mrb[54].mxu1 }
0x1ef0   :  { %v5358_v31 = vrot.slane %v5353_v52, 4  ;;  %v9879_v1 = vpop.f32.mrb[55].mxu1 }
0x1ef2   :  { %v5360_v46 = vadd.f32 %v5358_v31, %v14260_v21 }
0x1ef4   :  { %12066 = vtanh.f32 %v5360_v46  ;;  %v8952_v53 = vmul.f32 -1.442695, %v5360_v46 }
0x1ef6   :  { %12068 = vpow2.f32 %v8952_v53 }
0x1efe   :  { %v12067_v30 = vpop.eup %12066 }
0x1eff   :  { %5373 = vrot.lane.b32.xlu0 %v12067_v30, %s12529_s21 }
0x1f00   :  { %v12069_v23 = vpop.eup %12068 }
0x1f01   :  { %v5364_v38 = vadd.f32 1.0, %v12069_v23 }
0x1f03   :  { %12070 = vrcp.f32 %v5364_v38 }
0x1f0d   :  { %v12071_v51 = vpop.eup %12070 }
0x1f0e   :  { %v5371_v25 = vmul.f32 %v12071_v51, %v5369_v55 }
0x1f71   :  { %v5374_v28 = vpop.permute.xlu0 %5373 }
0x1f72   :  { %v5376_v40 = vmul.f32 %v12071_v51, %v5374_v28 }
0x1f74   :  { %5378 = vrot.lane.b32.xlu1 %v5376_v40, %s12529_s21 }
0x1fe6   :  { %v5379_v34 = vpop.permute.xlu1 %5378 }
0x1fe7   :  { %v5381_v7 = vadd.f32 %v5379_v34, %v5371_v25 }
0x1fe9   :  { %12072 = vtanh.f32 %v5381_v7  ;;  %v5480_v3 = vrot.slane %v5381_v7, 6 }
0x1ff3   :  { %v12073_v44 = vpop.eup %12072 }
0x1ff4   :  { %5384 = vrot.lane.b32.xlu0 %v12073_v44, %s12529_s21 }
0x2066   :  { %v5385_v63 = vpop.permute.xlu0 %5384 }
0x2067   :  { %v14294_v57 = vmul.f32 %v12071_v51, %v5385_v63 }
0x2069   :  { %v5393_v14 = vrot.slane %v14294_v57, 4 }
0x206b   :  { %5394 = vrot.lane.b32.xlu1 %v5393_v14, %s12544_s18 }
0x20dd   :  { %v5395_v11 = vpop.permute.xlu1 %5394 }
0x20de   :  { %9889 = vmatmul.mubr.msk.f32.vlgmr.msra.gmra.mrb[54].mxu0 %vm503_vm12, %v5395_v11 }
0x20df   :  { %10948 = vmatpush3.bf16.msra.mxu0 %v14157_v20  ;;  %9910 = vmatprep.mubr.msk.f32.mxu0 %vm12547_vm6, %v15094_v4 }
0x20e0   :  { %10949 = vmatprep.subr.bf16.mxu0 %v15090_v35 }
0x20e3   :  { %10951 = vmatpush3.bf16.msra.mxu0 %v14167_v60 }
0x20e4   :  { %10958 = vmatprep.subr.bf16.mxu0 %v15090_v35 }
0x21b1   :  { %v5464_v27 = vpop.f32.mrb[54].mxu0 }
0x21b2   :  { %v5469_v32 = vrot.slane %v5464_v27, 2  ;;  %v9890_v62 = vpop.f32.mrb[55].mxu0 }
0x21b4   :  { %v5471_v5 = vadd.f32 %v5469_v32, %v14260_v21 }
0x21b6   :  { %12074 = vtanh.f32 %v5471_v5  ;;  %v8954_v43 = vmul.f32 -1.442695, %v5471_v5 }
0x21b8   :  { %12076 = vpow2.f32 %v8954_v43 }
0x21c0   :  { %v12075_v54 = vpop.eup %12074 }
0x21c1   :  { %5484 = vrot.lane.b32.xlu0 %v12075_v54, %s12529_s21 }
0x21c2   :  { %v12077_v12 = vpop.eup %12076 }
0x21c3   :  { %v5475_v16 = vadd.f32 1.0, %v12077_v12 }
0x21c5   :  { %12078 = vrcp.f32 %v5475_v16 }
0x21cf   :  { %v12079_v61 = vpop.eup %12078 }
0x21d0   :  { %v5482_v45 = vmul.f32 %v12079_v61, %v5480_v3 }
0x2233   :  { %v5485_v6 = vpop.permute.xlu0 %5484 }
0x2234   :  { %v5487_v17 = vmul.f32 %v12079_v61, %v5485_v6 }
0x2236   :  { %5489 = vrot.lane.b32.xlu1 %v5487_v17, %s12529_s21 }
0x22a8   :  { %v5490_v10 = vpop.permute.xlu1 %5489 }
0x22a9   :  { %v5492_v37 = vadd.f32 %v5490_v10, %v5482_v45 }
0x22ab   :  { %12080 = vtanh.f32 %v5492_v37  ;;  %v5588_v13 = vrot.slane %v5492_v37, 6 }
0x22b5   :  { %v12081_v21 = vpop.eup %12080 }
0x22b6   :  { %5495 = vrot.lane.b32.xlu0 %v12081_v21, %s12529_s21 }
0x2328   :  { %v5496_v49 = vpop.permute.xlu0 %5495 }
0x2329   :  { %v14309_v33 = vmul.f32 %v12079_v61, %v5496_v49 }
0x232b   :  { %v5504_v15 = vrot.slane %v14309_v33, 6 }
0x232d   :  { %5505 = vrot.lane.b32.xlu1 %v5504_v15, %s12544_s18 }
0x239f   :  { %v5506_v59 = vpop.permute.xlu1 %5505 }
0x23a0   :  { %9900 = vmatmul.mubr.msk.f32.vlgmr.msra.gmra.mrb[56].mxu1 %vm503_vm12, %v5506_v59 }
0x23a1   :  { %10954 = vmatpush3.bf16.msra.mxu1 %v14157_v20  ;;  %9921 = vmatprep.mubr.msk.f32.mxu1 %vm12547_vm6, %v15094_v4 }
0x23a2   :  { %10955 = vmatprep.subr.bf16.mxu1 %v15090_v35 }
0x23a5   :  { %10957 = vmatpush3.bf16.msra.mxu1 %v14167_v60 }
0x23a6   :  { %10964 = vmatprep.subr.bf16.mxu1 %v15090_v35 }
0x2473   :  { %v5575_v0 = vpop.f32.mrb[56].mxu1 }
0x2474   :  { %v5579_v47 = vadd.f32 %v5575_v0, %v14322_v58  ;;  %v9901_v50 = vpop.f32.mrb[57].mxu1 }
0x2476   :  { %12082 = vtanh.f32 %v5579_v47  ;;  %v8956_v2 = vmul.f32 -1.442695, %v5579_v47 }
0x2478   :  { %12084 = vpow2.f32 %v8956_v2 }
0x2480   :  { %v12083_v24 = vpop.eup %12082 }
0x2481   :  { %5592 = vrot.lane.b32.xlu0 %v12083_v24, %s12529_s21 }
0x2482   :  { %v12085_v42 = vpop.eup %12084 }
0x2483   :  { %v5583_v22 = vadd.f32 1.0, %v12085_v42 }
0x2485   :  { %12086 = vrcp.f32 %v5583_v22 }
0x248f   :  { %v12087_v18 = vpop.eup %12086 }
0x2490   :  { %v5590_v41 = vmul.f32 %v12087_v18, %v5588_v13 }
0x24f3   :  { %v5593_v9 = vpop.permute.xlu0 %5592 }
0x24f4   :  { %v5595_v56 = vmul.f32 %v12087_v18, %v5593_v9 }
0x24f6   :  { %5597 = vrot.lane.b32.xlu1 %v5595_v56, %s12529_s21 }
0x2568   :  { %v5598_v52 = vpop.permute.xlu1 %5597 }
0x2569   :  { %v5600_v31 = vadd.f32 %v5598_v52, %v5590_v41 }
0x256b   :  { %12088 = vtanh.f32 %v5600_v31 }
0x2575   :  { %v12089_v1 = vpop.eup %12088 }
0x2576   :  { %5603 = vrot.lane.b32.xlu0 %v12089_v1, %s12529_s21 }
0x25e8   :  { %v5604_v46 = vpop.permute.xlu0 %5603 }
0x25e9   :  { %v5606_v30 = vmul.f32 %v12087_v18, %v5604_v46 }
0x25eb   :  { %5608 = vrot.lane.b32.xlu1 %v5606_v30, %s12544_s18 }
0x265d   :  { %v5609_v53 = vpop.permute.xlu1 %5608 }
0x265e   :  { %5611 = vst.msk [vmem:[#allocation2 + $0x10] sm:$0x3] %vm4731_vm11, %v5609_v53  ;;  %9911 = vmatmul.mubr.msk.f32.vlgmr.msra.gmra.mrb[56].mxu0 %vm503_vm12, %v5609_v53  ;;  %vm8820_vm11 = vcmask 45060  }
0x265f   :  { %10960 = vmatpush3.bf16.msra.mxu0 %v14157_v20  ;;  %9932 = vmatprep.mubr.msk.f32.mxu0 %vm12547_vm6, %v15094_v4 }
0x2660   :  { %10961 = vmatprep.subr.bf16.mxu0 %v15090_v35 }
0x2663   :  { %10963 = vmatpush3.bf16.msra.mxu0 %v14167_v60  ;;  %v5696_v60 = vrot.slane %v5600_v31, 6 }
0x2664   :  { %10970 = vmatprep.subr.bf16.mxu0 %v15090_v35 }
0x2731   :  { %v5680_v23 = vpop.f32.mrb[56].mxu0 }
0x2732   :  { %v5685_v38 = vrot.slane %v5680_v23, 6  ;;  %v9912_v51 = vpop.f32.mrb[57].mxu0 }
0x2733   :  { %v5945_v51 = vld [vmem:[%s15066_s13 + $0x10] sm:$0xff] }
0x2734   :  { %v5687_v28 = vadd.f32 %v5685_v38, %v14322_v58 }
0x2736   :  { %12090 = vtanh.f32 %v5687_v28  ;;  %v8958_v55 = vmul.f32 -1.442695, %v5687_v28 }
0x2738   :  { %12092 = vpow2.f32 %v8958_v55 }
0x2740   :  { %v12091_v40 = vpop.eup %12090 }
0x2741   :  { %5700 = vrot.lane.b32.xlu0 %v12091_v40, %s12529_s21  ;;  %v5948_v40 = vld [vmem:[%s15066_s13 + $0xb8] sm:$0xff] }
0x2742   :  { %v12093_v20 = vpop.eup %12092 }
0x2743   :  { %v5691_v25 = vadd.f32 1.0, %v12093_v20 }
0x2745   :  { %12094 = vrcp.f32 %v5691_v25 }
0x274f   :  { %v12095_v34 = vpop.eup %12094 }
0x2750   :  { %v5698_v63 = vmul.f32 %v12095_v34, %v5696_v60 }
0x27b3   :  { %v5701_v7 = vpop.permute.xlu0 %5700 }
0x27b4   :  { %v5703_v44 = vmul.f32 %v12095_v34, %v5701_v7 }
0x27b6   :  { %5705 = vrot.lane.b32.xlu1 %v5703_v44, %s12529_s21 }
0x2828   :  { %v5706_v14 = vpop.permute.xlu1 %5705 }
0x2829   :  { %v5708_v11 = vadd.f32 %v5706_v14, %v5698_v63 }
0x282b   :  { %12096 = vtanh.f32 %v5708_v11  ;;  %v5807_v49 = vrot.slane %v5708_v11, 6 }
0x2835   :  { %v12097_v27 = vpop.eup %12096 }
0x2836   :  { %5711 = vrot.lane.b32.xlu0 %v12097_v27, %s12529_s21 }
0x28a8   :  { %v5712_v32 = vpop.permute.xlu0 %5711 }
0x28a9   :  { %v5714_v62 = vmul.f32 %v12095_v34, %v5712_v32 }
0x28ab   :  { %v5720_v5 = vrot.slane %v5714_v62, 2 }
0x28ad   :  { %5721 = vrot.lane.b32.xlu1 %v5720_v5, %s12544_s18 }
0x291f   :  { %v5722_v54 = vpop.permute.xlu1 %5721 }
0x2920   :  { %9922 = vmatmul.mubr.msk.f32.vlgmr.msra.gmra.mrb[58].mxu1 %vm503_vm12, %v5722_v54 }
0x2921   :  { %9943 = vmatprep.mubr.msk.f32.mxu1 %vm12547_vm6, %v15094_v4 }
0x29f3   :  { %v5791_v43 = vpop.f32.mrb[58].mxu1 }
0x29f4   :  { %v5796_v12 = vrot.slane %v5791_v43, 4  ;;  %v9923_v16 = vpop.f32.mrb[59].mxu1 }
0x29f6   :  { %v5798_v61 = vadd.f32 %v5796_v12, %v14322_v58 }
0x29f8   :  { %12098 = vtanh.f32 %v5798_v61  ;;  %v8960_v17 = vmul.f32 -1.442695, %v5798_v61 }
0x29fa   :  { %12100 = vpow2.f32 %v8960_v17 }
0x2a02   :  { %v12099_v6 = vpop.eup %12098 }
0x2a03   :  { %5811 = vrot.lane.b32.xlu0 %v12099_v6, %s12529_s21 }
0x2a04   :  { %v12101_v3 = vpop.eup %12100 }
0x2a05   :  { %v5802_v45 = vadd.f32 1.0, %v12101_v3 }
0x2a07   :  { %12102 = vrcp.f32 %v5802_v45 }
0x2a11   :  { %v12103_v10 = vpop.eup %12102 }
0x2a12   :  { %v5809_v15 = vmul.f32 %v12103_v10, %v5807_v49  ;;  %v8963_v49 = vld [vmem:[#allocation16 + $0x1] ss:$0 sm:$0xff] }
0x2a75   :  { %v5812_v37 = vpop.permute.xlu0 %5811 }
0x2a76   :  { %v5814_v21 = vmul.f32 %v12103_v10, %v5812_v37 }
0x2a78   :  { %5816 = vrot.lane.b32.xlu1 %v5814_v21, %s12529_s21 }
0x2aea   :  { %v5817_v59 = vpop.permute.xlu1 %5816 }
0x2aeb   :  { %v5819_v0 = vadd.f32 %v5817_v59, %v5809_v15 }
0x2aed   :  { %12104 = vtanh.f32 %v5819_v0 }
0x2af7   :  { %v12105_v47 = vpop.eup %12104 }
0x2af8   :  { %5822 = vrot.lane.b32.xlu0 %v12105_v47, %s12529_s21 }
0x2b6a   :  { %v5823_v50 = vpop.permute.xlu0 %5822 }
0x2b6b   :  { %v5825_v24 = vmul.f32 %v12103_v10, %v5823_v50 }
0x2b6d   :  { %v5831_v2 = vrot.slane %v5825_v24, 4 }
0x2b6f   :  { %5832 = vrot.lane.b32.xlu1 %v5831_v2, %s12544_s18 }
0x2be1   :  { %v5833_v42 = vpop.permute.xlu1 %5832 }
0x2be2   :  { %9933 = vmatmul.mubr.msk.f32.vlgmr.msra.gmra.mrb[58].mxu0 %vm503_vm12, %v5833_v42 }
0x2be3   :  { %9960 = vmatprep.mubr.msk.f32.mxu0 %vm12547_vm6, %v15094_v4 }
0x2cb5   :  { %v5902_v22 = vpop.f32.mrb[58].mxu0 }
0x2cb6   :  { %v5907_v18 = vrot.slane %v5902_v22, 2  ;;  %v9934_v9 = vpop.f32.mrb[59].mxu0 }
0x2cb8   :  { %v5909_v56 = vadd.f32 %v5907_v18, %v14322_v58  ;;  %v5918_v58 = vrot.slane %v5819_v0, 6 }
0x2cba   :  { %12106 = vtanh.f32 %v5909_v56  ;;  %v8962_v41 = vmul.f32 -1.442695, %v5909_v56  ;;  %v8970_v56 = vld [vmem:[#allocation16 + $0x2] ss:$0 sm:$0xff] }
0x2cbc   :  { %12108 = vpow2.f32 %v8962_v41 }
0x2cc4   :  { %v12107_v13 = vpop.eup %12106 }
0x2cc5   :  { %5922 = vrot.lane.b32.xlu0 %v12107_v13, %s12529_s21 }
0x2cc6   :  { %v12109_v52 = vpop.eup %12108 }
0x2cc7   :  { %v5913_v31 = vadd.f32 1.0, %v12109_v52 }
0x2cc9   :  { %12110 = vrcp.f32 %v5913_v31 }
0x2cd3   :  { %v12111_v1 = vpop.eup %12110 }
0x2cd4   :  { %v5920_v53 = vmul.f32 %v12111_v1, %v5918_v58 }
0x2d37   :  { %v5923_v46 = vpop.permute.xlu0 %5922 }
0x2d38   :  { %v5925_v30 = vmul.f32 %v12111_v1, %v5923_v46 }
0x2d3a   :  { %5927 = vrot.lane.b32.xlu1 %v5925_v30, %s12529_s21 }
0x2d3e   :  { %4837 = vrot.lane.b32.xlu1 %v14217_v39, %s12544_s18  ;;  %v5946_v39 = vld [vmem:[%s15066_s13 + $0x48] sm:$0xff] }
0x2d3f   :  { %v10965_v28 = vpack.c.bf16 %v5946_v39, %v5945_v51  ;;  %v14389_v44 = vpack.i.bf16 %v5946_v39, %v5945_v51 }
0x2d41   :  { %10966 = vmatpush3.bf16.msra.mxu1 %v10965_v28 }
0x2d42   :  { %5061 = vrot.lane.b32.xlu1 %v14247_v36, %s12544_s18  ;;  %10967 = vmatprep.subr.bf16.mxu1 %v15090_v35 }
0x2d46   :  { %5389 = vrot.lane.b32.xlu1 %v14294_v57, %s12544_s18  ;;  %v5947_v57 = vld [vmem:[%s15066_s13 + $0x80] sm:$0xff] }
0x2d47   :  { %v10968_v20 = vpack.c.bf16 %v5948_v40, %v5947_v57  ;;  %v14394_v14 = vpack.i.bf16 %v5948_v40, %v5947_v57 }
0x2d49   :  { %10969 = vmatpush3.bf16.msra.mxu1 %v10968_v20 }
0x2d4a   :  { %5716 = vrot.lane.b32.xlu1 %v5714_v62, %s12544_s18  ;;  %10976 = vmatprep.subr.bf16.mxu1 %v15090_v35 }
0x2dac   :  { %v5928_v23 = vpop.permute.xlu1 %5927 }
0x2dad   :  { %v5930_v38 = vadd.f32 %v5928_v23, %v5920_v53 }
0x2daf   :  { %12112 = vtanh.f32 %v5930_v38 }
0x2db0   :  { %v4838_v36 = vpop.permute.xlu1 %4837 }
0x2db1   :  { %4841 = vst.msk [vmem:[#allocation2] sm:$0xc] %vm4840_vm2, %v4838_v36 }
0x2db4   :  { %v5062_v55 = vpop.permute.xlu1 %5061 }
0x2db5   :  { %5065 = vst.msk [vmem:[#allocation2] sm:$0xc0] %vm5064_vm3, %v5062_v55 }
0x2db8   :  { %v5390_v25 = vpop.permute.xlu1 %5389 }
0x2db9   :  { %v12113_v34 = vpop.eup %12112  ;;  %5392 = vst.msk [vmem:[#allocation2 + $0x8] sm:$0x30] %vm4952_vm4, %v5390_v25 }
0x2dba   :  { %5933 = vrot.lane.b32.xlu0 %v12113_v34, %s12529_s21 }
0x2dbc   :  { %v5717_v7 = vpop.permute.xlu1 %5716 }
0x2dbd   :  { %5719 = vst.msk [vmem:[#allocation2 + $0x10] sm:$0xc] %vm4840_vm2, %v5717_v7 }
0x2dbe   :  { %4949 = vrot.lane.b32.xlu0 %v14232_v8, %s12544_s18 }
0x2dc2   :  { %5278 = vrot.lane.b32.xlu0 %v14279_v19, %s12544_s18 }
0x2dc6   :  { %5500 = vrot.lane.b32.xlu0 %v14309_v33, %s12544_s18 }
0x2dca   :  { %5827 = vrot.lane.b32.xlu0 %v5825_v24, %s12544_s18 }
0x2dce   :  { %11797 = vrot.lane.b32.xlu0 %v14389_v44, %s12548_s2 }
0x2e2c   :  { %v5934_v60 = vpop.permute.xlu0 %5933 }
0x2e2d   :  { %v5936_v63 = vmul.f32 %v12111_v1, %v5934_v60 }
0x2e2f   :  { %5938 = vrot.lane.b32.xlu1 %v5936_v63, %s12544_s18 }
0x2e30   :  { %v4950_v8 = vpop.permute.xlu0 %4949 }
0x2e31   :  { %4953 = vst.msk [vmem:[#allocation2] sm:$0x30] %vm4952_vm4, %v4950_v8 }
0x2e33   :  { %11802 = vrot.lane.b32.xlu1 %v14394_v14, %s12548_s2 }
0x2e34   :  { %v5279_v19 = vpop.permute.xlu0 %5278 }
0x2e35   :  { %5281 = vst.msk [vmem:[#allocation2 + $0x8] sm:$0xc] %vm4840_vm2, %v5279_v19  ;;  %vm8822_vm2 = vcmask 47110  }
0x2e38   :  { %v5501_v33 = vpop.permute.xlu0 %5500  ;;  %v5942_v11 = vld [vmem:[#allocation2] sm:$0xff] }
0x2e39   :  { %5503 = vst.msk [vmem:[#allocation2 + $0x8] sm:$0xc0] %vm5064_vm3, %v5501_v33  ;;  %9944 = vmatmul.mubr.msk.f32.vlgmr.msra.gmra.mrb[60].mxu1 %vm503_vm12, %v5942_v11 }
0x2e3a   :  { %9946 = vmatprep.mubr.msk.f32.mxu1 %vm12547_vm6, %v15094_v4 }
0x2e3c   :  { %v5828_v27 = vpop.permute.xlu0 %5827 }
0x2e3d   :  { %5830 = vst.msk [vmem:[#allocation2 + $0x10] sm:$0x30] %vm4952_vm4, %v5828_v27  ;;  %vm8827_vm4 = vcmask 44035  }
0x2e40   :  { %v5943_v32 = vld [vmem:[#allocation2 + $0x8] sm:$0xff]  ;;  %v11798_v62 = vpop.permute.xlu0 %11797 }
0x2e41   :  { %9947 = vmatmul.mubr.msk.f32.gmra.mrb[62].mxu1 %vm503_vm12, %v5943_v32  ;;  %v11800_v5 = vunpack.i.h.bf16 %v11798_v62  ;;  %v11799_v54 = vunpack.i.l.bf16 %v11798_v62 }
0x2e42   :  { %9949 = vmatprep.mubr.msk.f32.mxu1 %vm12547_vm6, %v15094_v4 }
0x2e43   :  { %v10971_v43 = vpack.c.bf16 %v11800_v5, %v11799_v54 }
0x2e45   :  { %10972 = vmatpush3.bf16.msra.mxu0 %v10971_v43 }
0x2e46   :  { %10973 = vmatprep.subr.bf16.mxu0 %v15090_v35 }
0x2ea1   :  { %v5939_v12 = vpop.permute.xlu1 %5938 }
0x2ea2   :  { %5941 = vst.msk [vmem:[#allocation2 + $0x10] sm:$0xc0] %vm5064_vm3, %v5939_v12  ;;  %vm8825_vm3 = vcmask 41985  }
0x2ea5   :  { %v11803_v16 = vpop.permute.xlu1 %11802 }
0x2ea6   :  { %v11805_v61 = vunpack.i.h.bf16 %v11803_v16  ;;  %v11804_v6 = vunpack.i.l.bf16 %v11803_v16 }
0x2ea8   :  { %v10974_v17 = vpack.c.bf16 %v11805_v61, %v11804_v6 }
0x2ea9   :  { %v5944_v3 = vld [vmem:[#allocation2 + $0x10] sm:$0xff] }
0x2eaa   :  { %9950 = vmatmul.mubr.msk.f32.gmra.mrb[64].mxu1 %vm503_vm12, %v5944_v3  ;;  %10975 = vmatpush3.bf16.msra.mxu0 %v10974_v17 }
0x2eab   :  { %9977 = vmatprep.mubr.msk.f32.mxu1 %vm12547_vm6, %v15094_v4  ;;  %10982 = vmatprep.subr.bf16.mxu0 %v15090_v35 }
0x2ead   :  { %9961 = vmatmul.mubr.msk.f32.vlgmr.msra.gmra.mrb[60].mxu0 %vm503_vm12, %v5942_v11 }
0x2eae   :  { %9963 = vmatprep.mubr.msk.f32.mxu0 %vm12547_vm6, %v15094_v4 }
0x2eb1   :  { %9964 = vmatmul.mubr.msk.f32.gmra.mrb[62].mxu0 %vm503_vm12, %v5943_v32 }
0x2eb2   :  { %9966 = vmatprep.mubr.msk.f32.mxu0 %vm12547_vm6, %v15094_v4 }
0x2eb5   :  { %9967 = vmatmul.mubr.msk.f32.gmra.mrb[64].mxu0 %vm503_vm12, %v5944_v3 }
0x2eb6   :  { %9994 = vmatprep.mubr.msk.f32.mxu0 %vm12547_vm6, %v15094_v4 }
0x2f0c   :  { %v6029_v45 = vpop.f32.mrb[60].mxu1 }
0x2f0d   :  { %v9945_v10 = vpop.f32.mrb[61].mxu1  ;;  %v6030_v15 = vadd.f32 %v8963_v49, %v6029_v45 }
0x2f0f   :  { %v8967_v59 = vmul.f32 -1.442695, %v6030_v15 }
0x2f11   :  { %12114 = vpow2.f32 %v8967_v59 }
0x2f14   :  { %v6034_v37 = vpop.f32.mrb[62].mxu1 }
0x2f15   :  { %v9948_v21 = vpop.f32.mrb[63].mxu1  ;;  %v6035_v0 = vadd.f32 %v8963_v49, %v6034_v37 }
0x2f17   :  { %v8968_v47 = vmul.f32 -1.442695, %v6035_v0 }
0x2f19   :  { %12116 = vpow2.f32 %v8968_v47 }
0x2f1b   :  { %v12115_v50 = vpop.eup %12114 }
0x2f1c   :  { %v6052_v24 = vadd.f32 1.0, %v12115_v50 }
0x2f1e   :  { %12118 = vrcp.f32 %v6052_v24 }
0x2f23   :  { %v12117_v2 = vpop.eup %12116 }
0x2f24   :  { %v6053_v42 = vadd.f32 1.0, %v12117_v2 }
0x2f26   :  { %12120 = vrcp.f32 %v6053_v42 }
0x2f28   :  { %v12119_v1 = vpop.eup %12118 }
0x2f30   :  { %v12121_v38 = vpop.eup %12120 }
0x2f7d   :  { %v6039_v22 = vpop.f32.mrb[64].mxu1 }
0x2f7e   :  { %v6040_v18 = vadd.f32 %v8963_v49, %v6039_v22  ;;  %v9951_v9 = vpop.f32.mrb[65].mxu1  ;;  %v8974_v22 = vld [vmem:[#allocation16 + $0x3] ss:$0 sm:$0xff] }
0x2f80   :  { %v8969_v13 = vmul.f32 -1.442695, %v6040_v18  ;;  %v6148_v41 = vpop.f32.mrb[60].mxu0 }
0x2f81   :  { %v6149_v52 = vadd.f32 %v8970_v56, %v6148_v41  ;;  %v9962_v31 = vpop.f32.mrb[61].mxu0 }
0x2f82   :  { %12122 = vpow2.f32 %v8969_v13 }
0x2f83   :  { %v6162_v46 = vmul.f32 %v12119_v1, %v6149_v52 }
0x2f84   :  { %v6153_v30 = vpop.f32.mrb[62].mxu0 }
0x2f85   :  { %v6165_v58 = vadd.f32 %v6162_v46, %v13967_v26  ;;  %v6154_v53 = vadd.f32 %v8970_v56, %v6153_v30  ;;  %v9965_v23 = vpop.f32.mrb[63].mxu0  ;;  %v8975_v46 = vld [vmem:[#allocation16 + $0x4] ss:$0 sm:$0xff] }
0x2f87   :  { %v6163_v51 = vmul.f32 %v12121_v38, %v6154_v53  ;;  %v6170_v39 = vsel %vm503_vm12, %v6165_v58, 0.0  ;;  %v6183_v36 = vmul.f32 %v6165_v58, %v6165_v58 }
0x2f88   :  { %v6158_v28 = vpop.f32.mrb[64].mxu0  ;;  %6171 = vadd.xlane.f32.xlu0 %v6170_v39 }
0x2f89   :  { %v14426_v57 = vadd.f32 %v6163_v51, %v13969_v29  ;;  %v9968_v40 = vpop.f32.mrb[65].mxu0  ;;  %v6186_v55 = vsel %vm503_vm12, %v6183_v36, 0.0  ;;  %v6159_v60 = vadd.f32 %v8970_v56, %v6158_v28 }
0x2f8a   :  { %6187 = vadd.xlane.f32.xlu1 %v6186_v55 }
0x2f8b   :  { %v6173_v20 = vsel %vm503_vm12, %v14426_v57, 0.0  ;;  %v6184_v26 = vmul.f32 %v14426_v57, %v14426_v57 }
0x2f8c   :  { %v12123_v25 = vpop.eup %12122  ;;  %6174 = vadd.xlane.f32.xlu0 %v6173_v20 }
0x2f8d   :  { %v6054_v34 = vadd.f32 1.0, %v12123_v25  ;;  %v6189_v7 = vsel %vm503_vm12, %v6184_v26, 0.0 }
0x2f8f   :  { %12124 = vrcp.f32 %v6054_v34 }
0x2f90   :  { %6190 = vadd.xlane.f32.xlu0 %v6189_v7  ;;  %v6457_v7 = vld [vmem:[%s15066_s13 + $0x18] sm:$0xff] }
0x2f99   :  { %v12125_v29 = vpop.eup %12124 }
0x2f9a   :  { %v6164_v63 = vmul.f32 %v12125_v29, %v6159_v60  ;;  %v6458_v60 = vld [vmem:[%s15066_s13 + $0x50] sm:$0xff]  ;;  %v6459_v29 = vld [vmem:[%s15066_s13 + $0x88] sm:$0xff] }
0x2f9c   :  { %v14435_v8 = vadd.f32 %v6164_v63, %v14186_v48  ;;  %v14483_v63 = vpack.i.bf16 %v6458_v60, %v6457_v7 }
0x2f9e   :  { %v6176_v19 = vsel %vm503_vm12, %v14435_v8, 0.0  ;;  %v6185_v33 = vmul.f32 %v14435_v8, %v14435_v8 }
0x2f9f   :  { %6177 = vadd.xlane.f32.xlu1 %v6176_v19  ;;  %v10989_v19 = vpack.c.bf16 %v6458_v60, %v6457_v7 }
0x2fa0   :  { %v6192_v11 = vsel %vm503_vm12, %v6185_v33, 0.0 }
0x2fa1   :  { %6193 = vadd.xlane.f32.xlu0 %v6192_v11  ;;  %v8976_v11 = vld [vmem:[#allocation16 + $0x5] ss:$0 sm:$0xff] }
0x2fb0   :  { %11807 = vrot.lane.b32.xlu1 %v14389_v44, %s12544_s18 }
0x2fb4   :  { %11817 = vrot.lane.b32.xlu1 %v14389_v44, %s12529_s21 }
0x2fb7   :  { %11812 = vrot.lane.b32.xlu0 %v14394_v14, %s12544_s18 }
0x2fb8   :  { %11822 = vrot.lane.b32.xlu1 %v14394_v14, %s12529_s21 }
0x2fbb   :  { %11827 = vrot.lane.b32.xlu0 %v14483_v63, %s12548_s2 }
0x3015   :  { %v6172_v48 = vpop.xlane.xlu0 %6171 }
0x3016   :  { %v6180_v27 = vmul.f32 0.03125, %v6172_v48 }
0x3017   :  { %v6188_v32 = vpop.xlane.xlu1 %6187 }
0x3018   :  { %v6201_v62 = vmul.f32 %v6180_v27, %v6180_v27  ;;  %v6195_v5 = vmul.f32 0.03125, %v6188_v32  ;;  %v6198_v15 = vsub.f32 %v6165_v58, %v6180_v27 }
0x3019   :  { %v6175_v54 = vpop.xlane.xlu0 %6174 }
0x301a   :  { %v6181_v43 = vmul.f32 0.03125, %v6175_v54  ;;  %v6204_v12 = vsub.f32 %v6195_v5, %v6201_v62 }
0x301c   :  { %v6202_v6 = vmul.f32 %v6181_v43, %v6181_v43  ;;  %v6207_v17 = vadd.f32 1e-05, %v6204_v12  ;;  %v6199_v41 = vsub.f32 %v14426_v57, %v6181_v43 }
0x301d   :  { %v6191_v16 = vpop.xlane.xlu0 %6190 }
0x301e   :  { %v6196_v61 = vmul.f32 0.03125, %v6191_v16  ;;  %12126 = vrsqrt.f32 %v6207_v17 }
0x3020   :  { %v6205_v3 = vsub.f32 %v6196_v61, %v6202_v6 }
0x3022   :  { %v6208_v45 = vadd.f32 1e-05, %v6205_v3 }
0x3024   :  { %12128 = vrsqrt.f32 %v6208_v45 }
0x3028   :  { %v12127_v14 = vpop.eup %12126 }
0x3029   :  { %v6213_v24 = vmul.f32 %v12127_v14, %v6198_v15 }
0x302b   :  { %v6220_v31 = vmul.f32 %v8974_v22, %v6213_v24 }
0x302c   :  { %v6178_v44 = vpop.xlane.xlu1 %6177 }
0x302d   :  { %v6182_v10 = vmul.f32 0.03125, %v6178_v44  ;;  %v14452_v30 = vadd.f32 %v8975_v46, %v6220_v31 }
0x302e   :  { %v6194_v37 = vpop.xlane.xlu0 %6193  ;;  %v12129_v42 = vpop.eup %12128 }
0x302f   :  { %v6203_v21 = vmul.f32 %v6182_v10, %v6182_v10  ;;  %v6197_v49 = vmul.f32 0.03125, %v6194_v37  ;;  %v6214_v1 = vmul.f32 %v12129_v42, %v6199_v41  ;;  %v6200_v53 = vsub.f32 %v14435_v8, %v6182_v10  ;;  %v6460_v8 = vld [vmem:[%s15066_s13 + $0xc0] sm:$0xff] }
0x3030   :  { %v11808_v59 = vpop.permute.xlu1 %11807  ;;  %v14488_v33 = vpack.i.bf16 %v6460_v8, %v6459_v29 }
0x3031   :  { %v6206_v0 = vsub.f32 %v6197_v49, %v6203_v21  ;;  %v11810_v47 = vunpack.i.h.bf16 %v11808_v59  ;;  %v11809_v50 = vunpack.i.l.bf16 %v11808_v59  ;;  %v6221_v58 = vmul.f32 %v8974_v22, %v6214_v1 }
0x3032   :  { %v11813_v2 = vpop.permute.xlu0 %11812  ;;  %11832 = vrot.lane.b32.xlu1 %v14488_v33, %s12548_s2 }
0x3033   :  { %v6209_v18 = vadd.f32 1e-05, %v6206_v0  ;;  %v10977_v9 = vpack.c.bf16 %v11810_v47, %v11809_v50  ;;  %v11815_v56 = vunpack.i.h.bf16 %v11813_v2  ;;  %v11814_v13 = vunpack.i.l.bf16 %v11813_v2 }
0x3034   :  { %v14460_v23 = vadd.f32 %v8975_v46, %v6221_v58  ;;  %v11818_v28 = vpop.permute.xlu1 %11817 }
0x3035   :  { %12130 = vrsqrt.f32 %v6209_v18  ;;  %v10980_v52 = vpack.c.bf16 %v11815_v56, %v11814_v13  ;;  %10978 = vmatpush3.bf16.msra.mxu1 %v10977_v9  ;;  %v11820_v57 = vunpack.i.h.bf16 %v11818_v28  ;;  %v11819_v40 = vunpack.i.l.bf16 %v11818_v28  ;;  %v8983_v9 = vld [vmem:[#allocation16 + $0x6] ss:$0 sm:$0xff] }
0x3036   :  { %10979 = vmatprep.subr.bf16.mxu1 %v15090_v35  ;;  %v11828_v10 = vpop.permute.xlu0 %11827  ;;  %v10992_v18 = vpack.c.bf16 %v6460_v8, %v6459_v29 }
0x3037   :  { %v10983_v55 = vpack.c.bf16 %v11820_v57, %v11819_v40  ;;  %v11830_v14 = vunpack.i.h.bf16 %v11828_v10  ;;  %v11829_v21 = vunpack.i.l.bf16 %v11828_v10 }
0x3038   :  { %v11823_v20 = vpop.permute.xlu1 %11822 }
0x3039   :  { %10981 = vmatpush3.bf16.msra.mxu1 %v10980_v52  ;;  %v11825_v26 = vunpack.i.h.bf16 %v11823_v20  ;;  %v11824_v25 = vunpack.i.l.bf16 %v11823_v20  ;;  %10984 = vmatpush3.bf16.msra.mxu0 %v10983_v55  ;;  %v10995_v47 = vpack.c.bf16 %v11830_v14, %v11829_v21 }
0x303a   :  { %10988 = vmatprep.subr.bf16.mxu1 %v15090_v35  ;;  %10985 = vmatprep.subr.bf16.mxu0 %v15090_v35 }
0x303b   :  { %v10986_v34 = vpack.c.bf16 %v11825_v26, %v11824_v25 }
0x303c   :  { %9978 = vmatmul.mubr.msk.f32.vlgmr.msra.gmra.mrb[66].mxu1 %vm503_vm12, %v14452_v30 }
0x303d   :  { %9980 = vmatprep.mubr.msk.f32.mxu1 %vm12547_vm6, %v15094_v4  ;;  %10987 = vmatpush3.bf16.msra.mxu0 %v10986_v34 }
0x303e   :  { %10994 = vmatprep.subr.bf16.mxu0 %v15090_v35  ;;  %10990 = vmatpush3.bf16.msra.mxu1 %v10989_v19 }
0x303f   :  { %v12131_v38 = vpop.eup %12130  ;;  %10991 = vmatprep.subr.bf16.mxu1 %v15090_v35 }
0x3040   :  { %9981 = vmatmul.mubr.msk.f32.gmra.mrb[68].mxu1 %vm503_vm12, %v14460_v23  ;;  %v6215_v51 = vmul.f32 %v12131_v38, %v6200_v53  ;;  %v8987_v38 = vld [vmem:[#allocation16 + $0x7] ss:$0 sm:$0xff] }
0x3041   :  { %9983 = vmatprep.mubr.msk.f32.mxu1 %vm12547_vm6, %v15094_v4 }
0x3042   :  { %v6222_v39 = vmul.f32 %v8974_v22, %v6215_v51  ;;  %10993 = vmatpush3.bf16.msra.mxu1 %v10992_v18 }
0x3043   :  { %11000 = vmatprep.subr.bf16.mxu1 %v15090_v35 }
0x3044   :  { %v14466_v36 = vadd.f32 %v8975_v46, %v6222_v39 }
0x3046   :  { %9984 = vmatmul.mubr.msk.f32.gmra.mrb[70].mxu1 %vm503_vm12, %v14466_v36 }
0x3047   :  { %10011 = vmatprep.mubr.msk.f32.mxu1 %vm12547_vm6, %v15094_v4 }
0x30a4   :  { %v11833_v49 = vpop.permute.xlu1 %11832 }
0x30a5   :  { %v11835_v59 = vunpack.i.h.bf16 %v11833_v49  ;;  %v11834_v0 = vunpack.i.l.bf16 %v11833_v49 }
0x30a7   :  { %v10998_v24 = vpack.c.bf16 %v11835_v59, %v11834_v0 }
0x310f   :  { %v6322_v48 = vpop.f32.mrb[66].mxu1 }
0x3110   :  { %v6323_v27 = vadd.f32 %v8976_v11, %v6322_v48  ;;  %v9979_v32 = vpop.f32.mrb[67].mxu1 }
0x3112   :  { %v6339_v62 = vmul.f32 1.442695, %v6323_v27  ;;  %vm6336_vm5 = vcmp.gt.f32.partialorder %v6323_v27, 0.0 }
0x3113   :  { %v6327_v5 = vpop.f32.mrb[68].mxu1 }
0x3114   :  { %12132 = vpow2.f32 %v6339_v62  ;;  %v6328_v54 = vadd.f32 %v8976_v11, %v6327_v5  ;;  %v9982_v43 = vpop.f32.mrb[69].mxu1 }
0x3115   :  { %v8994_v43 = vld [vmem:[#allocation16 + $0x8] ss:$0 sm:$0xff] }
0x3116   :  { %v6341_v12 = vmul.f32 1.442695, %v6328_v54  ;;  %vm6337_vm7 = vcmp.gt.f32.partialorder %v6328_v54, 0.0 }
0x3118   :  { %12134 = vpow2.f32 %v6341_v12 }
0x3119   :  { %v6332_v16 = vpop.f32.mrb[70].mxu1 }
0x311a   :  { %v6333_v61 = vadd.f32 %v8976_v11, %v6332_v16  ;;  %v9985_v6 = vpop.f32.mrb[71].mxu1 }
0x311c   :  { %v6343_v17 = vmul.f32 1.442695, %v6333_v61  ;;  %vm6338_vm8 = vcmp.gt.f32.partialorder %v6333_v61, 0.0 }
0x311e   :  { %v12133_v3 = vpop.eup %12132  ;;  %12136 = vpow2.f32 %v6343_v17 }
0x311f   :  { %v8980_v45 = vadd.f32 -1.0, %v12133_v3 }
0x3121   :  { %v6348_v44 = vsel %vm6336_vm5, %v6323_v27, %v8980_v45  ;;  %vm8829_vm5 = vcmask 46085  }
0x3122   :  { %v12135_v37 = vpop.eup %12134  ;;  %9995 = vmatmul.mubr.msk.f32.vlgmr.msra.gmra.mrb[66].mxu0 %vm503_vm12, %v6348_v44 }
0x3123   :  { %9997 = vmatprep.mubr.msk.f32.mxu0 %vm12547_vm6, %v15094_v4  ;;  %v8981_v15 = vadd.f32 -1.0, %v12135_v37  ;;  %10996 = vmatpush3.bf16.msra.mxu0 %v10995_v47 }
0x3124   :  { %10997 = vmatprep.subr.bf16.mxu0 %v15090_v35 }
0x3125   :  { %v6349_v50 = vsel %vm6337_vm7, %v6328_v54, %v8981_v15  ;;  %vm8831_vm7 = vcmask 48135  }
0x3126   :  { %9998 = vmatmul.mubr.msk.f32.gmra.mrb[68].mxu0 %vm503_vm12, %v6349_v50 }
0x3127   :  { %10000 = vmatprep.mubr.msk.f32.mxu0 %vm12547_vm6, %v15094_v4  ;;  %10999 = vmatpush3.bf16.msra.mxu0 %v10998_v24 }
0x3128   :  { %v12137_v2 = vpop.eup %12136  ;;  %11006 = vmatprep.subr.bf16.mxu0 %v15090_v35 }
0x3129   :  { %v8982_v42 = vadd.f32 -1.0, %v12137_v2 }
0x312b   :  { %v6350_v22 = vsel %vm6338_vm8, %v6333_v61, %v8982_v42 }
0x312c   :  { %10001 = vmatmul.mubr.msk.f32.gmra.mrb[70].mxu0 %vm503_vm12, %v6350_v22 }
0x312d   :  { %10028 = vmatprep.mubr.msk.f32.mxu0 %vm12547_vm6, %v15094_v4 }
0x31f5   :  { %v6443_v56 = vpop.f32.mrb[66].mxu0 }
0x31f6   :  { %v6444_v13 = vadd.f32 %v8983_v9, %v6443_v56  ;;  %v9996_v41 = vpop.f32.mrb[67].mxu0 }
0x31f8   :  { %10012 = vmatmul.mubr.msk.f32.vlgmr.msra.gmra.mrb[72].mxu1 %vm503_vm12, %v6444_v13  ;;  %10029 = vmatmul.mubr.msk.f32.vlgmr.msra.gmra.mrb[72].mxu0 %vm503_vm12, %v6444_v13 }
0x31f9   :  { %v6448_v52 = vpop.f32.mrb[68].mxu0  ;;  %10014 = vmatprep.mubr.msk.f32.mxu1 %vm12547_vm6, %v15094_v4  ;;  %10031 = vmatprep.mubr.msk.f32.mxu0 %vm12547_vm6, %v15094_v4 }
0x31fa   :  { %v6449_v31 = vadd.f32 %v8983_v9, %v6448_v52  ;;  %v9999_v1 = vpop.f32.mrb[69].mxu0 }
0x31fc   :  { %10015 = vmatmul.mubr.msk.f32.gmra.mrb[74].mxu1 %vm503_vm12, %v6449_v31  ;;  %10032 = vmatmul.mubr.msk.f32.gmra.mrb[74].mxu0 %vm503_vm12, %v6449_v31 }
0x31fd   :  { %10017 = vmatprep.mubr.msk.f32.mxu1 %vm12547_vm6, %v15094_v4  ;;  %10034 = vmatprep.mubr.msk.f32.mxu0 %vm12547_vm6, %v15094_v4 }
0x31ff   :  { %v6453_v46 = vpop.f32.mrb[70].mxu0 }
0x3200   :  { %v6454_v58 = vadd.f32 %v8983_v9, %v6453_v46  ;;  %v10002_v53 = vpop.f32.mrb[71].mxu0 }
0x3202   :  { %10018 = vmatmul.mubr.msk.f32.gmra.mrb[76].mxu1 %vm503_vm12, %v6454_v58  ;;  %10035 = vmatmul.mubr.msk.f32.gmra.mrb[76].mxu0 %vm503_vm12, %v6454_v58 }
0x3203   :  { %10062 = vmatprep.mubr.msk.f32.mxu0 %vm12547_vm6, %v15094_v4  ;;  %10045 = vmatprep.mubr.msk.f32.mxu1 %vm12547_vm6, %v15094_v4 }
0x32cb   :  { %v6541_v51 = vpop.f32.mrb[72].mxu1  ;;  %v6660_v39 = vpop.f32.mrb[72].mxu0 }
0x32cc   :  { %v6542_v28 = vadd.f32 %v8987_v38, %v6541_v51  ;;  %v10013_v57 = vpop.f32.mrb[73].mxu1  ;;  %v10030_v40 = vpop.f32.mrb[73].mxu0  ;;  %v6661_v61 = vadd.f32 %v8994_v43, %v6660_v39 }
0x32ce   :  { %v8991_v55 = vmul.f32 -1.442695, %v6542_v28 }
0x32cf   :  { %v6546_v20 = vpop.f32.mrb[74].mxu1  ;;  %v6665_v26 = vpop.f32.mrb[74].mxu0 }
0x32d0   :  { %12138 = vpow2.f32 %v8991_v55  ;;  %v6547_v25 = vadd.f32 %v8987_v38, %v6546_v20  ;;  %v10016_v34 = vpop.f32.mrb[75].mxu1  ;;  %v10033_v7 = vpop.f32.mrb[75].mxu0  ;;  %v6666_v45 = vadd.f32 %v8994_v43, %v6665_v26 }
0x32d1   :  { %v8998_v34 = vld [vmem:[#allocation16 + $0x9] ss:$0 sm:$0xff] }
0x32d2   :  { %v8992_v60 = vmul.f32 -1.442695, %v6547_v25 }
0x32d4   :  { %12140 = vpow2.f32 %v8992_v60 }
0x32d5   :  { %v6551_v29 = vpop.f32.mrb[76].mxu1  ;;  %v6670_v8 = vpop.f32.mrb[76].mxu0 }
0x32d6   :  { %v6552_v19 = vadd.f32 %v8987_v38, %v6551_v29  ;;  %v10019_v11 = vpop.f32.mrb[77].mxu1  ;;  %v10036_v48 = vpop.f32.mrb[77].mxu0  ;;  %v6671_v15 = vadd.f32 %v8994_v43, %v6670_v8  ;;  %v8999_v29 = vld [vmem:[#allocation16 + $0xa] ss:$0 sm:$0xff] }
0x32d8   :  { %v8993_v27 = vmul.f32 -1.442695, %v6552_v19 }
0x32da   :  { %v12139_v32 = vpop.eup %12138  ;;  %12142 = vpow2.f32 %v8993_v27 }
0x32db   :  { %v6564_v62 = vadd.f32 1.0, %v12139_v32 }
0x32dd   :  { %12144 = vrcp.f32 %v6564_v62 }
0x32de   :  { %v12141_v5 = vpop.eup %12140 }
0x32df   :  { %v6565_v54 = vadd.f32 1.0, %v12141_v5 }
0x32e1   :  { %12146 = vrcp.f32 %v6565_v54 }
0x32e4   :  { %v12143_v12 = vpop.eup %12142 }
0x32e5   :  { %v6566_v16 = vadd.f32 1.0, %v12143_v12 }
0x32e7   :  { %v12145_v6 = vpop.eup %12144  ;;  %12148 = vrcp.f32 %v6566_v16 }
0x32e8   :  { %v6674_v17 = vmul.f32 %v12145_v6, %v6661_v61 }
0x32ea   :  { %v6677_v3 = vadd.f32 %v6674_v17, %v14452_v30 }
0x32eb   :  { %v12147_v44 = vpop.eup %12146 }
0x32ec   :  { %v6675_v10 = vmul.f32 %v12147_v44, %v6666_v45  ;;  %v6682_v37 = vsel %vm503_vm12, %v6677_v3, 0.0  ;;  %v6694_v14 = vmul.f32 %v6677_v3, %v6677_v3 }
0x32ed   :  { %6683 = vadd.xlane.f32.xlu0 %v6682_v37 }
0x32ee   :  { %v6678_v21 = vadd.f32 %v6675_v10, %v14460_v23  ;;  %v6697_v49 = vsel %vm503_vm12, %v6694_v14, 0.0  ;;  %v14565_v14 = vld [vmem:[%s15066_s13 + $0x20] sm:$0xff] }
0x32ef   :  { %6698 = vadd.xlane.f32.xlu1 %v6697_v49 }
0x32f0   :  { %v6685_v59 = vsel %vm503_vm12, %v6678_v21, 0.0  ;;  %v6695_v0 = vmul.f32 %v6678_v21, %v6678_v21 }
0x32f1   :  { %v12149_v47 = vpop.eup %12148  ;;  %6686 = vadd.xlane.f32.xlu0 %v6685_v59  ;;  %v14578_v59 = vld [vmem:[%s15066_s13 + $0x90] sm:$0xff] }
0x32f2   :  { %v6676_v50 = vmul.f32 %v12149_v47, %v6671_v15  ;;  %v6700_v24 = vsel %vm503_vm12, %v6695_v0, 0.0  ;;  %v14583_v0 = vld [vmem:[%s15066_s13 + $0xc8] sm:$0xff] }
0x32f3   :  { %v11016_v47 = vpack.c.bf16 %v14583_v0, %v14578_v59 }
0x32f4   :  { %v14531_v30 = vadd.f32 %v6676_v50, %v14466_v36 }
0x32f5   :  { %6701 = vadd.xlane.f32.xlu0 %v6700_v24 }
0x32f6   :  { %v6696_v2 = vmul.f32 %v14531_v30, %v14531_v30  ;;  %v6688_v42 = vsel %vm503_vm12, %v14531_v30, 0.0 }
0x32f8   :  { %v6703_v23 = vsel %vm503_vm12, %v6696_v2, 0.0 }
0x32f9   :  { %6704 = vadd.xlane.f32.xlu0 %v6703_v23 }
0x3300   :  { %11837 = vrot.lane.b32.xlu1 %v14483_v63, %s12529_s21 }
0x330f   :  { %11842 = vrot.lane.b32.xlu0 %v14488_v33, %s12529_s21 }
0x3324   :  { %6689 = vadd.xlane.f32.xlu1 %v6688_v42 }
0x3335   :  { %11847 = vrot.lane.b32.xlu1 %v14483_v63, %s12544_s18 }
0x3339   :  { %11852 = vrot.lane.b32.xlu1 %v14488_v33, %s12544_s18 }
0x337a   :  { %v6684_v22 = vpop.xlane.xlu0 %6683 }
0x337b   :  { %v6691_v18 = vmul.f32 0.03125, %v6684_v22 }
0x337c   :  { %v6699_v9 = vpop.xlane.xlu1 %6698 }
0x337d   :  { %v6712_v56 = vmul.f32 %v6691_v18, %v6691_v18  ;;  %v6706_v13 = vmul.f32 0.03125, %v6699_v9  ;;  %v6709_v26 = vsub.f32 %v6677_v3, %v6691_v18  ;;  %v7020_v9 = vld [vmem:[%s15068_s15 + $0x10] sm:$0xff] }
0x337e   :  { %v6687_v41 = vpop.xlane.xlu0 %6686 }
0x337f   :  { %v6715_v52 = vsub.f32 %v6706_v13, %v6712_v56  ;;  %v6692_v31 = vmul.f32 0.03125, %v6687_v41 }
0x3380   :  { %v11838_v1 = vpop.permute.xlu1 %11837 }
0x3381   :  { %v6718_v46 = vadd.f32 1e-05, %v6715_v52  ;;  %v11840_v58 = vunpack.i.h.bf16 %v11838_v1  ;;  %v11839_v53 = vunpack.i.l.bf16 %v11838_v1  ;;  %v6713_v51 = vmul.f32 %v6692_v31, %v6692_v31 }
0x3382   :  { %v6702_v38 = vpop.xlane.xlu0 %6701  ;;  %v6710_v19 = vsub.f32 %v6678_v21, %v6692_v31  ;;  %v14570_v21 = vld [vmem:[%s15066_s13 + $0x58] sm:$0xff] }
0x3383   :  { %12150 = vrsqrt.f32 %v6718_v46  ;;  %v6707_v39 = vmul.f32 0.03125, %v6702_v38  ;;  %v11007_v63 = vpack.c.bf16 %v11840_v58, %v11839_v53  ;;  %v11013_v15 = vpack.c.bf16 %v14570_v21, %v14565_v14 }
0x3385   :  { %v6716_v28 = vsub.f32 %v6707_v39, %v6713_v51  ;;  %11008 = vmatpush3.bf16.msra.mxu0 %v11007_v63 }
0x3386   :  { %v6705_v33 = vpop.xlane.xlu0 %6704  ;;  %11009 = vmatprep.subr.bf16.mxu0 %v15090_v35 }
0x3387   :  { %v6719_v57 = vadd.f32 1e-05, %v6716_v28  ;;  %v6708_v43 = vmul.f32 0.03125, %v6705_v33 }
0x3389   :  { %12152 = vrsqrt.f32 %v6719_v57 }
0x338a   :  { %v11843_v40 = vpop.permute.xlu0 %11842 }
0x338b   :  { %v11845_v55 = vunpack.i.h.bf16 %v11843_v40  ;;  %v11844_v20 = vunpack.i.l.bf16 %v11843_v40 }
0x338d   :  { %v12151_v25 = vpop.eup %12150  ;;  %v11010_v7 = vpack.c.bf16 %v11845_v55, %v11844_v20 }
0x338e   :  { %v6724_v60 = vmul.f32 %v12151_v25, %v6709_v26 }
0x338f   :  { %11011 = vmatpush3.bf16.msra.mxu0 %v11010_v7 }
0x3390   :  { %v6731_v8 = vmul.f32 %v8998_v34, %v6724_v60  ;;  %11018 = vmatprep.subr.bf16.mxu0 %v15090_v35 }
0x3392   :  { %v14549_v11 = vadd.f32 %v8999_v29, %v6731_v8 }
0x3393   :  { %v12153_v48 = vpop.eup %12152 }
0x3394   :  { %10063 = vmatmul.mubr.msk.f32.vlgmr.msra.gmra.mrb[78].mxu0 %vm503_vm12, %v14549_v11  ;;  %v6725_v27 = vmul.f32 %v12153_v48, %v6710_v19 }
0x3395   :  { %10065 = vmatprep.mubr.msk.f32.mxu0 %vm12547_vm6, %v15094_v4 }
0x3396   :  { %v6732_v32 = vmul.f32 %v8998_v34, %v6725_v27 }
0x3398   :  { %v14555_v62 = vadd.f32 %v8999_v29, %v6732_v32 }
0x339a   :  { %10066 = vmatmul.mubr.msk.f32.gmra.mrb[80].mxu0 %vm503_vm12, %v14555_v62 }
0x339b   :  { %10068 = vmatprep.mubr.msk.f32.mxu0 %vm12547_vm6, %v15094_v4 }
0x33b1   :  { %v6690_v5 = vpop.xlane.xlu1 %6689 }
0x33b2   :  { %v6693_v54 = vmul.f32 0.03125, %v6690_v5 }
0x33b4   :  { %v6714_v12 = vmul.f32 %v6693_v54, %v6693_v54  ;;  %v6711_v50 = vsub.f32 %v14531_v30, %v6693_v54 }
0x33b5   :  { %v11848_v16 = vpop.permute.xlu1 %11847 }
0x33b6   :  { %v6717_v61 = vsub.f32 %v6708_v43, %v6714_v12  ;;  %v11850_v6 = vunpack.i.h.bf16 %v11848_v16  ;;  %v11849_v17 = vunpack.i.l.bf16 %v11848_v16 }
0x33b8   :  { %v6720_v3 = vadd.f32 1e-05, %v6717_v61  ;;  %v11001_v45 = vpack.c.bf16 %v11850_v6, %v11849_v17 }
0x33b9   :  { %v11853_v44 = vpop.permute.xlu1 %11852 }
0x33ba   :  { %12154 = vrsqrt.f32 %v6720_v3  ;;  %v11855_v10 = vunpack.i.h.bf16 %v11853_v44  ;;  %v11854_v37 = vunpack.i.l.bf16 %v11853_v44  ;;  %11002 = vmatpush3.bf16.msra.mxu1 %v11001_v45 }
0x33bb   :  { %11003 = vmatprep.subr.bf16.mxu1 %v15090_v35 }
0x33bc   :  { %v11004_v49 = vpack.c.bf16 %v11855_v10, %v11854_v37  ;;  %v7018_v37 = vld [vmem:[%s15068_s15] sm:$0xff] }
0x33be   :  { %11005 = vmatpush3.bf16.msra.mxu1 %v11004_v49 }
0x33bf   :  { %11012 = vmatprep.subr.bf16.mxu1 %v15090_v35 }
0x33c1   :  { %10046 = vmatmul.mubr.msk.f32.vlgmr.msra.gmra.mrb[78].mxu1 %vm503_vm12, %v14549_v11 }
0x33c2   :  { %10048 = vmatprep.mubr.msk.f32.mxu1 %vm12547_vm6, %v15094_v4  ;;  %11014 = vmatpush3.bf16.msra.mxu1 %v11013_v15 }
0x33c3   :  { %11015 = vmatprep.subr.bf16.mxu1 %v15090_v35 }
0x33c4   :  { %v12155_v24 = vpop.eup %12154 }
0x33c5   :  { %v6726_v2 = vmul.f32 %v12155_v24, %v6711_v50  ;;  %10049 = vmatmul.mubr.msk.f32.gmra.mrb[80].mxu1 %vm503_vm12, %v14555_v62  ;;  %v7019_v24 = vld [vmem:[%s15068_s15 + $0x8] sm:$0xff] }
0x33c6   :  { %10051 = vmatprep.mubr.msk.f32.mxu1 %vm12547_vm6, %v15094_v4  ;;  %11017 = vmatpush3.bf16.msra.mxu1 %v11016_v47 }
0x33c7   :  { %v6733_v23 = vmul.f32 %v8998_v34, %v6726_v2  ;;  %11022 = vmatprep.subr.bf16.mxu1 %v15090_v35 }
0x33c9   :  { %v14598_v42 = vadd.f32 %v8999_v29, %v6733_v23 }
0x33cb   :  { %10052 = vmatmul.mubr.msk.f32.gmra.mrb[82].mxu1 %vm503_vm12, %v14598_v42  ;;  %10069 = vmatmul.mubr.msk.f32.gmra.mrb[82].mxu0 %vm503_vm12, %v14598_v42 }
0x33cc   :  { %10079 = vmatprep.mubr.msk.f32.mxu1 %vm12547_vm6, %v15094_v4  ;;  %10094 = vmatprep.mubr.msk.f32.mxu0 %vm12547_vm6, %v15094_v4 }
0x33cf   :  { %10080 = vmatmul.mubr.msk.f32.vlgmr.msra.gmra.mrb[84].mxu1 %vm503_vm12, %v14549_v11 }
0x33d0   :  { %10082 = vmatprep.mubr.msk.f32.mxu1 %vm12547_vm6, %v15094_v4 }
0x33d3   :  { %10083 = vmatmul.mubr.msk.f32.gmra.mrb[86].mxu1 %vm503_vm12, %v14555_v62 }
0x33d4   :  { %10085 = vmatprep.mubr.msk.f32.mxu1 %vm12547_vm6, %v15094_v4 }
0x33d7   :  { %10086 = vmatmul.mubr.msk.f32.gmra.mrb[88].mxu1 %vm503_vm12, %v14598_v42 }
0x33d8   :  { %10109 = vmatprep.mubr.msk.f32.mxu1 %vm12547_vm6, %v15094_v4 }
0x3467   :  { %v6920_v30 = vpop.f32.mrb[78].mxu0 }
0x3468   :  { %v10064_v22 = vpop.f32.mrb[79].mxu0 }
0x346d   :  { %v6925_v18 = vpop.f32.mrb[80].mxu0 }
0x346e   :  { %v11866_v56 = vpack.i.bf16 %v6925_v18, %v6920_v30  ;;  %v11019_v13 = vpack.c.bf16 %v6925_v18, %v6920_v30  ;;  %v10067_v41 = vpop.f32.mrb[81].mxu0 }
0x3470   :  { %11857 = vrot.lane.b32.xlu0 %v11866_v56, %s12551_s9  ;;  %11021 = vmatpush3.bf16.xpose.msk.msra.mxu0 %vm14622_vm10, %v11019_v13 }
0x3471   :  { %10092 = vmatprep.subr.mxu0 %v15094_v4 }
0x3474   :  { %11862 = vrot.lane.b32.xlu0 %v11866_v56, %s12552_s19 }
0x3494   :  { %v6828_v52 = vpop.f32.mrb[78].mxu1 }
0x3495   :  { %7163 = vrot.lane.b32.xlu0 %v6828_v52, %s12551_s9  ;;  %v10047_v31 = vpop.f32.mrb[79].mxu1 }
0x3498   :  { %v6833_v1 = vpop.f32.mrb[80].mxu1 }
0x3499   :  { %v10050_v46 = vpop.f32.mrb[81].mxu1 }
0x349e   :  { %v6838_v58 = vpop.f32.mrb[82].mxu1  ;;  %v6930_v53 = vpop.f32.mrb[82].mxu0 }
0x349f   :  { %7173 = vrot.lane.b32.xlu1 %v6930_v53, %s12551_s9  ;;  %v10070_v38 = vpop.f32.mrb[83].mxu0  ;;  %10093 = vmatpush3.xpose.msk.msra.mxu0 %vm7021_vm9, %v6930_v53  ;;  %v10053_v51 = vpop.f32.mrb[83].mxu1 }
0x34a0   :  { %7319 = vrot.lane.b32.xlu0 %v6930_v53, %s12552_s19  ;;  %11026 = vmatprep.subr.bf16.mxu0 %v15090_v35 }
0x34a2   :  { %v7004_v39 = vpop.f32.mrb[84].mxu1  ;;  %10095 = vmatmul.mubr.msk.f32.vlgmr.msra.gmra.mrb[84].mxu0 %vm7021_vm9, %v6828_v52 }
0x34a3   :  { %11867 = vrot.lane.b32.xlu1 %v11866_v56, %s12553_s23  ;;  %v10081_v63 = vpop.f32.mrb[85].mxu1  ;;  %10097 = vmatprep.mubr.msk.f32.mxu0 %vm12547_vm6, %v15094_v4 }
0x34a4   :  { %7465 = vrot.lane.b32.xlu0 %v6930_v53, %s12553_s23 }
0x34a6   :  { %v7009_v28 = vpop.f32.mrb[86].mxu1  ;;  %10098 = vmatmul.mubr.msk.f32.gmra.mrb[86].mxu0 %vm7021_vm9, %v6833_v1 }
0x34a7   :  { %v11035_v33 = vpack.c.bf16 %v7009_v28, %v7004_v39  ;;  %7165 = vrot.lane.b32.xlu1 %v6833_v1, %s12551_s9  ;;  %v10084_v57 = vpop.f32.mrb[87].mxu1  ;;  %10100 = vmatprep.mubr.msk.f32.mxu0 %vm12547_vm6, %v15094_v4 }
0x34a8   :  { %7455 = vrot.lane.b32.xlu0 %v6828_v52, %s12553_s23 }
0x34aa   :  { %v7014_v40 = vpop.f32.mrb[88].mxu1  ;;  %10101 = vmatmul.mubr.msk.f32.gmra.mrb[88].mxu0 %vm7021_vm9, %v6838_v58 }
0x34ab   :  { %7167 = vrot.lane.b32.xlu1 %v6838_v58, %s12551_s9  ;;  %v10087_v55 = vpop.f32.mrb[89].mxu1  ;;  %10124 = vmatprep.mubr.msk.f32.mxu0 %vm12547_vm6, %v15094_v4 }
0x34ac   :  { %7457 = vrot.lane.b32.xlu0 %v6833_v1, %s12553_s23 }
0x34af   :  { %7309 = vrot.lane.b32.xlu1 %v6828_v52, %s12552_s19 }
0x34b0   :  { %7459 = vrot.lane.b32.xlu0 %v6838_v58, %s12553_s23 }
0x34b3   :  { %7311 = vrot.lane.b32.xlu1 %v6833_v1, %s12552_s19 }
0x34b7   :  { %7313 = vrot.lane.b32.xlu1 %v6838_v58, %s12552_s19 }
0x34e2   :  { %v11858_v20 = vpop.permute.xlu0 %11857 }
0x34e3   :  { %v11860_v26 = vunpack.i.h.bf16 %v11858_v20  ;;  %v11859_v25 = vunpack.i.l.bf16 %v11858_v20 }
0x34e5   :  { %v11023_v34 = vpack.c.bf16 %v11860_v26, %v11859_v25 }
0x34e6   :  { %v11863_v7 = vpop.permute.xlu0 %11862 }
0x34e7   :  { %v11865_v60 = vunpack.i.h.bf16 %v11863_v7  ;;  %v11864_v29 = vunpack.i.l.bf16 %v11863_v7  ;;  %11025 = vmatpush3.bf16.xpose.msk.msra.mxu1 %vm14622_vm10, %v11023_v34 }
0x34e8   :  { %10107 = vmatprep.subr.mxu1 %v15094_v4 }
0x34e9   :  { %v11027_v8 = vpack.c.bf16 %v11865_v60, %v11864_v29 }
0x34eb   :  { %11029 = vmatpush3.bf16.xpose.msk.msra.mxu0 %vm14622_vm10, %v11027_v8 }
0x34ec   :  { %10122 = vmatprep.subr.mxu0 %v15094_v4 }
0x3507   :  { %v7164_v19 = vpop.permute.xlu0 %7163 }
0x3511   :  { %v7174_v48 = vpop.permute.xlu1 %7173 }
0x3512   :  { %v7320_v27 = vpop.permute.xlu0 %7319  ;;  %10108 = vmatpush3.xpose.msk.msra.mxu1 %vm7021_vm9, %v7174_v48 }
0x3513   :  { %10123 = vmatpush3.xpose.msk.msra.mxu0 %vm7021_vm9, %v7320_v27  ;;  %11030 = vmatprep.subr.bf16.mxu1 %v15090_v35 }
0x3514   :  { %11034 = vmatprep.subr.bf16.mxu0 %v15090_v35 }
0x3515   :  { %v11868_v32 = vpop.permute.xlu1 %11867  ;;  %10110 = vmatmul.mubr.msk.f32.vlgmr.msra.gmra.mrb[90].mxu1 %vm7021_vm9, %v7164_v19 }
0x3516   :  { %v11870_v5 = vunpack.i.h.bf16 %v11868_v32  ;;  %v11869_v54 = vunpack.i.l.bf16 %v11868_v32  ;;  %10112 = vmatprep.mubr.msk.f32.mxu1 %vm12547_vm6, %v15094_v4  ;;  %v7466_v16 = vpop.permute.xlu0 %7465 }
0x3518   :  { %v11031_v43 = vpack.c.bf16 %v11870_v5, %v11869_v54 }
0x3519   :  { %v7166_v12 = vpop.permute.xlu1 %7165 }
0x351a   :  { %10113 = vmatmul.mubr.msk.f32.gmra.mrb[92].mxu1 %vm7021_vm9, %v7166_v12  ;;  %v7456_v6 = vpop.permute.xlu0 %7455 }
0x351b   :  { %11033 = vmatpush3.bf16.xpose.msk.msra.mxu1 %vm14622_vm10, %v11031_v43  ;;  %10115 = vmatprep.mubr.msk.f32.mxu1 %vm12547_vm6, %v15094_v4 }
0x351c   :  { %10137 = vmatprep.subr.mxu1 %v15094_v4 }
0x351d   :  { %v7168_v61 = vpop.permute.xlu1 %7167 }
0x351e   :  { %10116 = vmatmul.mubr.msk.f32.gmra.mrb[94].mxu1 %vm7021_vm9, %v7168_v61  ;;  %v7458_v45 = vpop.permute.xlu0 %7457 }
0x351f   :  { %10139 = vmatprep.mubr.msk.f32.mxu1 %vm12547_vm6, %v15094_v4 }
0x3521   :  { %v7310_v17 = vpop.permute.xlu1 %7309 }
0x3522   :  { %10125 = vmatmul.mubr.msk.f32.vlgmr.msra.gmra.mrb[90].mxu0 %vm7021_vm9, %v7310_v17  ;;  %v7460_v10 = vpop.permute.xlu0 %7459 }
0x3523   :  { %10138 = vmatpush3.xpose.msk.msra.mxu1 %vm7021_vm9, %v7466_v16  ;;  %11036 = vmatpush3.bf16.msra.mxu0 %v11035_v33 }
0x3524   :  { %10127 = vmatprep.mubr.msk.f32.mxu0 %vm12547_vm6, %v15094_v4  ;;  %10152 = vmatprep.subr.mxu0 %v15094_v4 }
0x3525   :  { %v7312_v3 = vpop.permute.xlu1 %7311  ;;  %11037 = vmatprep.subr.bf16.mxu1 %v15090_v35 }
0x3526   :  { %10140 = vmatmul.mubr.msk.f32.vlgmr.msra.gmra.mrb[96].mxu1 %vm7021_vm9, %v7456_v6  ;;  %10128 = vmatmul.mubr.msk.f32.gmra.mrb[92].mxu0 %vm7021_vm9, %v7312_v3 }
0x3527   :  { %10153 = vmatpush3.msra.mxu0 %v7014_v40  ;;  %10142 = vmatprep.mubr.msk.f32.mxu1 %vm12547_vm6, %v15094_v4 }
0x3528   :  { %10130 = vmatprep.mubr.msk.f32.mxu0 %vm12547_vm6, %v15094_v4  ;;  %11043 = vmatprep.subr.bf16.mxu0 %v15090_v35 }
0x3529   :  { %v7314_v44 = vpop.permute.xlu1 %7313 }
0x352a   :  { %10143 = vmatmul.mubr.msk.f32.gmra.mrb[98].mxu1 %vm7021_vm9, %v7458_v45  ;;  %10131 = vmatmul.mubr.msk.f32.gmra.mrb[94].mxu0 %vm7021_vm9, %v7314_v44 }
0x352b   :  { %10145 = vmatprep.mubr.msk.f32.mxu1 %vm12547_vm6, %v15094_v4  ;;  %10154 = vmatprep.mubr.msk.f32.mxu0 %vm12547_vm6, %v15094_v4 }
0x352e   :  { %10146 = vmatmul.mubr.msk.f32.gmra.mrb[100].mxu1 %vm7021_vm9, %v7460_v10 }
0x352f   :  { %10171 = vmatprep.mubr.msk.f32.mxu1 %vm12547_vm6, %v15094_v4 }
0x3575   :  { %v7106_v49 = vpop.f32.mrb[84].mxu0 }
0x3576   :  { %v7120_v15 = vmul.f32 0.35355338, %v7106_v49  ;;  %v10096_v47 = vpop.f32.mrb[85].mxu0 }
0x3578   :  { %v14697_v50 = vadd.f32 %v7120_v15, %v7018_v37 }
0x3579   :  { %v7111_v2 = vpop.f32.mrb[86].mxu0 }
0x357a   :  { %v7121_v23 = vmul.f32 0.35355338, %v7111_v2  ;;  %v10099_v30 = vpop.f32.mrb[87].mxu0  ;;  %v7127_v22 = vsel %vm7126_vm13, %v14697_v50, -inf }
0x357b   :  { %7128 = vmax.xlane.f32.xlu1 %v7127_v22 }
0x357c   :  { %v14704_v18 = vadd.f32 %v7121_v23, %v7019_v24 }
0x357d   :  { %v7116_v56 = vpop.f32.mrb[88].mxu0 }
0x357e   :  { %v7122_v13 = vmul.f32 0.35355338, %v7116_v56  ;;  %v10102_v41 = vpop.f32.mrb[89].mxu0  ;;  %v7130_v52 = vsel %vm7126_vm13, %v14704_v18, -inf }
0x357f   :  { %7131 = vmax.xlane.f32.xlu1 %v7130_v52 }
0x3580   :  { %v14711_v31 = vadd.f32 %v7122_v13, %v7020_v9 }
0x3582   :  { %v7133_v1 = vsel %vm7126_vm13, %v14711_v31, -inf }
0x3583   :  { %7134 = vmax.xlane.f32.xlu1 %v7133_v1 }
0x35e8   :  { %v7253_v46 = vpop.f32.mrb[90].mxu1 }
0x35e9   :  { %v7267_v58 = vmul.f32 0.35355338, %v7253_v46  ;;  %v10111_v53 = vpop.f32.mrb[91].mxu1 }
0x35eb   :  { %v14715_v38 = vadd.f32 %v7267_v58, %v7018_v37 }
0x35ed   :  { %v7258_v51 = vpop.f32.mrb[92].mxu1  ;;  %v7273_v39 = vsel %vm7126_vm13, %v14715_v38, -inf }
0x35ee   :  { %7274 = vmax.xlane.f32.xlu0 %v7273_v39  ;;  %v10114_v63 = vpop.f32.mrb[93].mxu1  ;;  %v7268_v20 = vmul.f32 0.35355338, %v7258_v51 }
0x35f0   :  { %v14721_v8 = vadd.f32 %v7268_v20, %v7019_v24 }
0x35f1   :  { %v7263_v28 = vpop.f32.mrb[94].mxu1 }
0x35f2   :  { %v10117_v33 = vpop.f32.mrb[95].mxu1  ;;  %v7269_v16 = vmul.f32 0.35355338, %v7263_v28  ;;  %v7276_v17 = vsel %vm7126_vm13, %v14721_v8, -inf }
0x35f4   :  { %v14737_v49 = vadd.f32 %v7269_v16, %v7020_v9 }
0x35f5   :  { %v7399_v57 = vpop.f32.mrb[90].mxu0 }
0x35f6   :  { %v7413_v40 = vmul.f32 0.35355338, %v7399_v57  ;;  %v10126_v55 = vpop.f32.mrb[91].mxu0  ;;  %v7279_v30 = vsel %vm7126_vm13, %v14737_v49, -inf }
0x35f8   :  { %v14719_v26 = vadd.f32 %v7413_v40, %v7018_v37 }
0x35f9   :  { %v7545_v25 = vpop.f32.mrb[96].mxu1  ;;  %v7404_v34 = vpop.f32.mrb[92].mxu0 }
0x35fa   :  { %v7559_v7 = vmul.f32 0.35355338, %v7545_v25  ;;  %v10141_v60 = vpop.f32.mrb[97].mxu1  ;;  %v10129_v29 = vpop.f32.mrb[93].mxu0  ;;  %v7414_v19 = vmul.f32 0.35355338, %v7404_v34 }
0x35fb   :  { %v7419_v48 = vsel %vm7126_vm13, %v14719_v26, -inf }
0x35fc   :  { %v14725_v27 = vadd.f32 %v7559_v7, %v7018_v37  ;;  %7420 = vmax.xlane.f32.xlu0 %v7419_v48  ;;  %v14727_v61 = vadd.f32 %v7414_v19, %v7019_v24 }
0x35fd   :  { %v7550_v32 = vpop.f32.mrb[98].mxu1  ;;  %v7409_v5 = vpop.f32.mrb[94].mxu0 }
0x35fe   :  { %v7560_v54 = vmul.f32 0.35355338, %v7550_v32  ;;  %v10144_v43 = vpop.f32.mrb[99].mxu1  ;;  %v10132_v12 = vpop.f32.mrb[95].mxu0  ;;  %v7565_v6 = vsel %vm7126_vm13, %v14725_v27, -inf  ;;  %v7422_v47 = vsel %vm7126_vm13, %v14727_v61, -inf }
0x35ff   :  { %7566 = vmax.xlane.f32.xlu1 %v7565_v6  ;;  %v7415_v15 = vmul.f32 0.35355338, %v7409_v5 }
0x3600   :  { %v14733_v3 = vadd.f32 %v7560_v54, %v7019_v24  ;;  %7277 = vmax.xlane.f32.xlu0 %v7276_v17 }
0x3601   :  { %v7555_v45 = vpop.f32.mrb[100].mxu1  ;;  %v14745_v23 = vadd.f32 %v7415_v15, %v7020_v9 }
0x3602   :  { %v7561_v44 = vmul.f32 0.35355338, %v7555_v45  ;;  %v10147_v10 = vpop.f32.mrb[101].mxu1  ;;  %v7568_v37 = vsel %vm7126_vm13, %v14733_v3, -inf }
0x3603   :  { %7569 = vmax.xlane.f32.xlu1 %v7568_v37  ;;  %v7425_v41 = vsel %vm7126_vm13, %v14745_v23, -inf }
0x3604   :  { %v14741_v2 = vadd.f32 %v7561_v44, %v7020_v9  ;;  %7423 = vmax.xlane.f32.xlu0 %v7422_v47 }
0x3606   :  { %v7571_v24 = vsel %vm7126_vm13, %v14741_v2, -inf }
0x3607   :  { %7572 = vmax.xlane.f32.xlu1 %v7571_v24 }
0x3608   :  { %7280 = vmax.xlane.f32.xlu0 %v7279_v30  ;;  %v7129_v22 = vpop.xlane.xlu1 %7128 }
0x3609   :  { %v7136_v56 = vsub.f32 %v14697_v50, %v7129_v22 }
0x360b   :  { %v7139_v13 = vmul.f32 1.442695, %v7136_v56 }
0x360c   :  { %7426 = vmax.xlane.f32.xlu0 %v7425_v41  ;;  %v7132_v52 = vpop.xlane.xlu1 %7131 }
0x360d   :  { %12156 = vpow2.f32 %v7139_v13  ;;  %v7137_v1 = vsub.f32 %v14704_v18, %v7132_v52 }
0x360f   :  { %v7141_v46 = vmul.f32 1.442695, %v7137_v1 }
0x3610   :  { %v7135_v9 = vpop.xlane.xlu1 %7134 }
0x3611   :  { %12158 = vpow2.f32 %v7141_v46  ;;  %v7138_v58 = vsub.f32 %v14711_v31, %v7135_v9  ;;  %v14801_v9 = vpack.i.bf16 %v14583_v0, %v14578_v59 }
0x3613   :  { %v7143_v53 = vmul.f32 1.442695, %v7138_v58  ;;  %v14805_v58 = vpack.i.bf16 %v14570_v21, %v14565_v14 }
0x3615   :  { %12160 = vpow2.f32 %v7143_v53 }
0x3617   :  { %v14754_v51 = vpop.eup %12156 }
0x3618   :  { %v7145_v50 = vsel %vm7126_vm13, %v14754_v51, 0.0 }
0x3619   :  { %7146 = vadd.xlane.f32.xlu0 %v7145_v50 }
0x361b   :  { %v14758_v39 = vpop.eup %12158 }
0x361c   :  { %v7148_v63 = vsel %vm7126_vm13, %v14758_v39, 0.0 }
0x361d   :  { %7149 = vadd.xlane.f32.xlu1 %v7148_v63 }
0x361f   :  { %v14762_v18 = vpop.eup %12160 }
0x3620   :  { %v7151_v28 = vsel %vm7126_vm13, %v14762_v18, 0.0 }
0x3621   :  { %7152 = vadd.xlane.f32.xlu1 %v7151_v28 }
0x367b   :  { %v7275_v31 = vpop.xlane.xlu0 %7274 }
0x367c   :  { %v7282_v33 = vsub.f32 %v14715_v38, %v7275_v31 }
0x367e   :  { %v7285_v57 = vmul.f32 1.442695, %v7282_v33 }
0x3680   :  { %12162 = vpow2.f32 %v7285_v57 }
0x3689   :  { %v7421_v40 = vpop.xlane.xlu0 %7420 }
0x368a   :  { %v14767_v55 = vpop.eup %12162  ;;  %v7428_v20 = vsub.f32 %v14719_v26, %v7421_v40 }
0x368b   :  { %v7291_v25 = vsel %vm7126_vm13, %v14767_v55, 0.0 }
0x368c   :  { %v7431_v34 = vmul.f32 1.442695, %v7428_v20  ;;  %7292 = vadd.xlane.f32.xlu1 %v7291_v25  ;;  %v7567_v7 = vpop.xlane.xlu1 %7566 }
0x368d   :  { %v7278_v60 = vpop.xlane.xlu0 %7277  ;;  %v7574_v29 = vsub.f32 %v14725_v27, %v7567_v7 }
0x368e   :  { %12164 = vpow2.f32 %v7431_v34  ;;  %v7283_v19 = vsub.f32 %v14721_v8, %v7278_v60 }
0x368f   :  { %v7577_v38 = vmul.f32 1.442695, %v7574_v29 }
0x3690   :  { %v7287_v48 = vmul.f32 1.442695, %v7283_v19  ;;  %v7570_v32 = vpop.xlane.xlu1 %7569 }
0x3691   :  { %v7424_v5 = vpop.xlane.xlu0 %7423  ;;  %12166 = vpow2.f32 %v7577_v38  ;;  %v7575_v54 = vsub.f32 %v14733_v3, %v7570_v32 }
0x3692   :  { %v7429_v26 = vsub.f32 %v14727_v61, %v7424_v5  ;;  %12168 = vpow2.f32 %v7287_v48 }
0x3693   :  { %v7579_v43 = vmul.f32 1.442695, %v7575_v54 }
0x3694   :  { %v7433_v12 = vmul.f32 1.442695, %v7429_v26  ;;  %v7573_v16 = vpop.xlane.xlu1 %7572 }
0x3695   :  { %v7281_v6 = vpop.xlane.xlu0 %7280  ;;  %12170 = vpow2.f32 %v7579_v43  ;;  %v7576_v17 = vsub.f32 %v14741_v2, %v7573_v16 }
0x3696   :  { %v7284_v27 = vsub.f32 %v14737_v49, %v7281_v6  ;;  %12172 = vpow2.f32 %v7433_v12 }
0x3697   :  { %v7581_v45 = vmul.f32 1.442695, %v7576_v17 }
0x3698   :  { %v12165_v8 = vpop.eup %12164  ;;  %v7289_v44 = vmul.f32 1.442695, %v7284_v27 }
0x3699   :  { %v7427_v10 = vpop.xlane.xlu0 %7426  ;;  %v7437_v37 = vsel %vm7126_vm13, %v12165_v8, 0.0  ;;  %12174 = vpow2.f32 %v7581_v45 }
0x369a   :  { %v7430_v61 = vsub.f32 %v14745_v23, %v7427_v10  ;;  %7438 = vadd.xlane.f32.xlu0 %v7437_v37  ;;  %12176 = vpow2.f32 %v7289_v44 }
0x369b   :  { %v12167_v3 = vpop.eup %12166 }
0x369c   :  { %v7435_v15 = vmul.f32 1.442695, %v7430_v61  ;;  %v12169_v47 = vpop.eup %12168  ;;  %v7583_v24 = vsel %vm7126_vm13, %v12167_v3, 0.0 }
0x369d   :  { %7584 = vadd.xlane.f32.xlu1 %v7583_v24  ;;  %v7294_v49 = vsel %vm7126_vm13, %v12169_v47, 0.0 }
0x369e   :  { %12178 = vpow2.f32 %v7435_v15  ;;  %7295 = vadd.xlane.f32.xlu0 %v7294_v49 }
0x369f   :  { %v14782_v2 = vpop.eup %12170 }
0x36a0   :  { %v12173_v30 = vpop.eup %12172  ;;  %v7586_v22 = vsel %vm7126_vm13, %v14782_v2, 0.0 }
0x36a1   :  { %7587 = vadd.xlane.f32.xlu1 %v7586_v22  ;;  %v7440_v23 = vsel %vm7126_vm13, %v12173_v30, 0.0 }
0x36a2   :  { %7441 = vadd.xlane.f32.xlu0 %v7440_v23 }
0x36a3   :  { %v14787_v56 = vpop.eup %12174 }
0x36a4   :  { %v14789_v13 = vpop.eup %12176  ;;  %v7589_v41 = vsel %vm7126_vm13, %v14787_v56, 0.0 }
0x36a5   :  { %7590 = vadd.xlane.f32.xlu1 %v7589_v41  ;;  %v7297_v52 = vsel %vm7126_vm13, %v14789_v13, 0.0 }
0x36a6   :  { %7298 = vadd.xlane.f32.xlu0 %v7297_v52  ;;  %v7147_v0 = vpop.xlane.xlu0 %7146 }
0x36a8   :  { %v14795_v1 = vpop.eup %12178 }
0x36a9   :  { %v7443_v46 = vsel %vm7126_vm13, %v14795_v1, 0.0 }
0x36aa   :  { %7444 = vadd.xlane.f32.xlu0 %v7443_v46  ;;  %v7150_v53 = vpop.xlane.xlu1 %7149 }
0x36ae   :  { %v7153_v50 = vpop.xlane.xlu1 %7152 }
0x36b6   :  { %11877 = vrot.lane.b32.xlu1 %v14801_v9, %s12548_s2 }
0x36ba   :  { %11882 = vrot.lane.b32.xlu1 %v14805_v58, %s12544_s18 }
0x36c0   :  { %11872 = vrot.lane.b32.xlu0 %v14805_v58, %s12548_s2 }
0x36c4   :  { %11887 = vrot.lane.b32.xlu0 %v14801_v9, %s12544_s18 }
0x3719   :  { %v7293_v59 = vpop.xlane.xlu1 %7292 }
0x371a   :  { %12180 = vrcp.f32 %v7293_v59 }
0x371b   :  { %12182 = vrcp.f32 %v7147_v0 }
0x3724   :  { %v12181_v63 = vpop.eup %12180 }
0x3725   :  { %v12183_v31 = vpop.eup %12182  ;;  %v7301_v33 = vmul.f32 %v12181_v63, %v14767_v55 }
0x3726   :  { %v7155_v20 = vmul.f32 %v12183_v31, %v14754_v51 }
0x3727   :  { %v7439_v14 = vpop.xlane.xlu0 %7438 }
0x3728   :  { %12184 = vrcp.f32 %v7439_v14  ;;  %v7306_v34 = vadd.f32 %v7301_v33, %v7155_v20 }
0x3729   :  { %12186 = vrcp.f32 %v7150_v53 }
0x372a   :  { %v7585_v21 = vpop.xlane.xlu1 %7584 }
0x372b   :  { %12188 = vrcp.f32 %v7585_v21  ;;  %v7296_v28 = vpop.xlane.xlu0 %7295 }
0x372c   :  { %12190 = vrcp.f32 %v7296_v28 }
0x372e   :  { %v7588_v57 = vpop.xlane.xlu1 %7587 }
0x372f   :  { %12192 = vrcp.f32 %v7588_v57  ;;  %v7442_v40 = vpop.xlane.xlu0 %7441 }
0x3730   :  { %12194 = vrcp.f32 %v7442_v40 }
0x3731   :  { %12196 = vrcp.f32 %v7153_v50 }
0x3732   :  { %v12185_v25 = vpop.eup %12184  ;;  %v7591_v38 = vpop.xlane.xlu1 %7590 }
0x3733   :  { %v7447_v7 = vmul.f32 %v12185_v25, %v12165_v8  ;;  %v7299_v60 = vpop.xlane.xlu0 %7298  ;;  %v12187_v29 = vpop.eup %12186 }
0x3734   :  { %12198 = vrcp.f32 %v7299_v60  ;;  %v7157_v51 = vmul.f32 %v12187_v29, %v14758_v39 }
0x3735   :  { %v7452_v19 = vadd.f32 %v7447_v7, %v7306_v34  ;;  %v12189_v48 = vpop.eup %12188  ;;  %12200 = vrcp.f32 %v7591_v38  ;;  %v9036_v34 = vld [vmem:[#allocation16 + $0xb] ss:$0 sm:$0xff] }
0x3736   :  { %v12191_v32 = vpop.eup %12190  ;;  %v7593_v5 = vmul.f32 %v12189_v48, %v12167_v3  ;;  %v11878_v61 = vpop.permute.xlu1 %11877 }
0x3737   :  { %v7303_v54 = vmul.f32 %v12191_v32, %v12169_v47  ;;  %v7445_v55 = vpop.xlane.xlu0 %7444  ;;  %v11880_v39 = vunpack.i.h.bf16 %v11878_v61  ;;  %v11879_v15 = vunpack.i.l.bf16 %v11878_v61 }
0x3738   :  { %v7598_v26 = vadd.f32 %v7593_v5, %v7452_v19  ;;  %12202 = vrcp.f32 %v7445_v55 }
0x3739   :  { %v12193_v43 = vpop.eup %12192  ;;  %v7307_v17 = vadd.f32 %v7303_v54, %v7157_v51  ;;  %v11041_v46 = vpack.c.bf16 %v11880_v39, %v11879_v15 }
0x373a   :  { %v12195_v12 = vpop.eup %12194  ;;  %v7601_v16 = vmul.f32 0.25, %v7598_v26  ;;  %v7595_v45 = vmul.f32 %v12193_v43, %v14782_v2 }
0x373b   :  { %v7449_v6 = vmul.f32 %v12195_v12, %v12173_v30  ;;  %v12197_v27 = vpop.eup %12196  ;;  %v11873_v3 = vpop.permute.xlu0 %11872 }
0x373c   :  { %10155 = vmatmul.mubr.msk.f32.vlgmr.msra.gmra.mrb[96].mxu0 %vm7126_vm13, %v7601_v16  ;;  %v11875_v47 = vunpack.i.h.bf16 %v11873_v3  ;;  %v11874_v24 = vunpack.i.l.bf16 %v11873_v3  ;;  %v7159_v30 = vmul.f32 %v12197_v27, %v14762_v18 }
0x373d   :  { %10157 = vmatprep.mubr.msk.f32.mxu0 %vm12547_vm6, %v15094_v4  ;;  %v7453_v8 = vadd.f32 %v7449_v6, %v7307_v17 }
0x373e   :  { %v12199_v44 = vpop.eup %12198  ;;  %v11038_v41 = vpack.c.bf16 %v11875_v47, %v11874_v24 }
0x373f   :  { %v7305_v10 = vmul.f32 %v12199_v44, %v14789_v13  ;;  %v7599_v37 = vadd.f32 %v7595_v45, %v7453_v8  ;;  %v12201_v49 = vpop.eup %12200  ;;  %v11883_v13 = vpop.permute.xlu1 %11882 }
0x3740   :  { %v11888_v53 = vpop.permute.xlu0 %11887  ;;  %v11885_v50 = vunpack.i.h.bf16 %v11883_v13  ;;  %v11884_v59 = vunpack.i.l.bf16 %v11883_v13  ;;  %11039 = vmatpush3.bf16.msra.mxu1 %v11038_v41  ;;  %v7597_v21 = vmul.f32 %v12201_v49, %v14787_v56 }
0x3741   :  { %v7602_v22 = vmul.f32 0.25, %v7599_v37  ;;  %v7308_v2 = vadd.f32 %v7305_v10, %v7159_v30  ;;  %v11890_v0 = vunpack.i.h.bf16 %v11888_v53  ;;  %v11889_v14 = vunpack.i.l.bf16 %v11888_v53  ;;  %11040 = vmatprep.subr.bf16.mxu1 %v15090_v35  ;;  %v9043_v37 = vld [vmem:[#allocation16 + $0xc] ss:$0 sm:$0xff] }
0x3742   :  { %v12203_v23 = vpop.eup %12202 }
0x3743   :  { %v7451_v52 = vmul.f32 %v12203_v23, %v14795_v1  ;;  %10158 = vmatmul.mubr.msk.f32.gmra.mrb[98].mxu0 %vm7126_vm13, %v7602_v22  ;;  %v11044_v1 = vpack.c.bf16 %v11885_v50, %v11884_v59  ;;  %v11047_v28 = vpack.c.bf16 %v11890_v0, %v11889_v14 }
0x3744   :  { %10160 = vmatprep.mubr.msk.f32.mxu0 %vm12547_vm6, %v15094_v4  ;;  %11042 = vmatpush3.bf16.msra.mxu1 %v11041_v46 }
0x3745   :  { %v7454_v18 = vadd.f32 %v7451_v52, %v7308_v2  ;;  %11045 = vmatpush3.bf16.msra.mxu0 %v11044_v1  ;;  %11049 = vmatprep.subr.bf16.mxu1 %v15090_v35 }
0x3746   :  { %11046 = vmatprep.subr.bf16.mxu0 %v15090_v35 }
0x3747   :  { %v7600_v63 = vadd.f32 %v7597_v21, %v7454_v18 }
0x3749   :  { %v7603_v31 = vmul.f32 0.25, %v7600_v63  ;;  %11048 = vmatpush3.bf16.msra.mxu0 %v11047_v28 }
0x374a   :  { %11055 = vmatprep.subr.bf16.mxu0 %v15090_v35 }
0x374b   :  { %10161 = vmatmul.mubr.msk.f32.gmra.mrb[100].mxu0 %vm7126_vm13, %v7603_v31 }
0x374c   :  { %10188 = vmatprep.mubr.msk.f32.mxu0 %vm12547_vm6, %v15094_v4 }
0x380f   :  { %v7679_v56 = vpop.f32.mrb[96].mxu0 }
0x3810   :  { %v10156_v33 = vpop.f32.mrb[97].mxu0  ;;  %10172 = vmatmul.mubr.msk.f32.vlgmr.msra.gmra.mrb[102].mxu1 %vm503_vm12, %v7679_v56  ;;  %10189 = vmatmul.mubr.msk.f32.vlgmr.msra.gmra.mrb[102].mxu0 %vm503_vm12, %v7679_v56 }
0x3811   :  { %10174 = vmatprep.mubr.msk.f32.mxu1 %vm12547_vm6, %v15094_v4  ;;  %10191 = vmatprep.mubr.msk.f32.mxu0 %vm12547_vm6, %v15094_v4 }
0x3816   :  { %v7684_v57 = vpop.f32.mrb[98].mxu0 }
0x3817   :  { %v10159_v40 = vpop.f32.mrb[99].mxu0  ;;  %10175 = vmatmul.mubr.msk.f32.gmra.mrb[104].mxu1 %vm503_vm12, %v7684_v57  ;;  %10192 = vmatmul.mubr.msk.f32.gmra.mrb[104].mxu0 %vm503_vm12, %v7684_v57 }
0x3818   :  { %10177 = vmatprep.mubr.msk.f32.mxu1 %vm12547_vm6, %v15094_v4  ;;  %10194 = vmatprep.mubr.msk.f32.mxu0 %vm12547_vm6, %v15094_v4 }
0x381e   :  { %v7689_v20 = vpop.f32.mrb[100].mxu0 }
0x381f   :  { %v10162_v25 = vpop.f32.mrb[101].mxu0  ;;  %10178 = vmatmul.mubr.msk.f32.gmra.mrb[106].mxu1 %vm503_vm12, %v7689_v20  ;;  %10195 = vmatmul.mubr.msk.f32.gmra.mrb[106].mxu0 %vm503_vm12, %v7689_v20 }
0x3820   :  { %10205 = vmatprep.mubr.msk.f32.mxu1 %vm12547_vm6, %v15094_v4  ;;  %10222 = vmatprep.mubr.msk.f32.mxu0 %vm12547_vm6, %v15094_v4 }
0x38e3   :  { %v7789_v7 = vpop.f32.mrb[102].mxu1  ;;  %v7904_v60 = vpop.f32.mrb[102].mxu0 }
0x38e4   :  { %v7790_v29 = vadd.f32 %v9036_v34, %v7789_v7  ;;  %v10173_v19 = vpop.f32.mrb[103].mxu1  ;;  %v10190_v38 = vpop.f32.mrb[103].mxu0  ;;  %v7905_v61 = vadd.f32 %v9043_v37, %v7904_v60 }
0x38e6   :  { %v9040_v48 = vmul.f32 -1.442695, %v7790_v29 }
0x38e8   :  { %12204 = vpow2.f32 %v9040_v48 }
0x38ea   :  { %v7794_v32 = vpop.f32.mrb[104].mxu1  ;;  %v7909_v5 = vpop.f32.mrb[104].mxu0 }
0x38eb   :  { %v7795_v54 = vadd.f32 %v9036_v34, %v7794_v32  ;;  %v10176_v55 = vpop.f32.mrb[105].mxu1  ;;  %v10193_v26 = vpop.f32.mrb[105].mxu0  ;;  %v7910_v22 = vadd.f32 %v9043_v37, %v7909_v5 }
0x38ed   :  { %v9041_v43 = vmul.f32 -1.442695, %v7795_v54 }
0x38ef   :  { %12206 = vpow2.f32 %v9041_v43 }
0x38f2   :  { %v12205_v51 = vpop.eup %12204  ;;  %v7799_v12 = vpop.f32.mrb[106].mxu1 }
0x38f3   :  { %v7914_v16 = vpop.f32.mrb[106].mxu0  ;;  %v7812_v6 = vadd.f32 1.0, %v12205_v51  ;;  %v7800_v17 = vadd.f32 %v9036_v34, %v7799_v12  ;;  %v10179_v27 = vpop.f32.mrb[107].mxu1  ;;  %v9047_v51 = vld [vmem:[#allocation16 + $0xd] ss:$0 sm:$0xff] }
0x38f4   :  { %v10196_v8 = vpop.f32.mrb[107].mxu0  ;;  %v7915_v53 = vadd.f32 %v9043_v37, %v7914_v16 }
0x38f5   :  { %12208 = vrcp.f32 %v7812_v6  ;;  %v9042_v45 = vmul.f32 -1.442695, %v7800_v17 }
0x38f7   :  { %12210 = vpow2.f32 %v9042_v45 }
0x38f9   :  { %v12207_v44 = vpop.eup %12206 }
0x38fa   :  { %v7813_v10 = vadd.f32 1.0, %v12207_v44 }
0x38fc   :  { %12212 = vrcp.f32 %v7813_v10  ;;  %v9048_v10 = vld [vmem:[#allocation16 + $0xe] ss:$0 sm:$0xff] }
0x38ff   :  { %v12209_v3 = vpop.eup %12208 }
0x3900   :  { %v7918_v39 = vmul.f32 %v12209_v3, %v7905_v61 }
0x3901   :  { %v12211_v15 = vpop.eup %12210 }
0x3902   :  { %v7921_v47 = vadd.f32 %v7918_v39, %v14549_v11  ;;  %v7814_v24 = vadd.f32 1.0, %v12211_v15 }
0x3904   :  { %12214 = vrcp.f32 %v7814_v24  ;;  %v7926_v49 = vsel %vm503_vm12, %v7921_v47, 0.0  ;;  %v7938_v30 = vmul.f32 %v7921_v47, %v7921_v47 }
0x3905   :  { %7927 = vadd.xlane.f32.xlu1 %v7926_v49 }
0x3906   :  { %v12213_v23 = vpop.eup %12212  ;;  %v7941_v41 = vsel %vm503_vm12, %v7938_v30, 0.0 }
0x3907   :  { %v7919_v52 = vmul.f32 %v12213_v23, %v7910_v22  ;;  %7942 = vadd.xlane.f32.xlu0 %v7941_v41  ;;  %v8106_v22 = vld [vmem:[%s15066_s13 + $0x28] sm:$0xff]  ;;  %v8107_v23 = vld [vmem:[%s15066_s13 + $0x60] sm:$0xff] }
0x3908   :  { %v11056_v41 = vpack.c.bf16 %v8107_v23, %v8106_v22 }
0x3909   :  { %v7922_v2 = vadd.f32 %v7919_v52, %v14555_v62  ;;  %v8108_v52 = vld [vmem:[%s15066_s13 + $0x98] sm:$0xff] }
0x390a   :  { %11057 = vmatpush3.bf16.msra.mxu0 %v11056_v41 }
0x390b   :  { %v7929_v46 = vsel %vm503_vm12, %v7922_v2, 0.0  ;;  %v7939_v13 = vmul.f32 %v7922_v2, %v7922_v2  ;;  %11058 = vmatprep.subr.bf16.mxu0 %v15090_v35 }
0x390c   :  { %7930 = vadd.xlane.f32.xlu0 %v7929_v46 }
0x390d   :  { %v7944_v11 = vsel %vm503_vm12, %v7939_v13, 0.0  ;;  %v14901_v13 = vpack.i.bf16 %v8107_v23, %v8106_v22 }
0x390e   :  { %v12215_v50 = vpop.eup %12214  ;;  %7945 = vadd.xlane.f32.xlu1 %v7944_v11  ;;  %v9049_v11 = vld [vmem:[#allocation16 + $0xf] ss:$0 sm:$0xff] }
0x390f   :  { %v7920_v59 = vmul.f32 %v12215_v50, %v7915_v53 }
0x3911   :  { %v7923_v0 = vadd.f32 %v7920_v59, %v14598_v42 }
0x3913   :  { %v7932_v14 = vsel %vm503_vm12, %v7923_v0, 0.0  ;;  %v7940_v18 = vmul.f32 %v7923_v0, %v7923_v0 }
0x3914   :  { %7933 = vadd.xlane.f32.xlu0 %v7932_v14 }
0x3915   :  { %v7947_v21 = vsel %vm503_vm12, %v7940_v18, 0.0 }
0x3916   :  { %7948 = vadd.xlane.f32.xlu1 %v7947_v21 }
0x3927   :  { %11897 = vrot.lane.b32.xlu1 %v14801_v9, %s12529_s21 }
0x392a   :  { %11892 = vrot.lane.b32.xlu0 %v14805_v58, %s12529_s21 }
0x392b   :  { %11902 = vrot.lane.b32.xlu1 %v14901_v13, %s12548_s2 }
0x392f   :  { %11912 = vrot.lane.b32.xlu1 %v14901_v13, %s12544_s18 }
0x3992   :  { %v7928_v62 = vpop.xlane.xlu1 %7927 }
0x3993   :  { %v7935_v1 = vmul.f32 0.03125, %v7928_v62 }
0x3994   :  { %v7943_v63 = vpop.xlane.xlu0 %7942 }
0x3995   :  { %v7956_v28 = vmul.f32 %v7935_v1, %v7935_v1  ;;  %v7950_v31 = vmul.f32 0.03125, %v7943_v63  ;;  %v7953_v48 = vsub.f32 %v7921_v47, %v7935_v1 }
0x3997   :  { %v7959_v56 = vsub.f32 %v7950_v31, %v7956_v28 }
0x3999   :  { %v7962_v42 = vadd.f32 1e-05, %v7959_v56  ;;  %v7931_v33 = vpop.xlane.xlu0 %7930 }
0x399a   :  { %v7936_v57 = vmul.f32 0.03125, %v7931_v33 }
0x399b   :  { %12216 = vrsqrt.f32 %v7962_v42  ;;  %v7946_v40 = vpop.xlane.xlu1 %7945 }
0x399c   :  { %v7957_v20 = vmul.f32 %v7936_v57, %v7936_v57  ;;  %v7951_v25 = vmul.f32 0.03125, %v7946_v40  ;;  %v7954_v8 = vsub.f32 %v7922_v2, %v7936_v57  ;;  %v8109_v2 = vld [vmem:[%s15066_s13 + $0xd0] sm:$0xff] }
0x399d   :  { %v11059_v46 = vpack.c.bf16 %v8109_v2, %v8108_v52  ;;  %v14903_v53 = vpack.i.bf16 %v8109_v2, %v8108_v52 }
0x399e   :  { %v7960_v34 = vsub.f32 %v7951_v25, %v7957_v20 }
0x399f   :  { %11060 = vmatpush3.bf16.msra.mxu0 %v11059_v46  ;;  %11907 = vrot.lane.b32.xlu0 %v14903_v53, %s12548_s2 }
0x39a0   :  { %v7963_v7 = vadd.f32 1e-05, %v7960_v34  ;;  %11067 = vmatprep.subr.bf16.mxu0 %v15090_v35 }
0x39a1   :  { %v7934_v60 = vpop.xlane.xlu0 %7933 }
0x39a2   :  { %12218 = vrsqrt.f32 %v7963_v7  ;;  %v7937_v9 = vmul.f32 0.03125, %v7934_v60 }
0x39a3   :  { %v7949_v29 = vpop.xlane.xlu1 %7948  ;;  %11917 = vrot.lane.b32.xlu0 %v14903_v53, %s12544_s18 }
0x39a4   :  { %v7958_v58 = vmul.f32 %v7937_v9, %v7937_v9  ;;  %v7952_v19 = vmul.f32 0.03125, %v7949_v29  ;;  %v7955_v39 = vsub.f32 %v7923_v0, %v7937_v9 }
0x39a5   :  { %v12217_v38 = vpop.eup %12216  ;;  %v11893_v32 = vpop.permute.xlu0 %11892 }
0x39a6   :  { %v7961_v5 = vsub.f32 %v7952_v19, %v7958_v58  ;;  %v11895_v54 = vunpack.i.h.bf16 %v11893_v32  ;;  %v11894_v55 = vunpack.i.l.bf16 %v11893_v32  ;;  %v7968_v26 = vmul.f32 %v12217_v38, %v7953_v48 }
0x39a7   :  { %v11898_v43 = vpop.permute.xlu1 %11897 }
0x39a8   :  { %v7964_v12 = vadd.f32 1e-05, %v7961_v5  ;;  %v11050_v16 = vpack.c.bf16 %v11895_v54, %v11894_v55  ;;  %v11900_v6 = vunpack.i.h.bf16 %v11898_v43  ;;  %v11899_v17 = vunpack.i.l.bf16 %v11898_v43 }
0x39a9   :  { %v7975_v27 = vmul.f32 %v9047_v51, %v7968_v26 }
0x39aa   :  { %12220 = vrsqrt.f32 %v7964_v12  ;;  %11051 = vmatpush3.bf16.msra.mxu1 %v11050_v16  ;;  %v11053_v45 = vpack.c.bf16 %v11900_v6, %v11899_v17  ;;  %v9056_v17 = vld [vmem:[#allocation16 + $0x10] ss:$0 sm:$0xff] }
0x39ab   :  { %11052 = vmatprep.subr.bf16.mxu1 %v15090_v35  ;;  %v14868_v61 = vadd.f32 %v9048_v10, %v7975_v27  ;;  %v11903_v57 = vpop.permute.xlu1 %11902 }
0x39ac   :  { %v12219_v44 = vpop.eup %12218  ;;  %v11905_v25 = vunpack.i.h.bf16 %v11903_v57  ;;  %v11904_v34 = vunpack.i.l.bf16 %v11903_v57  ;;  %v9067_v57 = vld [vmem:[#allocation16 + $0x12] ss:$0 sm:$0xff] }
0x39ad   :  { %v7969_v37 = vmul.f32 %v12219_v44, %v7954_v8 }
0x39ae   :  { %11054 = vmatpush3.bf16.msra.mxu1 %v11053_v45  ;;  %v11062_v58 = vpack.c.bf16 %v11905_v25, %v11904_v34 }
0x39af   :  { %v7976_v3 = vmul.f32 %v9047_v51, %v7969_v37  ;;  %11061 = vmatprep.subr.bf16.mxu1 %v15090_v35  ;;  %v11913_v19 = vpop.permute.xlu1 %11912 }
0x39b0   :  { %v11915_v5 = vunpack.i.h.bf16 %v11913_v19  ;;  %v11914_v54 = vunpack.i.l.bf16 %v11913_v19 }
0x39b1   :  { %10206 = vmatmul.mubr.msk.f32.vlgmr.msra.gmra.mrb[108].mxu1 %vm503_vm12, %v14868_v61  ;;  %v14875_v15 = vadd.f32 %v9048_v10, %v7976_v3 }
0x39b2   :  { %10208 = vmatprep.mubr.msk.f32.mxu1 %vm12547_vm6, %v15094_v4  ;;  %11063 = vmatpush3.bf16.msra.mxu1 %v11062_v58  ;;  %v11068_v43 = vpack.c.bf16 %v11915_v5, %v11914_v54 }
0x39b3   :  { %11064 = vmatprep.subr.bf16.mxu1 %v15090_v35 }
0x39b4   :  { %v12221_v47 = vpop.eup %12220 }
0x39b5   :  { %10209 = vmatmul.mubr.msk.f32.gmra.mrb[110].mxu1 %vm503_vm12, %v14875_v15  ;;  %v7970_v24 = vmul.f32 %v12221_v47, %v7955_v39 }
0x39b6   :  { %10211 = vmatprep.mubr.msk.f32.mxu1 %vm12547_vm6, %v15094_v4 }
0x39b7   :  { %v7977_v49 = vmul.f32 %v9047_v51, %v7970_v24  ;;  %v9060_v24 = vld [vmem:[#allocation16 + $0x11] ss:$0 sm:$0xff] }
0x39b9   :  { %v14881_v30 = vadd.f32 %v9048_v10, %v7977_v49 }
0x39bb   :  { %10212 = vmatmul.mubr.msk.f32.gmra.mrb[112].mxu1 %vm503_vm12, %v14881_v30 }
0x39bc   :  { %10239 = vmatprep.mubr.msk.f32.mxu1 %vm12547_vm6, %v15094_v4 }
0x3a11   :  { %v11908_v40 = vpop.permute.xlu0 %11907 }
0x3a12   :  { %v11910_v7 = vunpack.i.h.bf16 %v11908_v40  ;;  %v11909_v9 = vunpack.i.l.bf16 %v11908_v40 }
0x3a14   :  { %v11065_v38 = vpack.c.bf16 %v11910_v7, %v11909_v9 }
0x3a15   :  { %v11918_v48 = vpop.permute.xlu0 %11917 }
0x3a16   :  { %v11920_v55 = vunpack.i.h.bf16 %v11918_v48  ;;  %v11919_v26 = vunpack.i.l.bf16 %v11918_v48  ;;  %11066 = vmatpush3.bf16.msra.mxu1 %v11065_v38 }
0x3a17   :  { %11073 = vmatprep.subr.bf16.mxu1 %v15090_v35 }
0x3a18   :  { %v11071_v16 = vpack.c.bf16 %v11920_v55, %v11919_v26 }
0x3a84   :  { %v8077_v50 = vpop.f32.mrb[108].mxu1 }
0x3a85   :  { %v8078_v59 = vadd.f32 %v9049_v11, %v8077_v50  ;;  %v10207_v0 = vpop.f32.mrb[109].mxu1 }
0x3a87   :  { %v8094_v14 = vmul.f32 1.442695, %v8078_v59  ;;  %vm8091_vm0 = vcmp.gt.f32.partialorder %v8078_v59, 0.0 }
0x3a88   :  { %v8082_v18 = vpop.f32.mrb[110].mxu1 }
0x3a89   :  { %12222 = vpow2.f32 %v8094_v14  ;;  %v8083_v21 = vadd.f32 %v9049_v11, %v8082_v18  ;;  %v10210_v62 = vpop.f32.mrb[111].mxu1 }
0x3a8b   :  { %v8096_v1 = vmul.f32 1.442695, %v8083_v21  ;;  %vm8092_vm14 = vcmp.gt.f32.partialorder %v8083_v21, 0.0 }
0x3a8d   :  { %12224 = vpow2.f32 %v8096_v1 }
0x3a8e   :  { %v8087_v63 = vpop.f32.mrb[112].mxu1 }
0x3a8f   :  { %v8088_v28 = vadd.f32 %v9049_v11, %v8087_v63  ;;  %v10213_v31 = vpop.f32.mrb[113].mxu1 }
0x3a91   :  { %v8098_v56 = vmul.f32 1.442695, %v8088_v28  ;;  %vm8093_vm15 = vcmp.gt.f32.partialorder %v8088_v28, 0.0 }
0x3a93   :  { %v12223_v42 = vpop.eup %12222  ;;  %12226 = vpow2.f32 %v8098_v56 }
0x3a94   :  { %v9053_v33 = vadd.f32 -1.0, %v12223_v42 }
0x3a96   :  { %v8103_v20 = vsel %vm8091_vm0, %v8078_v59, %v9053_v33 }
0x3a97   :  { %v12225_v60 = vpop.eup %12224  ;;  %10223 = vmatmul.mubr.msk.f32.vlgmr.msra.gmra.mrb[108].mxu0 %vm503_vm12, %v8103_v20 }
0x3a98   :  { %10225 = vmatprep.mubr.msk.f32.mxu0 %vm12547_vm6, %v15094_v4  ;;  %v9054_v29 = vadd.f32 -1.0, %v12225_v60  ;;  %11069 = vmatpush3.bf16.msra.mxu0 %v11068_v43 }
0x3a99   :  { %11070 = vmatprep.subr.bf16.mxu0 %v15090_v35 }
0x3a9a   :  { %v8104_v32 = vsel %vm8092_vm14, %v8083_v21, %v9054_v29 }
0x3a9b   :  { %10226 = vmatmul.mubr.msk.f32.gmra.mrb[110].mxu0 %vm503_vm12, %v8104_v32 }
0x3a9c   :  { %10228 = vmatprep.mubr.msk.f32.mxu0 %vm12547_vm6, %v15094_v4  ;;  %11072 = vmatpush3.bf16.msra.mxu0 %v11071_v16 }
0x3a9d   :  { %v12227_v51 = vpop.eup %12226  ;;  %11079 = vmatprep.subr.bf16.mxu0 %v15090_v35 }
0x3a9e   :  { %v9055_v12 = vadd.f32 -1.0, %v12227_v51 }
0x3aa0   :  { %v8105_v6 = vsel %vm8093_vm15, %v8088_v28, %v9055_v12 }
0x3aa1   :  { %10229 = vmatmul.mubr.msk.f32.gmra.mrb[112].mxu0 %vm503_vm12, %v8105_v6  ;;  %v14973_v6 = vld [vmem:[%s15066_s13 + $0x30] sm:$0xff] }
0x3aa2   :  { %10256 = vmatprep.mubr.msk.f32.mxu0 %vm12547_vm6, %v15094_v4 }
0x3b6a   :  { %v8190_v27 = vpop.f32.mrb[108].mxu0 }
0x3b6b   :  { %v8191_v8 = vadd.f32 %v9056_v17, %v8190_v27  ;;  %v10224_v45 = vpop.f32.mrb[109].mxu0  ;;  %v14993_v27 = vld [vmem:[%s15066_s13 + $0xd8] sm:$0xff] }
0x3b6d   :  { %10240 = vmatmul.mubr.msk.f32.vlgmr.msra.gmra.mrb[114].mxu1 %vm503_vm12, %v8191_v8  ;;  %10257 = vmatmul.mubr.msk.f32.vlgmr.msra.gmra.mrb[114].mxu0 %vm503_vm12, %v8191_v8 }
0x3b6e   :  { %v8195_v44 = vpop.f32.mrb[110].mxu0  ;;  %10242 = vmatprep.mubr.msk.f32.mxu1 %vm12547_vm6, %v15094_v4  ;;  %10259 = vmatprep.mubr.msk.f32.mxu0 %vm12547_vm6, %v15094_v4 }
0x3b6f   :  { %v8196_v10 = vadd.f32 %v9056_v17, %v8195_v44  ;;  %v10227_v37 = vpop.f32.mrb[111].mxu0 }
0x3b71   :  { %10243 = vmatmul.mubr.msk.f32.gmra.mrb[116].mxu1 %vm503_vm12, %v8196_v10  ;;  %10260 = vmatmul.mubr.msk.f32.gmra.mrb[116].mxu0 %vm503_vm12, %v8196_v10 }
0x3b72   :  { %10245 = vmatprep.mubr.msk.f32.mxu1 %vm12547_vm6, %v15094_v4  ;;  %10262 = vmatprep.mubr.msk.f32.mxu0 %vm12547_vm6, %v15094_v4 }
0x3b74   :  { %v8200_v3 = vpop.f32.mrb[112].mxu0 }
0x3b75   :  { %v8201_v39 = vadd.f32 %v9056_v17, %v8200_v3  ;;  %v10230_v47 = vpop.f32.mrb[113].mxu0 }
0x3b77   :  { %10246 = vmatmul.mubr.msk.f32.gmra.mrb[118].mxu1 %vm503_vm12, %v8201_v39  ;;  %10263 = vmatmul.mubr.msk.f32.gmra.mrb[118].mxu0 %vm503_vm12, %v8201_v39 }
0x3b78   :  { %10273 = vmatprep.mubr.msk.f32.mxu1 %vm12547_vm6, %v15094_v4  ;;  %10290 = vmatprep.mubr.msk.f32.mxu0 %vm12547_vm6, %v15094_v4 }
0x3c40   :  { %v8300_v49 = vpop.f32.mrb[114].mxu1  ;;  %v8415_v22 = vpop.f32.mrb[114].mxu0 }
0x3c41   :  { %v8301_v23 = vadd.f32 %v9060_v24, %v8300_v49  ;;  %v10241_v41 = vpop.f32.mrb[115].mxu1  ;;  %v10258_v52 = vpop.f32.mrb[115].mxu0  ;;  %v8416_v25 = vadd.f32 %v9067_v57, %v8415_v22 }
0x3c43   :  { %v9064_v2 = vmul.f32 -1.442695, %v8301_v23 }
0x3c44   :  { %v8305_v46 = vpop.f32.mrb[116].mxu1  ;;  %v8420_v11 = vpop.f32.mrb[116].mxu0 }
0x3c45   :  { %12228 = vpow2.f32 %v9064_v2  ;;  %v8306_v50 = vadd.f32 %v9060_v24, %v8305_v46  ;;  %v10244_v59 = vpop.f32.mrb[117].mxu1  ;;  %v10261_v0 = vpop.f32.mrb[117].mxu0  ;;  %v8421_v9 = vadd.f32 %v9067_v57, %v8420_v11 }
0x3c47   :  { %v9065_v14 = vmul.f32 -1.442695, %v8306_v50 }
0x3c49   :  { %12230 = vpow2.f32 %v9065_v14 }
0x3c4a   :  { %v8310_v18 = vpop.f32.mrb[118].mxu1  ;;  %v8425_v21 = vpop.f32.mrb[118].mxu0 }
0x3c4b   :  { %v8311_v62 = vadd.f32 %v9060_v24, %v8310_v18  ;;  %v10247_v1 = vpop.f32.mrb[119].mxu1  ;;  %v10264_v63 = vpop.f32.mrb[119].mxu0  ;;  %v8426_v5 = vadd.f32 %v9067_v57, %v8425_v21 }
0x3c4d   :  { %v9066_v28 = vmul.f32 -1.442695, %v8311_v62 }
0x3c4f   :  { %v12229_v31 = vpop.eup %12228  ;;  %12232 = vpow2.f32 %v9066_v28 }
0x3c50   :  { %v8323_v56 = vadd.f32 1.0, %v12229_v31 }
0x3c52   :  { %12234 = vrcp.f32 %v8323_v56 }
0x3c53   :  { %v12231_v42 = vpop.eup %12230 }
0x3c54   :  { %v8324_v33 = vadd.f32 1.0, %v12231_v42 }
0x3c56   :  { %12236 = vrcp.f32 %v8324_v33  ;;  %v9071_v33 = vld [vmem:[#allocation16 + $0x13] ss:$0 sm:$0xff] }
0x3c59   :  { %v12233_v40 = vpop.eup %12232 }
0x3c5a   :  { %v8325_v20 = vadd.f32 1.0, %v12233_v40 }
0x3c5c   :  { %v12235_v34 = vpop.eup %12234  ;;  %12238 = vrcp.f32 %v8325_v20  ;;  %v9072_v20 = vld [vmem:[#allocation16 + $0x14] ss:$0 sm:$0xff] }
0x3c5d   :  { %v8429_v7 = vmul.f32 %v12235_v34, %v8416_v25 }
0x3c5f   :  { %v14945_v60 = vadd.f32 %v8429_v7, %v14868_v61 }
0x3c60   :  { %v12237_v29 = vpop.eup %12236 }
0x3c61   :  { %v8430_v58 = vmul.f32 %v12237_v29, %v8421_v9  ;;  %v8437_v19 = vsel %vm503_vm12, %v14945_v60, 0.0  ;;  %v8449_v38 = vmul.f32 %v14945_v60, %v14945_v60 }
0x3c62   :  { %8438 = vadd.xlane.f32.xlu1 %v8437_v19 }
0x3c63   :  { %v14952_v48 = vadd.f32 %v8430_v58, %v14875_v15  ;;  %v8452_v32 = vsel %vm503_vm12, %v8449_v38, 0.0 }
0x3c64   :  { %8453 = vadd.xlane.f32.xlu0 %v8452_v32 }
0x3c65   :  { %v8450_v61 = vmul.f32 %v14952_v48, %v14952_v48  ;;  %v8440_v43 = vsel %vm503_vm12, %v14952_v48, 0.0 }
0x3c66   :  { %v12239_v54 = vpop.eup %12238 }
0x3c67   :  { %v8431_v55 = vmul.f32 %v12239_v54, %v8426_v5  ;;  %v8455_v26 = vsel %vm503_vm12, %v8450_v61, 0.0 }
0x3c68   :  { %8456 = vadd.xlane.f32.xlu1 %v8455_v26  ;;  %8441 = vadd.xlane.f32.xlu0 %v8440_v43 }
0x3c69   :  { %v14961_v51 = vadd.f32 %v8431_v55, %v14881_v30  ;;  %v14978_v30 = vld [vmem:[%s15066_s13 + $0x68] sm:$0xff] }
0x3c6a   :  { %v11080_v17 = vpack.c.bf16 %v14978_v30, %v14973_v6 }
0x3c6b   :  { %v8443_v15 = vsel %vm503_vm12, %v14961_v51, 0.0  ;;  %v8451_v12 = vmul.f32 %v14961_v51, %v14961_v51 }
0x3c6c   :  { %8444 = vadd.xlane.f32.xlu0 %v8443_v15  ;;  %11081 = vmatpush3.bf16.msra.mxu0 %v11080_v17 }
0x3c6d   :  { %v8458_v16 = vsel %vm503_vm12, %v8451_v12, 0.0  ;;  %11082 = vmatprep.subr.bf16.mxu0 %v15090_v35 }
0x3c6e   :  { %8459 = vadd.xlane.f32.xlu1 %v8458_v16  ;;  %v9073_v16 = vld [vmem:[#allocation16 + $0x15] ss:$0 sm:$0xff] }
0x3c7f   :  { %11927 = vrot.lane.b32.xlu1 %v14903_v53, %s12529_s21  ;;  %v14988_v53 = vld [vmem:[%s15066_s13 + $0xa0] sm:$0xff] }
0x3c80   :  { %v11083_v8 = vpack.c.bf16 %v14993_v27, %v14988_v53 }
0x3c82   :  { %11922 = vrot.lane.b32.xlu0 %v14901_v13, %s12529_s21  ;;  %11084 = vmatpush3.bf16.msra.mxu0 %v11083_v8 }
0x3cef   :  { %v8439_v45 = vpop.xlane.xlu1 %8438 }
0x3cf0   :  { %v8446_v44 = vmul.f32 0.03125, %v8439_v45 }
0x3cf1   :  { %v8454_v13 = vpop.xlane.xlu0 %8453 }
0x3cf2   :  { %v8467_v10 = vmul.f32 %v8446_v44, %v8446_v44  ;;  %v8461_v37 = vmul.f32 0.03125, %v8454_v13  ;;  %v8464_v56 = vsub.f32 %v14945_v60, %v8446_v44 }
0x3cf4   :  { %v8470_v3 = vsub.f32 %v8461_v37, %v8467_v10 }
0x3cf5   :  { %v8457_v39 = vpop.xlane.xlu1 %8456  ;;  %v8442_v47 = vpop.xlane.xlu0 %8441 }
0x3cf6   :  { %v8473_v24 = vadd.f32 1e-05, %v8470_v3  ;;  %v8447_v49 = vmul.f32 0.03125, %v8442_v47  ;;  %v8462_v22 = vmul.f32 0.03125, %v8457_v39 }
0x3cf8   :  { %12240 = vrsqrt.f32 %v8473_v24  ;;  %v8468_v23 = vmul.f32 %v8447_v49, %v8447_v49  ;;  %v8465_v7 = vsub.f32 %v14952_v48, %v8447_v49 }
0x3cf9   :  { %v8445_v41 = vpop.xlane.xlu0 %8444 }
0x3cfa   :  { %v8471_v52 = vsub.f32 %v8462_v22, %v8468_v23  ;;  %v8448_v2 = vmul.f32 0.03125, %v8445_v41 }
0x3cfb   :  { %v8460_v46 = vpop.xlane.xlu1 %8459 }
0x3cfc   :  { %v8474_v11 = vadd.f32 1e-05, %v8471_v52  ;;  %v8469_v50 = vmul.f32 %v8448_v2, %v8448_v2  ;;  %v8463_v59 = vmul.f32 0.03125, %v8460_v46  ;;  %v8466_v58 = vsub.f32 %v14961_v51, %v8448_v2 }
0x3cfd   :  { %v11923_v0 = vpop.permute.xlu0 %11922  ;;  %v11936_v52 = vpack.i.bf16 %v14993_v27, %v14988_v53  ;;  %v11931_v2 = vpack.i.bf16 %v14978_v30, %v14973_v6 }
0x3cfe   :  { %12242 = vrsqrt.f32 %v8474_v11  ;;  %v8472_v14 = vsub.f32 %v8463_v59, %v8469_v50  ;;  %v11925_v18 = vunpack.i.h.bf16 %v11923_v0  ;;  %v11924_v21 = vunpack.i.l.bf16 %v11923_v0 }
0x3cff   :  { %v11928_v62 = vpop.permute.xlu1 %11927 }
0x3d00   :  { %v8475_v1 = vadd.f32 1e-05, %v8472_v14  ;;  %v11074_v63 = vpack.c.bf16 %v11925_v18, %v11924_v21  ;;  %v11930_v28 = vunpack.i.h.bf16 %v11928_v62  ;;  %v11929_v31 = vunpack.i.l.bf16 %v11928_v62 }
0x3d02   :  { %v12241_v42 = vpop.eup %12240  ;;  %12244 = vrsqrt.f32 %v8475_v1  ;;  %v11077_v57 = vpack.c.bf16 %v11930_v28, %v11929_v31  ;;  %11075 = vmatpush3.bf16.msra.mxu1 %v11074_v63  ;;  %v9082_v31 = vld [vmem:[#allocation16 + $0x17] ss:$0 sm:$0xff] }
0x3d03   :  { %v8479_v40 = vmul.f32 %v12241_v42, %v8464_v56  ;;  %11076 = vmatprep.subr.bf16.mxu1 %v15090_v35  ;;  %v9083_v42 = vld [vmem:[#allocation16 + $0x18] ss:$0 sm:$0xff] }
0x3d05   :  { %v8486_v25 = vmul.f32 %v9071_v33, %v8479_v40  ;;  %v9084_v40 = vld [vmem:[#allocation16 + $0x19] ss:$0 sm:$0xff] }
0x3d06   :  { %11078 = vmatpush3.bf16.msra.mxu1 %v11077_v57 }
0x3d07   :  { %v8493_v34 = vadd.f32 %v9072_v20, %v8486_v25  ;;  %11085 = vmatprep.subr.bf16.mxu1 %v15090_v35 }
0x3d08   :  { %v12243_v9 = vpop.eup %12242 }
0x3d09   :  { %v8480_v29 = vmul.f32 %v12243_v9, %v8465_v7  ;;  %10274 = vmatmul.mubr.msk.f32.vlgmr.msra.gmra.mrb[120].mxu1 %vm503_vm12, %v8493_v34  ;;  %10291 = vmatmul.mubr.msk.f32.vlgmr.msra.gmra.mrb[120].mxu0 %vm503_vm12, %v8493_v34 }
0x3d0a   :  { %10276 = vmatprep.mubr.msk.f32.mxu1 %vm12547_vm6, %v15094_v4  ;;  %10293 = vmatprep.mubr.msk.f32.mxu0 %vm12547_vm6, %v15094_v4 }
0x3d0b   :  { %v8487_v60 = vmul.f32 %v9071_v33, %v8480_v29 }
0x3d0c   :  { %v12245_v19 = vpop.eup %12244 }
0x3d0d   :  { %v8494_v38 = vadd.f32 %v9072_v20, %v8487_v60  ;;  %v8481_v48 = vmul.f32 %v12245_v19, %v8466_v58 }
0x3d0f   :  { %10277 = vmatmul.mubr.msk.f32.gmra.mrb[122].mxu1 %vm503_vm12, %v8494_v38  ;;  %10294 = vmatmul.mubr.msk.f32.gmra.mrb[122].mxu0 %vm503_vm12, %v8494_v38  ;;  %v8488_v32 = vmul.f32 %v9071_v33, %v8481_v48 }
0x3d10   :  { %10279 = vmatprep.mubr.msk.f32.mxu1 %vm12547_vm6, %v15094_v4  ;;  %10296 = vmatprep.mubr.msk.f32.mxu0 %vm12547_vm6, %v15094_v4 }
0x3d11   :  { %v8495_v5 = vadd.f32 %v9072_v20, %v8488_v32 }
0x3d13   :  { %10280 = vmatmul.mubr.msk.f32.gmra.mrb[124].mxu1 %vm503_vm12, %v8495_v5  ;;  %10297 = vmatmul.mubr.msk.f32.gmra.mrb[124].mxu0 %vm503_vm12, %v8495_v5 }
0x3d14   :  { %10307 = vmatprep.mubr.msk.f32.mxu1 %vm12547_vm6, %v15094_v4  ;;  %v9078_v4 = vld [vmem:[#allocation16 + $0x16] ss:$0 sm:$0xff]  ;;  %vm8816_vm6 = vcmask 40960  }
0x3ddc   :  { %v8588_v61 = vpop.f32.mrb[120].mxu1  ;;  %v8681_v54 = vpop.f32.mrb[120].mxu0 }
0x3ddd   :  { %v10275_v55 = vpop.f32.mrb[121].mxu1  ;;  %v10292_v26 = vpop.f32.mrb[121].mxu0 }
0x3de2   :  { %v8592_v43 = vpop.f32.mrb[122].mxu1  ;;  %v8685_v51 = vpop.f32.mrb[122].mxu0 }
0x3de3   :  { %v10278_v15 = vpop.f32.mrb[123].mxu1  ;;  %v10295_v12 = vpop.f32.mrb[123].mxu0 }
0x3de6   :  { %v8596_v17 = vpop.f32.mrb[124].mxu1  ;;  %v8689_v8 = vpop.f32.mrb[124].mxu0 }
0x3de7   :  { %v8597_v45 = vadd.f32 %v9073_v16, %v8596_v17  ;;  %v10281_v44 = vpop.f32.mrb[125].mxu1  ;;  %v10298_v13 = vpop.f32.mrb[125].mxu0  ;;  %v8690_v39 = vadd.f32 %v9078_v4, %v8689_v8 }
0x3de9   :  { %v9077_v10 = vmul.f32 -1.442695, %v8597_v45 }
0x3deb   :  { %12246 = vpow2.f32 %v9077_v10 }
0x3df5   :  { %v12247_v37 = vpop.eup %12246 }
0x3df6   :  { %v8603_v3 = vadd.f32 1.0, %v12247_v37 }
0x3df8   :  { %12248 = vrcp.f32 %v8603_v3 }
0x3e02   :  { %v12249_v47 = vpop.eup %12248 }
0x3e03   :  { %v8693_v24 = vmul.f32 %v12249_v47, %v8690_v39 }
0x3e05   :  { %v8694_v49 = vadd.f32 %v8693_v24, %v14466_v36 }
0x3e07   :  { %v8697_v22 = vsel %vm503_vm12, %v8694_v49, 0.0  ;;  %v8701_v23 = vmul.f32 %v8694_v49, %v8694_v49 }
0x3e08   :  { %8698 = vadd.xlane.f32.xlu1 %v8697_v22 }
0x3e09   :  { %v8702_v41 = vsel %vm503_vm12, %v8701_v23, 0.0 }
0x3e0a   :  { %8703 = vadd.xlane.f32.xlu0 %v8702_v41 }
0x3e19   :  { %11937 = vrot.lane.b32.xlu1 %v11936_v52, %s12548_s2 }
0x3e20   :  { %11932 = vrot.lane.b32.xlu0 %v11931_v2, %s12548_s2  ;;  %s15098_s2 = sld [smem:[#allocation26_spill]] }
0x3e95   :  { %v8699_v46 = vpop.xlane.xlu1 %8698 }
0x3e96   :  { %v8700_v11 = vmul.f32 0.03125, %v8699_v46 }
0x3e97   :  { %v8704_v36 = vpop.xlane.xlu0 %8703 }
0x3e98   :  { %v8707_v50 = vmul.f32 %v8700_v11, %v8700_v11  ;;  %v8705_v59 = vmul.f32 0.03125, %v8704_v36  ;;  %v8706_v6 = vsub.f32 %v8694_v49, %v8700_v11 }
0x3e99   :  { %v11938_v0 = vpop.permute.xlu1 %11937 }
0x3e9a   :  { %v8708_v14 = vsub.f32 %v8705_v59, %v8707_v50  ;;  %v11940_v21 = vunpack.i.h.bf16 %v11938_v0  ;;  %v11939_v53 = vunpack.i.l.bf16 %v11938_v0 }
0x3e9b   :  { %v11933_v18 = vpop.permute.xlu0 %11932 }
0x3e9c   :  { %v8709_v62 = vadd.f32 1e-05, %v8708_v14  ;;  %v11935_v1 = vunpack.i.h.bf16 %v11933_v18  ;;  %v11934_v63 = vunpack.i.l.bf16 %v11933_v18  ;;  %v11089_v28 = vpack.c.bf16 %v11940_v21, %v11939_v53 }
0x3e9e   :  { %12250 = vrsqrt.f32 %v8709_v62  ;;  %v11086_v27 = vpack.c.bf16 %v11935_v1, %v11934_v63 }
0x3ea0   :  { %11087 = vmatpush3.bf16.msra.mxu1 %v11086_v27 }
0x3ea1   :  { %11088 = vmatprep.subr.bf16.mxu1 %v15090_v35 }
0x3ea4   :  { %11090 = vmatpush3.bf16.msra.mxu1 %v11089_v28 }
0x3ea8   :  { %v12251_v30 = vpop.eup %12250 }
0x3ea9   :  { %v8711_v56 = vmul.f32 %v12251_v30, %v8706_v6 }
0x3eab   :  { %v8716_v33 = vmul.f32 %v9082_v31, %v8711_v56 }
0x3ead   :  { %v8721_v57 = vadd.f32 %v9083_v42, %v8716_v33 }
0x3eaf   :  { %10308 = vmatmul.mubr.msk.f32.vlgmr.msra.gmra.mrb[126].mxu1 %vm503_vm12, %v8721_v57 }
0x3f82   :  { %v8812_v20 = vpop.f32.mrb[126].mxu1 }
0x3f83   :  { %v8813_v35 = vadd.f32 %v9084_v40, %v8812_v20  ;;  %v10309_v25 = vpop.f32.mrb[127].mxu1 }
0x3f85   :  { %8817 = vst.msk [vmem:[%s15098_s2] sm:$0x1] %vm8816_vm6, %v8813_v35 }
0x3f86   :  { %8819 = vst.msk [vmem:[%s15098_s2 - $0x1] sm:$0x4] %vm8818_vm1, %v8813_v35 }
0x3f87   :  { %8821 = vst.msk [vmem:[%s15098_s2 - $0x2] sm:$0x10] %vm8820_vm11, %v8813_v35 }
0x3f88   :  { %8823 = vst.msk [vmem:[%s15098_s2 - $0x3] sm:$0x40] %vm8822_vm2, %v8813_v35 }
0x3f89   :  { %9086 = vst.msk [vmem:[%s15098_s2 + $0x3] sm:$0x2] %vm8825_vm3, %v8813_v35 }
0x3f8a   :  { %9087 = vst.msk [vmem:[%s15098_s2 + $0x2] sm:$0x8] %vm8827_vm4, %v8813_v35 }
0x3f8b   :  { %9088 = vst.msk [vmem:[%s15098_s2 + $0x1] sm:$0x20] %vm8829_vm5, %v8813_v35 }
0x3f8c   :  { %9089 = vst.msk [vmem:[%s15098_s2] sm:$0x80] %vm8831_vm7, %v8813_v35 }
0x3f8d   :  { %8837 = vsyncpa [#allocation4], 1 }
0x3f8e   :  { %8838 = vsyncpa [#allocation6], 1 }
0x3f8f   :  { %8839 = vsyncpa [#allocation9], 1 }
0x3f90   :  { %8840 = vsyncpa [#allocation12], 1 }
0x3f91   :  { %8841 = vsyncpa [#allocation15], 1 }

</bundles_post_ra>
